<compile_context>
chip_gen: v7x
topology: tpu7x:2x2x1
jax: 0.10.0
libtpu: 0.0.40
codegen_flags: <defaults>
</compile_context>

<pallas_src>
import functools

import jax
import jax.numpy as jnp
from jax.experimental import pallas as pl
from jax.experimental.pallas import tpu as pltpu


# ----------------------------- model config ---------------------------------
D = 8                 # MLP depth (number of pts_linears)
W = 64                # MLP width (PyTorch default is 256; kept small for the demo)
INPUT_CH = 3          # point channels
INPUT_CH_VIEWS = 3    # view-direction channels
SKIPS = (4,)          # skip indices: concat([input_pts, h]) happens AFTER layer 4
MXU_DTYPE = jnp.bfloat16

# ------------------- derived static layout constants ------------------------
C_IN = INPUT_CH + INPUT_CH_VIEWS
HALF = W // 2
OUT_CH = 4                                   # [rgb(3), alpha(1)]
OUT_PAD = 16                                 # fused-head rows padded to a bf16 tile
SKIP_LAYERS = tuple(s + 1 for s in SKIPS)    # layers that consume cat([pts, h])
N_SKIP = len(SKIP_LAYERS)

# bf16 weight-slab row layout (every offset/size is a multiple of 16 -> tile-aligned)
W_IN_ROWS = (1 + N_SKIP) * W + HALF          # merged K=6 input projection (160)
HID_W_OFF = W_IN_ROFF = W_IN_ROWS            # layer i (1..D-1) at HID_W_OFF+(i-1)*W
FEAT_W_OFF = HID_W_OFF + (D - 1) * W
VF_W_OFF = FEAT_W_OFF + W
OUT_W_OFF = VF_W_OFF + HALF
W_SLAB_ROWS = OUT_W_OFF + OUT_PAD            # 720 for the demo config
SLAB_COLS = ((max(C_IN, W, HALF + W) + 127) // 128) * 128   # 128

# f32 bias-slab row layout
B_FEAT_OFF = D * W
B_V_OFF = B_FEAT_OFF + W
B_OUT_OFF = B_V_OFF + HALF
B_SLAB_ROWS = B_OUT_OFF + OUT_PAD            # 624 for the demo config


def _round_up(v, m):
    return ((v + m - 1) // m) * m


# ------------------------------- kernel -------------------------------------
def nerf_kernel(x_ref, w_ref, b_ref, out_ref, *, mxu_dtype):
    """Fused NeRF MLP forward on one batch tile, feature-major layout.

    x_ref:   (C_IN, tile_n)            f32  rows [pts(3), views(3)], batch on lanes
    w_ref:   (W_SLAB_ROWS, SLAB_COLS)  mxu_dtype  all weights packed in one slab
    b_ref:   (B_SLAB_ROWS, 1)          f32  all biases packed in one slab
    out_ref: (OUT_CH, tile_n)          f32  rows [rgb(3), alpha(1)]
    """
    x_lo = x_ref[...].astype(mxu_dtype)                          # (6, tile_n)

    # Merged input-side projection: layer-0 pts, skip-layer pts and views-layer
    # viewdir matmuls (all K=3, zero-padded block weight) fused into one K=6 pass.
    w_in = w_ref[0:W_IN_ROWS, 0:C_IN]                            # (160, 6)
    in_acc = jnp.dot(w_in, x_lo, preferred_element_type=jnp.float32)   # (160, tn) f32

    pts_l0 = in_acc[0:W, :]
    pts_skip = {layer: in_acc[(1 + k) * W:(2 + k) * W, :]
                for k, layer in enumerate(SKIP_LAYERS)}
    views_pre = in_acc[(1 + N_SKIP) * W:(1 + N_SKIP) * W + HALF, :]

    # Layer 0: its matmul already happened in the merged projection.
    h = jnp.maximum(pts_l0 + b_ref[0:W, :], 0.0)                 # f32 on the VPU
    h_lo = h.astype(mxu_dtype)

    # Layers 1..D-1; the skip-consuming layer adds its precomputed pts term in
    # the same accumulating expression (MRB-friendly on v7x).
    for i in range(1, D):
        w = w_ref[HID_W_OFF + (i - 1) * W:HID_W_OFF + i * W, 0:W]
        b = b_ref[i * W:(i + 1) * W, :]
        if i in SKIP_LAYERS:
            acc = jnp.dot(w, h_lo, preferred_element_type=jnp.float32) + pts_skip[i] + b
        else:
            acc = jnp.dot(w, h_lo, preferred_element_type=jnp.float32) + b
        h = jnp.maximum(acc, 0.0)
        h_lo = h.astype(mxu_dtype)

    # feature head (clean (W, W) matmul; alpha moved into the fused output head).
    w_f = w_ref[FEAT_W_OFF:FEAT_W_OFF + W, 0:W]
    feature = (jnp.dot(w_f, h_lo, preferred_element_type=jnp.float32)
               + b_ref[B_FEAT_OFF:B_FEAT_OFF + W, :])
    feature_lo = feature.astype(mxu_dtype)

    # views layer: matmul + precomputed viewdir term + bias in one expression.
    w_vf = w_ref[VF_W_OFF:VF_W_OFF + HALF, 0:W]
    hv = (jnp.dot(w_vf, feature_lo, preferred_element_type=jnp.float32)
          + views_pre + b_ref[B_V_OFF:B_V_OFF + HALF, :])
    hv_lo = jnp.maximum(hv, 0.0).astype(mxu_dtype)

    # Fused rgb+alpha head: one block-diagonal (OUT_PAD, HALF+W) matmul against
    # the sublane-concat [hv(32); h(64)] -> single K=96 MXU pass.
    cat = jnp.concatenate([hv_lo, h_lo], axis=0)                 # (96, tile_n) bf16
    w_out = w_ref[OUT_W_OFF:OUT_W_OFF + OUT_PAD, 0:HALF + W]
    outs = (jnp.dot(w_out, cat, preferred_element_type=jnp.float32)
            + b_ref[B_OUT_OFF:B_OUT_OFF + OUT_PAD, :])           # (16, tile_n)
    out_ref[...] = outs[0:OUT_CH, :]                             # lane-dense store


# ------------------------- parameter repacking --------------------------------
def prepare_kernel_params(params, mxu_dtype=MXU_DTYPE):
    """Pack PyTorch-layout params (weights stored (in,out), biases (out,)) into a
    single bf16 weight slab and a single f32 bias slab (2 DMAs instead of ~21)."""

    def wt(w):                      # (in, out) -> (out, in), f32
        return jnp.asarray(w, jnp.float32).T

    def pad_cols(a):
        return jnp.pad(a, ((0, 0), (0, SLAB_COLS - a.shape[1])))

    pts = params["pts"]
    vw, vb = params["views"]        # input order: cat([feature, views])
    fw, fb = params["feature"]
    aw, ab = params["alpha"]
    rw, rb = params["rgb"]

    # Merged input projection (zero blocks are exact -> no cross-contamination).
    w_in = jnp.zeros((W_IN_ROWS, C_IN), jnp.float32)
    w_in = w_in.at[0:W, 0:INPUT_CH].set(wt(pts[0][0]))
    for k, layer in enumerate(SKIP_LAYERS):
        w_in = w_in.at[(1 + k) * W:(2 + k) * W, 0:INPUT_CH].set(
            wt(pts[layer][0][:INPUT_CH, :]))                    # pts rows come first
    w_in = w_in.at[(1 + N_SKIP) * W:(1 + N_SKIP) * W + HALF,
                   INPUT_CH:C_IN].set(wt(vw[W:, :]))

    blocks = [pad_cols(w_in)]
    for i in range(1, D):
        wi = pts[i][0]
        if i in SKIP_LAYERS:
            wi = wi[INPUT_CH:, :]                               # pts part moved to w_in
        blocks.append(pad_cols(wt(wi)))                         # (W, W)
    blocks.append(pad_cols(wt(fw)))                             # feature head
    blocks.append(pad_cols(wt(vw[:W, :])))                      # views layer, feature part

    # Block-diagonal fused rgb+alpha head against [hv(HALF); h(W)].
    w_out = jnp.zeros((OUT_PAD, HALF + W), jnp.float32)
    w_out = w_out.at[0:3, 0:HALF].set(wt(rw))
    w_out = w_out.at[3:4, HALF:HALF + W].set(wt(aw))
    blocks.append(pad_cols(w_out))

    w_slab = jnp.concatenate(blocks, axis=0).astype(mxu_dtype)
    assert w_slab.shape == (W_SLAB_ROWS, SLAB_COLS)

    # Bias slab.
    brows = [jnp.asarray(pts[i][1], jnp.float32).reshape(-1, 1) for i in range(D)]
    brows.append(jnp.asarray(fb, jnp.float32).reshape(-1, 1))
    brows.append(jnp.asarray(vb, jnp.float32).reshape(-1, 1))
    b_out = jnp.zeros((OUT_PAD, 1), jnp.float32)
    b_out = b_out.at[0:3, :].set(jnp.asarray(rb, jnp.float32).reshape(3, 1))
    b_out = b_out.at[3:4, :].set(jnp.asarray(ab, jnp.float32).reshape(1, 1))
    brows.append(b_out)
    b_slab = jnp.concatenate(brows, axis=0)
    assert b_slab.shape == (B_SLAB_ROWS, 1)
    return w_slab, b_slab


# ------------------------------ wrapper --------------------------------------
def pick_tile_n(n, max_tile=2048):
    """Lane-multiple batch tile; prefers an even grid-step count so both v7x
    TensorCores get work on the 'parallel' axis."""
    tile = min(max_tile, _round_up(n, 256))
    steps = pl.cdiv(n, tile)
    if steps > 1 and steps % 2 == 1:
        tile = min(max_tile, _round_up(pl.cdiv(n, steps + 1), 256))
    return tile


def nerf_forward(x, params, *, tile_n=None, mxu_dtype=MXU_DTYPE):
    """x: (N, INPUT_CH + INPUT_CH_VIEWS) f32.  Returns (N, 4) = [rgb, alpha]."""
    n, c_in = x.shape
    assert c_in == C_IN

    w_slab, b_slab = prepare_kernel_params(params, mxu_dtype)

    if tile_n is None:
        tile_n = pick_tile_n(n)
    n_pad = pl.cdiv(n, tile_n) * tile_n

    # Feature-major input (batch on the 128-lane axis), padded so any N works.
    # TODO(synk): accept (C_IN, N) / return (4, N) directly when the caller is
    # feature-major, dropping these wrapper-side HBM relayout passes.
    x_fm = jnp.pad(x.T, ((0, 0), (0, n_pad - n)))               # (6, n_pad)
    grid = (n_pad // tile_n,)

    out_fm = pl.pallas_call(
        functools.partial(nerf_kernel, mxu_dtype=mxu_dtype),
        out_shape=jax.ShapeDtypeStruct((OUT_CH, n_pad), jnp.float32),
        grid_spec=pltpu.PrefetchScalarGridSpec(
            num_scalar_prefetch=0,
            grid=grid,
            in_specs=[
                pl.BlockSpec((C_IN, tile_n), lambda i: (0, i)),
                pl.BlockSpec(w_slab.shape, lambda i: (0, 0)),   # resident weight slab
                pl.BlockSpec(b_slab.shape, lambda i: (0, 0)),   # resident bias slab
            ],
            out_specs=pl.BlockSpec((OUT_CH, tile_n), lambda i: (0, i)),
        ),
        compiler_params=pltpu.CompilerParams(
            dimension_semantics=("parallel",),
            # Few MB live per step at tile_n<=4096: 32 MiB clears v5e's 16 MiB
            # scoped default and stays well under v7x's 64 MiB physical VMEM.
            vmem_limit_bytes=32 * 1024 * 1024,
        ),
    )(x_fm, w_slab, b_slab)

    return out_fm[:, :n].T                                      # back to (N, 4)


# --------------------------- parameter init ----------------------------------
def init_params(key):
    """PyTorch-equivalent params: weights stored as (in, out) (= weight.T), biases (out,)."""
    def linear(key, fan_in, fan_out):
        kw, kb = jax.random.split(key)
        scale = 1.0 / jnp.sqrt(fan_in)
        w = jax.random.uniform(kw, (fan_in, fan_out), jnp.float32, -scale, scale)
        b = jax.random.uniform(kb, (fan_out,), jnp.float32, -scale, scale)
        return w, b

    keys = jax.random.split(key, D + 4)
    pts = []
    fan_in = INPUT_CH
    for i in range(D):
        pts.append(linear(keys[i], fan_in, W))
        fan_in = W + INPUT_CH if i in SKIPS else W
    return {
        "pts": pts,
        "feature": linear(keys[D + 0], W, W),
        "alpha": linear(keys[D + 1], W, 1),
        "views": linear(keys[D + 2], W + INPUT_CH_VIEWS, W // 2),
        "rgb": linear(keys[D + 3], W // 2, 3),
    }


# ------------------------- pure-JAX reference --------------------------------
def nerf_reference(x, params, mxu_dtype=MXU_DTYPE):
    """Faithful (concat-based) NeRF forward; matmul operands cast to mxu_dtype to
    match the kernel's bf16-operand / f32-accumulate arithmetic."""
    def linear(h, w, b):
        return jnp.dot(h.astype(mxu_dtype), jnp.asarray(w).astype(mxu_dtype),
                       preferred_element_type=jnp.float32) + b

    input_pts = x[:, :INPUT_CH]
    input_views = x[:, INPUT_CH:INPUT_CH + INPUT_CH_VIEWS]
    h = input_pts
    for i, (w, b) in enumerate(params["pts"]):
        h = jnp.maximum(linear(h, w, b), 0.0)
        if i in SKIPS:
            h = jnp.concatenate([input_pts, h], axis=-1)
    alpha = linear(h, *params["alpha"])
    feature = linear(h, *params["feature"])
    hv = jnp.concatenate([feature, input_views], axis=-1)
    hv = jnp.maximum(linear(hv, *params["views"]), 0.0)
    rgb = linear(hv, *params["rgb"])
    return jnp.concatenate([rgb, alpha], axis=-1)


# --------------------------------- main ---------------------------------------
if __name__ == "__main__":
    key = jax.random.PRNGKey(0)
    kx, kp = jax.random.split(key)

    # Not a multiple of the tile -> exercises the padded tail; auto tile picks
    # 2048 -> a 2-step "parallel" grid (even step count keeps both v7x TCs busy).
    N = 2500
    x = jax.random.normal(kx, (N, INPUT_CH + INPUT_CH_VIEWS), jnp.float32)
    params = init_params(kp)

    fwd = jax.jit(nerf_forward)
    out = jax.block_until_ready(fwd(x, params))

    ref = nerf_reference(x, params)
    assert out.shape == (N, 4)
    max_err = float(jnp.max(jnp.abs(out - ref)))
    assert jnp.allclose(out, ref, atol=2e-3, rtol=2e-3), f"mismatch vs reference: {max_err}"

    print("KERNEL_OK")
</pallas_src>

<mosaic_0001>
module attributes {stable_mosaic.version = 11 : i64} {
  func.func @nerf_kernel(%arg0: i32, %arg1: memref<6x2048xf32, #tpu.memory_space<vmem>>, %arg2: memref<720x128xbf16, #tpu.memory_space<vmem>>, %arg3: memref<624x1xf32, #tpu.memory_space<vmem>>, %arg4: memref<4x2048xf32, #tpu.memory_space<vmem>>) attributes {dimension_semantics = [#tpu.dimension_semantics<parallel>], iteration_bounds = array<i64: 2>, scalar_prefetch = 0 : i64, scratch_operands = 0 : i64, tpu.core_type = #tpu.core_type<tc>, window_params = [{transform_indices = @transform_0, window_bounds = array<i64: 6, 2048>}, {pipeline_mode = #tpu.pipeline_mode<synchronous>, transform_indices = @transform_1, window_bounds = array<i64: 720, 128>}, {pipeline_mode = #tpu.pipeline_mode<synchronous>, transform_indices = @transform_2, window_bounds = array<i64: 624, 1>}, {transform_indices = @transform_3, window_bounds = array<i64: 4, 2048>}]} {
    %c0 = arith.constant 0 : index
    %c0_0 = arith.constant 0 : index
    %0 = vector.load %arg1[%c0, %c0_0] : memref<6x2048xf32, #tpu.memory_space<vmem>>, vector<6x2048xf32>
    %1 = arith.truncf %0 : vector<6x2048xf32> to vector<6x2048xbf16>
    %c0_1 = arith.constant 0 : index
    %c0_2 = arith.constant 0 : index
    %2 = vector.load %arg2[%c0_1, %c0_2] : memref<720x128xbf16, #tpu.memory_space<vmem>>, vector<160x6xbf16>
    %cst = arith.constant dense<0.000000e+00> : vector<160x2048xf32>
    %3 = tpu.matmul %2, %1, %cst {dimension_numbers = #tpu.dot_dimension_numbers<[1], [0], [0], [1], [0, 0, 1, 1], [], []>} : vector<160x6xbf16>, vector<6x2048xbf16>, vector<160x2048xf32> -> vector<160x2048xf32>
    %4 = vector.extract_strided_slice %3 {offsets = [0, 0], sizes = [64, 2048], strides = [1, 1]} : vector<160x2048xf32> to vector<64x2048xf32>
    %5 = vector.extract_strided_slice %3 {offsets = [64, 0], sizes = [64, 2048], strides = [1, 1]} : vector<160x2048xf32> to vector<64x2048xf32>
    %6 = vector.extract_strided_slice %3 {offsets = [128, 0], sizes = [32, 2048], strides = [1, 1]} : vector<160x2048xf32> to vector<32x2048xf32>
    %c0_3 = arith.constant 0 : index
    %c0_4 = arith.constant 0 : index
    %7 = vector.load %arg3[%c0_3, %c0_4] : memref<624x1xf32, #tpu.memory_space<vmem>>, vector<64x1xf32>
    %8 = vector.broadcast %7 : vector<64x1xf32> to vector<64x2048xf32>
    %9 = arith.addf %4, %8 : vector<64x2048xf32>
    %cst_5 = arith.constant 0.000000e+00 : f32
    %10 = vector.broadcast %cst_5 : f32 to vector<64x2048xf32>
    %11 = arith.maximumf %9, %10 : vector<64x2048xf32>
    %12 = arith.truncf %11 : vector<64x2048xf32> to vector<64x2048xbf16>
    %c160 = arith.constant 160 : index
    %c0_6 = arith.constant 0 : index
    %13 = vector.load %arg2[%c160, %c0_6] : memref<720x128xbf16, #tpu.memory_space<vmem>>, vector<64x64xbf16>
    %c64 = arith.constant 64 : index
    %c0_7 = arith.constant 0 : index
    %14 = vector.load %arg3[%c64, %c0_7] : memref<624x1xf32, #tpu.memory_space<vmem>>, vector<64x1xf32>
    %cst_8 = arith.constant dense<0.000000e+00> : vector<64x2048xf32>
    %15 = tpu.matmul %13, %12, %cst_8 {dimension_numbers = #tpu.dot_dimension_numbers<[1], [0], [0], [1], [0, 0, 1, 1], [], []>} : vector<64x64xbf16>, vector<64x2048xbf16>, vector<64x2048xf32> -> vector<64x2048xf32>
    %16 = vector.broadcast %14 : vector<64x1xf32> to vector<64x2048xf32>
    %17 = arith.addf %15, %16 : vector<64x2048xf32>
    %cst_9 = arith.constant 0.000000e+00 : f32
    %18 = vector.broadcast %cst_9 : f32 to vector<64x2048xf32>
    %19 = arith.maximumf %17, %18 : vector<64x2048xf32>
    %20 = arith.truncf %19 : vector<64x2048xf32> to vector<64x2048xbf16>
    %c224 = arith.constant 224 : index
    %c0_10 = arith.constant 0 : index
    %21 = vector.load %arg2[%c224, %c0_10] : memref<720x128xbf16, #tpu.memory_space<vmem>>, vector<64x64xbf16>
    %c128 = arith.constant 128 : index
    %c0_11 = arith.constant 0 : index
    %22 = vector.load %arg3[%c128, %c0_11] : memref<624x1xf32, #tpu.memory_space<vmem>>, vector<64x1xf32>
    %cst_12 = arith.constant dense<0.000000e+00> : vector<64x2048xf32>
    %23 = tpu.matmul %21, %20, %cst_12 {dimension_numbers = #tpu.dot_dimension_numbers<[1], [0], [0], [1], [0, 0, 1, 1], [], []>} : vector<64x64xbf16>, vector<64x2048xbf16>, vector<64x2048xf32> -> vector<64x2048xf32>
    %24 = vector.broadcast %22 : vector<64x1xf32> to vector<64x2048xf32>
    %25 = arith.addf %23, %24 : vector<64x2048xf32>
    %cst_13 = arith.constant 0.000000e+00 : f32
    %26 = vector.broadcast %cst_13 : f32 to vector<64x2048xf32>
    %27 = arith.maximumf %25, %26 : vector<64x2048xf32>
    %28 = arith.truncf %27 : vector<64x2048xf32> to vector<64x2048xbf16>
    %c288 = arith.constant 288 : index
    %c0_14 = arith.constant 0 : index
    %29 = vector.load %arg2[%c288, %c0_14] : memref<720x128xbf16, #tpu.memory_space<vmem>>, vector<64x64xbf16>
    %c192 = arith.constant 192 : index
    %c0_15 = arith.constant 0 : index
    %30 = vector.load %arg3[%c192, %c0_15] : memref<624x1xf32, #tpu.memory_space<vmem>>, vector<64x1xf32>
    %cst_16 = arith.constant dense<0.000000e+00> : vector<64x2048xf32>
    %31 = tpu.matmul %29, %28, %cst_16 {dimension_numbers = #tpu.dot_dimension_numbers<[1], [0], [0], [1], [0, 0, 1, 1], [], []>} : vector<64x64xbf16>, vector<64x2048xbf16>, vector<64x2048xf32> -> vector<64x2048xf32>
    %32 = vector.broadcast %30 : vector<64x1xf32> to vector<64x2048xf32>
    %33 = arith.addf %31, %32 : vector<64x2048xf32>
    %cst_17 = arith.constant 0.000000e+00 : f32
    %34 = vector.broadcast %cst_17 : f32 to vector<64x2048xf32>
    %35 = arith.maximumf %33, %34 : vector<64x2048xf32>
    %36 = arith.truncf %35 : vector<64x2048xf32> to vector<64x2048xbf16>
    %c352 = arith.constant 352 : index
    %c0_18 = arith.constant 0 : index
    %37 = vector.load %arg2[%c352, %c0_18] : memref<720x128xbf16, #tpu.memory_space<vmem>>, vector<64x64xbf16>
    %c256 = arith.constant 256 : index
    %c0_19 = arith.constant 0 : index
    %38 = vector.load %arg3[%c256, %c0_19] : memref<624x1xf32, #tpu.memory_space<vmem>>, vector<64x1xf32>
    %cst_20 = arith.constant dense<0.000000e+00> : vector<64x2048xf32>
    %39 = tpu.matmul %37, %36, %cst_20 {dimension_numbers = #tpu.dot_dimension_numbers<[1], [0], [0], [1], [0, 0, 1, 1], [], []>} : vector<64x64xbf16>, vector<64x2048xbf16>, vector<64x2048xf32> -> vector<64x2048xf32>
    %40 = vector.broadcast %38 : vector<64x1xf32> to vector<64x2048xf32>
    %41 = arith.addf %39, %40 : vector<64x2048xf32>
    %cst_21 = arith.constant 0.000000e+00 : f32
    %42 = vector.broadcast %cst_21 : f32 to vector<64x2048xf32>
    %43 = arith.maximumf %41, %42 : vector<64x2048xf32>
    %44 = arith.truncf %43 : vector<64x2048xf32> to vector<64x2048xbf16>
    %c416 = arith.constant 416 : index
    %c0_22 = arith.constant 0 : index
    %45 = vector.load %arg2[%c416, %c0_22] : memref<720x128xbf16, #tpu.memory_space<vmem>>, vector<64x64xbf16>
    %c320 = arith.constant 320 : index
    %c0_23 = arith.constant 0 : index
    %46 = vector.load %arg3[%c320, %c0_23] : memref<624x1xf32, #tpu.memory_space<vmem>>, vector<64x1xf32>
    %cst_24 = arith.constant dense<0.000000e+00> : vector<64x2048xf32>
    %47 = tpu.matmul %45, %44, %cst_24 {dimension_numbers = #tpu.dot_dimension_numbers<[1], [0], [0], [1], [0, 0, 1, 1], [], []>} : vector<64x64xbf16>, vector<64x2048xbf16>, vector<64x2048xf32> -> vector<64x2048xf32>
    %48 = arith.addf %47, %5 : vector<64x2048xf32>
    %49 = vector.broadcast %46 : vector<64x1xf32> to vector<64x2048xf32>
    %50 = arith.addf %48, %49 : vector<64x2048xf32>
    %cst_25 = arith.constant 0.000000e+00 : f32
    %51 = vector.broadcast %cst_25 : f32 to vector<64x2048xf32>
    %52 = arith.maximumf %50, %51 : vector<64x2048xf32>
    %53 = arith.truncf %52 : vector<64x2048xf32> to vector<64x2048xbf16>
    %c480 = arith.constant 480 : index
    %c0_26 = arith.constant 0 : index
    %54 = vector.load %arg2[%c480, %c0_26] : memref<720x128xbf16, #tpu.memory_space<vmem>>, vector<64x64xbf16>
    %c384 = arith.constant 384 : index
    %c0_27 = arith.constant 0 : index
    %55 = vector.load %arg3[%c384, %c0_27] : memref<624x1xf32, #tpu.memory_space<vmem>>, vector<64x1xf32>
    %cst_28 = arith.constant dense<0.000000e+00> : vector<64x2048xf32>
    %56 = tpu.matmul %54, %53, %cst_28 {dimension_numbers = #tpu.dot_dimension_numbers<[1], [0], [0], [1], [0, 0, 1, 1], [], []>} : vector<64x64xbf16>, vector<64x2048xbf16>, vector<64x2048xf32> -> vector<64x2048xf32>
    %57 = vector.broadcast %55 : vector<64x1xf32> to vector<64x2048xf32>
    %58 = arith.addf %56, %57 : vector<64x2048xf32>
    %cst_29 = arith.constant 0.000000e+00 : f32
    %59 = vector.broadcast %cst_29 : f32 to vector<64x2048xf32>
    %60 = arith.maximumf %58, %59 : vector<64x2048xf32>
    %61 = arith.truncf %60 : vector<64x2048xf32> to vector<64x2048xbf16>
    %c544 = arith.constant 544 : index
    %c0_30 = arith.constant 0 : index
    %62 = vector.load %arg2[%c544, %c0_30] : memref<720x128xbf16, #tpu.memory_space<vmem>>, vector<64x64xbf16>
    %c448 = arith.constant 448 : index
    %c0_31 = arith.constant 0 : index
    %63 = vector.load %arg3[%c448, %c0_31] : memref<624x1xf32, #tpu.memory_space<vmem>>, vector<64x1xf32>
    %cst_32 = arith.constant dense<0.000000e+00> : vector<64x2048xf32>
    %64 = tpu.matmul %62, %61, %cst_32 {dimension_numbers = #tpu.dot_dimension_numbers<[1], [0], [0], [1], [0, 0, 1, 1], [], []>} : vector<64x64xbf16>, vector<64x2048xbf16>, vector<64x2048xf32> -> vector<64x2048xf32>
    %65 = vector.broadcast %63 : vector<64x1xf32> to vector<64x2048xf32>
    %66 = arith.addf %64, %65 : vector<64x2048xf32>
    %cst_33 = arith.constant 0.000000e+00 : f32
    %67 = vector.broadcast %cst_33 : f32 to vector<64x2048xf32>
    %68 = arith.maximumf %66, %67 : vector<64x2048xf32>
    %69 = arith.truncf %68 : vector<64x2048xf32> to vector<64x2048xbf16>
    %c608 = arith.constant 608 : index
    %c0_34 = arith.constant 0 : index
    %70 = vector.load %arg2[%c608, %c0_34] : memref<720x128xbf16, #tpu.memory_space<vmem>>, vector<64x64xbf16>
    %cst_35 = arith.constant dense<0.000000e+00> : vector<64x2048xf32>
    %71 = tpu.matmul %70, %69, %cst_35 {dimension_numbers = #tpu.dot_dimension_numbers<[1], [0], [0], [1], [0, 0, 1, 1], [], []>} : vector<64x64xbf16>, vector<64x2048xbf16>, vector<64x2048xf32> -> vector<64x2048xf32>
    %c512 = arith.constant 512 : index
    %c0_36 = arith.constant 0 : index
    %72 = vector.load %arg3[%c512, %c0_36] : memref<624x1xf32, #tpu.memory_space<vmem>>, vector<64x1xf32>
    %73 = vector.broadcast %72 : vector<64x1xf32> to vector<64x2048xf32>
    %74 = arith.addf %71, %73 : vector<64x2048xf32>
    %75 = arith.truncf %74 : vector<64x2048xf32> to vector<64x2048xbf16>
    %c672 = arith.constant 672 : index
    %c0_37 = arith.constant 0 : index
    %76 = vector.load %arg2[%c672, %c0_37] : memref<720x128xbf16, #tpu.memory_space<vmem>>, vector<32x64xbf16>
    %cst_38 = arith.constant dense<0.000000e+00> : vector<32x2048xf32>
    %77 = tpu.matmul %76, %75, %cst_38 {dimension_numbers = #tpu.dot_dimension_numbers<[1], [0], [0], [1], [0, 0, 1, 1], [], []>} : vector<32x64xbf16>, vector<64x2048xbf16>, vector<32x2048xf32> -> vector<32x2048xf32>
    %78 = arith.addf %77, %6 : vector<32x2048xf32>
    %c576 = arith.constant 576 : index
    %c0_39 = arith.constant 0 : index
    %79 = vector.load %arg3[%c576, %c0_39] : memref<624x1xf32, #tpu.memory_space<vmem>>, vector<32x1xf32>
    %80 = vector.broadcast %79 : vector<32x1xf32> to vector<32x2048xf32>
    %81 = arith.addf %78, %80 : vector<32x2048xf32>
    %cst_40 = arith.constant 0.000000e+00 : f32
    %82 = vector.broadcast %cst_40 : f32 to vector<32x2048xf32>
    %83 = arith.maximumf %81, %82 : vector<32x2048xf32>
    %84 = arith.truncf %83 : vector<32x2048xf32> to vector<32x2048xbf16>
    %85 = tpu.concatenate %84, %69 in 0 : vector<32x2048xbf16>, vector<64x2048xbf16> -> vector<96x2048xbf16>
    %c704 = arith.constant 704 : index
    %c0_41 = arith.constant 0 : index
    %86 = vector.load %arg2[%c704, %c0_41] : memref<720x128xbf16, #tpu.memory_space<vmem>>, vector<16x96xbf16>
    %cst_42 = arith.constant dense<0.000000e+00> : vector<16x2048xf32>
    %87 = tpu.matmul %86, %85, %cst_42 {dimension_numbers = #tpu.dot_dimension_numbers<[1], [0], [0], [1], [0, 0, 1, 1], [], []>} : vector<16x96xbf16>, vector<96x2048xbf16>, vector<16x2048xf32> -> vector<16x2048xf32>
    %c608_43 = arith.constant 608 : index
    %c0_44 = arith.constant 0 : index
    %88 = vector.load %arg3[%c608_43, %c0_44] : memref<624x1xf32, #tpu.memory_space<vmem>>, vector<16x1xf32>
    %89 = vector.broadcast %88 : vector<16x1xf32> to vector<16x2048xf32>
    %90 = arith.addf %87, %89 : vector<16x2048xf32>
    %91 = vector.extract_strided_slice %90 {offsets = [0, 0], sizes = [4, 2048], strides = [1, 1]} : vector<16x2048xf32> to vector<4x2048xf32>
    %c0_45 = arith.constant 0 : index
    %c0_46 = arith.constant 0 : index
    %92 = vector.load %arg4[%c0_45, %c0_46] : memref<4x2048xf32, #tpu.memory_space<vmem>>, vector<4x2048xf32>
    tpu.vector_store %arg4[%c0_45, %c0_46], %91 {strides = array<i32>} : memref<4x2048xf32, #tpu.memory_space<vmem>>, vector<4x2048xf32>,
    return
  }
  func.func @transform_0(%arg0: i32) -> (i32, i32) {
    %c0_i32 = arith.constant 0 : i32
    %c0_i32_0 = arith.constant 0 : i32
    return %c0_i32, %arg0 : i32, i32
  }
  func.func @transform_1(%arg0: i32) -> (i32, i32) {
    %c0_i32 = arith.constant 0 : i32
    %c0_i32_0 = arith.constant 0 : i32
    %c0_i32_1 = arith.constant 0 : i32
    return %c0_i32, %c0_i32_0 : i32, i32
  }
  func.func @transform_2(%arg0: i32) -> (i32, i32) {
    %c0_i32 = arith.constant 0 : i32
    %c0_i32_0 = arith.constant 0 : i32
    %c0_i32_1 = arith.constant 0 : i32
    return %c0_i32, %c0_i32_0 : i32, i32
  }
  func.func @transform_3(%arg0: i32) -> (i32, i32) {
    %c0_i32 = arith.constant 0 : i32
    %c0_i32_0 = arith.constant 0 : i32
    return %c0_i32, %arg0 : i32, i32
  }
}

</mosaic_0001>

<bundles_post_ra>
// kernel: nerf_forward.1
= control target key start
LH: loop header
LB: loop body
LE: loop exit
PB: predicated region body
PF: predicated region fallthrough
CT: control target
= control target key end

     0   :  { %s10478_s12 = smov 0   ;;  %s13740_s0 = inlined_call_operand.vmem [shape: f32[6,4096], index: 0, kind: input, shape index: {}]   ;;  %s13741_s1 = inlined_call_operand.vmem [shape: bf16[720,128], index: 1, kind: input, shape index: {}]   ;;  %s13742_s2 = inlined_call_operand.vmem [shape: f32[624,1], index: 2, kind: input, shape index: {}]   ;;  %s13743_s3 = inlined_call_operand.vmem [shape: f32[4,4096], index: 3, kind: output, shape index: {}]  }
   0x1 LB: > { %s9776_s13 = sadd.s32 4294967295, %s10455_s12   ;;  %p9780_p0 = scmp.ge.s32.totalorder %s10455_s12, 1  ;;  %s10455_s12 = sphi %s10478_s12, %s13_s12  }
   0x2   : > { %p138_p1 = scmp.lt.s32.totalorder %s10455_s12, 3 }
   0x4   : > { %p139_p2 = pnand %p9780_p0, %p138_p1 }
   0x6   : > { %142 = sbr.rel (%p139_p2) target bundleno = 2973 (0xb9d), region = 32 }
   0xd   : > { %s9781_s14 = sshll.u32 %s9776_s13, 4  ;;  %v13744_v0 = vmov 0   ;;  %v1421_v1 = vld [vmem:[%s13742_s2] sm:$0xff]  ;;  %vm308_vm0 = vcmask 1042432   ;;  %v1422_v2 = vld [vmem:[%s13742_s2 + $0x8] sm:$0xff]  ;;  %vm277_vm1 = vcmask 48128  }
   0xe   : > { %p163_p3 = scmp.lt.s32.totalorder %s9781_s14, 31  ;;  %389 = vmatprep.mubr.bf16.mxu0 %v13744_v0  ;;  %522 = vmatprep.mubr.bf16.mxu1 %v13744_v0  ;;  %v10518_v18 = vld [vmem:[%s13741_s1] sm:$0xff]   ;;  %v1423_v24 = vld [vmem:[%s13742_s2 + $0x10] sm:$0xff]  ;;  %v1424_v27 = vld [vmem:[%s13742_s2 + $0x18] sm:$0xff]  ;;  %vm1865_vm2 = vcmask 523264   ;;  %vm9348_vm3 = vcmask 785408  }
   0xf   : > { %10401 = vset.pattern.permute.xlu0 %v13744_v0  ;;  %10402 = vset.pattern.permute.xlu1 %v13744_v0  ;;  %v1425_v21 = vld [vmem:[%s13742_s2 + $0x20] sm:$0xff]  ;;  %v1427_v26 = vld [vmem:[%s13742_s2 + $0x30] sm:$0xff]  ;;  %v10546_v28 = vld [vmem:[%s13741_s1 + $0x8] sm:$0xff]  }
  0x10   : > { %s13844_s14 = smov (!%p163_p3, %s9781_s14), 31  ;;  %1431 = vperm.xlu0 %10401, %v1421_v1   ;;  %1441 = vperm.xlu1 %10402, %v1423_v24   ;;  %v1797_v29 = vld [vmem:[%s13742_s2 + $0x40] sm:$0xff]  ;;  %v1426_v30 = vld [vmem:[%s13742_s2 + $0x28] sm:$0xff]  ;;  %v1799_v33 = vld [vmem:[%s13742_s2 + $0x50] sm:$0xff] }
  0x11   : > { %s9782_s17 = sshll.u32 %s13844_s14, 3  ;;  %v1428_v36 = vld [vmem:[%s13742_s2 + $0x38] sm:$0xff]  ;;  %v10573_v37 = vld [vmem:[%s13741_s1 + $0x10] sm:$0xff]   ;;  %v1801_v38 = vld [vmem:[%s13742_s2 + $0x60] sm:$0xff]  ;;  %s9784_s22 = sshll.u32 %s13844_s14, 2 }
  0x12   : > { %s10499_s20 = scalar_lea.vmem %s13740_s0, %s9782_s17  ;;  %v1798_v39 = vld [vmem:[%s13742_s2 + $0x48] sm:$0xff]  ;;  %v1803_v40 = vld [vmem:[%s13742_s2 + $0x70] sm:$0xff]  ;;  %v1800_v41 = vld [vmem:[%s13742_s2 + $0x58] sm:$0xff] }
  0x13   : > { %v176_v3 = vld [vmem:[%s10499_s20 + $0x8] sm:$0x3f]  ;;  %v178_v4 = vld [vmem:[%s10499_s20 + $0x18] sm:$0x3f]  ;;  %v175_v5 = vld [vmem:[%s10499_s20] sm:$0x3f] }
  0x14   : > { %v192_v6 = vpack.c.bf16 %v176_v3, %v176_v3  ;;  %v194_v7 = vpack.c.bf16 %v178_v4, %v178_v4  ;;  %v191_v8 = vpack.c.bf16 %v175_v5, %v175_v5  ;;  %v177_v9 = vld [vmem:[%s10499_s20 + $0x10] sm:$0x3f]  ;;  %v180_v10 = vld [vmem:[%s10499_s20 + $0x28] sm:$0x3f]  ;;  %v182_v11 = vld [vmem:[%s10499_s20 + $0x38] sm:$0x3f]  ;;  %1436 = vperm.xlu0 %10401, %v1422_v2   ;;  %1446 = vperm.xlu1 %10402, %v1424_v27  }
  0x15   : > { %v193_v12 = vpack.c.bf16 %v177_v9, %v177_v9  ;;  %v196_v13 = vpack.c.bf16 %v180_v10, %v180_v10  ;;  %v198_v14 = vpack.c.bf16 %v182_v11, %v182_v11  ;;  %v179_v15 = vld [vmem:[%s10499_s20 + $0x20] sm:$0x3f]  ;;  %v181_v16 = vld [vmem:[%s10499_s20 + $0x30] sm:$0x3f]  ;;  %v184_v31 = vld [vmem:[%s10499_s20 + $0x48] sm:$0x3f] }
  0x16   : > { %9795 = vmatprep.subr.msk.bf16.mxu0 %vm308_vm0, %v192_v6  ;;  %9806 = vmatprep.subr.msk.bf16.mxu1 %vm308_vm0, %v194_v7  ;;  %v310_v17 = vsel %vm308_vm0, %v191_v8, 0  ;;  %v195_v19 = vpack.c.bf16 %v179_v15, %v179_v15  ;;  %v197_v20 = vpack.c.bf16 %v181_v16, %v181_v16  ;;  %v186_v32 = vld [vmem:[%s10499_s20 + $0x58] sm:$0x3f]  ;;  %v200_v34 = vpack.c.bf16 %v184_v31, %v184_v31  ;;  %v2662_v43 = vld [vmem:[%s13742_s2 + $0x80] sm:$0xff]  ;;  %v1802_v44 = vld [vmem:[%s13742_s2 + $0x68] sm:$0xff] }
  0x17   : > { %358 = vmatpush1.bf16.msra.mxu0 %v310_v17  ;;  %v316_v22 = vsel %vm308_vm0, %v193_v12, 0  ;;  %v202_v35 = vpack.c.bf16 %v186_v32, %v186_v32  ;;  %v10596_v42 = vld [vmem:[%s13741_s1 + $0x18] sm:$0xff]   ;;  %v2664_v45 = vld [vmem:[%s13742_s2 + $0x90] sm:$0xff]  ;;  %v10619_v47 = vld [vmem:[%s13741_s1 + $0x20] sm:$0xff]  }
  0x18   : > { %491 = vmatpush1.bf16.msra.mxu1 %v316_v22  ;;  %9817 = vmatprep.subr.msk.bf16.mxu0 %vm308_vm0, %v196_v13  ;;  %v322_v23 = vsel %vm308_vm0, %v195_v19, 0  ;;  %v328_v25 = vsel %vm308_vm0, %v197_v20, 0  ;;  %v1804_v46 = vld [vmem:[%s13742_s2 + $0x78] sm:$0xff]  ;;  %v2666_v48 = vld [vmem:[%s13742_s2 + $0xa0] sm:$0xff]  ;;  %v2663_v49 = vld [vmem:[%s13742_s2 + $0x88] sm:$0xff] }
  0x19   : > { %9828 = vmatprep.subr.msk.bf16.mxu1 %vm308_vm0, %v198_v14  ;;  %1451 = vperm.xlu0 %10401, %v1425_v21   ;;  %v2668_v50 = vld [vmem:[%s13742_s2 + $0xb0] sm:$0xff]  ;;  %v2665_v51 = vld [vmem:[%s13742_s2 + $0x98] sm:$0xff]  ;;  %v10642_v52 = vld [vmem:[%s13741_s1 + $0x28] sm:$0xff]  }
  0x1a   : > { %9796 = vmatmul.mubr.msk.bf16.vlgmr.msra.gmra.mrb[0].mxu0 %vm277_vm1, %v10518_v18  ;;  %1456 = vperm.xlu1 %10402, %v1426_v30   ;;  %v3526_v53 = vld [vmem:[%s13742_s2 + $0xc0] sm:$0xff]  ;;  %v2667_v54 = vld [vmem:[%s13742_s2 + $0xa8] sm:$0xff]  ;;  %v3528_v55 = vld [vmem:[%s13742_s2 + $0xd0] sm:$0xff] }
  0x1b   : > { %9807 = vmatmul.mubr.msk.bf16.vlgmr.msra.gmra.mrb[0].mxu1 %vm277_vm1, %v10518_v18  ;;  %624 = vmatpush1.bf16.msra.mxu0 %v322_v23  ;;  %v2669_v56 = vld [vmem:[%s13742_s2 + $0xb8] sm:$0xff]  ;;  %v10665_v57 = vld [vmem:[%s13741_s1 + $0x30] sm:$0xff]   ;;  %v3530_v58 = vld [vmem:[%s13742_s2 + $0xe0] sm:$0xff] }
  0x1c   : > { %757 = vmatpush1.bf16.msra.mxu1 %v328_v25  ;;  %399 = vmatprep.mubr.bf16.mxu0 %v13744_v0  ;;  %v3527_v59 = vld [vmem:[%s13742_s2 + $0xc8] sm:$0xff]  ;;  %v3532_v60 = vld [vmem:[%s13742_s2 + $0xf0] sm:$0xff]  ;;  %v3529_v61 = vld [vmem:[%s13742_s2 + $0xd8] sm:$0xff] }
  0x1d   : > { %532 = vmatprep.mubr.bf16.mxu1 %v13744_v0  ;;  %1461 = vperm.xlu0 %10401, %v1427_v26   ;;  %v10688_v62 = vld [vmem:[%s13741_s1 + $0x38] sm:$0xff]   ;;  %v4390_v63 = vld [vmem:[%s13742_s2 + $0x100] sm:$0xff]  ;;  %v3531_v1 = vld [vmem:[%s13742_s2 + $0xe8] sm:$0xff] }
  0x1e   : > { %9839 = vmatprep.subr.msk.bf16.mxu0 %vm308_vm0, %v200_v34  ;;  %9850 = vmatprep.subr.msk.bf16.mxu1 %vm308_vm0, %v202_v35  ;;  %v4392_v2 = vld [vmem:[%s13742_s2 + $0x110] sm:$0xff]  ;;  %v3533_v3 = vld [vmem:[%s13742_s2 + $0xf8] sm:$0xff]  ;;  %v10711_v4 = vld [vmem:[%s13741_s1 + $0x40] sm:$0xff]  }
  0x1f   : > { %1466 = vperm.xlu1 %10402, %v1428_v36   ;;  %v4394_v5 = vld [vmem:[%s13742_s2 + $0x120] sm:$0xff]  ;;  %v4391_v6 = vld [vmem:[%s13742_s2 + $0x108] sm:$0xff]  ;;  %v4396_v7 = vld [vmem:[%s13742_s2 + $0x130] sm:$0xff] }
  0x20   : > { %v4393_v8 = vld [vmem:[%s13742_s2 + $0x118] sm:$0xff]  ;;  %v10734_v9 = vld [vmem:[%s13741_s1 + $0x48] sm:$0xff]   ;;  %v5254_v10 = vld [vmem:[%s13742_s2 + $0x140] sm:$0xff] }
  0x21   : > { %1807 = vperm.xlu0 %10401, %v1797_v29   ;;  %v4395_v11 = vld [vmem:[%s13742_s2 + $0x128] sm:$0xff]  ;;  %v183_v12 = vld [vmem:[%s10499_s20 + $0x40] sm:$0x3f]  ;;  %v185_v13 = vld [vmem:[%s10499_s20 + $0x50] sm:$0x3f] }
  0x22   : > { %9797 = vmatmul.mubr.msk.bf16.gmra.mrb[4].mxu0 %vm277_vm1, %v10546_v28  ;;  %v5256_v14 = vld [vmem:[%s13742_s2 + $0x150] sm:$0xff]  ;;  %v4397_v15 = vld [vmem:[%s13742_s2 + $0x138] sm:$0xff]  ;;  %v199_v16 = vpack.c.bf16 %v183_v12, %v183_v12  ;;  %v201_v17 = vpack.c.bf16 %v185_v13, %v185_v13  ;;  %v5258_v19 = vld [vmem:[%s13742_s2 + $0x160] sm:$0xff] }
  0x23   : > { %9808 = vmatmul.mubr.msk.bf16.gmra.mrb[4].mxu1 %vm277_vm1, %v10546_v28  ;;  %409 = vmatprep.mubr.bf16.mxu0 %v13744_v0  ;;  %v5255_v20 = vld [vmem:[%s13742_s2 + $0x148] sm:$0xff]  ;;  %v190_v23 = vld [vmem:[%s10499_s20 + $0x78] sm:$0x3f]  ;;  %v5260_v25 = vld [vmem:[%s13742_s2 + $0x170] sm:$0xff] }
  0x24   : > { %542 = vmatprep.mubr.bf16.mxu1 %v13744_v0  ;;  %1812 = vperm.xlu1 %10402, %v1798_v39   ;;  %v188_v21 = vld [vmem:[%s10499_s20 + $0x68] sm:$0x3f]  ;;  %v334_v22 = vsel %vm308_vm0, %v199_v16, 0  ;;  %v340_v24 = vsel %vm308_vm0, %v201_v17, 0  ;;  %v5257_v27 = vld [vmem:[%s13742_s2 + $0x158] sm:$0xff]  ;;  %v206_v29 = vpack.c.bf16 %v190_v23, %v190_v23  ;;  %v6246_v30 = vld [vmem:[%s13742_s2 + $0x180] sm:$0xff] }
  0x25   : > { %1817 = vperm.xlu0 %10401, %v1799_v33   ;;  %v204_v26 = vpack.c.bf16 %v188_v21, %v188_v21  ;;  %v5259_v31 = vld [vmem:[%s13742_s2 + $0x168] sm:$0xff]  ;;  %v6248_v32 = vld [vmem:[%s13742_s2 + $0x190] sm:$0xff]  ;;  %v5261_v33 = vld [vmem:[%s13742_s2 + $0x178] sm:$0xff] }
  0x26   : > { %v6250_v34 = vld [vmem:[%s13742_s2 + $0x1a0] sm:$0xff]  ;;  %v6247_v35 = vld [vmem:[%s13742_s2 + $0x188] sm:$0xff]  ;;  %v6252_v36 = vld [vmem:[%s13742_s2 + $0x1b0] sm:$0xff] }
  0x27   : > { %v7110_v39 = vld [vmem:[%s13742_s2 + $0x1c0] sm:$0xff] }
  0x28   : > { %1822 = vperm.xlu1 %10402, %v1800_v41   ;;  %v7112_v41 = vld [vmem:[%s13742_s2 + $0x1d0] sm:$0xff] }
  0x29   : > { %1827 = vperm.xlu0 %10401, %v1801_v38   ;;  %v6249_v38 = vld [vmem:[%s13742_s2 + $0x198] sm:$0xff] }
  0x2a   : > { %9798 = vmatmul.mubr.msk.bf16.gmra.mrb[8].mxu0 %vm277_vm1, %v10573_v37 }
  0x2b   : > { %9809 = vmatmul.mubr.msk.bf16.gmra.mrb[8].mxu1 %vm277_vm1, %v10573_v37  ;;  %419 = vmatprep.mubr.bf16.mxu0 %v13744_v0 }
  0x2c   : > { %552 = vmatprep.mubr.bf16.mxu1 %v13744_v0  ;;  %1832 = vperm.xlu1 %10402, %v1802_v44   ;;  %v7114_v44 = vld [vmem:[%s13742_s2 + $0x1e0] sm:$0xff] }
  0x2d   : > { %1837 = vperm.xlu0 %10401, %v1803_v40   ;;  %v6251_v40 = vld [vmem:[%s13742_s2 + $0x1a8] sm:$0xff] }
  0x30   : > { %1842 = vperm.xlu1 %10402, %v1804_v46   ;;  %v7116_v46 = vld [vmem:[%s13742_s2 + $0x1f0] sm:$0xff] }
  0x31   : > { %2672 = vperm.xlu0 %10401, %v2662_v43   ;;  %v6253_v43 = vld [vmem:[%s13742_s2 + $0x1b8] sm:$0xff] }
  0x32   : > { %9799 = vmatmul.mubr.msk.bf16.gmra.mrb[12].mxu0 %vm277_vm1, %v10596_v42 }
  0x33   : > { %9810 = vmatmul.mubr.msk.bf16.gmra.mrb[12].mxu1 %vm277_vm1, %v10596_v42  ;;  %429 = vmatprep.mubr.bf16.mxu0 %v13744_v0 }
  0x34   : > { %562 = vmatprep.mubr.bf16.mxu1 %v13744_v0  ;;  %2677 = vperm.xlu1 %10402, %v2663_v49   ;;  %v7974_v49 = vld [vmem:[%s13742_s2 + $0x200] sm:$0xff] }
  0x35   : > { %2682 = vperm.xlu0 %10401, %v2664_v45   ;;  %v7111_v45 = vld [vmem:[%s13742_s2 + $0x1c8] sm:$0xff] }
  0x38   : > { %2687 = vperm.xlu1 %10402, %v2665_v51   ;;  %v7976_v51 = vld [vmem:[%s13742_s2 + $0x210] sm:$0xff] }
  0x39   : > { %2692 = vperm.xlu0 %10401, %v2666_v48   ;;  %v7113_v48 = vld [vmem:[%s13742_s2 + $0x1d8] sm:$0xff] }
  0x3a   : > { %9800 = vmatmul.mubr.msk.bf16.gmra.mrb[16].mxu0 %vm277_vm1, %v10619_v47 }
  0x3b   : > { %9811 = vmatmul.mubr.msk.bf16.gmra.mrb[16].mxu1 %vm277_vm1, %v10619_v47  ;;  %439 = vmatprep.mubr.bf16.mxu0 %v13744_v0 }
  0x3c   : > { %572 = vmatprep.mubr.bf16.mxu1 %v13744_v0  ;;  %2697 = vperm.xlu1 %10402, %v2667_v54   ;;  %v7978_v54 = vld [vmem:[%s13742_s2 + $0x220] sm:$0xff] }
  0x3d   : > { %2702 = vperm.xlu0 %10401, %v2668_v50   ;;  %v7115_v50 = vld [vmem:[%s13742_s2 + $0x1e8] sm:$0xff] }
  0x40   : > { %2707 = vperm.xlu1 %10402, %v2669_v56   ;;  %v7980_v56 = vld [vmem:[%s13742_s2 + $0x230] sm:$0xff] }
  0x41   : > { %3536 = vperm.xlu0 %10401, %v3526_v53   ;;  %v7117_v53 = vld [vmem:[%s13742_s2 + $0x1f8] sm:$0xff] }
  0x42   : > { %9801 = vmatmul.mubr.msk.bf16.gmra.mrb[20].mxu0 %vm277_vm1, %v10642_v52 }
  0x43   : > { %9812 = vmatmul.mubr.msk.bf16.gmra.mrb[20].mxu1 %vm277_vm1, %v10642_v52  ;;  %449 = vmatprep.mubr.bf16.mxu0 %v13744_v0 }
  0x44   : > { %582 = vmatprep.mubr.bf16.mxu1 %v13744_v0  ;;  %3541 = vperm.xlu1 %10402, %v3527_v59   ;;  %v9146_v59 = vld [vmem:[%s13742_s2 + $0x240] sm:$0xff] }
  0x45   : > { %3546 = vperm.xlu0 %10401, %v3528_v55   ;;  %v7975_v55 = vld [vmem:[%s13742_s2 + $0x208] sm:$0xff] }
  0x48   : > { %3551 = vperm.xlu1 %10402, %v3529_v61   ;;  %v9148_v61 = vld [vmem:[%s13742_s2 + $0x250] sm:$0xff] }
  0x49   : > { %3556 = vperm.xlu0 %10401, %v3530_v58   ;;  %v7977_v58 = vld [vmem:[%s13742_s2 + $0x218] sm:$0xff] }
  0x4a   : > { %9802 = vmatmul.mubr.msk.bf16.gmra.mrb[24].mxu0 %vm277_vm1, %v10665_v57 }
  0x4b   : > { %9813 = vmatmul.mubr.msk.bf16.gmra.mrb[24].mxu1 %vm277_vm1, %v10665_v57  ;;  %459 = vmatprep.mubr.bf16.mxu0 %v13744_v0 }
  0x4c   : > { %592 = vmatprep.mubr.bf16.mxu1 %v13744_v0  ;;  %3561 = vperm.xlu1 %10402, %v3531_v1   ;;  %v9332_v1 = vld [vmem:[%s13742_s2 + $0x260] sm:$0xff] }
  0x4d   : > { %3566 = vperm.xlu0 %10401, %v3532_v60   ;;  %v7979_v60 = vld [vmem:[%s13742_s2 + $0x228] sm:$0xff] }
  0x50   : > { %3571 = vperm.xlu1 %10402, %v3533_v3   ;;  %v9149_v3 = vld [vmem:[%s13742_s2 + $0x258] sm:$0xff] }
  0x51   : > { %4400 = vperm.xlu0 %10401, %v4390_v63   ;;  %v7981_v63 = vld [vmem:[%s13742_s2 + $0x238] sm:$0xff] }
  0x52   : > { %9803 = vmatmul.mubr.msk.bf16.gmra.mrb[28].mxu0 %vm277_vm1, %v10688_v62 }
  0x53   : > { %9814 = vmatmul.mubr.msk.bf16.gmra.mrb[28].mxu1 %vm277_vm1, %v10688_v62  ;;  %469 = vmatprep.mubr.bf16.mxu0 %v13744_v0 }
  0x54   : > { %602 = vmatprep.mubr.bf16.mxu1 %v13744_v0  ;;  %4405 = vperm.xlu1 %10402, %v4391_v6   ;;  %v189_v6 = vld [vmem:[%s10499_s20 + $0x70] sm:$0x3f] }
  0x55   : > { %4410 = vperm.xlu0 %10401, %v4392_v2   ;;  %v9147_v2 = vld [vmem:[%s13742_s2 + $0x248] sm:$0xff] }
  0x58   : > { %4415 = vperm.xlu1 %10402, %v4393_v8   ;;  %v205_v8 = vpack.c.bf16 %v189_v6, %v189_v6 }
  0x59   : > { %4420 = vperm.xlu0 %10401, %v4394_v5   ;;  %v187_v5 = vld [vmem:[%s10499_s20 + $0x60] sm:$0x3f]  ;;  %s13727_s20 = scalar_lea.vmem %s13743_s3, %s9784_s22 }
  0x5a   : > { %9804 = vmatmul.mubr.msk.bf16.gmra.mrb[32].mxu0 %vm277_vm1, %v10711_v4 }
  0x5b   : > { %9815 = vmatmul.mubr.msk.bf16.gmra.mrb[32].mxu1 %vm277_vm1, %v10711_v4  ;;  %479 = vmatprep.mubr.bf16.mxu0 %v13744_v0 }
  0x5c   : > { %612 = vmatprep.mubr.bf16.mxu1 %v13744_v0  ;;  %4425 = vperm.xlu1 %10402, %v4395_v11   ;;  %v352_v11 = vsel %vm308_vm0, %v205_v8, 0 }
  0x5d   : > { %4430 = vperm.xlu0 %10401, %v4396_v7   ;;  %v203_v7 = vpack.c.bf16 %v187_v5, %v187_v5 }
  0x60   : > { %4435 = vperm.xlu1 %10402, %v4397_v15  }
  0x61   : > { %5880 = vperm.xlu0 %10401, %v5254_v10   ;;  %v346_v10 = vsel %vm308_vm0, %v203_v7, 0 }
  0x62   : > { %9805 = vmatmul.mubr.msk.bf16.gmra.mrb[36].mxu0 %vm277_vm1, %v10734_v9 }
  0x63   : > { %9816 = vmatmul.mubr.msk.bf16.gmra.mrb[36].mxu1 %vm277_vm1, %v10734_v9  ;;  %655 = vmatprep.mubr.bf16.mxu0 %v13744_v0 }
  0x64   : > { %788 = vmatprep.mubr.bf16.mxu1 %v13744_v0  ;;  %5885 = vperm.xlu1 %10402, %v5255_v20  }
  0x65   : > { %5890 = vperm.xlu0 %10401, %v5256_v14  }
  0x68   : > { %5895 = vperm.xlu1 %10402, %v5257_v27  }
  0x69   : > { %5900 = vperm.xlu0 %10401, %v5258_v19  }
  0x6a   : > { %9818 = vmatmul.mubr.msk.bf16.vlgmr.msra.gmra.mrb[40].mxu0 %vm277_vm1, %v10518_v18 }
  0x6b   : > { %9829 = vmatmul.mubr.msk.bf16.vlgmr.msra.gmra.mrb[40].mxu1 %vm277_vm1, %v10518_v18  ;;  %890 = vmatpush1.bf16.msra.mxu0 %v334_v22 }
  0x6c   : > { %1023 = vmatpush1.bf16.msra.mxu1 %v340_v24  ;;  %665 = vmatprep.mubr.bf16.mxu0 %v13744_v0 }
  0x6d   : > { %798 = vmatprep.mubr.bf16.mxu1 %v13744_v0  ;;  %5910 = vperm.xlu0 %10401, %v5260_v25  }
  0x6e   : > { %9861 = vmatprep.subr.msk.bf16.mxu0 %vm308_vm0, %v204_v26  ;;  %9872 = vmatprep.subr.msk.bf16.mxu1 %vm308_vm0, %v206_v29 }
  0x6f   : > { %5905 = vperm.xlu1 %10402, %v5259_v31  }
  0x71   : > { %6256 = vperm.xlu0 %10401, %v6246_v30  }
  0x72   : > { %9819 = vmatmul.mubr.msk.bf16.gmra.mrb[44].mxu0 %vm277_vm1, %v10546_v28 }
  0x73   : > { %9830 = vmatmul.mubr.msk.bf16.gmra.mrb[44].mxu1 %vm277_vm1, %v10546_v28  ;;  %675 = vmatprep.mubr.bf16.mxu0 %v13744_v0 }
  0x74   : > { %808 = vmatprep.mubr.bf16.mxu1 %v13744_v0  ;;  %5915 = vperm.xlu1 %10402, %v5261_v33  }
  0x75   : > { %6266 = vperm.xlu0 %10401, %v6248_v32  }
  0x78   : > { %6261 = vperm.xlu1 %10402, %v6247_v35  }
  0x79   : > { %6276 = vperm.xlu0 %10401, %v6250_v34  }
  0x7a   : > { %9820 = vmatmul.mubr.msk.bf16.gmra.mrb[48].mxu0 %vm277_vm1, %v10573_v37 }
  0x7b   : > { %9831 = vmatmul.mubr.msk.bf16.gmra.mrb[48].mxu1 %vm277_vm1, %v10573_v37  ;;  %685 = vmatprep.mubr.bf16.mxu0 %v13744_v0 }
  0x7c   : > { %818 = vmatprep.mubr.bf16.mxu1 %v13744_v0  ;;  %6271 = vperm.xlu1 %10402, %v6249_v38  }
  0x7d   : > { %6286 = vperm.xlu0 %10401, %v6252_v36  }
  0x80   : > { %6281 = vperm.xlu1 %10402, %v6251_v40  }
  0x81   : > { %7120 = vperm.xlu0 %10401, %v7110_v39  }
  0x82   : > { %9821 = vmatmul.mubr.msk.bf16.gmra.mrb[52].mxu0 %vm277_vm1, %v10596_v42 }
  0x83   : > { %9832 = vmatmul.mubr.msk.bf16.gmra.mrb[52].mxu1 %vm277_vm1, %v10596_v42  ;;  %695 = vmatprep.mubr.bf16.mxu0 %v13744_v0 }
  0x84   : > { %828 = vmatprep.mubr.bf16.mxu1 %v13744_v0  ;;  %6291 = vperm.xlu1 %10402, %v6253_v43  }
  0x85   : > { %7130 = vperm.xlu0 %10401, %v7112_v41  }
  0x88   : > { %7125 = vperm.xlu1 %10402, %v7111_v45  }
  0x89   : > { %7140 = vperm.xlu0 %10401, %v7114_v44  }
  0x8a   : > { %9822 = vmatmul.mubr.msk.bf16.gmra.mrb[56].mxu0 %vm277_vm1, %v10619_v47 }
  0x8b   : > { %9833 = vmatmul.mubr.msk.bf16.gmra.mrb[56].mxu1 %vm277_vm1, %v10619_v47  ;;  %705 = vmatprep.mubr.bf16.mxu0 %v13744_v0 }
  0x8c   : > { %838 = vmatprep.mubr.bf16.mxu1 %v13744_v0  ;;  %7135 = vperm.xlu1 %10402, %v7113_v48  }
  0x8d   : > { %7150 = vperm.xlu0 %10401, %v7116_v46  }
  0x8f   : > { %v10967_v12 = vpop.permute.xlu0 %1431  ;;  %v10977_v14 = vpop.permute.xlu1 %1441 }
  0x90   : > { %7145 = vperm.xlu1 %10402, %v7115_v50  }
  0x91   : > { %7984 = vperm.xlu0 %10401, %v7974_v49  }
  0x92   : > { %9823 = vmatmul.mubr.msk.bf16.gmra.mrb[60].mxu0 %vm277_vm1, %v10642_v52 }
  0x93   : > { %9834 = vmatmul.mubr.msk.bf16.gmra.mrb[60].mxu1 %vm277_vm1, %v10642_v52  ;;  %715 = vmatprep.mubr.bf16.mxu0 %v13744_v0  ;;  %v10974_v13 = vpop.permute.xlu0 %1436  ;;  %v10995_v44 = vpop.permute.xlu1 %1446 }
  0x94   : > { %848 = vmatprep.mubr.bf16.mxu1 %v13744_v0  ;;  %7155 = vperm.xlu1 %10402, %v7117_v53  }
  0x95   : > { %7994 = vperm.xlu0 %10401, %v7976_v51  }
  0x98   : > { %7989 = vperm.xlu1 %10402, %v7975_v55  }
  0x99   : > { %8004 = vperm.xlu0 %10401, %v7978_v54  }
  0x9a   : > { %9824 = vmatmul.mubr.msk.bf16.gmra.mrb[64].mxu0 %vm277_vm1, %v10665_v57 }
  0x9b   : > { %9835 = vmatmul.mubr.msk.bf16.gmra.mrb[64].mxu1 %vm277_vm1, %v10665_v57  ;;  %725 = vmatprep.mubr.bf16.mxu0 %v13744_v0 }
  0x9c   : > { %858 = vmatprep.mubr.bf16.mxu1 %v13744_v0  ;;  %7999 = vperm.xlu1 %10402, %v7977_v58  }
  0x9d   : > { %8014 = vperm.xlu0 %10401, %v7980_v56  }
  0xa0   : > { %8009 = vperm.xlu1 %10402, %v7979_v60  }
  0xa1   : > { %9152 = vperm.xlu0 %10401, %v9146_v59  }
  0xa2   : > { %9825 = vmatmul.mubr.msk.bf16.gmra.mrb[68].mxu0 %vm277_vm1, %v10688_v62 }
  0xa3   : > { %9836 = vmatmul.mubr.msk.bf16.gmra.mrb[68].mxu1 %vm277_vm1, %v10688_v62  ;;  %735 = vmatprep.mubr.bf16.mxu0 %v13744_v0 }
  0xa4   : > { %868 = vmatprep.mubr.bf16.mxu1 %v13744_v0  ;;  %8019 = vperm.xlu1 %10402, %v7981_v63  }
  0xa5   : > { %9162 = vperm.xlu0 %10401, %v9148_v61  }
  0xa8   : > { %9157 = vperm.xlu1 %10402, %v9147_v2  }
  0xa9   : > { %9336 = vperm.xlu0 %10401, %v9332_v1  }
  0xaa   : > { %9826 = vmatmul.mubr.msk.bf16.gmra.mrb[72].mxu0 %vm277_vm1, %v10711_v4 }
  0xab   : > { %9837 = vmatmul.mubr.msk.bf16.gmra.mrb[72].mxu1 %vm277_vm1, %v10711_v4  ;;  %745 = vmatprep.mubr.bf16.mxu0 %v13744_v0 }
  0xac   : > { %878 = vmatprep.mubr.bf16.mxu1 %v13744_v0  ;;  %9167 = vperm.xlu1 %10402, %v9149_v3  }
  0xb2   : > { %9827 = vmatmul.mubr.msk.bf16.gmra.mrb[76].mxu0 %vm277_vm1, %v10734_v9 }
  0xb3   : > { %9838 = vmatmul.mubr.msk.bf16.gmra.mrb[76].mxu1 %vm277_vm1, %v10734_v9  ;;  %921 = vmatprep.mubr.bf16.mxu0 %v13744_v0 }
  0xb4   : > { %1054 = vmatprep.mubr.bf16.mxu1 %v13744_v0 }
  0xba   : > { %9840 = vmatmul.mubr.msk.bf16.vlgmr.msra.gmra.mrb[80].mxu0 %vm277_vm1, %v10518_v18 }
  0xbb   : > { %9851 = vmatmul.mubr.msk.bf16.vlgmr.msra.gmra.mrb[80].mxu1 %vm277_vm1, %v10518_v18  ;;  %1156 = vmatpush1.bf16.msra.mxu0 %v346_v10 }
  0xbc   : > { %1289 = vmatpush1.bf16.msra.mxu1 %v352_v11  ;;  %931 = vmatprep.mubr.bf16.mxu0 %v13744_v0 }
  0xbd   : > { %1064 = vmatprep.mubr.bf16.mxu1 %v13744_v0 }
  0xc2   : > { %9841 = vmatmul.mubr.msk.bf16.gmra.mrb[84].mxu0 %vm277_vm1, %v10546_v28 }
  0xc3   : > { %9852 = vmatmul.mubr.msk.bf16.gmra.mrb[84].mxu1 %vm277_vm1, %v10546_v28  ;;  %941 = vmatprep.mubr.bf16.mxu0 %v13744_v0 }
  0xc4   : > { %1074 = vmatprep.mubr.bf16.mxu1 %v13744_v0 }
  0xca   : > { %9842 = vmatmul.mubr.msk.bf16.gmra.mrb[88].mxu0 %vm277_vm1, %v10573_v37 }
  0xcb   : > { %9853 = vmatmul.mubr.msk.bf16.gmra.mrb[88].mxu1 %vm277_vm1, %v10573_v37  ;;  %951 = vmatprep.mubr.bf16.mxu0 %v13744_v0 }
  0xcc   : > { %1084 = vmatprep.mubr.bf16.mxu1 %v13744_v0 }
  0xd2   : > { %9843 = vmatmul.mubr.msk.bf16.gmra.mrb[92].mxu0 %vm277_vm1, %v10596_v42 }
  0xd3   : > { %9854 = vmatmul.mubr.msk.bf16.gmra.mrb[92].mxu1 %vm277_vm1, %v10596_v42  ;;  %961 = vmatprep.mubr.bf16.mxu0 %v13744_v0 }
  0xd4   : > { %1094 = vmatprep.mubr.bf16.mxu1 %v13744_v0 }
  0xda   : > { %9844 = vmatmul.mubr.msk.bf16.gmra.mrb[96].mxu0 %vm277_vm1, %v10619_v47 }
  0xdb   : > { %9855 = vmatmul.mubr.msk.bf16.gmra.mrb[96].mxu1 %vm277_vm1, %v10619_v47  ;;  %971 = vmatprep.mubr.bf16.mxu0 %v13744_v0 }
  0xdc   : > { %1104 = vmatprep.mubr.bf16.mxu1 %v13744_v0 }
  0xe2   : > { %9845 = vmatmul.mubr.msk.bf16.gmra.mrb[100].mxu0 %vm277_vm1, %v10642_v52 }
  0xe3   : > { %9856 = vmatmul.mubr.msk.bf16.gmra.mrb[100].mxu1 %vm277_vm1, %v10642_v52  ;;  %981 = vmatprep.mubr.bf16.mxu0 %v13744_v0 }
  0xe4   : > { %1114 = vmatprep.mubr.bf16.mxu1 %v13744_v0 }
  0xea   : > { %9846 = vmatmul.mubr.msk.bf16.gmra.mrb[104].mxu0 %vm277_vm1, %v10665_v57 }
  0xeb   : > { %9857 = vmatmul.mubr.msk.bf16.gmra.mrb[104].mxu1 %vm277_vm1, %v10665_v57  ;;  %991 = vmatprep.mubr.bf16.mxu0 %v13744_v0 }
  0xec   : > { %1124 = vmatprep.mubr.bf16.mxu1 %v13744_v0 }
  0xed   : > { %v391_v15 = vpop.f32.mrb[0].mxu0 }
  0xee   : > { %v1469_v16 = vadd.f32 %v10967_v12, %v391_v15  ;;  %v524_v17 = vpop.f32.mrb[0].mxu1  ;;  %v393_v19 = vpop.f32.mrb[1].mxu0 }
  0xef   : > { %v1471_v20 = vadd.f32 %v10967_v12, %v524_v17  ;;  %v1470_v21 = vadd.f32 %v10967_v12, %v393_v19  ;;  %v526_v22 = vpop.f32.mrb[1].mxu1  ;;  %v395_v23 = vpop.f32.mrb[2].mxu0 }
  0xf0   : > { %v1472_v24 = vadd.f32 %v10967_v12, %v526_v22  ;;  %v1485_v25 = vadd.f32 %v10974_v13, %v395_v23  ;;  %v528_v26 = vpop.f32.mrb[2].mxu1  ;;  %v397_v27 = vpop.f32.mrb[3].mxu0  ;;  %v1597_v32 = vmax.f32 %v1469_v16, 0.0 }
  0xf1   : > { %v1487_v29 = vadd.f32 %v10974_v13, %v528_v26  ;;  %v1486_v30 = vadd.f32 %v10974_v13, %v397_v27  ;;  %v530_v31 = vpop.f32.mrb[3].mxu1  ;;  %v1599_v35 = vmax.f32 %v1471_v20, 0.0  ;;  %v1598_v36 = vmax.f32 %v1470_v21, 0.0  ;;  %v11012_v16 = vpop.permute.xlu0 %1451 }
  0xf2   : > { %v1613_v33 = vmax.f32 %v1485_v25, 0.0  ;;  %v1488_v34 = vadd.f32 %v10974_v13, %v530_v31  ;;  %9847 = vmatmul.mubr.msk.bf16.gmra.mrb[108].mxu0 %vm277_vm1, %v10688_v62  ;;  %v1600_v40 = vmax.f32 %v1472_v24, 0.0  ;;  %v11017_v21 = vpop.permute.xlu1 %1456 }
  0xf3   : > { %v1615_v38 = vmax.f32 %v1487_v29, 0.0  ;;  %v1614_v39 = vmax.f32 %v1486_v30, 0.0  ;;  %9858 = vmatmul.mubr.msk.bf16.gmra.mrb[108].mxu1 %vm277_vm1, %v10688_v62  ;;  %1001 = vmatprep.mubr.bf16.mxu0 %v13744_v0 }
  0xf4   : > { %v10992_v41 = vpack.c.bf16 %v1613_v33, %v1597_v32  ;;  %v1616_v43 = vmax.f32 %v1488_v34, 0.0  ;;  %1134 = vmatprep.mubr.bf16.mxu1 %v13744_v0 }
  0xf5   : > { %v10997_v45 = vpack.c.bf16 %v1615_v38, %v1599_v35  ;;  %v401_v46 = vpop.f32.mrb[4].mxu0  ;;  %v1726_v48 = vpack.c.bf16 %v1614_v39, %v1598_v36 }
  0xf6   : > { %v1501_v49 = vadd.f32 %v10977_v14, %v401_v46  ;;  %v534_v50 = vpop.f32.mrb[4].mxu1  ;;  %v403_v51 = vpop.f32.mrb[5].mxu0  ;;  %v1728_v53 = vpack.c.bf16 %v1616_v43, %v1600_v40 }
  0xf7   : > { %v1503_v54 = vadd.f32 %v10977_v14, %v534_v50  ;;  %v1502_v55 = vadd.f32 %v10977_v14, %v403_v51  ;;  %v536_v56 = vpop.f32.mrb[5].mxu1  ;;  %v405_v58 = vpop.f32.mrb[6].mxu0  ;;  %1878 = vmatprep.subr.bf16.mxu0 %v1726_v48 }
  0xf8   : > { %v1504_v59 = vadd.f32 %v10977_v14, %v536_v56  ;;  %v1517_v60 = vadd.f32 %v10995_v44, %v405_v58  ;;  %v538_v61 = vpop.f32.mrb[6].mxu1  ;;  %1951 = vmatprep.subr.bf16.mxu1 %v1728_v53  ;;  %v407_v63 = vpop.f32.mrb[7].mxu0  ;;  %v1629_v5 = vmax.f32 %v1501_v49, 0.0 }
  0xf9   : > { %v1519_v1 = vadd.f32 %v10995_v44, %v538_v61  ;;  %v1518_v2 = vadd.f32 %v10995_v44, %v407_v63  ;;  %v540_v3 = vpop.f32.mrb[7].mxu1  ;;  %v1631_v8 = vmax.f32 %v1503_v54, 0.0  ;;  %v1630_v10 = vmax.f32 %v1502_v55, 0.0  ;;  %v11038_v55 = vpop.permute.xlu0 %1461 }
  0xfa   : > { %v1645_v6 = vmax.f32 %v1517_v60, 0.0  ;;  %v1520_v7 = vadd.f32 %v10995_v44, %v540_v3  ;;  %9848 = vmatmul.mubr.msk.bf16.gmra.mrb[112].mxu0 %vm277_vm1, %v10711_v4  ;;  %v1632_v17 = vmax.f32 %v1504_v59, 0.0  ;;  %v11041_v60 = vpop.permute.xlu1 %1466 }
  0xfb   : > { %v1647_v11 = vmax.f32 %v1519_v1, 0.0  ;;  %v1646_v15 = vmax.f32 %v1518_v2, 0.0  ;;  %9859 = vmatmul.mubr.msk.bf16.gmra.mrb[112].mxu1 %vm277_vm1, %v10711_v4  ;;  %1011 = vmatprep.mubr.bf16.mxu0 %v13744_v0 }
  0xfc   : > { %v11014_v19 = vpack.c.bf16 %v1645_v6, %v1629_v5  ;;  %v1648_v20 = vmax.f32 %v1520_v7, 0.0  ;;  %1144 = vmatprep.mubr.bf16.mxu1 %v13744_v0 }
  0xfd   : > { %v11019_v22 = vpack.c.bf16 %v1647_v11, %v1631_v8  ;;  %v411_v23 = vpop.f32.mrb[8].mxu0  ;;  %v11021_v24 = vpack.c.bf16 %v1646_v15, %v1630_v10 }
  0xfe   : > { %v1533_v25 = vadd.f32 %v11012_v16, %v411_v23  ;;  %v544_v26 = vpop.f32.mrb[8].mxu1  ;;  %v413_v27 = vpop.f32.mrb[9].mxu0  ;;  %v11024_v29 = vpack.c.bf16 %v1648_v20, %v1632_v17 }
  0xff   : > { %v1535_v30 = vadd.f32 %v11012_v16, %v544_v26  ;;  %v1534_v31 = vadd.f32 %v11012_v16, %v413_v27  ;;  %v546_v32 = vpop.f32.mrb[9].mxu1  ;;  %v415_v33 = vpop.f32.mrb[10].mxu0 }
 0x100   : > { %v1536_v34 = vadd.f32 %v11012_v16, %v546_v32  ;;  %v1549_v35 = vadd.f32 %v11017_v21, %v415_v33  ;;  %v548_v36 = vpop.f32.mrb[10].mxu1  ;;  %v417_v38 = vpop.f32.mrb[11].mxu0  ;;  %v1661_v46 = vmax.f32 %v1533_v25, 0.0 }
 0x101   : > { %v1551_v39 = vadd.f32 %v11017_v21, %v548_v36  ;;  %v1550_v40 = vadd.f32 %v11017_v21, %v417_v38  ;;  %v550_v43 = vpop.f32.mrb[11].mxu1  ;;  %v1663_v50 = vmax.f32 %v1535_v30, 0.0  ;;  %v1662_v51 = vmax.f32 %v1534_v31, 0.0  ;;  %v10448_v38 = vld [vmem:[%s13741_s1] sm:$0xff]  }
 0x102   : > { %v1677_v48 = vmax.f32 %v1549_v35, 0.0  ;;  %v1552_v49 = vadd.f32 %v11017_v21, %v550_v43  ;;  %9849 = vmatmul.mubr.msk.bf16.gmra.mrb[116].mxu0 %vm277_vm1, %v10734_v9  ;;  %v1664_v56 = vmax.f32 %v1536_v34, 0.0 }
 0x103   : > { %v1679_v53 = vmax.f32 %v1551_v39, 0.0  ;;  %v1678_v54 = vmax.f32 %v1550_v40, 0.0  ;;  %9860 = vmatmul.mubr.msk.bf16.gmra.mrb[116].mxu1 %vm277_vm1, %v10734_v9  ;;  %1187 = vmatprep.mubr.bf16.mxu0 %v13744_v0 }
 0x104   : > { %v1757_v58 = vpack.c.bf16 %v1677_v48, %v1661_v46  ;;  %v1680_v59 = vmax.f32 %v1552_v49, 0.0  ;;  %1320 = vmatprep.mubr.bf16.mxu1 %v13744_v0 }
 0x105   : > { %v1759_v61 = vpack.c.bf16 %v1679_v53, %v1663_v50  ;;  %v421_v63 = vpop.f32.mrb[12].mxu0  ;;  %v1758_v1 = vpack.c.bf16 %v1678_v54, %v1662_v51 }
 0x106   : > { %v1565_v2 = vadd.f32 %v11038_v55, %v421_v63  ;;  %v554_v3 = vpop.f32.mrb[12].mxu1  ;;  %v423_v5 = vpop.f32.mrb[13].mxu0  ;;  %v1760_v6 = vpack.c.bf16 %v1680_v59, %v1664_v56 }
 0x107   : > { %v1567_v7 = vadd.f32 %v11038_v55, %v554_v3  ;;  %v1566_v8 = vadd.f32 %v11038_v55, %v423_v5  ;;  %v556_v10 = vpop.f32.mrb[13].mxu1  ;;  %v425_v11 = vpop.f32.mrb[14].mxu0 }
 0x108   : > { %v1568_v15 = vadd.f32 %v11038_v55, %v556_v10  ;;  %v1581_v17 = vadd.f32 %v11041_v60, %v425_v11  ;;  %v558_v20 = vpop.f32.mrb[14].mxu1  ;;  %v427_v23 = vpop.f32.mrb[15].mxu0  ;;  %v1693_v30 = vmax.f32 %v1565_v2, 0.0 }
 0x109   : > { %v1583_v25 = vadd.f32 %v11041_v60, %v558_v20  ;;  %v1582_v26 = vadd.f32 %v11041_v60, %v427_v23  ;;  %v560_v27 = vpop.f32.mrb[15].mxu1  ;;  %v1695_v33 = vmax.f32 %v1567_v7, 0.0  ;;  %v1694_v34 = vmax.f32 %v1566_v8, 0.0 }
 0x10a   : > { %v1709_v31 = vmax.f32 %v1581_v17, 0.0  ;;  %v1584_v32 = vadd.f32 %v11041_v60, %v560_v27  ;;  %9862 = vmatmul.mubr.msk.bf16.vlgmr.msra.gmra.mrb[120].mxu0 %vm277_vm1, %v10518_v18  ;;  %v1696_v39 = vmax.f32 %v1568_v15, 0.0 }
 0x10b   : > { %v1711_v35 = vmax.f32 %v1583_v25, 0.0  ;;  %v1710_v36 = vmax.f32 %v1582_v26, 0.0  ;;  %9873 = vmatmul.mubr.msk.bf16.vlgmr.msra.gmra.mrb[120].mxu1 %vm277_vm1, %v10448_v38  ;;  %1879 = vmatpush1.bf16.msra.mxu0 %v10992_v41 }
 0x10c   : > { %v1773_v40 = vpack.c.bf16 %v1709_v31, %v1693_v30  ;;  %v1712_v43 = vmax.f32 %v1584_v32, 0.0  ;;  %1952 = vmatpush1.bf16.msra.mxu1 %v10997_v45  ;;  %1880 = vmatprep.subr.bf16.mxu0 %v11021_v24 }
 0x10d   : > { %v1775_v18 = vpack.c.bf16 %v1711_v35, %v1695_v33  ;;  %1953 = vmatprep.subr.bf16.mxu1 %v11024_v29  ;;  %1197 = vmatprep.mubr.bf16.mxu0 %v13744_v0  ;;  %v1774_v46 = vpack.c.bf16 %v1710_v36, %v1694_v34 }
 0x10e   : > { %1330 = vmatprep.mubr.bf16.mxu1 %v13744_v0  ;;  %v1776_v48 = vpack.c.bf16 %v1712_v43, %v1696_v39 }
 0x10f   : > { %1881 = vmatpush1.bf16.msra.mxu0 %v11014_v19 }
 0x110   : > { %1954 = vmatpush1.bf16.msra.mxu1 %v11019_v22  ;;  %1882 = vmatprep.subr.bf16.mxu0 %v1758_v1 }
 0x111   : > { %1955 = vmatprep.subr.bf16.mxu1 %v1760_v6 }
 0x112   : > { %9863 = vmatmul.mubr.msk.bf16.gmra.mrb[124].mxu0 %vm277_vm1, %v10546_v28 }
 0x113   : > { %9874 = vmatmul.mubr.msk.bf16.gmra.mrb[124].mxu1 %vm277_vm1, %v10546_v28  ;;  %1883 = vmatpush1.bf16.msra.mxu0 %v1757_v58 }
 0x114   : > { %1956 = vmatpush1.bf16.msra.mxu1 %v1759_v61  ;;  %1884 = vmatprep.subr.bf16.mxu0 %v1774_v46 }
 0x115   : > { %1957 = vmatprep.subr.bf16.mxu1 %v1776_v48  ;;  %1207 = vmatprep.mubr.bf16.mxu0 %v13744_v0 }
 0x116   : > { %1340 = vmatprep.mubr.bf16.mxu1 %v13744_v0 }
 0x117   : > { %1885 = vmatpush1.bf16.msra.mxu0 %v1773_v40 }
 0x118   : > { %1958 = vmatpush1.bf16.msra.mxu1 %v1775_v18 }
 0x11a   : > { %9864 = vmatmul.mubr.msk.bf16.gmra.mrb[128].mxu0 %vm277_vm1, %v10573_v37 }
 0x11b   : > { %9875 = vmatmul.mubr.msk.bf16.gmra.mrb[128].mxu1 %vm277_vm1, %v10573_v37  ;;  %1217 = vmatprep.mubr.bf16.mxu0 %v13744_v0 }
 0x11c   : > { %1350 = vmatprep.mubr.bf16.mxu1 %v13744_v0 }
 0x122   : > { %9865 = vmatmul.mubr.msk.bf16.gmra.mrb[132].mxu0 %vm277_vm1, %v10596_v42 }
 0x123   : > { %9876 = vmatmul.mubr.msk.bf16.gmra.mrb[132].mxu1 %vm277_vm1, %v10596_v42  ;;  %1227 = vmatprep.mubr.bf16.mxu0 %v13744_v0 }
 0x124   : > { %1360 = vmatprep.mubr.bf16.mxu1 %v13744_v0 }
 0x12a   : > { %9866 = vmatmul.mubr.msk.bf16.gmra.mrb[136].mxu0 %vm277_vm1, %v10619_v47 }
 0x12b   : > { %9877 = vmatmul.mubr.msk.bf16.gmra.mrb[136].mxu1 %vm277_vm1, %v10619_v47  ;;  %1237 = vmatprep.mubr.bf16.mxu0 %v13744_v0 }
 0x12c   : > { %1370 = vmatprep.mubr.bf16.mxu1 %v13744_v0 }
 0x132   : > { %9867 = vmatmul.mubr.msk.bf16.gmra.mrb[140].mxu0 %vm277_vm1, %v10642_v52 }
 0x133   : > { %9878 = vmatmul.mubr.msk.bf16.gmra.mrb[140].mxu1 %vm277_vm1, %v10642_v52  ;;  %1247 = vmatprep.mubr.bf16.mxu0 %v13744_v0 }
 0x134   : > { %1380 = vmatprep.mubr.bf16.mxu1 %v13744_v0 }
 0x13a   : > { %9868 = vmatmul.mubr.msk.bf16.gmra.mrb[144].mxu0 %vm277_vm1, %v10665_v57 }
 0x13b   : > { %9879 = vmatmul.mubr.msk.bf16.gmra.mrb[144].mxu1 %vm277_vm1, %v10665_v57  ;;  %1257 = vmatprep.mubr.bf16.mxu0 %v13744_v0 }
 0x13c   : > { %1390 = vmatprep.mubr.bf16.mxu1 %v13744_v0 }
 0x13d   : > { %v657_v28 = vpop.f32.mrb[40].mxu0 }
 0x13e   : > { %v1473_v37 = vadd.f32 %v10967_v12, %v657_v28  ;;  %v790_v42 = vpop.f32.mrb[40].mxu1  ;;  %v659_v47 = vpop.f32.mrb[41].mxu0 }
 0x13f   : > { %v1475_v52 = vadd.f32 %v10967_v12, %v790_v42  ;;  %v1474_v41 = vadd.f32 %v10967_v12, %v659_v47  ;;  %v792_v45 = vpop.f32.mrb[41].mxu1  ;;  %v661_v19 = vpop.f32.mrb[42].mxu0 }
 0x140   : > { %v1476_v22 = vadd.f32 %v10967_v12, %v792_v45  ;;  %v1489_v24 = vadd.f32 %v10974_v13, %v661_v19  ;;  %v794_v57 = vpop.f32.mrb[42].mxu1  ;;  %v663_v29 = vpop.f32.mrb[43].mxu0  ;;  %v1601_v53 = vmax.f32 %v1473_v37, 0.0 }
 0x141   : > { %v1491_v49 = vadd.f32 %v10974_v13, %v794_v57  ;;  %v1490_v50 = vadd.f32 %v10974_v13, %v663_v29  ;;  %v796_v51 = vpop.f32.mrb[43].mxu1  ;;  %v1603_v58 = vmax.f32 %v1475_v52, 0.0  ;;  %v1602_v59 = vmax.f32 %v1474_v41, 0.0 }
 0x142   : > { %v1617_v54 = vmax.f32 %v1489_v24, 0.0  ;;  %v1492_v56 = vadd.f32 %v10974_v13, %v796_v51  ;;  %9869 = vmatmul.mubr.msk.bf16.gmra.mrb[148].mxu0 %vm277_vm1, %v10688_v62  ;;  %v1604_v1 = vmax.f32 %v1476_v22, 0.0 }
 0x143   : > { %v1619_v61 = vmax.f32 %v1491_v49, 0.0  ;;  %v1618_v63 = vmax.f32 %v1490_v50, 0.0  ;;  %9880 = vmatmul.mubr.msk.bf16.gmra.mrb[148].mxu1 %vm277_vm1, %v10688_v62  ;;  %1267 = vmatprep.mubr.bf16.mxu0 %v13744_v0 }
 0x144   : > { %v11114_v2 = vpack.c.bf16 %v1617_v54, %v1601_v53  ;;  %v1620_v3 = vmax.f32 %v1492_v56, 0.0  ;;  %1400 = vmatprep.mubr.bf16.mxu1 %v13744_v0 }
 0x145   : > { %v11117_v5 = vpack.c.bf16 %v1619_v61, %v1603_v58  ;;  %v667_v6 = vpop.f32.mrb[44].mxu0  ;;  %v1730_v7 = vpack.c.bf16 %v1618_v63, %v1602_v59 }
 0x146   : > { %v1505_v8 = vadd.f32 %v10977_v14, %v667_v6  ;;  %v800_v10 = vpop.f32.mrb[44].mxu1  ;;  %v669_v11 = vpop.f32.mrb[45].mxu0  ;;  %v1732_v15 = vpack.c.bf16 %v1620_v3, %v1604_v1 }
 0x147   : > { %v1507_v17 = vadd.f32 %v10977_v14, %v800_v10  ;;  %v1506_v62 = vadd.f32 %v10977_v14, %v669_v11  ;;  %v802_v20 = vpop.f32.mrb[45].mxu1  ;;  %v671_v23 = vpop.f32.mrb[46].mxu0  ;;  %2024 = vmatprep.subr.bf16.mxu0 %v1730_v7 }
 0x148   : > { %v1508_v25 = vadd.f32 %v10977_v14, %v802_v20  ;;  %v1521_v26 = vadd.f32 %v10995_v44, %v671_v23  ;;  %v804_v27 = vpop.f32.mrb[46].mxu1  ;;  %2097 = vmatprep.subr.bf16.mxu1 %v1732_v15  ;;  %v673_v30 = vpop.f32.mrb[47].mxu0  ;;  %v1633_v34 = vmax.f32 %v1505_v8, 0.0  ;;  %v11157_v23 = vld [vmem:[%s13741_s1 + $0x50] sm:$0xff]  }
 0x149   : > { %v1523_v31 = vadd.f32 %v10995_v44, %v804_v27  ;;  %v1522_v32 = vadd.f32 %v10995_v44, %v673_v30  ;;  %v806_v33 = vpop.f32.mrb[47].mxu1  ;;  %v1635_v38 = vmax.f32 %v1507_v17, 0.0  ;;  %v1634_v39 = vmax.f32 %v1506_v62, 0.0 }
 0x14a   : > { %v1649_v35 = vmax.f32 %v1521_v26, 0.0  ;;  %v1524_v36 = vadd.f32 %v10995_v44, %v806_v33  ;;  %9870 = vmatmul.mubr.msk.bf16.gmra.mrb[152].mxu0 %vm277_vm1, %v10711_v4  ;;  %v1636_v18 = vmax.f32 %v1508_v25, 0.0 }
 0x14b   : > { %v1651_v40 = vmax.f32 %v1523_v31, 0.0  ;;  %v1650_v43 = vmax.f32 %v1522_v32, 0.0  ;;  %9881 = vmatmul.mubr.msk.bf16.gmra.mrb[152].mxu1 %vm277_vm1, %v10711_v4  ;;  %1277 = vmatprep.mubr.bf16.mxu0 %v13744_v0 }
 0x14c   : > { %v11132_v46 = vpack.c.bf16 %v1649_v35, %v1633_v34  ;;  %v1652_v48 = vmax.f32 %v1524_v36, 0.0  ;;  %1410 = vmatprep.mubr.bf16.mxu1 %v13744_v0 }
 0x14d   : > { %v11135_v28 = vpack.c.bf16 %v1651_v40, %v1635_v38  ;;  %v677_v37 = vpop.f32.mrb[48].mxu0  ;;  %v11137_v42 = vpack.c.bf16 %v1650_v43, %v1634_v39 }
 0x14e   : > { %v1537_v47 = vadd.f32 %v11012_v16, %v677_v37  ;;  %v810_v52 = vpop.f32.mrb[48].mxu1  ;;  %v679_v41 = vpop.f32.mrb[49].mxu0  ;;  %v1748_v45 = vpack.c.bf16 %v1652_v48, %v1636_v18 }
 0x14f   : > { %v1539_v4 = vadd.f32 %v11012_v16, %v810_v52  ;;  %v1538_v19 = vadd.f32 %v11012_v16, %v679_v41  ;;  %v812_v22 = vpop.f32.mrb[49].mxu1  ;;  %v681_v24 = vpop.f32.mrb[50].mxu0 }
 0x150   : > { %v1540_v57 = vadd.f32 %v11012_v16, %v812_v22  ;;  %v1553_v29 = vadd.f32 %v11017_v21, %v681_v24  ;;  %v814_v49 = vpop.f32.mrb[50].mxu1  ;;  %v683_v50 = vpop.f32.mrb[51].mxu0  ;;  %v1665_v56 = vmax.f32 %v1537_v47, 0.0  ;;  %v11178_v24 = vld [vmem:[%s13741_s1 + $0x58] sm:$0xff]  }
 0x151   : > { %v1555_v51 = vadd.f32 %v11017_v21, %v814_v49  ;;  %v1554_v53 = vadd.f32 %v11017_v21, %v683_v50  ;;  %v816_v54 = vpop.f32.mrb[51].mxu1  ;;  %v1667_v61 = vmax.f32 %v1539_v4, 0.0  ;;  %v1666_v63 = vmax.f32 %v1538_v19, 0.0 }
 0x152   : > { %v1681_v58 = vmax.f32 %v1553_v29, 0.0  ;;  %v1556_v59 = vadd.f32 %v11017_v21, %v816_v54  ;;  %9871 = vmatmul.mubr.msk.bf16.gmra.mrb[156].mxu0 %vm277_vm1, %v10734_v9  ;;  %v1668_v6 = vmax.f32 %v1540_v57, 0.0 }
 0x153   : > { %v1683_v1 = vmax.f32 %v1555_v51, 0.0  ;;  %v1682_v3 = vmax.f32 %v1554_v53, 0.0  ;;  %9882 = vmatmul.mubr.msk.bf16.gmra.mrb[156].mxu1 %vm277_vm1, %v10734_v9  ;;  %1910 = vmatprep.mubr.bf16.mxu0 %v13744_v0 }
 0x154   : > { %v1761_v7 = vpack.c.bf16 %v1681_v58, %v1665_v56  ;;  %v1684_v8 = vmax.f32 %v1556_v59, 0.0  ;;  %1983 = vmatprep.mubr.bf16.mxu1 %v13744_v0 }
 0x155   : > { %v1763_v10 = vpack.c.bf16 %v1683_v1, %v1667_v61  ;;  %v687_v11 = vpop.f32.mrb[52].mxu0  ;;  %v1762_v15 = vpack.c.bf16 %v1682_v3, %v1666_v63 }
 0x156   : > { %v1569_v17 = vadd.f32 %v11038_v55, %v687_v11  ;;  %v820_v62 = vpop.f32.mrb[52].mxu1  ;;  %v689_v20 = vpop.f32.mrb[53].mxu0  ;;  %v1764_v9 = vpack.c.bf16 %v1684_v8, %v1668_v6 }
 0x157   : > { %v1571_v25 = vadd.f32 %v11038_v55, %v820_v62  ;;  %v1570_v26 = vadd.f32 %v11038_v55, %v689_v20  ;;  %v822_v27 = vpop.f32.mrb[53].mxu1  ;;  %v691_v30 = vpop.f32.mrb[54].mxu0 }
 0x158   : > { %v1572_v31 = vadd.f32 %v11038_v55, %v822_v27  ;;  %v1585_v32 = vadd.f32 %v11041_v60, %v691_v30  ;;  %v824_v33 = vpop.f32.mrb[54].mxu1  ;;  %v693_v34 = vpop.f32.mrb[55].mxu0  ;;  %v1697_v39 = vmax.f32 %v1569_v17, 0.0 }
 0x159   : > { %v1587_v35 = vadd.f32 %v11041_v60, %v824_v33  ;;  %v1586_v36 = vadd.f32 %v11041_v60, %v693_v34  ;;  %v826_v38 = vpop.f32.mrb[55].mxu1  ;;  %v1699_v18 = vmax.f32 %v1571_v25, 0.0  ;;  %v1698_v48 = vmax.f32 %v1570_v26, 0.0 }
 0x15a   : > { %v1713_v40 = vmax.f32 %v1585_v32, 0.0  ;;  %v1588_v43 = vadd.f32 %v11041_v60, %v826_v38  ;;  %9887 = vmatmul.mubr.msk.bf16.vlgmr.msra.gmra.mrb[160].mxu0 %vm1865_vm2, %v11157_v23  ;;  %v1700_v52 = vmax.f32 %v1572_v31, 0.0 }
 0x15b   : > { %v1715_v37 = vmax.f32 %v1587_v35, 0.0  ;;  %v1714_v47 = vmax.f32 %v1586_v36, 0.0  ;;  %9891 = vmatmul.mubr.msk.bf16.vlgmr.msra.gmra.mrb[160].mxu1 %vm1865_vm2, %v11157_v23  ;;  %2025 = vmatpush1.bf16.msra.mxu0 %v11114_v2 }
 0x15c   : > { %v1777_v41 = vpack.c.bf16 %v1713_v40, %v1697_v39  ;;  %v1716_v4 = vmax.f32 %v1588_v43, 0.0  ;;  %2098 = vmatpush1.bf16.msra.mxu1 %v11117_v5  ;;  %2026 = vmatprep.subr.bf16.mxu0 %v11137_v42  ;;  %v11191_v5 = vld [vmem:[%s13741_s1 + $0x60] sm:$0xff]  }
 0x15d   : > { %v1779_v19 = vpack.c.bf16 %v1715_v37, %v1699_v18  ;;  %2099 = vmatprep.subr.bf16.mxu1 %v1748_v45  ;;  %1920 = vmatprep.mubr.bf16.mxu0 %v13744_v0  ;;  %v1778_v22 = vpack.c.bf16 %v1714_v47, %v1698_v48 }
 0x15e   : > { %1993 = vmatprep.mubr.bf16.mxu1 %v13744_v0  ;;  %v1780_v2 = vpack.c.bf16 %v1716_v4, %v1700_v52 }
 0x15f   : > { %2027 = vmatpush1.bf16.msra.mxu0 %v11132_v46  ;;  %v11202_v46 = vld [vmem:[%s13741_s1 + $0x68] sm:$0xff]  }
 0x160   : > { %2100 = vmatpush1.bf16.msra.mxu1 %v11135_v28  ;;  %2028 = vmatprep.subr.bf16.mxu0 %v1762_v15 }
 0x161   : > { %2101 = vmatprep.subr.bf16.mxu1 %v1764_v9 }
 0x162   : > { %9888 = vmatmul.mubr.msk.bf16.gmra.mrb[164].mxu0 %vm1865_vm2, %v11178_v24 }
 0x163   : > { %9892 = vmatmul.mubr.msk.bf16.gmra.mrb[164].mxu1 %vm1865_vm2, %v11178_v24  ;;  %2029 = vmatpush1.bf16.msra.mxu0 %v1761_v7 }
 0x164   : > { %2102 = vmatpush1.bf16.msra.mxu1 %v1763_v10  ;;  %2030 = vmatprep.subr.bf16.mxu0 %v1778_v22 }
 0x165   : > { %2103 = vmatprep.subr.bf16.mxu1 %v1780_v2  ;;  %1930 = vmatprep.mubr.bf16.mxu0 %v13744_v0 }
 0x166   : > { %2003 = vmatprep.mubr.bf16.mxu1 %v13744_v0 }
 0x167   : > { %2031 = vmatpush1.bf16.msra.mxu0 %v1777_v41 }
 0x168   : > { %2104 = vmatpush1.bf16.msra.mxu1 %v1779_v19 }
 0x16a   : > { %9889 = vmatmul.mubr.msk.bf16.gmra.mrb[168].mxu0 %vm1865_vm2, %v11191_v5 }
 0x16b   : > { %9893 = vmatmul.mubr.msk.bf16.gmra.mrb[168].mxu1 %vm1865_vm2, %v11191_v5  ;;  %1940 = vmatprep.mubr.bf16.mxu0 %v13744_v0 }
 0x16c   : > { %2013 = vmatprep.mubr.bf16.mxu1 %v13744_v0 }
 0x172   : > { %9890 = vmatmul.mubr.msk.bf16.gmra.mrb[172].mxu0 %vm1865_vm2, %v11202_v46 }
 0x173   : > { %9894 = vmatmul.mubr.msk.bf16.gmra.mrb[172].mxu1 %vm1865_vm2, %v11202_v46  ;;  %2056 = vmatprep.mubr.bf16.mxu0 %v13744_v0 }
 0x174   : > { %2129 = vmatprep.mubr.bf16.mxu1 %v13744_v0 }
 0x17a   : > { %9895 = vmatmul.mubr.msk.bf16.vlgmr.msra.gmra.mrb[176].mxu0 %vm1865_vm2, %v11157_v23 }
 0x17b   : > { %9899 = vmatmul.mubr.msk.bf16.vlgmr.msra.gmra.mrb[176].mxu1 %vm1865_vm2, %v11157_v23  ;;  %2066 = vmatprep.mubr.bf16.mxu0 %v13744_v0 }
 0x17c   : > { %2139 = vmatprep.mubr.bf16.mxu1 %v13744_v0 }
 0x182   : > { %9896 = vmatmul.mubr.msk.bf16.gmra.mrb[180].mxu0 %vm1865_vm2, %v11178_v24 }
 0x183   : > { %9900 = vmatmul.mubr.msk.bf16.gmra.mrb[180].mxu1 %vm1865_vm2, %v11178_v24  ;;  %2076 = vmatprep.mubr.bf16.mxu0 %v13744_v0 }
 0x184   : > { %2149 = vmatprep.mubr.bf16.mxu1 %v13744_v0 }
 0x18a   : > { %9897 = vmatmul.mubr.msk.bf16.gmra.mrb[184].mxu0 %vm1865_vm2, %v11191_v5 }
 0x18b   : > { %9901 = vmatmul.mubr.msk.bf16.gmra.mrb[184].mxu1 %vm1865_vm2, %v11191_v5  ;;  %2086 = vmatprep.mubr.bf16.mxu0 %v13744_v0 }
 0x18c   : > { %2159 = vmatprep.mubr.bf16.mxu1 %v13744_v0 }
 0x18d   : > { %v923_v28 = vpop.f32.mrb[80].mxu0 }
 0x18e   : > { %v1477_v42 = vadd.f32 %v10967_v12, %v923_v28  ;;  %v1056_v45 = vpop.f32.mrb[80].mxu1  ;;  %v925_v57 = vpop.f32.mrb[81].mxu0 }
 0x18f   : > { %v1479_v29 = vadd.f32 %v10967_v12, %v1056_v45  ;;  %v1478_v49 = vadd.f32 %v10967_v12, %v925_v57  ;;  %v1058_v50 = vpop.f32.mrb[81].mxu1  ;;  %v927_v51 = vpop.f32.mrb[82].mxu0 }
 0x190   : > { %v1480_v53 = vadd.f32 %v10967_v12, %v1058_v50  ;;  %v1493_v54 = vadd.f32 %v10974_v13, %v927_v51  ;;  %v1060_v56 = vpop.f32.mrb[82].mxu1  ;;  %v929_v58 = vpop.f32.mrb[83].mxu0  ;;  %v1605_v1 = vmax.f32 %v1477_v42, 0.0 }
 0x191   : > { %v1495_v59 = vadd.f32 %v10974_v13, %v1060_v56  ;;  %v1494_v61 = vadd.f32 %v10974_v13, %v929_v58  ;;  %v1062_v63 = vpop.f32.mrb[83].mxu1  ;;  %v1607_v7 = vmax.f32 %v1479_v29, 0.0  ;;  %v1606_v8 = vmax.f32 %v1478_v49, 0.0 }
 0x192   : > { %v1621_v3 = vmax.f32 %v1493_v54, 0.0  ;;  %v1496_v6 = vadd.f32 %v10974_v13, %v1062_v63  ;;  %9898 = vmatmul.mubr.msk.bf16.gmra.mrb[188].mxu0 %vm1865_vm2, %v11202_v46  ;;  %v1608_v15 = vmax.f32 %v1480_v53, 0.0 }
 0x193   : > { %v1623_v10 = vmax.f32 %v1495_v59, 0.0  ;;  %v1622_v11 = vmax.f32 %v1494_v61, 0.0  ;;  %9902 = vmatmul.mubr.msk.bf16.gmra.mrb[188].mxu1 %vm1865_vm2, %v11202_v46  ;;  %2202 = vmatprep.mubr.bf16.mxu0 %v13744_v0 }
 0x194   : > { %v1733_v17 = vpack.c.bf16 %v1621_v3, %v1605_v1  ;;  %v1624_v62 = vmax.f32 %v1496_v6, 0.0  ;;  %2275 = vmatprep.mubr.bf16.mxu1 %v13744_v0 }
 0x195   : > { %v1735_v20 = vpack.c.bf16 %v1623_v10, %v1607_v7  ;;  %v933_v9 = vpop.f32.mrb[84].mxu0  ;;  %v1734_v25 = vpack.c.bf16 %v1622_v11, %v1606_v8 }
 0x196   : > { %v1509_v26 = vadd.f32 %v10977_v14, %v933_v9  ;;  %v1066_v27 = vpop.f32.mrb[84].mxu1  ;;  %v935_v30 = vpop.f32.mrb[85].mxu0  ;;  %v1736_v31 = vpack.c.bf16 %v1624_v62, %v1608_v15 }
 0x197   : > { %v1511_v32 = vadd.f32 %v10977_v14, %v1066_v27  ;;  %v1510_v33 = vadd.f32 %v10977_v14, %v935_v30  ;;  %v1068_v34 = vpop.f32.mrb[85].mxu1  ;;  %v937_v35 = vpop.f32.mrb[86].mxu0  ;;  %2170 = vmatprep.subr.bf16.mxu0 %v1734_v25 }
 0x198   : > { %v1512_v36 = vadd.f32 %v10977_v14, %v1068_v34  ;;  %v1525_v38 = vadd.f32 %v10995_v44, %v937_v35  ;;  %v1070_v39 = vpop.f32.mrb[86].mxu1  ;;  %2243 = vmatprep.subr.bf16.mxu1 %v1736_v31  ;;  %v939_v40 = vpop.f32.mrb[87].mxu0  ;;  %2171 = vmatpush1.bf16.msra.mxu0 %v1733_v17  ;;  %v1637_v37 = vmax.f32 %v1509_v26, 0.0 }
 0x199   : > { %v1527_v43 = vadd.f32 %v10995_v44, %v1070_v39  ;;  %v1526_v18 = vadd.f32 %v10995_v44, %v939_v40  ;;  %v1072_v48 = vpop.f32.mrb[87].mxu1  ;;  %2244 = vmatpush1.bf16.msra.mxu1 %v1735_v20  ;;  %v1639_v41 = vmax.f32 %v1511_v32, 0.0  ;;  %v1638_v4 = vmax.f32 %v1510_v33, 0.0 }
 0x19a   : > { %v1653_v47 = vmax.f32 %v1525_v38, 0.0  ;;  %v1528_v52 = vadd.f32 %v10995_v44, %v1072_v48  ;;  %v1640_v2 = vmax.f32 %v1512_v36, 0.0 }
 0x19b   : > { %v1655_v19 = vmax.f32 %v1527_v43, 0.0  ;;  %v1654_v22 = vmax.f32 %v1526_v18, 0.0 }
 0x19c   : > { %v1749_v28 = vpack.c.bf16 %v1653_v47, %v1637_v37  ;;  %v1656_v42 = vmax.f32 %v1528_v52, 0.0 }
 0x19d   : > { %v1751_v45 = vpack.c.bf16 %v1655_v19, %v1639_v41  ;;  %v943_v57 = vpop.f32.mrb[88].mxu0  ;;  %v1750_v29 = vpack.c.bf16 %v1654_v22, %v1638_v4 }
 0x19e   : > { %v1541_v49 = vadd.f32 %v11012_v16, %v943_v57  ;;  %v1076_v50 = vpop.f32.mrb[88].mxu1  ;;  %v945_v51 = vpop.f32.mrb[89].mxu0  ;;  %v1752_v53 = vpack.c.bf16 %v1656_v42, %v1640_v2 }
 0x19f   : > { %v1543_v54 = vadd.f32 %v11012_v16, %v1076_v50  ;;  %v1542_v56 = vadd.f32 %v11012_v16, %v945_v51  ;;  %v1078_v58 = vpop.f32.mrb[89].mxu1  ;;  %v947_v59 = vpop.f32.mrb[90].mxu0  ;;  %2172 = vmatprep.subr.bf16.mxu0 %v1750_v29 }
 0x1a0   : > { %v1544_v61 = vadd.f32 %v11012_v16, %v1078_v58  ;;  %v1557_v63 = vadd.f32 %v11017_v21, %v947_v59  ;;  %v1080_v1 = vpop.f32.mrb[90].mxu1  ;;  %2245 = vmatprep.subr.bf16.mxu1 %v1752_v53  ;;  %v949_v3 = vpop.f32.mrb[91].mxu0  ;;  %2173 = vmatpush1.bf16.msra.mxu0 %v1749_v28  ;;  %v1669_v10 = vmax.f32 %v1541_v49, 0.0 }
 0x1a1   : > { %v1559_v6 = vadd.f32 %v11017_v21, %v1080_v1  ;;  %v1558_v7 = vadd.f32 %v11017_v21, %v949_v3  ;;  %v1082_v8 = vpop.f32.mrb[91].mxu1  ;;  %2246 = vmatpush1.bf16.msra.mxu1 %v1751_v45  ;;  %v1671_v17 = vmax.f32 %v1543_v54, 0.0  ;;  %v1670_v62 = vmax.f32 %v1542_v56, 0.0 }
 0x1a2   : > { %v1685_v11 = vmax.f32 %v1557_v63, 0.0  ;;  %v1560_v15 = vadd.f32 %v11017_v21, %v1082_v8  ;;  %v1672_v25 = vmax.f32 %v1544_v61, 0.0 }
 0x1a3   : > { %v1687_v20 = vmax.f32 %v1559_v6, 0.0  ;;  %v1686_v9 = vmax.f32 %v1558_v7, 0.0 }
 0x1a4   : > { %v1765_v26 = vpack.c.bf16 %v1685_v11, %v1669_v10  ;;  %v1688_v27 = vmax.f32 %v1560_v15, 0.0 }
 0x1a5   : > { %v1767_v30 = vpack.c.bf16 %v1687_v20, %v1671_v17  ;;  %v953_v31 = vpop.f32.mrb[92].mxu0  ;;  %v1766_v32 = vpack.c.bf16 %v1686_v9, %v1670_v62 }
 0x1a6   : > { %v1573_v33 = vadd.f32 %v11038_v55, %v953_v31  ;;  %v1086_v34 = vpop.f32.mrb[92].mxu1  ;;  %v955_v35 = vpop.f32.mrb[93].mxu0  ;;  %v1768_v36 = vpack.c.bf16 %v1688_v27, %v1672_v25 }
 0x1a7   : > { %v1575_v38 = vadd.f32 %v11038_v55, %v1086_v34  ;;  %v1574_v39 = vadd.f32 %v11038_v55, %v955_v35  ;;  %v1088_v40 = vpop.f32.mrb[93].mxu1  ;;  %v957_v43 = vpop.f32.mrb[94].mxu0  ;;  %2174 = vmatprep.subr.bf16.mxu0 %v1766_v32 }
 0x1a8   : > { %v1576_v18 = vadd.f32 %v11038_v55, %v1088_v40  ;;  %v1589_v48 = vadd.f32 %v11041_v60, %v957_v43  ;;  %v1090_v37 = vpop.f32.mrb[94].mxu1  ;;  %2247 = vmatprep.subr.bf16.mxu1 %v1768_v36  ;;  %v959_v47 = vpop.f32.mrb[95].mxu0  ;;  %2175 = vmatpush1.bf16.msra.mxu0 %v1765_v26  ;;  %v1701_v19 = vmax.f32 %v1573_v33, 0.0 }
 0x1a9   : > { %v1591_v52 = vadd.f32 %v11041_v60, %v1090_v37  ;;  %v1590_v41 = vadd.f32 %v11041_v60, %v959_v47  ;;  %v1092_v4 = vpop.f32.mrb[95].mxu1  ;;  %2248 = vmatpush1.bf16.msra.mxu1 %v1767_v30  ;;  %v1703_v28 = vmax.f32 %v1575_v38, 0.0  ;;  %v1702_v42 = vmax.f32 %v1574_v39, 0.0 }
 0x1aa   : > { %v1717_v22 = vmax.f32 %v1589_v48, 0.0  ;;  %v1592_v2 = vadd.f32 %v11041_v60, %v1092_v4  ;;  %v1704_v29 = vmax.f32 %v1576_v18, 0.0 }
 0x1ab   : > { %v1719_v45 = vmax.f32 %v1591_v52, 0.0  ;;  %v1718_v57 = vmax.f32 %v1590_v41, 0.0 }
 0x1ac   : > { %v1781_v49 = vpack.c.bf16 %v1717_v22, %v1701_v19  ;;  %v1720_v50 = vmax.f32 %v1592_v2, 0.0 }
 0x1ad   : > { %v1783_v51 = vpack.c.bf16 %v1719_v45, %v1703_v28  ;;  %v1782_v53 = vpack.c.bf16 %v1718_v57, %v1702_v42 }
 0x1ae   : > { %v1784_v54 = vpack.c.bf16 %v1720_v50, %v1704_v29 }
 0x1af   : > { %2176 = vmatprep.subr.bf16.mxu0 %v1782_v53 }
 0x1b0   : > { %2249 = vmatprep.subr.bf16.mxu1 %v1784_v54  ;;  %2177 = vmatpush1.bf16.msra.mxu0 %v1781_v49 }
 0x1b1   : > { %2250 = vmatpush1.bf16.msra.mxu1 %v1783_v51 }
 0x1b3   : > { %9903 = vmatmul.mubr.msk.bf16.vlgmr.msra.gmra.mrb[192].mxu0 %vm1865_vm2, %v11157_v23 }
 0x1b4   : > { %9907 = vmatmul.mubr.msk.bf16.vlgmr.msra.gmra.mrb[192].mxu1 %vm1865_vm2, %v11157_v23  ;;  %2212 = vmatprep.mubr.bf16.mxu0 %v13744_v0 }
 0x1b5   : > { %2285 = vmatprep.mubr.bf16.mxu1 %v13744_v0 }
 0x1bb   : > { %9904 = vmatmul.mubr.msk.bf16.gmra.mrb[196].mxu0 %vm1865_vm2, %v11178_v24 }
 0x1bc   : > { %9908 = vmatmul.mubr.msk.bf16.gmra.mrb[196].mxu1 %vm1865_vm2, %v11178_v24  ;;  %2222 = vmatprep.mubr.bf16.mxu0 %v13744_v0 }
 0x1bd   : > { %2295 = vmatprep.mubr.bf16.mxu1 %v13744_v0 }
 0x1c3   : > { %9905 = vmatmul.mubr.msk.bf16.gmra.mrb[200].mxu0 %vm1865_vm2, %v11191_v5 }
 0x1c4   : > { %9909 = vmatmul.mubr.msk.bf16.gmra.mrb[200].mxu1 %vm1865_vm2, %v11191_v5  ;;  %2232 = vmatprep.mubr.bf16.mxu0 %v13744_v0 }
 0x1c5   : > { %2305 = vmatprep.mubr.bf16.mxu1 %v13744_v0 }
 0x1cb   : > { %9906 = vmatmul.mubr.msk.bf16.gmra.mrb[204].mxu0 %vm1865_vm2, %v11202_v46 }
 0x1cc   : > { %9910 = vmatmul.mubr.msk.bf16.gmra.mrb[204].mxu1 %vm1865_vm2, %v11202_v46  ;;  %2348 = vmatprep.mubr.bf16.mxu0 %v13744_v0 }
 0x1cd   : > { %2421 = vmatprep.mubr.bf16.mxu1 %v13744_v0 }
 0x1dd   : > { %v1189_v56 = vpop.f32.mrb[120].mxu0 }
 0x1de   : > { %v1481_v58 = vadd.f32 %v10967_v12, %v1189_v56  ;;  %v1322_v59 = vpop.f32.mrb[120].mxu1  ;;  %v1191_v61 = vpop.f32.mrb[121].mxu0 }
 0x1df   : > { %v1483_v63 = vadd.f32 %v10967_v12, %v1322_v59  ;;  %v1482_v1 = vadd.f32 %v10967_v12, %v1191_v61  ;;  %v1324_v3 = vpop.f32.mrb[121].mxu1  ;;  %v1193_v6 = vpop.f32.mrb[122].mxu0 }
 0x1e0   : > { %v1484_v7 = vadd.f32 %v10967_v12, %v1324_v3  ;;  %v1497_v8 = vadd.f32 %v10974_v13, %v1193_v6  ;;  %v1326_v10 = vpop.f32.mrb[122].mxu1  ;;  %v1195_v11 = vpop.f32.mrb[123].mxu0  ;;  %v1609_v20 = vmax.f32 %v1481_v58, 0.0 }
 0x1e1   : > { %v1499_v15 = vadd.f32 %v10974_v13, %v1326_v10  ;;  %v1498_v17 = vadd.f32 %v10974_v13, %v1195_v11  ;;  %v1328_v62 = vpop.f32.mrb[123].mxu1  ;;  %v1611_v26 = vmax.f32 %v1483_v63, 0.0  ;;  %v1610_v27 = vmax.f32 %v1482_v1, 0.0 }
 0x1e2   : > { %v1625_v9 = vmax.f32 %v1497_v8, 0.0  ;;  %v1500_v25 = vadd.f32 %v10974_v13, %v1328_v62  ;;  %v1612_v32 = vmax.f32 %v1484_v7, 0.0 }
 0x1e3   : > { %v1627_v30 = vmax.f32 %v1499_v15, 0.0  ;;  %v1626_v31 = vmax.f32 %v1498_v17, 0.0 }
 0x1e4   : > { %v1737_v33 = vpack.c.bf16 %v1625_v9, %v1609_v20  ;;  %v1628_v12 = vmax.f32 %v1500_v25, 0.0 }
 0x1e5   : > { %v1739_v34 = vpack.c.bf16 %v1627_v30, %v1611_v26  ;;  %v1199_v35 = vpop.f32.mrb[124].mxu0  ;;  %v1738_v36 = vpack.c.bf16 %v1626_v31, %v1610_v27 }
 0x1e6   : > { %v1513_v38 = vadd.f32 %v10977_v14, %v1199_v35  ;;  %v1332_v39 = vpop.f32.mrb[124].mxu1  ;;  %v1201_v40 = vpop.f32.mrb[125].mxu0  ;;  %v1740_v43 = vpack.c.bf16 %v1628_v12, %v1612_v32 }
 0x1e7   : > { %v1515_v18 = vadd.f32 %v10977_v14, %v1332_v39  ;;  %v1514_v48 = vadd.f32 %v10977_v14, %v1201_v40  ;;  %v1334_v13 = vpop.f32.mrb[125].mxu1  ;;  %v1203_v37 = vpop.f32.mrb[126].mxu0  ;;  %2316 = vmatprep.subr.bf16.mxu0 %v1738_v36 }
 0x1e8   : > { %v1516_v47 = vadd.f32 %v10977_v14, %v1334_v13  ;;  %v1529_v52 = vadd.f32 %v10995_v44, %v1203_v37  ;;  %v1336_v41 = vpop.f32.mrb[126].mxu1  ;;  %2389 = vmatprep.subr.bf16.mxu1 %v1740_v43  ;;  %v1205_v4 = vpop.f32.mrb[127].mxu0  ;;  %2317 = vmatpush1.bf16.msra.mxu0 %v1737_v33  ;;  %v1641_v28 = vmax.f32 %v1513_v38, 0.0 }
 0x1e9   : > { %v1531_v19 = vadd.f32 %v10995_v44, %v1336_v41  ;;  %v1530_v22 = vadd.f32 %v10995_v44, %v1205_v4  ;;  %v1338_v2 = vpop.f32.mrb[127].mxu1  ;;  %2390 = vmatpush1.bf16.msra.mxu1 %v1739_v34  ;;  %v1643_v57 = vmax.f32 %v1515_v18, 0.0  ;;  %v1642_v29 = vmax.f32 %v1514_v48, 0.0 }
 0x1ea   : > { %v1657_v42 = vmax.f32 %v1529_v52, 0.0  ;;  %v1532_v45 = vadd.f32 %v10995_v44, %v1338_v2  ;;  %v1644_v50 = vmax.f32 %v1516_v47, 0.0 }
 0x1eb   : > { %v1659_v49 = vmax.f32 %v1531_v19, 0.0  ;;  %v1658_v14 = vmax.f32 %v1530_v22, 0.0 }
 0x1ec   : > { %v1753_v51 = vpack.c.bf16 %v1657_v42, %v1641_v28  ;;  %v1660_v53 = vmax.f32 %v1532_v45, 0.0 }
 0x1ed   : > { %v1755_v54 = vpack.c.bf16 %v1659_v49, %v1643_v57  ;;  %v1209_v56 = vpop.f32.mrb[128].mxu0  ;;  %v1754_v58 = vpack.c.bf16 %v1658_v14, %v1642_v29 }
 0x1ee   : > { %v1545_v59 = vadd.f32 %v11012_v16, %v1209_v56  ;;  %v1342_v61 = vpop.f32.mrb[128].mxu1  ;;  %v1211_v63 = vpop.f32.mrb[129].mxu0  ;;  %v1756_v1 = vpack.c.bf16 %v1660_v53, %v1644_v50 }
 0x1ef   : > { %v1547_v3 = vadd.f32 %v11012_v16, %v1342_v61  ;;  %v1546_v6 = vadd.f32 %v11012_v16, %v1211_v63  ;;  %v1344_v44 = vpop.f32.mrb[129].mxu1  ;;  %v1213_v7 = vpop.f32.mrb[130].mxu0  ;;  %2318 = vmatprep.subr.bf16.mxu0 %v1754_v58 }
 0x1f0   : > { %v1548_v8 = vadd.f32 %v11012_v16, %v1344_v44  ;;  %v1561_v10 = vadd.f32 %v11017_v21, %v1213_v7  ;;  %v1346_v11 = vpop.f32.mrb[130].mxu1  ;;  %2391 = vmatprep.subr.bf16.mxu1 %v1756_v1  ;;  %v1215_v15 = vpop.f32.mrb[131].mxu0  ;;  %2319 = vmatpush1.bf16.msra.mxu0 %v1753_v51  ;;  %v1673_v9 = vmax.f32 %v1545_v59, 0.0 }
 0x1f1   : > { %v1563_v17 = vadd.f32 %v11017_v21, %v1346_v11  ;;  %v1562_v62 = vadd.f32 %v11017_v21, %v1215_v15  ;;  %v1348_v20 = vpop.f32.mrb[131].mxu1  ;;  %2392 = vmatpush1.bf16.msra.mxu1 %v1755_v54  ;;  %v1675_v27 = vmax.f32 %v1547_v3, 0.0  ;;  %v1674_v30 = vmax.f32 %v1546_v6, 0.0 }
 0x1f2   : > { %v1689_v25 = vmax.f32 %v1561_v10, 0.0  ;;  %v1564_v26 = vadd.f32 %v11017_v21, %v1348_v20  ;;  %v1676_v32 = vmax.f32 %v1548_v8, 0.0 }
 0x1f3   : > { %v1691_v31 = vmax.f32 %v1563_v17, 0.0  ;;  %v1690_v16 = vmax.f32 %v1562_v62, 0.0 }
 0x1f4   : > { %v1769_v33 = vpack.c.bf16 %v1689_v25, %v1673_v9  ;;  %v1692_v12 = vmax.f32 %v1564_v26, 0.0 }
 0x1f5   : > { %v1771_v34 = vpack.c.bf16 %v1691_v31, %v1675_v27  ;;  %v1219_v35 = vpop.f32.mrb[132].mxu0  ;;  %v1770_v36 = vpack.c.bf16 %v1690_v16, %v1674_v30 }
 0x1f6   : > { %v1577_v38 = vadd.f32 %v11038_v55, %v1219_v35  ;;  %v1352_v39 = vpop.f32.mrb[132].mxu1  ;;  %v1221_v40 = vpop.f32.mrb[133].mxu0  ;;  %v1772_v43 = vpack.c.bf16 %v1692_v12, %v1676_v32 }
 0x1f7   : > { %v1579_v18 = vadd.f32 %v11038_v55, %v1352_v39  ;;  %v1578_v48 = vadd.f32 %v11038_v55, %v1221_v40  ;;  %v1354_v21 = vpop.f32.mrb[133].mxu1  ;;  %v1223_v13 = vpop.f32.mrb[134].mxu0  ;;  %2320 = vmatprep.subr.bf16.mxu0 %v1770_v36 }
 0x1f8   : > { %v1580_v37 = vadd.f32 %v11038_v55, %v1354_v21  ;;  %v1593_v47 = vadd.f32 %v11041_v60, %v1223_v13  ;;  %v1356_v52 = vpop.f32.mrb[134].mxu1  ;;  %2393 = vmatprep.subr.bf16.mxu1 %v1772_v43  ;;  %v1225_v41 = vpop.f32.mrb[135].mxu0  ;;  %2321 = vmatpush1.bf16.msra.mxu0 %v1769_v33  ;;  %v1705_v2 = vmax.f32 %v1577_v38, 0.0 }
 0x1f9   : > { %v1595_v4 = vadd.f32 %v11041_v60, %v1356_v52  ;;  %v1594_v19 = vadd.f32 %v11041_v60, %v1225_v41  ;;  %v1358_v22 = vpop.f32.mrb[135].mxu1  ;;  %2394 = vmatpush1.bf16.msra.mxu1 %v1771_v34  ;;  %v1707_v45 = vmax.f32 %v1579_v18, 0.0  ;;  %v1706_v57 = vmax.f32 %v1578_v48, 0.0 }
 0x1fa   : > { %v1721_v28 = vmax.f32 %v1593_v47, 0.0  ;;  %v1596_v42 = vadd.f32 %v11041_v60, %v1358_v22  ;;  %v1708_v49 = vmax.f32 %v1580_v37, 0.0  ;;  %v11346_v60 = vpop.permute.xlu0 %1807 }
 0x1fb   : > { %v1723_v29 = vmax.f32 %v1595_v4, 0.0  ;;  %v1722_v55 = vmax.f32 %v1594_v19, 0.0 }
 0x1fc   : > { %v1785_v14 = vpack.c.bf16 %v1721_v28, %v1705_v2  ;;  %v1724_v50 = vmax.f32 %v1596_v42, 0.0 }
 0x1fd   : > { %v1787_v51 = vpack.c.bf16 %v1723_v29, %v1707_v45  ;;  %v1786_v53 = vpack.c.bf16 %v1722_v55, %v1706_v57 }
 0x1fe   : > { %v1788_v54 = vpack.c.bf16 %v1724_v50, %v1708_v49  ;;  %v11358_v26 = vpop.permute.xlu0 %1817 }
 0x1ff   : > { %2322 = vmatprep.subr.bf16.mxu0 %v1786_v53 }
 0x200   : > { %2395 = vmatprep.subr.bf16.mxu1 %v1788_v54  ;;  %2323 = vmatpush1.bf16.msra.mxu0 %v1785_v14 }
 0x201   : > { %2396 = vmatpush1.bf16.msra.mxu1 %v1787_v51 }
 0x202   : > { %v11370_v57 = vpop.permute.xlu0 %1827 }
 0x203   : > { %9911 = vmatmul.mubr.msk.bf16.vlgmr.msra.gmra.mrb[208].mxu0 %vm1865_vm2, %v11157_v23 }
 0x204   : > { %9915 = vmatmul.mubr.msk.bf16.vlgmr.msra.gmra.mrb[208].mxu1 %vm1865_vm2, %v11157_v23  ;;  %2358 = vmatprep.mubr.bf16.mxu0 %v13744_v0  ;;  %v11348_v23 = vpop.permute.xlu1 %1812 }
 0x205   : > { %2431 = vmatprep.mubr.bf16.mxu1 %v13744_v0 }
 0x208   : > { %v11360_v16 = vpop.permute.xlu1 %1822 }
 0x20b   : > { %9912 = vmatmul.mubr.msk.bf16.gmra.mrb[212].mxu0 %vm1865_vm2, %v11178_v24 }
 0x20c   : > { %9916 = vmatmul.mubr.msk.bf16.gmra.mrb[212].mxu1 %vm1865_vm2, %v11178_v24  ;;  %2368 = vmatprep.mubr.bf16.mxu0 %v13744_v0  ;;  %v11372_v14 = vpop.permute.xlu1 %1832 }
 0x20d   : > { %2441 = vmatprep.mubr.bf16.mxu1 %v13744_v0 }
 0x213   : > { %9913 = vmatmul.mubr.msk.bf16.gmra.mrb[216].mxu0 %vm1865_vm2, %v11191_v5 }
 0x214   : > { %9917 = vmatmul.mubr.msk.bf16.gmra.mrb[216].mxu1 %vm1865_vm2, %v11191_v5  ;;  %2378 = vmatprep.mubr.bf16.mxu0 %v13744_v0 }
 0x215   : > { %2451 = vmatprep.mubr.bf16.mxu1 %v13744_v0 }
 0x21b   : > { %9914 = vmatmul.mubr.msk.bf16.gmra.mrb[220].mxu0 %vm1865_vm2, %v11202_v46 }
 0x21c   : > { %9918 = vmatmul.mubr.msk.bf16.gmra.mrb[220].mxu1 %vm1865_vm2, %v11202_v46  ;;  %2774 = vmatprep.mubr.bf16.mxu0 %v13744_v0 }
 0x21d   : > { %2847 = vmatprep.mubr.bf16.mxu1 %v13744_v0 }
 0x22d   : > { %v1912_v24 = vpop.f32.mrb[160].mxu0 }
 0x22e   : > { %v1913_v5 = vadd.f32 %v1912_v24, %v11346_v60  ;;  %v1985_v56 = vpop.f32.mrb[160].mxu1  ;;  %v1914_v58 = vpop.f32.mrb[161].mxu0 }
 0x22f   : > { %v1986_v59 = vadd.f32 %v1985_v56, %v11346_v60  ;;  %v1915_v61 = vadd.f32 %v1914_v58, %v11346_v60  ;;  %v1987_v63 = vpop.f32.mrb[161].mxu1  ;;  %v1916_v1 = vpop.f32.mrb[162].mxu0 }
 0x230   : > { %v1988_v46 = vadd.f32 %v1987_v63, %v11346_v60  ;;  %v1917_v3 = vadd.f32 %v1916_v1, %v11348_v23  ;;  %v1989_v6 = vpop.f32.mrb[162].mxu1  ;;  %v1918_v44 = vpop.f32.mrb[163].mxu0  ;;  %v2462_v11 = vmax.f32 %v1913_v5, 0.0 }
 0x231   : > { %v1990_v7 = vadd.f32 %v1989_v6, %v11348_v23  ;;  %v1919_v8 = vadd.f32 %v1918_v44, %v11348_v23  ;;  %v1991_v10 = vpop.f32.mrb[163].mxu1  ;;  %v2464_v62 = vmax.f32 %v1986_v59, 0.0  ;;  %v2463_v20 = vmax.f32 %v1915_v61, 0.0 }
 0x232   : > { %v2478_v15 = vmax.f32 %v1917_v3, 0.0  ;;  %v1992_v17 = vadd.f32 %v1991_v10, %v11348_v23  ;;  %v2465_v27 = vmax.f32 %v1988_v46, 0.0 }
 0x233   : > { %v2480_v9 = vmax.f32 %v1990_v7, 0.0  ;;  %v2479_v25 = vmax.f32 %v1919_v8, 0.0 }
 0x234   : > { %v2590_v30 = vpack.c.bf16 %v2478_v15, %v2462_v11  ;;  %v2481_v31 = vmax.f32 %v1992_v17, 0.0 }
 0x235   : > { %v2592_v32 = vpack.c.bf16 %v2480_v9, %v2464_v62  ;;  %v1922_v33 = vpop.f32.mrb[164].mxu0  ;;  %v2591_v12 = vpack.c.bf16 %v2479_v25, %v2463_v20  ;;  %v11382_v25 = vpop.permute.xlu0 %1837 }
 0x236   : > { %v1923_v34 = vadd.f32 %v1922_v33, %v11358_v26  ;;  %v1995_v35 = vpop.f32.mrb[164].mxu1  ;;  %v1924_v36 = vpop.f32.mrb[165].mxu0  ;;  %v2593_v38 = vpack.c.bf16 %v2481_v31, %v2465_v27 }
 0x237   : > { %v1996_v39 = vadd.f32 %v1995_v35, %v11358_v26  ;;  %v1925_v40 = vadd.f32 %v1924_v36, %v11358_v26  ;;  %v1997_v43 = vpop.f32.mrb[165].mxu1  ;;  %v1926_v18 = vpop.f32.mrb[166].mxu0  ;;  %2742 = vmatprep.subr.bf16.mxu0 %v2591_v12 }
 0x238   : > { %v1998_v48 = vadd.f32 %v1997_v43, %v11358_v26  ;;  %v1927_v21 = vadd.f32 %v1926_v18, %v11360_v16  ;;  %v1999_v13 = vpop.f32.mrb[166].mxu1  ;;  %2815 = vmatprep.subr.bf16.mxu1 %v2593_v38  ;;  %v1928_v37 = vpop.f32.mrb[167].mxu0  ;;  %2743 = vmatpush1.bf16.msra.mxu0 %v2590_v30  ;;  %v2494_v4 = vmax.f32 %v1923_v34, 0.0 }
 0x239   : > { %v2000_v47 = vadd.f32 %v1999_v13, %v11360_v16  ;;  %v1929_v52 = vadd.f32 %v1928_v37, %v11360_v16  ;;  %v2001_v41 = vpop.f32.mrb[167].mxu1  ;;  %2816 = vmatpush1.bf16.msra.mxu1 %v2592_v32  ;;  %v2496_v2 = vmax.f32 %v1996_v39, 0.0  ;;  %v2495_v28 = vmax.f32 %v1925_v40, 0.0  ;;  %v11384_v32 = vpop.permute.xlu1 %1842 }
 0x23a   : > { %v2510_v19 = vmax.f32 %v1927_v21, 0.0  ;;  %v2002_v22 = vadd.f32 %v2001_v41, %v11360_v16  ;;  %v2497_v29 = vmax.f32 %v1998_v48, 0.0 }
 0x23b   : > { %v2512_v42 = vmax.f32 %v2000_v47, 0.0  ;;  %v2511_v45 = vmax.f32 %v1929_v52, 0.0 }
 0x23c   : > { %v2606_v55 = vpack.c.bf16 %v2510_v19, %v2494_v4  ;;  %v2513_v49 = vmax.f32 %v2002_v22, 0.0 }
 0x23d   : > { %v2608_v50 = vpack.c.bf16 %v2512_v42, %v2496_v2  ;;  %v1932_v51 = vpop.f32.mrb[168].mxu0  ;;  %v2607_v53 = vpack.c.bf16 %v2511_v45, %v2495_v28 }
 0x23e   : > { %v1933_v54 = vadd.f32 %v1932_v51, %v11370_v57  ;;  %v2005_v24 = vpop.f32.mrb[168].mxu1  ;;  %v1934_v5 = vpop.f32.mrb[169].mxu0  ;;  %v2609_v56 = vpack.c.bf16 %v2513_v49, %v2497_v29 }
 0x23f   : > { %v2006_v58 = vadd.f32 %v2005_v24, %v11370_v57  ;;  %v1935_v59 = vadd.f32 %v1934_v5, %v11370_v57  ;;  %v2007_v61 = vpop.f32.mrb[169].mxu1  ;;  %v1936_v63 = vpop.f32.mrb[170].mxu0  ;;  %2744 = vmatprep.subr.bf16.mxu0 %v2607_v53 }
 0x240   : > { %v2008_v1 = vadd.f32 %v2007_v61, %v11370_v57  ;;  %v1937_v46 = vadd.f32 %v1936_v63, %v11372_v14  ;;  %v2009_v3 = vpop.f32.mrb[170].mxu1  ;;  %2817 = vmatprep.subr.bf16.mxu1 %v2609_v56  ;;  %v1938_v6 = vpop.f32.mrb[171].mxu0  ;;  %2745 = vmatpush1.bf16.msra.mxu0 %v2606_v55  ;;  %v2526_v10 = vmax.f32 %v1933_v54, 0.0 }
 0x241   : > { %v2010_v44 = vadd.f32 %v2009_v3, %v11372_v14  ;;  %v1939_v7 = vadd.f32 %v1938_v6, %v11372_v14  ;;  %v2011_v8 = vpop.f32.mrb[171].mxu1  ;;  %2818 = vmatpush1.bf16.msra.mxu1 %v2608_v50  ;;  %v2528_v17 = vmax.f32 %v2006_v58, 0.0  ;;  %v2527_v62 = vmax.f32 %v1935_v59, 0.0 }
 0x242   : > { %v2542_v11 = vmax.f32 %v1937_v46, 0.0  ;;  %v2012_v15 = vadd.f32 %v2011_v8, %v11372_v14  ;;  %v2529_v27 = vmax.f32 %v2008_v1, 0.0  ;;  %v11400_v46 = vld [vmem:[%s13741_s1 + $0x70] sm:$0xff]  }
 0x243   : > { %v2544_v20 = vmax.f32 %v2010_v44, 0.0  ;;  %v2543_v9 = vmax.f32 %v1939_v7, 0.0 }
 0x244   : > { %v2622_v30 = vpack.c.bf16 %v2542_v11, %v2526_v10  ;;  %v2545_v31 = vmax.f32 %v2012_v15, 0.0 }
 0x245   : > { %v2624_v33 = vpack.c.bf16 %v2544_v20, %v2528_v17  ;;  %v1942_v12 = vpop.f32.mrb[172].mxu0  ;;  %v2623_v34 = vpack.c.bf16 %v2543_v9, %v2527_v62 }
 0x246   : > { %v1943_v35 = vadd.f32 %v1942_v12, %v11382_v25  ;;  %v2015_v36 = vpop.f32.mrb[172].mxu1  ;;  %v1944_v38 = vpop.f32.mrb[173].mxu0  ;;  %v2625_v39 = vpack.c.bf16 %v2545_v31, %v2529_v27 }
 0x247   : > { %v2016_v40 = vadd.f32 %v2015_v36, %v11382_v25  ;;  %v1945_v43 = vadd.f32 %v1944_v38, %v11382_v25  ;;  %v2017_v18 = vpop.f32.mrb[173].mxu1  ;;  %v1946_v48 = vpop.f32.mrb[174].mxu0  ;;  %2746 = vmatprep.subr.bf16.mxu0 %v2623_v34 }
 0x248   : > { %v2018_v21 = vadd.f32 %v2017_v18, %v11382_v25  ;;  %v1947_v13 = vadd.f32 %v1946_v48, %v11384_v32  ;;  %v2019_v37 = vpop.f32.mrb[174].mxu1  ;;  %2819 = vmatprep.subr.bf16.mxu1 %v2625_v39  ;;  %v1948_v47 = vpop.f32.mrb[175].mxu0  ;;  %2747 = vmatpush1.bf16.msra.mxu0 %v2622_v30  ;;  %v2558_v19 = vmax.f32 %v1943_v35, 0.0 }
 0x249   : > { %v2020_v52 = vadd.f32 %v2019_v37, %v11384_v32  ;;  %v1949_v41 = vadd.f32 %v1948_v47, %v11384_v32  ;;  %v2021_v4 = vpop.f32.mrb[175].mxu1  ;;  %2820 = vmatpush1.bf16.msra.mxu1 %v2624_v33  ;;  %v2560_v28 = vmax.f32 %v2016_v40, 0.0  ;;  %v2559_v42 = vmax.f32 %v1945_v43, 0.0  ;;  %v11419_v37 = vld [vmem:[%s13741_s1 + $0x78] sm:$0xff]  }
 0x24a   : > { %v2574_v22 = vmax.f32 %v1947_v13, 0.0  ;;  %v2022_v2 = vadd.f32 %v2021_v4, %v11384_v32  ;;  %v2561_v55 = vmax.f32 %v2018_v21, 0.0 }
 0x24b   : > { %v2576_v45 = vmax.f32 %v2020_v52, 0.0  ;;  %v2575_v29 = vmax.f32 %v1949_v41, 0.0 }
 0x24c   : > { %v2638_v49 = vpack.c.bf16 %v2574_v22, %v2558_v19  ;;  %v2577_v50 = vmax.f32 %v2022_v2, 0.0 }
 0x24d   : > { %v2640_v51 = vpack.c.bf16 %v2576_v45, %v2560_v28  ;;  %v2058_v53 = vpop.f32.mrb[176].mxu0  ;;  %v2639_v54 = vpack.c.bf16 %v2575_v29, %v2559_v42 }
 0x24e   : > { %v2059_v24 = vadd.f32 %v2058_v53, %v11346_v60  ;;  %v2131_v5 = vpop.f32.mrb[176].mxu1  ;;  %v2060_v56 = vpop.f32.mrb[177].mxu0  ;;  %v2641_v58 = vpack.c.bf16 %v2577_v50, %v2561_v55 }
 0x24f   : > { %v2132_v59 = vadd.f32 %v2131_v5, %v11346_v60  ;;  %v2061_v61 = vadd.f32 %v2060_v56, %v11346_v60  ;;  %v2133_v63 = vpop.f32.mrb[177].mxu1  ;;  %v2062_v1 = vpop.f32.mrb[178].mxu0  ;;  %2748 = vmatprep.subr.bf16.mxu0 %v2639_v54 }
 0x250   : > { %v2134_v3 = vadd.f32 %v2133_v63, %v11346_v60  ;;  %v2063_v6 = vadd.f32 %v2062_v1, %v11348_v23  ;;  %v2135_v44 = vpop.f32.mrb[178].mxu1  ;;  %2821 = vmatprep.subr.bf16.mxu1 %v2641_v58  ;;  %v2064_v7 = vpop.f32.mrb[179].mxu0  ;;  %2749 = vmatpush1.bf16.msra.mxu0 %v2638_v49  ;;  %v2466_v15 = vmax.f32 %v2059_v24, 0.0 }
 0x251   : > { %v2136_v8 = vadd.f32 %v2135_v44, %v11348_v23  ;;  %v2065_v10 = vadd.f32 %v2064_v7, %v11348_v23  ;;  %v2137_v11 = vpop.f32.mrb[179].mxu1  ;;  %2822 = vmatpush1.bf16.msra.mxu1 %v2640_v51  ;;  %v2468_v20 = vmax.f32 %v2132_v59, 0.0  ;;  %v2467_v9 = vmax.f32 %v2061_v61, 0.0  ;;  %v11438_v7 = vld [vmem:[%s13741_s1 + $0x80] sm:$0xff]  }
 0x252   : > { %v2482_v17 = vmax.f32 %v2063_v6, 0.0  ;;  %v2138_v62 = vadd.f32 %v2137_v11, %v11348_v23  ;;  %v2469_v31 = vmax.f32 %v2134_v3, 0.0 }
 0x253   : > { %v2484_v27 = vmax.f32 %v2136_v8, 0.0  ;;  %v2483_v30 = vmax.f32 %v2065_v10, 0.0  ;;  %9923 = vmatmul.mubr.msk.bf16.vlgmr.msra.gmra.mrb[224].mxu0 %vm1865_vm2, %v11400_v46 }
 0x254   : > { %v2594_v33 = vpack.c.bf16 %v2482_v17, %v2466_v15  ;;  %v2485_v12 = vmax.f32 %v2138_v62, 0.0  ;;  %9927 = vmatmul.mubr.msk.bf16.vlgmr.msra.gmra.mrb[224].mxu1 %vm1865_vm2, %v11400_v46  ;;  %2784 = vmatprep.mubr.bf16.mxu0 %v13744_v0 }
 0x255   : > { %v2596_v34 = vpack.c.bf16 %v2484_v27, %v2468_v20  ;;  %v2068_v35 = vpop.f32.mrb[180].mxu0  ;;  %v2595_v36 = vpack.c.bf16 %v2483_v30, %v2467_v9  ;;  %2857 = vmatprep.mubr.bf16.mxu1 %v13744_v0 }
 0x256   : > { %v2069_v38 = vadd.f32 %v2068_v35, %v11358_v26  ;;  %v2141_v39 = vpop.f32.mrb[180].mxu1  ;;  %v2070_v40 = vpop.f32.mrb[181].mxu0  ;;  %v2597_v43 = vpack.c.bf16 %v2485_v12, %v2469_v31 }
 0x257   : > { %v2142_v18 = vadd.f32 %v2141_v39, %v11358_v26  ;;  %v2071_v48 = vadd.f32 %v2070_v40, %v11358_v26  ;;  %v2143_v21 = vpop.f32.mrb[181].mxu1  ;;  %v2072_v13 = vpop.f32.mrb[182].mxu0  ;;  %2888 = vmatprep.subr.bf16.mxu0 %v2595_v36 }
 0x258   : > { %v2144_v47 = vadd.f32 %v2143_v21, %v11358_v26  ;;  %v2073_v52 = vadd.f32 %v2072_v13, %v11360_v16  ;;  %v2145_v41 = vpop.f32.mrb[182].mxu1  ;;  %2961 = vmatprep.subr.bf16.mxu1 %v2597_v43  ;;  %v2074_v4 = vpop.f32.mrb[183].mxu0  ;;  %2889 = vmatpush1.bf16.msra.mxu0 %v2594_v33  ;;  %v2498_v28 = vmax.f32 %v2069_v38, 0.0 }
 0x259   : > { %v2146_v19 = vadd.f32 %v2145_v41, %v11360_v16  ;;  %v2075_v22 = vadd.f32 %v2074_v4, %v11360_v16  ;;  %v2147_v2 = vpop.f32.mrb[183].mxu1  ;;  %2962 = vmatpush1.bf16.msra.mxu1 %v2596_v34  ;;  %v2500_v29 = vmax.f32 %v2142_v18, 0.0  ;;  %v2499_v55 = vmax.f32 %v2071_v48, 0.0 }
 0x25a   : > { %v2514_v42 = vmax.f32 %v2073_v52, 0.0  ;;  %v2148_v45 = vadd.f32 %v2147_v2, %v11360_v16  ;;  %v2501_v51 = vmax.f32 %v2144_v47, 0.0 }
 0x25b   : > { %v2516_v49 = vmax.f32 %v2146_v19, 0.0  ;;  %v2515_v50 = vmax.f32 %v2075_v22, 0.0  ;;  %9924 = vmatmul.mubr.msk.bf16.gmra.mrb[228].mxu0 %vm1865_vm2, %v11419_v37  ;;  %v11457_v19 = vld [vmem:[%s13741_s1 + $0x88] sm:$0xff]  }
 0x25c   : > { %v2610_v53 = vpack.c.bf16 %v2514_v42, %v2498_v28  ;;  %v2517_v54 = vmax.f32 %v2148_v45, 0.0  ;;  %9928 = vmatmul.mubr.msk.bf16.gmra.mrb[228].mxu1 %vm1865_vm2, %v11419_v37  ;;  %2794 = vmatprep.mubr.bf16.mxu0 %v13744_v0 }
 0x25d   : > { %v2612_v24 = vpack.c.bf16 %v2516_v49, %v2500_v29  ;;  %v2078_v5 = vpop.f32.mrb[184].mxu0  ;;  %v2611_v56 = vpack.c.bf16 %v2515_v50, %v2499_v55  ;;  %2867 = vmatprep.mubr.bf16.mxu1 %v13744_v0 }
 0x25e   : > { %v2079_v58 = vadd.f32 %v2078_v5, %v11370_v57  ;;  %v2151_v59 = vpop.f32.mrb[184].mxu1  ;;  %v2080_v61 = vpop.f32.mrb[185].mxu0  ;;  %v2613_v63 = vpack.c.bf16 %v2517_v54, %v2501_v51 }
 0x25f   : > { %v2152_v1 = vadd.f32 %v2151_v59, %v11370_v57  ;;  %v2081_v3 = vadd.f32 %v2080_v61, %v11370_v57  ;;  %v2153_v6 = vpop.f32.mrb[185].mxu1  ;;  %v2082_v44 = vpop.f32.mrb[186].mxu0  ;;  %2890 = vmatprep.subr.bf16.mxu0 %v2611_v56 }
 0x260   : > { %v2154_v8 = vadd.f32 %v2153_v6, %v11370_v57  ;;  %v2083_v10 = vadd.f32 %v2082_v44, %v11372_v14  ;;  %v2155_v11 = vpop.f32.mrb[186].mxu1  ;;  %2963 = vmatprep.subr.bf16.mxu1 %v2613_v63  ;;  %v2084_v15 = vpop.f32.mrb[187].mxu0  ;;  %2891 = vmatpush1.bf16.msra.mxu0 %v2610_v53  ;;  %v2530_v9 = vmax.f32 %v2079_v58, 0.0 }
 0x261   : > { %v2156_v17 = vadd.f32 %v2155_v11, %v11372_v14  ;;  %v2085_v62 = vadd.f32 %v2084_v15, %v11372_v14  ;;  %v2157_v20 = vpop.f32.mrb[187].mxu1  ;;  %2964 = vmatpush1.bf16.msra.mxu1 %v2612_v24  ;;  %v2532_v31 = vmax.f32 %v2152_v1, 0.0  ;;  %v2531_v33 = vmax.f32 %v2081_v3, 0.0 }
 0x262   : > { %v2546_v27 = vmax.f32 %v2083_v10, 0.0  ;;  %v2158_v30 = vadd.f32 %v2157_v20, %v11372_v14  ;;  %v2533_v35 = vmax.f32 %v2154_v8, 0.0 }
 0x263   : > { %v2548_v12 = vmax.f32 %v2156_v17, 0.0  ;;  %v2547_v34 = vmax.f32 %v2085_v62, 0.0  ;;  %9925 = vmatmul.mubr.msk.bf16.gmra.mrb[232].mxu0 %vm1865_vm2, %v11438_v7 }
 0x264   : > { %v2626_v36 = vpack.c.bf16 %v2546_v27, %v2530_v9  ;;  %v2549_v38 = vmax.f32 %v2158_v30, 0.0  ;;  %9929 = vmatmul.mubr.msk.bf16.gmra.mrb[232].mxu1 %vm1865_vm2, %v11438_v7  ;;  %2804 = vmatprep.mubr.bf16.mxu0 %v13744_v0 }
 0x265   : > { %v2628_v39 = vpack.c.bf16 %v2548_v12, %v2532_v31  ;;  %v2088_v40 = vpop.f32.mrb[188].mxu0  ;;  %v2627_v43 = vpack.c.bf16 %v2547_v34, %v2531_v33  ;;  %2877 = vmatprep.mubr.bf16.mxu1 %v13744_v0 }
 0x266   : > { %v2089_v18 = vadd.f32 %v2088_v40, %v11382_v25  ;;  %v2161_v48 = vpop.f32.mrb[188].mxu1  ;;  %v2090_v21 = vpop.f32.mrb[189].mxu0  ;;  %v2629_v13 = vpack.c.bf16 %v2549_v38, %v2533_v35 }
 0x267   : > { %v2162_v47 = vadd.f32 %v2161_v48, %v11382_v25  ;;  %v2091_v52 = vadd.f32 %v2090_v21, %v11382_v25  ;;  %v2163_v41 = vpop.f32.mrb[189].mxu1  ;;  %v2092_v4 = vpop.f32.mrb[190].mxu0  ;;  %2892 = vmatprep.subr.bf16.mxu0 %v2627_v43 }
 0x268   : > { %v2164_v22 = vadd.f32 %v2163_v41, %v11382_v25  ;;  %v2093_v2 = vadd.f32 %v2092_v4, %v11384_v32  ;;  %v2165_v28 = vpop.f32.mrb[190].mxu1  ;;  %2965 = vmatprep.subr.bf16.mxu1 %v2629_v13  ;;  %v2094_v42 = vpop.f32.mrb[191].mxu0  ;;  %2893 = vmatpush1.bf16.msra.mxu0 %v2626_v36  ;;  %v2562_v49 = vmax.f32 %v2089_v18, 0.0 }
 0x269   : > { %v2166_v45 = vadd.f32 %v2165_v28, %v11384_v32  ;;  %v2095_v29 = vadd.f32 %v2094_v42, %v11384_v32  ;;  %v2167_v55 = vpop.f32.mrb[191].mxu1  ;;  %2966 = vmatpush1.bf16.msra.mxu1 %v2628_v39  ;;  %v2564_v53 = vmax.f32 %v2162_v47, 0.0  ;;  %v2563_v54 = vmax.f32 %v2091_v52, 0.0 }
 0x26a   : > { %v2578_v50 = vmax.f32 %v2093_v2, 0.0  ;;  %v2168_v51 = vadd.f32 %v2167_v55, %v11384_v32  ;;  %v2565_v56 = vmax.f32 %v2164_v22, 0.0 }
 0x26b   : > { %v2580_v24 = vmax.f32 %v2166_v45, 0.0  ;;  %v2579_v5 = vmax.f32 %v2095_v29, 0.0  ;;  %9926 = vmatmul.mubr.msk.bf16.gmra.mrb[236].mxu0 %vm1865_vm2, %v11457_v19 }
 0x26c   : > { %v2642_v58 = vpack.c.bf16 %v2578_v50, %v2562_v49  ;;  %v2581_v59 = vmax.f32 %v2168_v51, 0.0  ;;  %9930 = vmatmul.mubr.msk.bf16.gmra.mrb[236].mxu1 %vm1865_vm2, %v11457_v19  ;;  %2920 = vmatprep.mubr.bf16.mxu0 %v13744_v0 }
 0x26d   : > { %v2644_v61 = vpack.c.bf16 %v2580_v24, %v2564_v53  ;;  %v2643_v63 = vpack.c.bf16 %v2579_v5, %v2563_v54  ;;  %2993 = vmatprep.mubr.bf16.mxu1 %v13744_v0 }
 0x26e   : > { %v2645_v1 = vpack.c.bf16 %v2581_v59, %v2565_v56 }
 0x26f   : > { %2894 = vmatprep.subr.bf16.mxu0 %v2643_v63 }
 0x270   : > { %2967 = vmatprep.subr.bf16.mxu1 %v2645_v1  ;;  %2895 = vmatpush1.bf16.msra.mxu0 %v2642_v58 }
 0x271   : > { %2968 = vmatpush1.bf16.msra.mxu1 %v2644_v61 }
 0x273   : > { %9931 = vmatmul.mubr.msk.bf16.vlgmr.msra.gmra.mrb[240].mxu0 %vm1865_vm2, %v11400_v46 }
 0x274   : > { %9935 = vmatmul.mubr.msk.bf16.vlgmr.msra.gmra.mrb[240].mxu1 %vm1865_vm2, %v11400_v46  ;;  %2930 = vmatprep.mubr.bf16.mxu0 %v13744_v0 }
 0x275   : > { %3003 = vmatprep.mubr.bf16.mxu1 %v13744_v0 }
 0x27b   : > { %9932 = vmatmul.mubr.msk.bf16.gmra.mrb[244].mxu0 %vm1865_vm2, %v11419_v37 }
 0x27c   : > { %9936 = vmatmul.mubr.msk.bf16.gmra.mrb[244].mxu1 %vm1865_vm2, %v11419_v37  ;;  %2940 = vmatprep.mubr.bf16.mxu0 %v13744_v0 }
 0x27d   : > { %3013 = vmatprep.mubr.bf16.mxu1 %v13744_v0 }
 0x283   : > { %9933 = vmatmul.mubr.msk.bf16.gmra.mrb[248].mxu0 %vm1865_vm2, %v11438_v7 }
 0x284   : > { %9937 = vmatmul.mubr.msk.bf16.gmra.mrb[248].mxu1 %vm1865_vm2, %v11438_v7  ;;  %2950 = vmatprep.mubr.bf16.mxu0 %v13744_v0 }
 0x285   : > { %3023 = vmatprep.mubr.bf16.mxu1 %v13744_v0 }
 0x286   : > { %v2204_v3 = vpop.f32.mrb[192].mxu0 }
 0x287   : > { %v2205_v6 = vadd.f32 %v2204_v3, %v11346_v60  ;;  %v2277_v44 = vpop.f32.mrb[192].mxu1  ;;  %v2206_v8 = vpop.f32.mrb[193].mxu0 }
 0x288   : > { %v2278_v10 = vadd.f32 %v2277_v44, %v11346_v60  ;;  %v2207_v11 = vadd.f32 %v2206_v8, %v11346_v60  ;;  %v2279_v15 = vpop.f32.mrb[193].mxu1  ;;  %v2208_v17 = vpop.f32.mrb[194].mxu0 }
 0x289   : > { %v2280_v62 = vadd.f32 %v2279_v15, %v11346_v60  ;;  %v2209_v20 = vadd.f32 %v2208_v17, %v11348_v23  ;;  %v2281_v9 = vpop.f32.mrb[194].mxu1  ;;  %v2210_v27 = vpop.f32.mrb[195].mxu0  ;;  %v2470_v12 = vmax.f32 %v2205_v6, 0.0 }
 0x28a   : > { %v2282_v30 = vadd.f32 %v2281_v9, %v11348_v23  ;;  %v2211_v31 = vadd.f32 %v2210_v27, %v11348_v23  ;;  %v2283_v33 = vpop.f32.mrb[195].mxu1  ;;  %v2472_v36 = vmax.f32 %v2278_v10, 0.0  ;;  %v2471_v38 = vmax.f32 %v2207_v11, 0.0 }
 0x28b   : > { %v2486_v34 = vmax.f32 %v2209_v20, 0.0  ;;  %v2284_v35 = vadd.f32 %v2283_v33, %v11348_v23  ;;  %9934 = vmatmul.mubr.msk.bf16.gmra.mrb[252].mxu0 %vm1865_vm2, %v11457_v19  ;;  %v2473_v43 = vmax.f32 %v2280_v62, 0.0 }
 0x28c   : > { %v2488_v39 = vmax.f32 %v2282_v30, 0.0  ;;  %v2487_v40 = vmax.f32 %v2211_v31, 0.0  ;;  %9938 = vmatmul.mubr.msk.bf16.gmra.mrb[252].mxu1 %vm1865_vm2, %v11457_v19  ;;  %3066 = vmatprep.mubr.bf16.mxu0 %v13744_v0 }
 0x28d   : > { %v2598_v18 = vpack.c.bf16 %v2486_v34, %v2470_v12  ;;  %v2489_v48 = vmax.f32 %v2284_v35, 0.0  ;;  %3139 = vmatprep.mubr.bf16.mxu1 %v13744_v0 }
 0x28e   : > { %v2600_v21 = vpack.c.bf16 %v2488_v39, %v2472_v36  ;;  %v2214_v13 = vpop.f32.mrb[196].mxu0  ;;  %v2599_v47 = vpack.c.bf16 %v2487_v40, %v2471_v38 }
 0x28f   : > { %v2215_v52 = vadd.f32 %v2214_v13, %v11358_v26  ;;  %v2287_v41 = vpop.f32.mrb[196].mxu1  ;;  %v2216_v4 = vpop.f32.mrb[197].mxu0  ;;  %v2601_v22 = vpack.c.bf16 %v2489_v48, %v2473_v43 }
 0x290   : > { %v2288_v2 = vadd.f32 %v2287_v41, %v11358_v26  ;;  %v2217_v28 = vadd.f32 %v2216_v4, %v11358_v26  ;;  %v2289_v42 = vpop.f32.mrb[197].mxu1  ;;  %v2218_v45 = vpop.f32.mrb[198].mxu0  ;;  %3034 = vmatprep.subr.bf16.mxu0 %v2599_v47 }
 0x291   : > { %v2290_v29 = vadd.f32 %v2289_v42, %v11358_v26  ;;  %v2219_v55 = vadd.f32 %v2218_v45, %v11360_v16  ;;  %v2291_v49 = vpop.f32.mrb[198].mxu1  ;;  %3107 = vmatprep.subr.bf16.mxu1 %v2601_v22  ;;  %v2220_v50 = vpop.f32.mrb[199].mxu0  ;;  %3035 = vmatpush1.bf16.msra.mxu0 %v2598_v18  ;;  %v2502_v24 = vmax.f32 %v2215_v52, 0.0 }
 0x292   : > { %v2292_v51 = vadd.f32 %v2291_v49, %v11360_v16  ;;  %v2221_v53 = vadd.f32 %v2220_v50, %v11360_v16  ;;  %v2293_v54 = vpop.f32.mrb[199].mxu1  ;;  %3108 = vmatpush1.bf16.msra.mxu1 %v2600_v21  ;;  %v2504_v58 = vmax.f32 %v2288_v2, 0.0  ;;  %v2503_v59 = vmax.f32 %v2217_v28, 0.0 }
 0x293   : > { %v2518_v5 = vmax.f32 %v2219_v55, 0.0  ;;  %v2294_v56 = vadd.f32 %v2293_v54, %v11360_v16  ;;  %v2505_v1 = vmax.f32 %v2290_v29, 0.0 }
 0x294   : > { %v2520_v61 = vmax.f32 %v2292_v51, 0.0  ;;  %v2519_v63 = vmax.f32 %v2221_v53, 0.0 }
 0x295   : > { %v2614_v3 = vpack.c.bf16 %v2518_v5, %v2502_v24  ;;  %v2521_v6 = vmax.f32 %v2294_v56, 0.0 }
 0x296   : > { %v2616_v44 = vpack.c.bf16 %v2520_v61, %v2504_v58  ;;  %v2224_v8 = vpop.f32.mrb[200].mxu0  ;;  %v2615_v10 = vpack.c.bf16 %v2519_v63, %v2503_v59 }
 0x297   : > { %v2225_v11 = vadd.f32 %v2224_v8, %v11370_v57  ;;  %v2297_v15 = vpop.f32.mrb[200].mxu1  ;;  %v2226_v17 = vpop.f32.mrb[201].mxu0  ;;  %v2617_v62 = vpack.c.bf16 %v2521_v6, %v2505_v1 }
 0x298   : > { %v2298_v20 = vadd.f32 %v2297_v15, %v11370_v57  ;;  %v2227_v9 = vadd.f32 %v2226_v17, %v11370_v57  ;;  %v2299_v27 = vpop.f32.mrb[201].mxu1  ;;  %v2228_v30 = vpop.f32.mrb[202].mxu0  ;;  %3036 = vmatprep.subr.bf16.mxu0 %v2615_v10 }
 0x299   : > { %v2300_v31 = vadd.f32 %v2299_v27, %v11370_v57  ;;  %v2229_v33 = vadd.f32 %v2228_v30, %v11372_v14  ;;  %v2301_v12 = vpop.f32.mrb[202].mxu1  ;;  %3109 = vmatprep.subr.bf16.mxu1 %v2617_v62  ;;  %v2230_v34 = vpop.f32.mrb[203].mxu0  ;;  %3037 = vmatpush1.bf16.msra.mxu0 %v2614_v3  ;;  %v2534_v39 = vmax.f32 %v2225_v11, 0.0 }
 0x29a   : > { %v2302_v35 = vadd.f32 %v2301_v12, %v11372_v14  ;;  %v2231_v36 = vadd.f32 %v2230_v34, %v11372_v14  ;;  %v2303_v38 = vpop.f32.mrb[203].mxu1  ;;  %3110 = vmatpush1.bf16.msra.mxu1 %v2616_v44  ;;  %v2536_v18 = vmax.f32 %v2298_v20, 0.0  ;;  %v2535_v48 = vmax.f32 %v2227_v9, 0.0 }
 0x29b   : > { %v2550_v40 = vmax.f32 %v2229_v33, 0.0  ;;  %v2304_v43 = vadd.f32 %v2303_v38, %v11372_v14  ;;  %v2537_v47 = vmax.f32 %v2300_v31, 0.0 }
 0x29c   : > { %v2552_v21 = vmax.f32 %v2302_v35, 0.0  ;;  %v2551_v13 = vmax.f32 %v2231_v36, 0.0 }
 0x29d   : > { %v2630_v52 = vpack.c.bf16 %v2550_v40, %v2534_v39  ;;  %v2553_v41 = vmax.f32 %v2304_v43, 0.0 }
 0x29e   : > { %v2632_v4 = vpack.c.bf16 %v2552_v21, %v2536_v18  ;;  %v2234_v22 = vpop.f32.mrb[204].mxu0  ;;  %v2631_v2 = vpack.c.bf16 %v2551_v13, %v2535_v48 }
 0x29f   : > { %v2235_v28 = vadd.f32 %v2234_v22, %v11382_v25  ;;  %v2307_v42 = vpop.f32.mrb[204].mxu1  ;;  %v2236_v45 = vpop.f32.mrb[205].mxu0  ;;  %v2633_v29 = vpack.c.bf16 %v2553_v41, %v2537_v47 }
 0x2a0   : > { %v2308_v55 = vadd.f32 %v2307_v42, %v11382_v25  ;;  %v2237_v49 = vadd.f32 %v2236_v45, %v11382_v25  ;;  %v2309_v50 = vpop.f32.mrb[205].mxu1  ;;  %v2238_v51 = vpop.f32.mrb[206].mxu0  ;;  %3038 = vmatprep.subr.bf16.mxu0 %v2631_v2 }
 0x2a1   : > { %v2310_v53 = vadd.f32 %v2309_v50, %v11382_v25  ;;  %v2239_v54 = vadd.f32 %v2238_v51, %v11384_v32  ;;  %v2311_v24 = vpop.f32.mrb[206].mxu1  ;;  %3111 = vmatprep.subr.bf16.mxu1 %v2633_v29  ;;  %v2240_v5 = vpop.f32.mrb[207].mxu0  ;;  %3039 = vmatpush1.bf16.msra.mxu0 %v2630_v52  ;;  %v2566_v61 = vmax.f32 %v2235_v28, 0.0 }
 0x2a2   : > { %v2312_v56 = vadd.f32 %v2311_v24, %v11384_v32  ;;  %v2241_v58 = vadd.f32 %v2240_v5, %v11384_v32  ;;  %v2313_v59 = vpop.f32.mrb[207].mxu1  ;;  %3112 = vmatpush1.bf16.msra.mxu1 %v2632_v4  ;;  %v2568_v3 = vmax.f32 %v2308_v55, 0.0  ;;  %v2567_v6 = vmax.f32 %v2237_v49, 0.0 }
 0x2a3   : > { %v2582_v63 = vmax.f32 %v2239_v54, 0.0  ;;  %v2314_v1 = vadd.f32 %v2313_v59, %v11384_v32  ;;  %v2569_v10 = vmax.f32 %v2310_v53, 0.0 }
 0x2a4   : > { %v2584_v44 = vmax.f32 %v2312_v56, 0.0  ;;  %v2583_v8 = vmax.f32 %v2241_v58, 0.0 }
 0x2a5   : > { %v2646_v11 = vpack.c.bf16 %v2582_v63, %v2566_v61  ;;  %v2585_v15 = vmax.f32 %v2314_v1, 0.0 }
 0x2a6   : > { %v2648_v17 = vpack.c.bf16 %v2584_v44, %v2568_v3  ;;  %v2647_v62 = vpack.c.bf16 %v2583_v8, %v2567_v6 }
 0x2a7   : > { %v2649_v20 = vpack.c.bf16 %v2585_v15, %v2569_v10 }
 0x2a8   : > { %3040 = vmatprep.subr.bf16.mxu0 %v2647_v62 }
 0x2a9   : > { %3113 = vmatprep.subr.bf16.mxu1 %v2649_v20  ;;  %3041 = vmatpush1.bf16.msra.mxu0 %v2646_v11 }
 0x2aa   : > { %3114 = vmatpush1.bf16.msra.mxu1 %v2648_v17 }
 0x2ac   : > { %9939 = vmatmul.mubr.msk.bf16.vlgmr.msra.gmra.mrb[0].mxu0 %vm1865_vm2, %v11400_v46 }
 0x2ad   : > { %9943 = vmatmul.mubr.msk.bf16.vlgmr.msra.gmra.mrb[0].mxu1 %vm1865_vm2, %v11400_v46  ;;  %3076 = vmatprep.mubr.bf16.mxu0 %v13744_v0 }
 0x2ae   : > { %3149 = vmatprep.mubr.bf16.mxu1 %v13744_v0 }
 0x2b4   : > { %9940 = vmatmul.mubr.msk.bf16.gmra.mrb[4].mxu0 %vm1865_vm2, %v11419_v37 }
 0x2b5   : > { %9944 = vmatmul.mubr.msk.bf16.gmra.mrb[4].mxu1 %vm1865_vm2, %v11419_v37  ;;  %3086 = vmatprep.mubr.bf16.mxu0 %v13744_v0 }
 0x2b6   : > { %3159 = vmatprep.mubr.bf16.mxu1 %v13744_v0 }
 0x2bc   : > { %9941 = vmatmul.mubr.msk.bf16.gmra.mrb[8].mxu0 %vm1865_vm2, %v11438_v7 }
 0x2bd   : > { %9945 = vmatmul.mubr.msk.bf16.gmra.mrb[8].mxu1 %vm1865_vm2, %v11438_v7  ;;  %3096 = vmatprep.mubr.bf16.mxu0 %v13744_v0 }
 0x2be   : > { %3169 = vmatprep.mubr.bf16.mxu1 %v13744_v0 }
 0x2c4   : > { %9942 = vmatmul.mubr.msk.bf16.gmra.mrb[12].mxu0 %vm1865_vm2, %v11457_v19 }
 0x2c5   : > { %9946 = vmatmul.mubr.msk.bf16.gmra.mrb[12].mxu1 %vm1865_vm2, %v11457_v19  ;;  %3212 = vmatprep.mubr.bf16.mxu0 %v13744_v0 }
 0x2c6   : > { %3285 = vmatprep.mubr.bf16.mxu1 %v13744_v0 }
 0x2d6   : > { %v2350_v9 = vpop.f32.mrb[208].mxu0 }
 0x2d7   : > { %v2351_v27 = vadd.f32 %v2350_v9, %v11346_v60  ;;  %v2423_v30 = vpop.f32.mrb[208].mxu1  ;;  %v2352_v31 = vpop.f32.mrb[209].mxu0 }
 0x2d8   : > { %v2424_v33 = vadd.f32 %v2423_v30, %v11346_v60  ;;  %v2353_v12 = vadd.f32 %v2352_v31, %v11346_v60  ;;  %v2425_v34 = vpop.f32.mrb[209].mxu1  ;;  %v2354_v35 = vpop.f32.mrb[210].mxu0 }
 0x2d9   : > { %v2426_v36 = vadd.f32 %v2425_v34, %v11346_v60  ;;  %v2355_v38 = vadd.f32 %v2354_v35, %v11348_v23  ;;  %v2427_v39 = vpop.f32.mrb[210].mxu1  ;;  %v2356_v40 = vpop.f32.mrb[211].mxu0  ;;  %v2474_v21 = vmax.f32 %v2351_v27, 0.0 }
 0x2da   : > { %v2428_v43 = vadd.f32 %v2427_v39, %v11348_v23  ;;  %v2357_v18 = vadd.f32 %v2356_v40, %v11348_v23  ;;  %v2429_v48 = vpop.f32.mrb[211].mxu1  ;;  %v2476_v52 = vmax.f32 %v2424_v33, 0.0  ;;  %v2475_v41 = vmax.f32 %v2353_v12, 0.0 }
 0x2db   : > { %v2490_v13 = vmax.f32 %v2355_v38, 0.0  ;;  %v2430_v47 = vadd.f32 %v2429_v48, %v11348_v23  ;;  %v2477_v2 = vmax.f32 %v2426_v36, 0.0 }
 0x2dc   : > { %v2492_v4 = vmax.f32 %v2428_v43, 0.0  ;;  %v2491_v22 = vmax.f32 %v2357_v18, 0.0 }
 0x2dd   : > { %v2602_v28 = vpack.c.bf16 %v2490_v13, %v2474_v21  ;;  %v2493_v60 = vmax.f32 %v2430_v47, 0.0 }
 0x2de   : > { %v2604_v42 = vpack.c.bf16 %v2492_v4, %v2476_v52  ;;  %v2360_v45 = vpop.f32.mrb[212].mxu0  ;;  %v2603_v29 = vpack.c.bf16 %v2491_v22, %v2475_v41 }
 0x2df   : > { %v2361_v55 = vadd.f32 %v2360_v45, %v11358_v26  ;;  %v2433_v49 = vpop.f32.mrb[212].mxu1  ;;  %v2362_v50 = vpop.f32.mrb[213].mxu0  ;;  %v2605_v51 = vpack.c.bf16 %v2493_v60, %v2477_v2 }
 0x2e0   : > { %v2434_v53 = vadd.f32 %v2433_v49, %v11358_v26  ;;  %v2363_v54 = vadd.f32 %v2362_v50, %v11358_v26  ;;  %v2435_v23 = vpop.f32.mrb[213].mxu1  ;;  %v2364_v24 = vpop.f32.mrb[214].mxu0  ;;  %3180 = vmatprep.subr.bf16.mxu0 %v2603_v29 }
 0x2e1   : > { %v2436_v5 = vadd.f32 %v2435_v23, %v11358_v26  ;;  %v2365_v56 = vadd.f32 %v2364_v24, %v11360_v16  ;;  %v2437_v58 = vpop.f32.mrb[214].mxu1  ;;  %3253 = vmatprep.subr.bf16.mxu1 %v2605_v51  ;;  %v2366_v59 = vpop.f32.mrb[215].mxu0  ;;  %3181 = vmatpush1.bf16.msra.mxu0 %v2602_v28  ;;  %v2506_v3 = vmax.f32 %v2361_v55, 0.0 }
 0x2e2   : > { %v2438_v61 = vadd.f32 %v2437_v58, %v11360_v16  ;;  %v2367_v63 = vadd.f32 %v2366_v59, %v11360_v16  ;;  %v2439_v1 = vpop.f32.mrb[215].mxu1  ;;  %3254 = vmatpush1.bf16.msra.mxu1 %v2604_v42  ;;  %v2508_v8 = vmax.f32 %v2434_v53, 0.0  ;;  %v2507_v10 = vmax.f32 %v2363_v54, 0.0 }
 0x2e3   : > { %v2522_v6 = vmax.f32 %v2365_v56, 0.0  ;;  %v2440_v44 = vadd.f32 %v2439_v1, %v11360_v16  ;;  %v2509_v15 = vmax.f32 %v2436_v5, 0.0 }
 0x2e4   : > { %v2524_v11 = vmax.f32 %v2438_v61, 0.0  ;;  %v2523_v26 = vmax.f32 %v2367_v63, 0.0 }
 0x2e5   : > { %v2618_v17 = vpack.c.bf16 %v2522_v6, %v2506_v3  ;;  %v2525_v62 = vmax.f32 %v2440_v44, 0.0 }
 0x2e6   : > { %v2620_v20 = vpack.c.bf16 %v2524_v11, %v2508_v8  ;;  %v2370_v9 = vpop.f32.mrb[216].mxu0  ;;  %v2619_v27 = vpack.c.bf16 %v2523_v26, %v2507_v10 }
 0x2e7   : > { %v2371_v30 = vadd.f32 %v2370_v9, %v11370_v57  ;;  %v2443_v31 = vpop.f32.mrb[216].mxu1  ;;  %v2372_v33 = vpop.f32.mrb[217].mxu0  ;;  %v2621_v12 = vpack.c.bf16 %v2525_v62, %v2509_v15 }
 0x2e8   : > { %v2444_v34 = vadd.f32 %v2443_v31, %v11370_v57  ;;  %v2373_v35 = vadd.f32 %v2372_v33, %v11370_v57  ;;  %v2445_v16 = vpop.f32.mrb[217].mxu1  ;;  %v2374_v36 = vpop.f32.mrb[218].mxu0  ;;  %3182 = vmatprep.subr.bf16.mxu0 %v2619_v27 }
 0x2e9   : > { %v2446_v38 = vadd.f32 %v2445_v16, %v11370_v57  ;;  %v2375_v39 = vadd.f32 %v2374_v36, %v11372_v14  ;;  %v2447_v40 = vpop.f32.mrb[218].mxu1  ;;  %3255 = vmatprep.subr.bf16.mxu1 %v2621_v12  ;;  %v2376_v43 = vpop.f32.mrb[219].mxu0  ;;  %3183 = vmatpush1.bf16.msra.mxu0 %v2618_v17  ;;  %v2538_v13 = vmax.f32 %v2371_v30, 0.0 }
 0x2ea   : > { %v2448_v18 = vadd.f32 %v2447_v40, %v11372_v14  ;;  %v2377_v48 = vadd.f32 %v2376_v43, %v11372_v14  ;;  %v2449_v21 = vpop.f32.mrb[219].mxu1  ;;  %3256 = vmatpush1.bf16.msra.mxu1 %v2620_v20  ;;  %v2540_v41 = vmax.f32 %v2444_v34, 0.0  ;;  %v2539_v4 = vmax.f32 %v2373_v35, 0.0 }
 0x2eb   : > { %v2554_v47 = vmax.f32 %v2375_v39, 0.0  ;;  %v2450_v52 = vadd.f32 %v2449_v21, %v11372_v14  ;;  %v2541_v2 = vmax.f32 %v2446_v38, 0.0 }
 0x2ec   : > { %v2556_v22 = vmax.f32 %v2448_v18, 0.0  ;;  %v2555_v57 = vmax.f32 %v2377_v48, 0.0 }
 0x2ed   : > { %v2634_v28 = vpack.c.bf16 %v2554_v47, %v2538_v13  ;;  %v2557_v60 = vmax.f32 %v2450_v52, 0.0 }
 0x2ee   : > { %v2636_v42 = vpack.c.bf16 %v2556_v22, %v2540_v41  ;;  %v2380_v45 = vpop.f32.mrb[220].mxu0  ;;  %v2635_v29 = vpack.c.bf16 %v2555_v57, %v2539_v4 }
 0x2ef   : > { %v2381_v55 = vadd.f32 %v2380_v45, %v11382_v25  ;;  %v2453_v49 = vpop.f32.mrb[220].mxu1  ;;  %v2382_v50 = vpop.f32.mrb[221].mxu0  ;;  %v2637_v51 = vpack.c.bf16 %v2557_v60, %v2541_v2 }
 0x2f0   : > { %v2454_v53 = vadd.f32 %v2453_v49, %v11382_v25  ;;  %v2383_v54 = vadd.f32 %v2382_v50, %v11382_v25  ;;  %v2455_v14 = vpop.f32.mrb[221].mxu1  ;;  %v2384_v23 = vpop.f32.mrb[222].mxu0  ;;  %3184 = vmatprep.subr.bf16.mxu0 %v2635_v29 }
 0x2f1   : > { %v2456_v24 = vadd.f32 %v2455_v14, %v11382_v25  ;;  %v2385_v5 = vadd.f32 %v2384_v23, %v11384_v32  ;;  %v2457_v56 = vpop.f32.mrb[222].mxu1  ;;  %3257 = vmatprep.subr.bf16.mxu1 %v2637_v51  ;;  %v2386_v58 = vpop.f32.mrb[223].mxu0  ;;  %3185 = vmatpush1.bf16.msra.mxu0 %v2634_v28  ;;  %v2570_v1 = vmax.f32 %v2381_v55, 0.0 }
 0x2f2   : > { %v2458_v59 = vadd.f32 %v2457_v56, %v11384_v32  ;;  %v2387_v61 = vadd.f32 %v2386_v58, %v11384_v32  ;;  %v2459_v63 = vpop.f32.mrb[223].mxu1  ;;  %3258 = vmatpush1.bf16.msra.mxu1 %v2636_v42  ;;  %v2572_v44 = vmax.f32 %v2454_v53, 0.0  ;;  %v2571_v8 = vmax.f32 %v2383_v54, 0.0 }
 0x2f3   : > { %v2586_v3 = vmax.f32 %v2385_v5, 0.0  ;;  %v2460_v6 = vadd.f32 %v2459_v63, %v11384_v32  ;;  %v2573_v11 = vmax.f32 %v2456_v24, 0.0  ;;  %v11606_v32 = vpop.permute.xlu0 %2672 }
 0x2f4   : > { %v2588_v10 = vmax.f32 %v2458_v59, 0.0  ;;  %v2587_v25 = vmax.f32 %v2387_v61, 0.0 }
 0x2f5   : > { %v2650_v26 = vpack.c.bf16 %v2586_v3, %v2570_v1  ;;  %v2589_v15 = vmax.f32 %v2460_v6, 0.0 }
 0x2f6   : > { %v2652_v17 = vpack.c.bf16 %v2588_v10, %v2572_v44  ;;  %v2651_v62 = vpack.c.bf16 %v2587_v25, %v2571_v8 }
 0x2f7   : > { %v2653_v20 = vpack.c.bf16 %v2589_v15, %v2573_v11  ;;  %v11618_v52 = vpop.permute.xlu0 %2682 }
 0x2f8   : > { %3186 = vmatprep.subr.bf16.mxu0 %v2651_v62 }
 0x2f9   : > { %3259 = vmatprep.subr.bf16.mxu1 %v2653_v20  ;;  %3187 = vmatpush1.bf16.msra.mxu0 %v2650_v26 }
 0x2fa   : > { %3260 = vmatpush1.bf16.msra.mxu1 %v2652_v17 }
 0x2fb   : > { %v11630_v8 = vpop.permute.xlu0 %2692 }
 0x2fc   : > { %9947 = vmatmul.mubr.msk.bf16.vlgmr.msra.gmra.mrb[40].mxu0 %vm1865_vm2, %v11400_v46 }
 0x2fd   : > { %9951 = vmatmul.mubr.msk.bf16.vlgmr.msra.gmra.mrb[40].mxu1 %vm1865_vm2, %v11400_v46  ;;  %3222 = vmatprep.mubr.bf16.mxu0 %v13744_v0  ;;  %v11608_v46 = vpop.permute.xlu1 %2677 }
 0x2fe   : > { %3295 = vmatprep.mubr.bf16.mxu1 %v13744_v0 }
 0x301   : > { %v11620_v57 = vpop.permute.xlu1 %2687 }
 0x304   : > { %9948 = vmatmul.mubr.msk.bf16.gmra.mrb[44].mxu0 %vm1865_vm2, %v11419_v37 }
 0x305   : > { %9952 = vmatmul.mubr.msk.bf16.gmra.mrb[44].mxu1 %vm1865_vm2, %v11419_v37  ;;  %3232 = vmatprep.mubr.bf16.mxu0 %v13744_v0  ;;  %v11632_v26 = vpop.permute.xlu1 %2697 }
 0x306   : > { %3305 = vmatprep.mubr.bf16.mxu1 %v13744_v0 }
 0x30c   : > { %9949 = vmatmul.mubr.msk.bf16.gmra.mrb[48].mxu0 %vm1865_vm2, %v11438_v7 }
 0x30d   : > { %9953 = vmatmul.mubr.msk.bf16.gmra.mrb[48].mxu1 %vm1865_vm2, %v11438_v7  ;;  %3242 = vmatprep.mubr.bf16.mxu0 %v13744_v0 }
 0x30e   : > { %3315 = vmatprep.mubr.bf16.mxu1 %v13744_v0 }
 0x314   : > { %9950 = vmatmul.mubr.msk.bf16.gmra.mrb[52].mxu0 %vm1865_vm2, %v11457_v19 }
 0x315   : > { %9954 = vmatmul.mubr.msk.bf16.gmra.mrb[52].mxu1 %vm1865_vm2, %v11457_v19  ;;  %3638 = vmatprep.mubr.bf16.mxu0 %v13744_v0 }
 0x316   : > { %3711 = vmatprep.mubr.bf16.mxu1 %v13744_v0 }
 0x326   : > { %v2776_v37 = vpop.f32.mrb[224].mxu0 }
 0x327   : > { %v2777_v7 = vadd.f32 %v2776_v37, %v11606_v32  ;;  %v2849_v9 = vpop.f32.mrb[224].mxu1  ;;  %v2778_v27 = vpop.f32.mrb[225].mxu0 }
 0x328   : > { %v2850_v30 = vadd.f32 %v2849_v9, %v11606_v32  ;;  %v2779_v31 = vadd.f32 %v2778_v27, %v11606_v32  ;;  %v2851_v33 = vpop.f32.mrb[225].mxu1  ;;  %v2780_v12 = vpop.f32.mrb[226].mxu0 }
 0x329   : > { %v2852_v19 = vadd.f32 %v2851_v33, %v11606_v32  ;;  %v2781_v34 = vadd.f32 %v2780_v12, %v11608_v46  ;;  %v2853_v35 = vpop.f32.mrb[226].mxu1  ;;  %v2782_v16 = vpop.f32.mrb[227].mxu0  ;;  %v3326_v40 = vmax.f32 %v2777_v7, 0.0 }
 0x32a   : > { %v2854_v36 = vadd.f32 %v2853_v35, %v11608_v46  ;;  %v2783_v38 = vadd.f32 %v2782_v16, %v11608_v46  ;;  %v2855_v39 = vpop.f32.mrb[227].mxu1  ;;  %v3328_v48 = vmax.f32 %v2850_v30, 0.0  ;;  %v3327_v21 = vmax.f32 %v2779_v31, 0.0 }
 0x32b   : > { %v3342_v43 = vmax.f32 %v2781_v34, 0.0  ;;  %v2856_v18 = vadd.f32 %v2855_v39, %v11608_v46  ;;  %v3329_v41 = vmax.f32 %v2852_v19, 0.0 }
 0x32c   : > { %v3344_v13 = vmax.f32 %v2854_v36, 0.0  ;;  %v3343_v47 = vmax.f32 %v2783_v38, 0.0 }
 0x32d   : > { %v3454_v4 = vpack.c.bf16 %v3342_v43, %v3326_v40  ;;  %v3345_v22 = vmax.f32 %v2856_v18, 0.0 }
 0x32e   : > { %v3456_v2 = vpack.c.bf16 %v3344_v13, %v3328_v48  ;;  %v2786_v28 = vpop.f32.mrb[228].mxu0  ;;  %v3455_v60 = vpack.c.bf16 %v3343_v47, %v3327_v21  ;;  %v11642_v47 = vpop.permute.xlu0 %2702 }
 0x32f   : > { %v2787_v42 = vadd.f32 %v2786_v28, %v11618_v52  ;;  %v2859_v45 = vpop.f32.mrb[228].mxu1  ;;  %v2788_v29 = vpop.f32.mrb[229].mxu0  ;;  %v3457_v55 = vpack.c.bf16 %v3345_v22, %v3329_v41 }
 0x330   : > { %v2860_v49 = vadd.f32 %v2859_v45, %v11618_v52  ;;  %v2789_v50 = vadd.f32 %v2788_v29, %v11618_v52  ;;  %v2861_v51 = vpop.f32.mrb[229].mxu1  ;;  %v2790_v53 = vpop.f32.mrb[230].mxu0  ;;  %3606 = vmatprep.subr.bf16.mxu0 %v3455_v60 }
 0x331   : > { %v2862_v54 = vadd.f32 %v2861_v51, %v11618_v52  ;;  %v2791_v14 = vadd.f32 %v2790_v53, %v11620_v57  ;;  %v2863_v23 = vpop.f32.mrb[230].mxu1  ;;  %3679 = vmatprep.subr.bf16.mxu1 %v3457_v55  ;;  %v2792_v24 = vpop.f32.mrb[231].mxu0  ;;  %3607 = vmatpush1.bf16.msra.mxu0 %v3454_v4  ;;  %v3358_v59 = vmax.f32 %v2787_v42, 0.0 }
 0x332   : > { %v2864_v5 = vadd.f32 %v2863_v23, %v11620_v57  ;;  %v2793_v56 = vadd.f32 %v2792_v24, %v11620_v57  ;;  %v2865_v58 = vpop.f32.mrb[231].mxu1  ;;  %3680 = vmatpush1.bf16.msra.mxu1 %v3456_v2  ;;  %v3360_v1 = vmax.f32 %v2860_v49, 0.0  ;;  %v3359_v3 = vmax.f32 %v2789_v50, 0.0  ;;  %v11644_v2 = vpop.permute.xlu1 %2707 }
 0x333   : > { %v3374_v61 = vmax.f32 %v2791_v14, 0.0  ;;  %v2866_v63 = vadd.f32 %v2865_v58, %v11620_v57  ;;  %v3361_v10 = vmax.f32 %v2862_v54, 0.0 }
 0x334   : > { %v3376_v6 = vmax.f32 %v2864_v5, 0.0  ;;  %v3375_v44 = vmax.f32 %v2793_v56, 0.0 }
 0x335   : > { %v3470_v25 = vpack.c.bf16 %v3374_v61, %v3358_v59  ;;  %v3377_v11 = vmax.f32 %v2866_v63, 0.0 }
 0x336   : > { %v3472_v15 = vpack.c.bf16 %v3376_v6, %v3360_v1  ;;  %v2796_v17 = vpop.f32.mrb[232].mxu0  ;;  %v3471_v62 = vpack.c.bf16 %v3375_v44, %v3359_v3 }
 0x337   : > { %v2797_v20 = vadd.f32 %v2796_v17, %v11630_v8  ;;  %v2869_v37 = vpop.f32.mrb[232].mxu1  ;;  %v2798_v7 = vpop.f32.mrb[233].mxu0  ;;  %v3473_v9 = vpack.c.bf16 %v3377_v11, %v3361_v10 }
 0x338   : > { %v2870_v27 = vadd.f32 %v2869_v37, %v11630_v8  ;;  %v2799_v30 = vadd.f32 %v2798_v7, %v11630_v8  ;;  %v2871_v31 = vpop.f32.mrb[233].mxu1  ;;  %v2800_v33 = vpop.f32.mrb[234].mxu0  ;;  %3608 = vmatprep.subr.bf16.mxu0 %v3471_v62 }
 0x339   : > { %v2872_v12 = vadd.f32 %v2871_v31, %v11630_v8  ;;  %v2801_v19 = vadd.f32 %v2800_v33, %v11632_v26  ;;  %v2873_v34 = vpop.f32.mrb[234].mxu1  ;;  %3681 = vmatprep.subr.bf16.mxu1 %v3473_v9  ;;  %v2802_v35 = vpop.f32.mrb[235].mxu0  ;;  %3609 = vmatpush1.bf16.msra.mxu0 %v3470_v25  ;;  %v3390_v39 = vmax.f32 %v2797_v20, 0.0 }
 0x33a   : > { %v2874_v16 = vadd.f32 %v2873_v34, %v11632_v26  ;;  %v2803_v36 = vadd.f32 %v2802_v35, %v11632_v26  ;;  %v2875_v38 = vpop.f32.mrb[235].mxu1  ;;  %3682 = vmatpush1.bf16.msra.mxu1 %v3472_v15  ;;  %v3392_v18 = vmax.f32 %v2870_v27, 0.0  ;;  %v3391_v48 = vmax.f32 %v2799_v30, 0.0 }
 0x33b   : > { %v3406_v40 = vmax.f32 %v2801_v19, 0.0  ;;  %v2876_v43 = vadd.f32 %v2875_v38, %v11632_v26  ;;  %v3393_v41 = vmax.f32 %v2872_v12, 0.0  ;;  %v11660_v19 = vld [vmem:[%s13741_s1 + $0x90] sm:$0xff]  }
 0x33c   : > { %v3408_v21 = vmax.f32 %v2874_v16, 0.0  ;;  %v3407_v13 = vmax.f32 %v2803_v36, 0.0 }
 0x33d   : > { %v3486_v4 = vpack.c.bf16 %v3406_v40, %v3390_v39  ;;  %v3409_v22 = vmax.f32 %v2876_v43, 0.0 }
 0x33e   : > { %v3488_v28 = vpack.c.bf16 %v3408_v21, %v3392_v18  ;;  %v2806_v60 = vpop.f32.mrb[236].mxu0  ;;  %v3487_v42 = vpack.c.bf16 %v3407_v13, %v3391_v48 }
 0x33f   : > { %v2807_v45 = vadd.f32 %v2806_v60, %v11642_v47  ;;  %v2879_v29 = vpop.f32.mrb[236].mxu1  ;;  %v2808_v55 = vpop.f32.mrb[237].mxu0  ;;  %v3489_v49 = vpack.c.bf16 %v3409_v22, %v3393_v41 }
 0x340   : > { %v2880_v50 = vadd.f32 %v2879_v29, %v11642_v47  ;;  %v2809_v51 = vadd.f32 %v2808_v55, %v11642_v47  ;;  %v2881_v53 = vpop.f32.mrb[237].mxu1  ;;  %v2810_v54 = vpop.f32.mrb[238].mxu0  ;;  %3610 = vmatprep.subr.bf16.mxu0 %v3487_v42 }
 0x341   : > { %v2882_v14 = vadd.f32 %v2881_v53, %v11642_v47  ;;  %v2811_v23 = vadd.f32 %v2810_v54, %v11644_v2  ;;  %v2883_v24 = vpop.f32.mrb[238].mxu1  ;;  %3683 = vmatprep.subr.bf16.mxu1 %v3489_v49  ;;  %v2812_v5 = vpop.f32.mrb[239].mxu0  ;;  %3611 = vmatpush1.bf16.msra.mxu0 %v3486_v4  ;;  %v3422_v61 = vmax.f32 %v2807_v45, 0.0 }
 0x342   : > { %v2884_v56 = vadd.f32 %v2883_v24, %v11644_v2  ;;  %v2813_v58 = vadd.f32 %v2812_v5, %v11644_v2  ;;  %v2885_v59 = vpop.f32.mrb[239].mxu1  ;;  %3684 = vmatpush1.bf16.msra.mxu1 %v3488_v28  ;;  %v3424_v3 = vmax.f32 %v2880_v50, 0.0  ;;  %v3423_v6 = vmax.f32 %v2809_v51, 0.0  ;;  %v11679_v24 = vld [vmem:[%s13741_s1 + $0x98] sm:$0xff]  }
 0x343   : > { %v3438_v63 = vmax.f32 %v2811_v23, 0.0  ;;  %v2886_v1 = vadd.f32 %v2885_v59, %v11644_v2  ;;  %v3425_v25 = vmax.f32 %v2882_v14, 0.0 }
 0x344   : > { %v3440_v44 = vmax.f32 %v2884_v56, 0.0  ;;  %v3439_v10 = vmax.f32 %v2813_v58, 0.0 }
 0x345   : > { %v3502_v11 = vpack.c.bf16 %v3438_v63, %v3422_v61  ;;  %v3441_v15 = vmax.f32 %v2886_v1, 0.0 }
 0x346   : > { %v3504_v17 = vpack.c.bf16 %v3440_v44, %v3424_v3  ;;  %v2922_v62 = vpop.f32.mrb[240].mxu0  ;;  %v3503_v20 = vpack.c.bf16 %v3439_v10, %v3423_v6 }
 0x347   : > { %v2923_v37 = vadd.f32 %v2922_v62, %v11606_v32  ;;  %v2995_v7 = vpop.f32.mrb[240].mxu1  ;;  %v2924_v9 = vpop.f32.mrb[241].mxu0  ;;  %v3505_v27 = vpack.c.bf16 %v3441_v15, %v3425_v25 }
 0x348   : > { %v2996_v30 = vadd.f32 %v2995_v7, %v11606_v32  ;;  %v2925_v31 = vadd.f32 %v2924_v9, %v11606_v32  ;;  %v2997_v33 = vpop.f32.mrb[241].mxu1  ;;  %v2926_v12 = vpop.f32.mrb[242].mxu0  ;;  %3612 = vmatprep.subr.bf16.mxu0 %v3503_v20 }
 0x349   : > { %v2998_v34 = vadd.f32 %v2997_v33, %v11606_v32  ;;  %v2927_v35 = vadd.f32 %v2926_v12, %v11608_v46  ;;  %v2999_v16 = vpop.f32.mrb[242].mxu1  ;;  %3685 = vmatprep.subr.bf16.mxu1 %v3505_v27  ;;  %v2928_v36 = vpop.f32.mrb[243].mxu0  ;;  %3613 = vmatpush1.bf16.msra.mxu0 %v3502_v11  ;;  %v3330_v43 = vmax.f32 %v2923_v37, 0.0 }
 0x34a   : > { %v3000_v38 = vadd.f32 %v2999_v16, %v11608_v46  ;;  %v2929_v39 = vadd.f32 %v2928_v36, %v11608_v46  ;;  %v3001_v40 = vpop.f32.mrb[243].mxu1  ;;  %3686 = vmatpush1.bf16.msra.mxu1 %v3504_v17  ;;  %v3332_v21 = vmax.f32 %v2996_v30, 0.0  ;;  %v3331_v13 = vmax.f32 %v2925_v31, 0.0  ;;  %v11698_v36 = vld [vmem:[%s13741_s1 + $0xa0] sm:$0xff]  }
 0x34b   : > { %v3346_v18 = vmax.f32 %v2927_v35, 0.0  ;;  %v3002_v48 = vadd.f32 %v3001_v40, %v11608_v46  ;;  %v3333_v22 = vmax.f32 %v2998_v34, 0.0 }
 0x34c   : > { %v3348_v41 = vmax.f32 %v3000_v38, 0.0  ;;  %v3347_v4 = vmax.f32 %v2929_v39, 0.0  ;;  %9959 = vmatmul.mubr.msk.bf16.vlgmr.msra.gmra.mrb[80].mxu0 %vm1865_vm2, %v11660_v19 }
 0x34d   : > { %v3458_v28 = vpack.c.bf16 %v3346_v18, %v3330_v43  ;;  %v3349_v60 = vmax.f32 %v3002_v48, 0.0  ;;  %9963 = vmatmul.mubr.msk.bf16.vlgmr.msra.gmra.mrb[80].mxu1 %vm1865_vm2, %v11660_v19  ;;  %3648 = vmatprep.mubr.bf16.mxu0 %v13744_v0 }
 0x34e   : > { %v3460_v42 = vpack.c.bf16 %v3348_v41, %v3332_v21  ;;  %v2932_v45 = vpop.f32.mrb[244].mxu0  ;;  %v3459_v29 = vpack.c.bf16 %v3347_v4, %v3331_v13  ;;  %3721 = vmatprep.mubr.bf16.mxu1 %v13744_v0 }
 0x34f   : > { %v2933_v55 = vadd.f32 %v2932_v45, %v11618_v52  ;;  %v3005_v49 = vpop.f32.mrb[244].mxu1  ;;  %v2934_v50 = vpop.f32.mrb[245].mxu0  ;;  %v3461_v51 = vpack.c.bf16 %v3349_v60, %v3333_v22 }
 0x350   : > { %v3006_v53 = vadd.f32 %v3005_v49, %v11618_v52  ;;  %v2935_v54 = vadd.f32 %v2934_v50, %v11618_v52  ;;  %v3007_v14 = vpop.f32.mrb[245].mxu1  ;;  %v2936_v23 = vpop.f32.mrb[246].mxu0  ;;  %3752 = vmatprep.subr.bf16.mxu0 %v3459_v29 }
 0x351   : > { %v3008_v5 = vadd.f32 %v3007_v14, %v11618_v52  ;;  %v2937_v56 = vadd.f32 %v2936_v23, %v11620_v57  ;;  %v3009_v58 = vpop.f32.mrb[246].mxu1  ;;  %3825 = vmatprep.subr.bf16.mxu1 %v3461_v51  ;;  %v2938_v59 = vpop.f32.mrb[247].mxu0  ;;  %3753 = vmatpush1.bf16.msra.mxu0 %v3458_v28  ;;  %v3362_v3 = vmax.f32 %v2933_v55, 0.0 }
 0x352   : > { %v3010_v61 = vadd.f32 %v3009_v58, %v11620_v57  ;;  %v2939_v63 = vadd.f32 %v2938_v59, %v11620_v57  ;;  %v3011_v1 = vpop.f32.mrb[247].mxu1  ;;  %3826 = vmatpush1.bf16.msra.mxu1 %v3460_v42  ;;  %v3364_v10 = vmax.f32 %v3006_v53, 0.0  ;;  %v3363_v25 = vmax.f32 %v2935_v54, 0.0 }
 0x353   : > { %v3378_v6 = vmax.f32 %v2937_v56, 0.0  ;;  %v3012_v44 = vadd.f32 %v3011_v1, %v11620_v57  ;;  %v3365_v17 = vmax.f32 %v3008_v5, 0.0 }
 0x354   : > { %v3380_v11 = vmax.f32 %v3010_v61, 0.0  ;;  %v3379_v15 = vmax.f32 %v2939_v63, 0.0  ;;  %9960 = vmatmul.mubr.msk.bf16.gmra.mrb[84].mxu0 %vm1865_vm2, %v11679_v24  ;;  %v11717_v61 = vld [vmem:[%s13741_s1 + $0xa8] sm:$0xff]  }
 0x355   : > { %v3474_v62 = vpack.c.bf16 %v3378_v6, %v3362_v3  ;;  %v3381_v20 = vmax.f32 %v3012_v44, 0.0  ;;  %9964 = vmatmul.mubr.msk.bf16.gmra.mrb[84].mxu1 %vm1865_vm2, %v11679_v24  ;;  %3658 = vmatprep.mubr.bf16.mxu0 %v13744_v0 }
 0x356   : > { %v3476_v37 = vpack.c.bf16 %v3380_v11, %v3364_v10  ;;  %v2942_v7 = vpop.f32.mrb[248].mxu0  ;;  %v3475_v9 = vpack.c.bf16 %v3379_v15, %v3363_v25  ;;  %3731 = vmatprep.mubr.bf16.mxu1 %v13744_v0 }
 0x357   : > { %v2943_v27 = vadd.f32 %v2942_v7, %v11630_v8  ;;  %v3015_v30 = vpop.f32.mrb[248].mxu1  ;;  %v2944_v31 = vpop.f32.mrb[249].mxu0  ;;  %v3477_v33 = vpack.c.bf16 %v3381_v20, %v3365_v17 }
 0x358   : > { %v3016_v12 = vadd.f32 %v3015_v30, %v11630_v8  ;;  %v2945_v34 = vadd.f32 %v2944_v31, %v11630_v8  ;;  %v3017_v35 = vpop.f32.mrb[249].mxu1  ;;  %v2946_v16 = vpop.f32.mrb[250].mxu0  ;;  %3754 = vmatprep.subr.bf16.mxu0 %v3475_v9 }
 0x359   : > { %v3018_v38 = vadd.f32 %v3017_v35, %v11630_v8  ;;  %v2947_v39 = vadd.f32 %v2946_v16, %v11632_v26  ;;  %v3019_v40 = vpop.f32.mrb[250].mxu1  ;;  %3827 = vmatprep.subr.bf16.mxu1 %v3477_v33  ;;  %v2948_v43 = vpop.f32.mrb[251].mxu0  ;;  %3755 = vmatpush1.bf16.msra.mxu0 %v3474_v62  ;;  %v3394_v13 = vmax.f32 %v2943_v27, 0.0 }
 0x35a   : > { %v3020_v18 = vadd.f32 %v3019_v40, %v11632_v26  ;;  %v2949_v48 = vadd.f32 %v2948_v43, %v11632_v26  ;;  %v3021_v21 = vpop.f32.mrb[251].mxu1  ;;  %3828 = vmatpush1.bf16.msra.mxu1 %v3476_v37  ;;  %v3396_v22 = vmax.f32 %v3016_v12, 0.0  ;;  %v3395_v28 = vmax.f32 %v2945_v34, 0.0 }
 0x35b   : > { %v3410_v41 = vmax.f32 %v2947_v39, 0.0  ;;  %v3022_v4 = vadd.f32 %v3021_v21, %v11632_v26  ;;  %v3397_v45 = vmax.f32 %v3018_v38, 0.0 }
 0x35c   : > { %v3412_v60 = vmax.f32 %v3020_v18, 0.0  ;;  %v3411_v42 = vmax.f32 %v2949_v48, 0.0  ;;  %9961 = vmatmul.mubr.msk.bf16.gmra.mrb[88].mxu0 %vm1865_vm2, %v11698_v36 }
 0x35d   : > { %v3490_v29 = vpack.c.bf16 %v3410_v41, %v3394_v13  ;;  %v3413_v55 = vmax.f32 %v3022_v4, 0.0  ;;  %9965 = vmatmul.mubr.msk.bf16.gmra.mrb[88].mxu1 %vm1865_vm2, %v11698_v36  ;;  %3668 = vmatprep.mubr.bf16.mxu0 %v13744_v0 }
 0x35e   : > { %v3492_v49 = vpack.c.bf16 %v3412_v60, %v3396_v22  ;;  %v2952_v50 = vpop.f32.mrb[252].mxu0  ;;  %v3491_v51 = vpack.c.bf16 %v3411_v42, %v3395_v28  ;;  %3741 = vmatprep.mubr.bf16.mxu1 %v13744_v0 }
 0x35f   : > { %v2953_v53 = vadd.f32 %v2952_v50, %v11642_v47  ;;  %v3025_v54 = vpop.f32.mrb[252].mxu1  ;;  %v2954_v14 = vpop.f32.mrb[253].mxu0  ;;  %v3493_v23 = vpack.c.bf16 %v3413_v55, %v3397_v45 }
 0x360   : > { %v3026_v5 = vadd.f32 %v3025_v54, %v11642_v47  ;;  %v2955_v56 = vadd.f32 %v2954_v14, %v11642_v47  ;;  %v3027_v58 = vpop.f32.mrb[253].mxu1  ;;  %v2956_v59 = vpop.f32.mrb[254].mxu0  ;;  %3756 = vmatprep.subr.bf16.mxu0 %v3491_v51 }
 0x361   : > { %v3028_v63 = vadd.f32 %v3027_v58, %v11642_v47  ;;  %v2957_v1 = vadd.f32 %v2956_v59, %v11644_v2  ;;  %v3029_v3 = vpop.f32.mrb[254].mxu1  ;;  %3829 = vmatprep.subr.bf16.mxu1 %v3493_v23  ;;  %v2958_v6 = vpop.f32.mrb[255].mxu0  ;;  %3757 = vmatpush1.bf16.msra.mxu0 %v3490_v29  ;;  %v3426_v11 = vmax.f32 %v2953_v53, 0.0 }
 0x362   : > { %v3030_v44 = vadd.f32 %v3029_v3, %v11644_v2  ;;  %v2959_v10 = vadd.f32 %v2958_v6, %v11644_v2  ;;  %v3031_v25 = vpop.f32.mrb[255].mxu1  ;;  %3830 = vmatpush1.bf16.msra.mxu1 %v3492_v49  ;;  %v3428_v62 = vmax.f32 %v3026_v5, 0.0  ;;  %v3427_v20 = vmax.f32 %v2955_v56, 0.0 }
 0x363   : > { %v3442_v15 = vmax.f32 %v2957_v1, 0.0  ;;  %v3032_v17 = vadd.f32 %v3031_v25, %v11644_v2  ;;  %v3429_v9 = vmax.f32 %v3028_v63, 0.0 }
 0x364   : > { %v3444_v37 = vmax.f32 %v3030_v44, 0.0  ;;  %v3443_v7 = vmax.f32 %v2959_v10, 0.0  ;;  %9962 = vmatmul.mubr.msk.bf16.gmra.mrb[92].mxu0 %vm1865_vm2, %v11717_v61 }
 0x365   : > { %v3506_v27 = vpack.c.bf16 %v3442_v15, %v3426_v11  ;;  %v3445_v30 = vmax.f32 %v3032_v17, 0.0  ;;  %9966 = vmatmul.mubr.msk.bf16.gmra.mrb[92].mxu1 %vm1865_vm2, %v11717_v61  ;;  %3784 = vmatprep.mubr.bf16.mxu0 %v13744_v0 }
 0x366   : > { %v3508_v31 = vpack.c.bf16 %v3444_v37, %v3428_v62  ;;  %v3507_v33 = vpack.c.bf16 %v3443_v7, %v3427_v20  ;;  %3857 = vmatprep.mubr.bf16.mxu1 %v13744_v0 }
 0x367   : > { %v3509_v12 = vpack.c.bf16 %v3445_v30, %v3429_v9 }
 0x368   : > { %3758 = vmatprep.subr.bf16.mxu0 %v3507_v33 }
 0x369   : > { %3831 = vmatprep.subr.bf16.mxu1 %v3509_v12  ;;  %3759 = vmatpush1.bf16.msra.mxu0 %v3506_v27 }
 0x36a   : > { %3832 = vmatpush1.bf16.msra.mxu1 %v3508_v31 }
 0x36c   : > { %9967 = vmatmul.mubr.msk.bf16.vlgmr.msra.gmra.mrb[120].mxu0 %vm1865_vm2, %v11660_v19 }
 0x36d   : > { %9971 = vmatmul.mubr.msk.bf16.vlgmr.msra.gmra.mrb[120].mxu1 %vm1865_vm2, %v11660_v19  ;;  %3794 = vmatprep.mubr.bf16.mxu0 %v13744_v0 }
 0x36e   : > { %3867 = vmatprep.mubr.bf16.mxu1 %v13744_v0 }
 0x374   : > { %9968 = vmatmul.mubr.msk.bf16.gmra.mrb[124].mxu0 %vm1865_vm2, %v11679_v24 }
 0x375   : > { %9972 = vmatmul.mubr.msk.bf16.gmra.mrb[124].mxu1 %vm1865_vm2, %v11679_v24  ;;  %3804 = vmatprep.mubr.bf16.mxu0 %v13744_v0 }
 0x376   : > { %3877 = vmatprep.mubr.bf16.mxu1 %v13744_v0 }
 0x37c   : > { %9969 = vmatmul.mubr.msk.bf16.gmra.mrb[128].mxu0 %vm1865_vm2, %v11698_v36 }
 0x37d   : > { %9973 = vmatmul.mubr.msk.bf16.gmra.mrb[128].mxu1 %vm1865_vm2, %v11698_v36  ;;  %3814 = vmatprep.mubr.bf16.mxu0 %v13744_v0 }
 0x37e   : > { %3887 = vmatprep.mubr.bf16.mxu1 %v13744_v0 }
 0x37f   : > { %v3068_v34 = vpop.f32.mrb[0].mxu0 }
 0x380   : > { %v3069_v35 = vadd.f32 %v3068_v34, %v11606_v32  ;;  %v3141_v16 = vpop.f32.mrb[0].mxu1  ;;  %v3070_v38 = vpop.f32.mrb[1].mxu0 }
 0x381   : > { %v3142_v39 = vadd.f32 %v3141_v16, %v11606_v32  ;;  %v3071_v40 = vadd.f32 %v3070_v38, %v11606_v32  ;;  %v3143_v43 = vpop.f32.mrb[1].mxu1  ;;  %v3072_v18 = vpop.f32.mrb[2].mxu0 }
 0x382   : > { %v3144_v48 = vadd.f32 %v3143_v43, %v11606_v32  ;;  %v3073_v21 = vadd.f32 %v3072_v18, %v11608_v46  ;;  %v3145_v13 = vpop.f32.mrb[2].mxu1  ;;  %v3074_v41 = vpop.f32.mrb[3].mxu0  ;;  %v3334_v60 = vmax.f32 %v3069_v35, 0.0 }
 0x383   : > { %v3146_v4 = vadd.f32 %v3145_v13, %v11608_v46  ;;  %v3075_v22 = vadd.f32 %v3074_v41, %v11608_v46  ;;  %v3147_v28 = vpop.f32.mrb[3].mxu1  ;;  %v3336_v29 = vmax.f32 %v3142_v39, 0.0  ;;  %v3335_v55 = vmax.f32 %v3071_v40, 0.0 }
 0x384   : > { %v3350_v42 = vmax.f32 %v3073_v21, 0.0  ;;  %v3148_v45 = vadd.f32 %v3147_v28, %v11608_v46  ;;  %9970 = vmatmul.mubr.msk.bf16.gmra.mrb[132].mxu0 %vm1865_vm2, %v11717_v61  ;;  %v3337_v51 = vmax.f32 %v3144_v48, 0.0 }
 0x385   : > { %v3352_v49 = vmax.f32 %v3146_v4, 0.0  ;;  %v3351_v50 = vmax.f32 %v3075_v22, 0.0  ;;  %9974 = vmatmul.mubr.msk.bf16.gmra.mrb[132].mxu1 %vm1865_vm2, %v11717_v61  ;;  %3930 = vmatprep.mubr.bf16.mxu0 %v13744_v0 }
 0x386   : > { %v3462_v53 = vpack.c.bf16 %v3350_v42, %v3334_v60  ;;  %v3353_v54 = vmax.f32 %v3148_v45, 0.0  ;;  %4003 = vmatprep.mubr.bf16.mxu1 %v13744_v0 }
 0x387   : > { %v3464_v14 = vpack.c.bf16 %v3352_v49, %v3336_v29  ;;  %v3078_v23 = vpop.f32.mrb[4].mxu0  ;;  %v3463_v5 = vpack.c.bf16 %v3351_v50, %v3335_v55 }
 0x388   : > { %v3079_v56 = vadd.f32 %v3078_v23, %v11618_v52  ;;  %v3151_v58 = vpop.f32.mrb[4].mxu1  ;;  %v3080_v59 = vpop.f32.mrb[5].mxu0  ;;  %v3465_v63 = vpack.c.bf16 %v3353_v54, %v3337_v51 }
 0x389   : > { %v3152_v1 = vadd.f32 %v3151_v58, %v11618_v52  ;;  %v3081_v3 = vadd.f32 %v3080_v59, %v11618_v52  ;;  %v3153_v6 = vpop.f32.mrb[5].mxu1  ;;  %v3082_v44 = vpop.f32.mrb[6].mxu0  ;;  %3898 = vmatprep.subr.bf16.mxu0 %v3463_v5 }
 0x38a   : > { %v3154_v10 = vadd.f32 %v3153_v6, %v11618_v52  ;;  %v3083_v25 = vadd.f32 %v3082_v44, %v11620_v57  ;;  %v3155_v11 = vpop.f32.mrb[6].mxu1  ;;  %3971 = vmatprep.subr.bf16.mxu1 %v3465_v63  ;;  %v3084_v15 = vpop.f32.mrb[7].mxu0  ;;  %3899 = vmatpush1.bf16.msra.mxu0 %v3462_v53  ;;  %v3366_v37 = vmax.f32 %v3079_v56, 0.0 }
 0x38b   : > { %v3156_v17 = vadd.f32 %v3155_v11, %v11620_v57  ;;  %v3085_v62 = vadd.f32 %v3084_v15, %v11620_v57  ;;  %v3157_v20 = vpop.f32.mrb[7].mxu1  ;;  %3972 = vmatpush1.bf16.msra.mxu1 %v3464_v14  ;;  %v3368_v27 = vmax.f32 %v3152_v1, 0.0  ;;  %v3367_v30 = vmax.f32 %v3081_v3, 0.0 }
 0x38c   : > { %v3382_v7 = vmax.f32 %v3083_v25, 0.0  ;;  %v3158_v9 = vadd.f32 %v3157_v20, %v11620_v57  ;;  %v3369_v12 = vmax.f32 %v3154_v10, 0.0 }
 0x38d   : > { %v3384_v31 = vmax.f32 %v3156_v17, 0.0  ;;  %v3383_v33 = vmax.f32 %v3085_v62, 0.0 }
 0x38e   : > { %v3478_v34 = vpack.c.bf16 %v3382_v7, %v3366_v37  ;;  %v3385_v35 = vmax.f32 %v3158_v9, 0.0 }
 0x38f   : > { %v3480_v16 = vpack.c.bf16 %v3384_v31, %v3368_v27  ;;  %v3088_v38 = vpop.f32.mrb[8].mxu0  ;;  %v3479_v39 = vpack.c.bf16 %v3383_v33, %v3367_v30 }
 0x390   : > { %v3089_v40 = vadd.f32 %v3088_v38, %v11630_v8  ;;  %v3161_v43 = vpop.f32.mrb[8].mxu1  ;;  %v3090_v18 = vpop.f32.mrb[9].mxu0  ;;  %v3481_v48 = vpack.c.bf16 %v3385_v35, %v3369_v12 }
 0x391   : > { %v3162_v21 = vadd.f32 %v3161_v43, %v11630_v8  ;;  %v3091_v13 = vadd.f32 %v3090_v18, %v11630_v8  ;;  %v3163_v41 = vpop.f32.mrb[9].mxu1  ;;  %v3092_v4 = vpop.f32.mrb[10].mxu0  ;;  %3900 = vmatprep.subr.bf16.mxu0 %v3479_v39 }
 0x392   : > { %v3164_v22 = vadd.f32 %v3163_v41, %v11630_v8  ;;  %v3093_v28 = vadd.f32 %v3092_v4, %v11632_v26  ;;  %v3165_v60 = vpop.f32.mrb[10].mxu1  ;;  %3973 = vmatprep.subr.bf16.mxu1 %v3481_v48  ;;  %v3094_v42 = vpop.f32.mrb[11].mxu0  ;;  %3901 = vmatpush1.bf16.msra.mxu0 %v3478_v34  ;;  %v3398_v49 = vmax.f32 %v3089_v40, 0.0 }
 0x393   : > { %v3166_v45 = vadd.f32 %v3165_v60, %v11632_v26  ;;  %v3095_v29 = vadd.f32 %v3094_v42, %v11632_v26  ;;  %v3167_v55 = vpop.f32.mrb[11].mxu1  ;;  %3974 = vmatpush1.bf16.msra.mxu1 %v3480_v16  ;;  %v3400_v53 = vmax.f32 %v3162_v21, 0.0  ;;  %v3399_v54 = vmax.f32 %v3091_v13, 0.0 }
 0x394   : > { %v3414_v50 = vmax.f32 %v3093_v28, 0.0  ;;  %v3168_v51 = vadd.f32 %v3167_v55, %v11632_v26  ;;  %v3401_v5 = vmax.f32 %v3164_v22, 0.0 }
 0x395   : > { %v3416_v14 = vmax.f32 %v3166_v45, 0.0  ;;  %v3415_v23 = vmax.f32 %v3095_v29, 0.0 }
 0x396   : > { %v3494_v56 = vpack.c.bf16 %v3414_v50, %v3398_v49  ;;  %v3417_v58 = vmax.f32 %v3168_v51, 0.0 }
 0x397   : > { %v3496_v59 = vpack.c.bf16 %v3416_v14, %v3400_v53  ;;  %v3098_v63 = vpop.f32.mrb[12].mxu0  ;;  %v3495_v1 = vpack.c.bf16 %v3415_v23, %v3399_v54 }
 0x398   : > { %v3099_v3 = vadd.f32 %v3098_v63, %v11642_v47  ;;  %v3171_v6 = vpop.f32.mrb[12].mxu1  ;;  %v3100_v44 = vpop.f32.mrb[13].mxu0  ;;  %v3497_v10 = vpack.c.bf16 %v3417_v58, %v3401_v5 }
 0x399   : > { %v3172_v25 = vadd.f32 %v3171_v6, %v11642_v47  ;;  %v3101_v11 = vadd.f32 %v3100_v44, %v11642_v47  ;;  %v3173_v15 = vpop.f32.mrb[13].mxu1  ;;  %v3102_v17 = vpop.f32.mrb[14].mxu0  ;;  %3902 = vmatprep.subr.bf16.mxu0 %v3495_v1 }
 0x39a   : > { %v3174_v62 = vadd.f32 %v3173_v15, %v11642_v47  ;;  %v3103_v20 = vadd.f32 %v3102_v17, %v11644_v2  ;;  %v3175_v37 = vpop.f32.mrb[14].mxu1  ;;  %3975 = vmatprep.subr.bf16.mxu1 %v3497_v10  ;;  %v3104_v7 = vpop.f32.mrb[15].mxu0  ;;  %3903 = vmatpush1.bf16.msra.mxu0 %v3494_v56  ;;  %v3430_v31 = vmax.f32 %v3099_v3, 0.0 }
 0x39b   : > { %v3176_v9 = vadd.f32 %v3175_v37, %v11644_v2  ;;  %v3105_v27 = vadd.f32 %v3104_v7, %v11644_v2  ;;  %v3177_v30 = vpop.f32.mrb[15].mxu1  ;;  %3976 = vmatpush1.bf16.msra.mxu1 %v3496_v59  ;;  %v3432_v34 = vmax.f32 %v3172_v25, 0.0  ;;  %v3431_v35 = vmax.f32 %v3101_v11, 0.0 }
 0x39c   : > { %v3446_v33 = vmax.f32 %v3103_v20, 0.0  ;;  %v3178_v12 = vadd.f32 %v3177_v30, %v11644_v2  ;;  %v3433_v39 = vmax.f32 %v3174_v62, 0.0 }
 0x39d   : > { %v3448_v16 = vmax.f32 %v3176_v9, 0.0  ;;  %v3447_v38 = vmax.f32 %v3105_v27, 0.0 }
 0x39e   : > { %v3510_v40 = vpack.c.bf16 %v3446_v33, %v3430_v31  ;;  %v3449_v43 = vmax.f32 %v3178_v12, 0.0 }
 0x39f   : > { %v3512_v18 = vpack.c.bf16 %v3448_v16, %v3432_v34  ;;  %v3511_v48 = vpack.c.bf16 %v3447_v38, %v3431_v35 }
 0x3a0   : > { %v3513_v21 = vpack.c.bf16 %v3449_v43, %v3433_v39 }
 0x3a1   : > { %3904 = vmatprep.subr.bf16.mxu0 %v3511_v48 }
 0x3a2   : > { %3977 = vmatprep.subr.bf16.mxu1 %v3513_v21  ;;  %3905 = vmatpush1.bf16.msra.mxu0 %v3510_v40 }
 0x3a3   : > { %3978 = vmatpush1.bf16.msra.mxu1 %v3512_v18 }
 0x3a5   : > { %9975 = vmatmul.mubr.msk.bf16.vlgmr.msra.gmra.mrb[160].mxu0 %vm1865_vm2, %v11660_v19 }
 0x3a6   : > { %9979 = vmatmul.mubr.msk.bf16.vlgmr.msra.gmra.mrb[160].mxu1 %vm1865_vm2, %v11660_v19  ;;  %3940 = vmatprep.mubr.bf16.mxu0 %v13744_v0 }
 0x3a7   : > { %4013 = vmatprep.mubr.bf16.mxu1 %v13744_v0 }
 0x3ad   : > { %9976 = vmatmul.mubr.msk.bf16.gmra.mrb[164].mxu0 %vm1865_vm2, %v11679_v24 }
 0x3ae   : > { %9980 = vmatmul.mubr.msk.bf16.gmra.mrb[164].mxu1 %vm1865_vm2, %v11679_v24  ;;  %3950 = vmatprep.mubr.bf16.mxu0 %v13744_v0 }
 0x3af   : > { %4023 = vmatprep.mubr.bf16.mxu1 %v13744_v0 }
 0x3b5   : > { %9977 = vmatmul.mubr.msk.bf16.gmra.mrb[168].mxu0 %vm1865_vm2, %v11698_v36 }
 0x3b6   : > { %9981 = vmatmul.mubr.msk.bf16.gmra.mrb[168].mxu1 %vm1865_vm2, %v11698_v36  ;;  %3960 = vmatprep.mubr.bf16.mxu0 %v13744_v0 }
 0x3b7   : > { %4033 = vmatprep.mubr.bf16.mxu1 %v13744_v0 }
 0x3bd   : > { %9978 = vmatmul.mubr.msk.bf16.gmra.mrb[172].mxu0 %vm1865_vm2, %v11717_v61 }
 0x3be   : > { %9982 = vmatmul.mubr.msk.bf16.gmra.mrb[172].mxu1 %vm1865_vm2, %v11717_v61  ;;  %4076 = vmatprep.mubr.bf16.mxu0 %v13744_v0 }
 0x3bf   : > { %4149 = vmatprep.mubr.bf16.mxu1 %v13744_v0 }
 0x3cf   : > { %v3214_v13 = vpop.f32.mrb[40].mxu0 }
 0x3d0   : > { %v3215_v41 = vadd.f32 %v3214_v13, %v11606_v32  ;;  %v3287_v4 = vpop.f32.mrb[40].mxu1  ;;  %v3216_v22 = vpop.f32.mrb[41].mxu0 }
 0x3d1   : > { %v3288_v28 = vadd.f32 %v3287_v4, %v11606_v32  ;;  %v3217_v60 = vadd.f32 %v3216_v22, %v11606_v32  ;;  %v3289_v42 = vpop.f32.mrb[41].mxu1  ;;  %v3218_v45 = vpop.f32.mrb[42].mxu0 }
 0x3d2   : > { %v3290_v29 = vadd.f32 %v3289_v42, %v11606_v32  ;;  %v3219_v55 = vadd.f32 %v3218_v45, %v11608_v46  ;;  %v3291_v49 = vpop.f32.mrb[42].mxu1  ;;  %v3220_v50 = vpop.f32.mrb[43].mxu0  ;;  %v3338_v14 = vmax.f32 %v3215_v41, 0.0 }
 0x3d3   : > { %v3292_v51 = vadd.f32 %v3291_v49, %v11608_v46  ;;  %v3221_v53 = vadd.f32 %v3220_v50, %v11608_v46  ;;  %v3293_v54 = vpop.f32.mrb[43].mxu1  ;;  %v3340_v56 = vmax.f32 %v3288_v28, 0.0  ;;  %v3339_v58 = vmax.f32 %v3217_v60, 0.0 }
 0x3d4   : > { %v3354_v23 = vmax.f32 %v3219_v55, 0.0  ;;  %v3294_v5 = vadd.f32 %v3293_v54, %v11608_v46  ;;  %v3341_v1 = vmax.f32 %v3290_v29, 0.0 }
 0x3d5   : > { %v3356_v59 = vmax.f32 %v3292_v51, 0.0  ;;  %v3355_v63 = vmax.f32 %v3221_v53, 0.0 }
 0x3d6   : > { %v3466_v3 = vpack.c.bf16 %v3354_v23, %v3338_v14  ;;  %v3357_v32 = vmax.f32 %v3294_v5, 0.0 }
 0x3d7   : > { %v3468_v6 = vpack.c.bf16 %v3356_v59, %v3340_v56  ;;  %v3224_v44 = vpop.f32.mrb[44].mxu0  ;;  %v3467_v10 = vpack.c.bf16 %v3355_v63, %v3339_v58 }
 0x3d8   : > { %v3225_v25 = vadd.f32 %v3224_v44, %v11618_v52  ;;  %v3297_v11 = vpop.f32.mrb[44].mxu1  ;;  %v3226_v15 = vpop.f32.mrb[45].mxu0  ;;  %v3469_v17 = vpack.c.bf16 %v3357_v32, %v3341_v1 }
 0x3d9   : > { %v3298_v62 = vadd.f32 %v3297_v11, %v11618_v52  ;;  %v3227_v20 = vadd.f32 %v3226_v15, %v11618_v52  ;;  %v3299_v46 = vpop.f32.mrb[45].mxu1  ;;  %v3228_v37 = vpop.f32.mrb[46].mxu0  ;;  %4044 = vmatprep.subr.bf16.mxu0 %v3467_v10 }
 0x3da   : > { %v3300_v7 = vadd.f32 %v3299_v46, %v11618_v52  ;;  %v3229_v9 = vadd.f32 %v3228_v37, %v11620_v57  ;;  %v3301_v27 = vpop.f32.mrb[46].mxu1  ;;  %4117 = vmatprep.subr.bf16.mxu1 %v3469_v17  ;;  %v3230_v30 = vpop.f32.mrb[47].mxu0  ;;  %4045 = vmatpush1.bf16.msra.mxu0 %v3466_v3  ;;  %v3370_v34 = vmax.f32 %v3225_v25, 0.0 }
 0x3db   : > { %v3302_v31 = vadd.f32 %v3301_v27, %v11620_v57  ;;  %v3231_v33 = vadd.f32 %v3230_v30, %v11620_v57  ;;  %v3303_v12 = vpop.f32.mrb[47].mxu1  ;;  %4118 = vmatpush1.bf16.msra.mxu1 %v3468_v6  ;;  %v3372_v38 = vmax.f32 %v3298_v62, 0.0  ;;  %v3371_v39 = vmax.f32 %v3227_v20, 0.0 }
 0x3dc   : > { %v3386_v35 = vmax.f32 %v3229_v9, 0.0  ;;  %v3304_v16 = vadd.f32 %v3303_v12, %v11620_v57  ;;  %v3373_v43 = vmax.f32 %v3300_v7, 0.0 }
 0x3dd   : > { %v3388_v40 = vmax.f32 %v3302_v31, 0.0  ;;  %v3387_v52 = vmax.f32 %v3231_v33, 0.0 }
 0x3de   : > { %v3482_v18 = vpack.c.bf16 %v3386_v35, %v3370_v34  ;;  %v3389_v48 = vmax.f32 %v3304_v16, 0.0 }
 0x3df   : > { %v3484_v21 = vpack.c.bf16 %v3388_v40, %v3372_v38  ;;  %v3234_v13 = vpop.f32.mrb[48].mxu0  ;;  %v3483_v41 = vpack.c.bf16 %v3387_v52, %v3371_v39 }
 0x3e0   : > { %v3235_v4 = vadd.f32 %v3234_v13, %v11630_v8  ;;  %v3307_v22 = vpop.f32.mrb[48].mxu1  ;;  %v3236_v28 = vpop.f32.mrb[49].mxu0  ;;  %v3485_v60 = vpack.c.bf16 %v3389_v48, %v3373_v43 }
 0x3e1   : > { %v3308_v42 = vadd.f32 %v3307_v22, %v11630_v8  ;;  %v3237_v45 = vadd.f32 %v3236_v28, %v11630_v8  ;;  %v3309_v57 = vpop.f32.mrb[49].mxu1  ;;  %v3238_v29 = vpop.f32.mrb[50].mxu0  ;;  %4046 = vmatprep.subr.bf16.mxu0 %v3483_v41 }
 0x3e2   : > { %v3310_v55 = vadd.f32 %v3309_v57, %v11630_v8  ;;  %v3239_v49 = vadd.f32 %v3238_v29, %v11632_v26  ;;  %v3311_v50 = vpop.f32.mrb[50].mxu1  ;;  %4119 = vmatprep.subr.bf16.mxu1 %v3485_v60  ;;  %v3240_v51 = vpop.f32.mrb[51].mxu0  ;;  %4047 = vmatpush1.bf16.msra.mxu0 %v3482_v18  ;;  %v3402_v23 = vmax.f32 %v3235_v4, 0.0 }
 0x3e3   : > { %v3312_v53 = vadd.f32 %v3311_v50, %v11632_v26  ;;  %v3241_v54 = vadd.f32 %v3240_v51, %v11632_v26  ;;  %v3313_v14 = vpop.f32.mrb[51].mxu1  ;;  %4120 = vmatpush1.bf16.msra.mxu1 %v3484_v21  ;;  %v3404_v58 = vmax.f32 %v3308_v42, 0.0  ;;  %v3403_v59 = vmax.f32 %v3237_v45, 0.0 }
 0x3e4   : > { %v3418_v5 = vmax.f32 %v3239_v49, 0.0  ;;  %v3314_v56 = vadd.f32 %v3313_v14, %v11632_v26  ;;  %v3405_v1 = vmax.f32 %v3310_v55, 0.0 }
 0x3e5   : > { %v3420_v63 = vmax.f32 %v3312_v53, 0.0  ;;  %v3419_v8 = vmax.f32 %v3241_v54, 0.0 }
 0x3e6   : > { %v3498_v3 = vpack.c.bf16 %v3418_v5, %v3402_v23  ;;  %v3421_v32 = vmax.f32 %v3314_v56, 0.0 }
 0x3e7   : > { %v3500_v6 = vpack.c.bf16 %v3420_v63, %v3404_v58  ;;  %v3244_v44 = vpop.f32.mrb[52].mxu0  ;;  %v3499_v10 = vpack.c.bf16 %v3419_v8, %v3403_v59 }
 0x3e8   : > { %v3245_v25 = vadd.f32 %v3244_v44, %v11642_v47  ;;  %v3317_v11 = vpop.f32.mrb[52].mxu1  ;;  %v3246_v15 = vpop.f32.mrb[53].mxu0  ;;  %v3501_v17 = vpack.c.bf16 %v3421_v32, %v3405_v1 }
 0x3e9   : > { %v3318_v62 = vadd.f32 %v3317_v11, %v11642_v47  ;;  %v3247_v20 = vadd.f32 %v3246_v15, %v11642_v47  ;;  %v3319_v26 = vpop.f32.mrb[53].mxu1  ;;  %v3248_v46 = vpop.f32.mrb[54].mxu0  ;;  %4048 = vmatprep.subr.bf16.mxu0 %v3499_v10 }
 0x3ea   : > { %v3320_v37 = vadd.f32 %v3319_v26, %v11642_v47  ;;  %v3249_v7 = vadd.f32 %v3248_v46, %v11644_v2  ;;  %v3321_v9 = vpop.f32.mrb[54].mxu1  ;;  %4121 = vmatprep.subr.bf16.mxu1 %v3501_v17  ;;  %v3250_v27 = vpop.f32.mrb[55].mxu0  ;;  %4049 = vmatpush1.bf16.msra.mxu0 %v3498_v3  ;;  %v3434_v12 = vmax.f32 %v3245_v25, 0.0 }
 0x3eb   : > { %v3322_v30 = vadd.f32 %v3321_v9, %v11644_v2  ;;  %v3251_v31 = vadd.f32 %v3250_v27, %v11644_v2  ;;  %v3323_v33 = vpop.f32.mrb[55].mxu1  ;;  %4122 = vmatpush1.bf16.msra.mxu1 %v3500_v6  ;;  %v3436_v16 = vmax.f32 %v3318_v62, 0.0  ;;  %v3435_v38 = vmax.f32 %v3247_v20, 0.0 }
 0x3ec   : > { %v3450_v34 = vmax.f32 %v3249_v7, 0.0  ;;  %v3324_v35 = vadd.f32 %v3323_v33, %v11644_v2  ;;  %v3437_v40 = vmax.f32 %v3320_v37, 0.0  ;;  %v11866_v2 = vpop.permute.xlu0 %3536 }
 0x3ed   : > { %v3452_v39 = vmax.f32 %v3322_v30, 0.0  ;;  %v3451_v47 = vmax.f32 %v3251_v31, 0.0 }
 0x3ee   : > { %v3514_v52 = vpack.c.bf16 %v3450_v34, %v3434_v12  ;;  %v3453_v43 = vmax.f32 %v3324_v35, 0.0 }
 0x3ef   : > { %v3516_v18 = vpack.c.bf16 %v3452_v39, %v3436_v16  ;;  %v3515_v48 = vpack.c.bf16 %v3451_v47, %v3435_v38 }
 0x3f0   : > { %v3517_v21 = vpack.c.bf16 %v3453_v43, %v3437_v40  ;;  %v11878_v56 = vpop.permute.xlu0 %3546 }
 0x3f1   : > { %4050 = vmatprep.subr.bf16.mxu0 %v3515_v48 }
 0x3f2   : > { %4123 = vmatprep.subr.bf16.mxu1 %v3517_v21  ;;  %4051 = vmatpush1.bf16.msra.mxu0 %v3514_v52 }
 0x3f3   : > { %4124 = vmatpush1.bf16.msra.mxu1 %v3516_v18 }
 0x3f4   : > { %v11890_v38 = vpop.permute.xlu0 %3556 }
 0x3f5   : > { %9983 = vmatmul.mubr.msk.bf16.vlgmr.msra.gmra.mrb[176].mxu0 %vm1865_vm2, %v11660_v19 }
 0x3f6   : > { %9987 = vmatmul.mubr.msk.bf16.vlgmr.msra.gmra.mrb[176].mxu1 %vm1865_vm2, %v11660_v19  ;;  %4086 = vmatprep.mubr.bf16.mxu0 %v13744_v0  ;;  %v11868_v19 = vpop.permute.xlu1 %3541 }
 0x3f7   : > { %4159 = vmatprep.mubr.bf16.mxu1 %v13744_v0 }
 0x3fa   : > { %v11880_v8 = vpop.permute.xlu1 %3551 }
 0x3fd   : > { %9984 = vmatmul.mubr.msk.bf16.gmra.mrb[180].mxu0 %vm1865_vm2, %v11679_v24 }
 0x3fe   : > { %9988 = vmatmul.mubr.msk.bf16.gmra.mrb[180].mxu1 %vm1865_vm2, %v11679_v24  ;;  %4096 = vmatprep.mubr.bf16.mxu0 %v13744_v0  ;;  %v11892_v52 = vpop.permute.xlu1 %3561 }
 0x3ff   : > { %4169 = vmatprep.mubr.bf16.mxu1 %v13744_v0 }
 0x405   : > { %9985 = vmatmul.mubr.msk.bf16.gmra.mrb[184].mxu0 %vm1865_vm2, %v11698_v36 }
 0x406   : > { %9989 = vmatmul.mubr.msk.bf16.gmra.mrb[184].mxu1 %vm1865_vm2, %v11698_v36  ;;  %4106 = vmatprep.mubr.bf16.mxu0 %v13744_v0 }
 0x407   : > { %4179 = vmatprep.mubr.bf16.mxu1 %v13744_v0 }
 0x40d   : > { %9986 = vmatmul.mubr.msk.bf16.gmra.mrb[188].mxu0 %vm1865_vm2, %v11717_v61 }
 0x40e   : > { %9990 = vmatmul.mubr.msk.bf16.gmra.mrb[188].mxu1 %vm1865_vm2, %v11717_v61  ;;  %4502 = vmatprep.mubr.bf16.mxu0 %v13744_v0 }
 0x40f   : > { %4575 = vmatprep.mubr.bf16.mxu1 %v13744_v0 }
 0x41f   : > { %v3640_v24 = vpop.f32.mrb[80].mxu0 }
 0x420   : > { %v3641_v36 = vadd.f32 %v3640_v24, %v11866_v2  ;;  %v3713_v13 = vpop.f32.mrb[80].mxu1  ;;  %v3642_v41 = vpop.f32.mrb[81].mxu0 }
 0x421   : > { %v3714_v4 = vadd.f32 %v3713_v13, %v11866_v2  ;;  %v3643_v22 = vadd.f32 %v3642_v41, %v11866_v2  ;;  %v3715_v28 = vpop.f32.mrb[81].mxu1  ;;  %v3644_v60 = vpop.f32.mrb[82].mxu0 }
 0x422   : > { %v3716_v61 = vadd.f32 %v3715_v28, %v11866_v2  ;;  %v3645_v42 = vadd.f32 %v3644_v60, %v11868_v19  ;;  %v3717_v45 = vpop.f32.mrb[82].mxu1  ;;  %v3646_v57 = vpop.f32.mrb[83].mxu0  ;;  %v4190_v50 = vmax.f32 %v3641_v36, 0.0 }
 0x423   : > { %v3718_v29 = vadd.f32 %v3717_v45, %v11868_v19  ;;  %v3647_v55 = vadd.f32 %v3646_v57, %v11868_v19  ;;  %v3719_v49 = vpop.f32.mrb[83].mxu1  ;;  %v4192_v54 = vmax.f32 %v3714_v4, 0.0  ;;  %v4191_v14 = vmax.f32 %v3643_v22, 0.0 }
 0x424   : > { %v4206_v51 = vmax.f32 %v3645_v42, 0.0  ;;  %v3720_v53 = vadd.f32 %v3719_v49, %v11868_v19  ;;  %v4193_v58 = vmax.f32 %v3716_v61, 0.0 }
 0x425   : > { %v4208_v23 = vmax.f32 %v3718_v29, 0.0  ;;  %v4207_v5 = vmax.f32 %v3647_v55, 0.0 }
 0x426   : > { %v4318_v59 = vpack.c.bf16 %v4206_v51, %v4190_v50  ;;  %v4209_v63 = vmax.f32 %v3720_v53, 0.0 }
 0x427   : > { %v4320_v1 = vpack.c.bf16 %v4208_v23, %v4192_v54  ;;  %v3650_v3 = vpop.f32.mrb[84].mxu0  ;;  %v4319_v32 = vpack.c.bf16 %v4207_v5, %v4191_v14  ;;  %v11902_v5 = vpop.permute.xlu0 %3566 }
 0x428   : > { %v3651_v6 = vadd.f32 %v3650_v3, %v11878_v56  ;;  %v3723_v44 = vpop.f32.mrb[84].mxu1  ;;  %v3652_v10 = vpop.f32.mrb[85].mxu0  ;;  %v4321_v25 = vpack.c.bf16 %v4209_v63, %v4193_v58 }
 0x429   : > { %v3724_v11 = vadd.f32 %v3723_v44, %v11878_v56  ;;  %v3653_v15 = vadd.f32 %v3652_v10, %v11878_v56  ;;  %v3725_v17 = vpop.f32.mrb[85].mxu1  ;;  %v3654_v62 = vpop.f32.mrb[86].mxu0  ;;  %4470 = vmatprep.subr.bf16.mxu0 %v4319_v32 }
 0x42a   : > { %v3726_v20 = vadd.f32 %v3725_v17, %v11878_v56  ;;  %v3655_v26 = vadd.f32 %v3654_v62, %v11880_v8  ;;  %v3727_v46 = vpop.f32.mrb[86].mxu1  ;;  %4543 = vmatprep.subr.bf16.mxu1 %v4321_v25  ;;  %v3656_v37 = vpop.f32.mrb[87].mxu0  ;;  %4471 = vmatpush1.bf16.msra.mxu0 %v4318_v59  ;;  %v4222_v30 = vmax.f32 %v3651_v6, 0.0 }
 0x42b   : > { %v3728_v7 = vadd.f32 %v3727_v46, %v11880_v8  ;;  %v3657_v9 = vadd.f32 %v3656_v37, %v11880_v8  ;;  %v3729_v27 = vpop.f32.mrb[87].mxu1  ;;  %4544 = vmatpush1.bf16.msra.mxu1 %v4320_v1  ;;  %v4224_v12 = vmax.f32 %v3724_v11, 0.0  ;;  %v4223_v34 = vmax.f32 %v3653_v15, 0.0  ;;  %v11904_v1 = vpop.permute.xlu1 %3571 }
 0x42c   : > { %v4238_v31 = vmax.f32 %v3655_v26, 0.0  ;;  %v3730_v33 = vadd.f32 %v3729_v27, %v11880_v8  ;;  %v4225_v39 = vmax.f32 %v3726_v20, 0.0 }
 0x42d   : > { %v4240_v35 = vmax.f32 %v3728_v7, 0.0  ;;  %v4239_v16 = vmax.f32 %v3657_v9, 0.0 }
 0x42e   : > { %v4334_v47 = vpack.c.bf16 %v4238_v31, %v4222_v30  ;;  %v4241_v40 = vmax.f32 %v3730_v33, 0.0 }
 0x42f   : > { %v4336_v43 = vpack.c.bf16 %v4240_v35, %v4224_v12  ;;  %v3660_v18 = vpop.f32.mrb[88].mxu0  ;;  %v4335_v48 = vpack.c.bf16 %v4239_v16, %v4223_v34 }
 0x430   : > { %v3661_v21 = vadd.f32 %v3660_v18, %v11890_v38  ;;  %v3733_v24 = vpop.f32.mrb[88].mxu1  ;;  %v3662_v36 = vpop.f32.mrb[89].mxu0  ;;  %v4337_v13 = vpack.c.bf16 %v4241_v40, %v4225_v39 }
 0x431   : > { %v3734_v41 = vadd.f32 %v3733_v24, %v11890_v38  ;;  %v3663_v4 = vadd.f32 %v3662_v36, %v11890_v38  ;;  %v3735_v22 = vpop.f32.mrb[89].mxu1  ;;  %v3664_v28 = vpop.f32.mrb[90].mxu0  ;;  %4472 = vmatprep.subr.bf16.mxu0 %v4335_v48 }
 0x432   : > { %v3736_v60 = vadd.f32 %v3735_v22, %v11890_v38  ;;  %v3665_v61 = vadd.f32 %v3664_v28, %v11892_v52  ;;  %v3737_v42 = vpop.f32.mrb[90].mxu1  ;;  %4545 = vmatprep.subr.bf16.mxu1 %v4337_v13  ;;  %v3666_v45 = vpop.f32.mrb[91].mxu0  ;;  %4473 = vmatpush1.bf16.msra.mxu0 %v4334_v47  ;;  %v4254_v49 = vmax.f32 %v3661_v21, 0.0 }
 0x433   : > { %v3738_v57 = vadd.f32 %v3737_v42, %v11892_v52  ;;  %v3667_v29 = vadd.f32 %v3666_v45, %v11892_v52  ;;  %v3739_v55 = vpop.f32.mrb[91].mxu1  ;;  %4546 = vmatpush1.bf16.msra.mxu1 %v4336_v43  ;;  %v4256_v53 = vmax.f32 %v3734_v41, 0.0  ;;  %v4255_v54 = vmax.f32 %v3663_v4, 0.0 }
 0x434   : > { %v4270_v50 = vmax.f32 %v3665_v61, 0.0  ;;  %v3740_v51 = vadd.f32 %v3739_v55, %v11892_v52  ;;  %v4257_v58 = vmax.f32 %v3736_v60, 0.0  ;;  %v11920_v61 = vld [vmem:[%s13741_s1 + $0xb0] sm:$0xff]  }
 0x435   : > { %v4272_v14 = vmax.f32 %v3738_v57, 0.0  ;;  %v4271_v23 = vmax.f32 %v3667_v29, 0.0 }
 0x436   : > { %v4350_v59 = vpack.c.bf16 %v4270_v50, %v4254_v49  ;;  %v4273_v63 = vmax.f32 %v3740_v51, 0.0 }
 0x437   : > { %v4352_v3 = vpack.c.bf16 %v4272_v14, %v4256_v53  ;;  %v3670_v32 = vpop.f32.mrb[92].mxu0  ;;  %v4351_v6 = vpack.c.bf16 %v4271_v23, %v4255_v54 }
 0x438   : > { %v3671_v44 = vadd.f32 %v3670_v32, %v11902_v5  ;;  %v3743_v10 = vpop.f32.mrb[92].mxu1  ;;  %v3672_v25 = vpop.f32.mrb[93].mxu0  ;;  %v4353_v11 = vpack.c.bf16 %v4273_v63, %v4257_v58 }
 0x439   : > { %v3744_v15 = vadd.f32 %v3743_v10, %v11902_v5  ;;  %v3673_v17 = vadd.f32 %v3672_v25, %v11902_v5  ;;  %v3745_v62 = vpop.f32.mrb[93].mxu1  ;;  %v3674_v20 = vpop.f32.mrb[94].mxu0  ;;  %4474 = vmatprep.subr.bf16.mxu0 %v4351_v6 }
 0x43a   : > { %v3746_v26 = vadd.f32 %v3745_v62, %v11902_v5  ;;  %v3675_v46 = vadd.f32 %v3674_v20, %v11904_v1  ;;  %v3747_v37 = vpop.f32.mrb[94].mxu1  ;;  %4547 = vmatprep.subr.bf16.mxu1 %v4353_v11  ;;  %v3676_v7 = vpop.f32.mrb[95].mxu0  ;;  %4475 = vmatpush1.bf16.msra.mxu0 %v4350_v59  ;;  %v4286_v31 = vmax.f32 %v3671_v44, 0.0 }
 0x43b   : > { %v3748_v9 = vadd.f32 %v3747_v37, %v11904_v1  ;;  %v3677_v27 = vadd.f32 %v3676_v7, %v11904_v1  ;;  %v3749_v30 = vpop.f32.mrb[95].mxu1  ;;  %4548 = vmatpush1.bf16.msra.mxu1 %v4352_v3  ;;  %v4288_v34 = vmax.f32 %v3744_v15, 0.0  ;;  %v4287_v35 = vmax.f32 %v3673_v17, 0.0  ;;  %v11939_v37 = vld [vmem:[%s13741_s1 + $0xb8] sm:$0xff]  }
 0x43c   : > { %v4302_v33 = vmax.f32 %v3675_v46, 0.0  ;;  %v3750_v12 = vadd.f32 %v3749_v30, %v11904_v1  ;;  %v4289_v47 = vmax.f32 %v3746_v26, 0.0 }
 0x43d   : > { %v4304_v16 = vmax.f32 %v3748_v9, 0.0  ;;  %v4303_v39 = vmax.f32 %v3677_v27, 0.0 }
 0x43e   : > { %v4366_v40 = vpack.c.bf16 %v4302_v33, %v4286_v31  ;;  %v4305_v43 = vmax.f32 %v3750_v12, 0.0 }
 0x43f   : > { %v4368_v18 = vpack.c.bf16 %v4304_v16, %v4288_v34  ;;  %v3786_v48 = vpop.f32.mrb[120].mxu0  ;;  %v4367_v21 = vpack.c.bf16 %v4303_v39, %v4287_v35 }
 0x440   : > { %v3787_v24 = vadd.f32 %v3786_v48, %v11866_v2  ;;  %v3859_v36 = vpop.f32.mrb[120].mxu1  ;;  %v3788_v13 = vpop.f32.mrb[121].mxu0  ;;  %v4369_v41 = vpack.c.bf16 %v4305_v43, %v4289_v47 }
 0x441   : > { %v3860_v4 = vadd.f32 %v3859_v36, %v11866_v2  ;;  %v3789_v22 = vadd.f32 %v3788_v13, %v11866_v2  ;;  %v3861_v28 = vpop.f32.mrb[121].mxu1  ;;  %v3790_v60 = vpop.f32.mrb[122].mxu0  ;;  %4476 = vmatprep.subr.bf16.mxu0 %v4367_v21 }
 0x442   : > { %v3862_v42 = vadd.f32 %v3861_v28, %v11866_v2  ;;  %v3791_v45 = vadd.f32 %v3790_v60, %v11868_v19  ;;  %v3863_v57 = vpop.f32.mrb[122].mxu1  ;;  %4549 = vmatprep.subr.bf16.mxu1 %v4369_v41  ;;  %v3792_v29 = vpop.f32.mrb[123].mxu0  ;;  %4477 = vmatpush1.bf16.msra.mxu0 %v4366_v40  ;;  %v4194_v51 = vmax.f32 %v3787_v24, 0.0 }
 0x443   : > { %v3864_v55 = vadd.f32 %v3863_v57, %v11868_v19  ;;  %v3793_v49 = vadd.f32 %v3792_v29, %v11868_v19  ;;  %v3865_v50 = vpop.f32.mrb[123].mxu1  ;;  %4550 = vmatpush1.bf16.msra.mxu1 %v4368_v18  ;;  %v4196_v14 = vmax.f32 %v3860_v4, 0.0  ;;  %v4195_v23 = vmax.f32 %v3789_v22, 0.0  ;;  %v11958_v29 = vld [vmem:[%s13741_s1 + $0xc0] sm:$0xff]  }
 0x444   : > { %v4210_v53 = vmax.f32 %v3791_v45, 0.0  ;;  %v3866_v54 = vadd.f32 %v3865_v50, %v11868_v19  ;;  %v4197_v63 = vmax.f32 %v3862_v42, 0.0 }
 0x445   : > { %v4212_v58 = vmax.f32 %v3864_v55, 0.0  ;;  %v4211_v59 = vmax.f32 %v3793_v49, 0.0  ;;  %9995 = vmatmul.mubr.msk.bf16.vlgmr.msra.gmra.mrb[192].mxu0 %vm1865_vm2, %v11920_v61 }
 0x446   : > { %v4322_v3 = vpack.c.bf16 %v4210_v53, %v4194_v51  ;;  %v4213_v32 = vmax.f32 %v3866_v54, 0.0  ;;  %9999 = vmatmul.mubr.msk.bf16.vlgmr.msra.gmra.mrb[192].mxu1 %vm1865_vm2, %v11920_v61  ;;  %4512 = vmatprep.mubr.bf16.mxu0 %v13744_v0 }
 0x447   : > { %v4324_v6 = vpack.c.bf16 %v4212_v58, %v4196_v14  ;;  %v3796_v44 = vpop.f32.mrb[124].mxu0  ;;  %v4323_v10 = vpack.c.bf16 %v4211_v59, %v4195_v23  ;;  %4585 = vmatprep.mubr.bf16.mxu1 %v13744_v0 }
 0x448   : > { %v3797_v25 = vadd.f32 %v3796_v44, %v11878_v56  ;;  %v3869_v11 = vpop.f32.mrb[124].mxu1  ;;  %v3798_v15 = vpop.f32.mrb[125].mxu0  ;;  %v4325_v17 = vpack.c.bf16 %v4213_v32, %v4197_v63 }
 0x449   : > { %v3870_v62 = vadd.f32 %v3869_v11, %v11878_v56  ;;  %v3799_v20 = vadd.f32 %v3798_v15, %v11878_v56  ;;  %v3871_v26 = vpop.f32.mrb[125].mxu1  ;;  %v3800_v46 = vpop.f32.mrb[126].mxu0  ;;  %4616 = vmatprep.subr.bf16.mxu0 %v4323_v10 }
 0x44a   : > { %v3872_v7 = vadd.f32 %v3871_v26, %v11878_v56  ;;  %v3801_v9 = vadd.f32 %v3800_v46, %v11880_v8  ;;  %v3873_v27 = vpop.f32.mrb[126].mxu1  ;;  %4689 = vmatprep.subr.bf16.mxu1 %v4325_v17  ;;  %v3802_v30 = vpop.f32.mrb[127].mxu0  ;;  %4617 = vmatpush1.bf16.msra.mxu0 %v4322_v3  ;;  %v4226_v34 = vmax.f32 %v3797_v25, 0.0 }
 0x44b   : > { %v3874_v31 = vadd.f32 %v3873_v27, %v11880_v8  ;;  %v3803_v33 = vadd.f32 %v3802_v30, %v11880_v8  ;;  %v3875_v12 = vpop.f32.mrb[127].mxu1  ;;  %4690 = vmatpush1.bf16.msra.mxu1 %v4324_v6  ;;  %v4228_v39 = vmax.f32 %v3870_v62, 0.0  ;;  %v4227_v47 = vmax.f32 %v3799_v20, 0.0 }
 0x44c   : > { %v4242_v35 = vmax.f32 %v3801_v9, 0.0  ;;  %v3876_v16 = vadd.f32 %v3875_v12, %v11880_v8  ;;  %v4229_v18 = vmax.f32 %v3872_v7, 0.0 }
 0x44d   : > { %v4244_v40 = vmax.f32 %v3874_v31, 0.0  ;;  %v4243_v43 = vmax.f32 %v3803_v33, 0.0  ;;  %9996 = vmatmul.mubr.msk.bf16.gmra.mrb[196].mxu0 %vm1865_vm2, %v11939_v37  ;;  %v11977_v31 = vld [vmem:[%s13741_s1 + $0xc8] sm:$0xff]  }
 0x44e   : > { %v4338_v48 = vpack.c.bf16 %v4242_v35, %v4226_v34  ;;  %v4245_v21 = vmax.f32 %v3876_v16, 0.0  ;;  %10000 = vmatmul.mubr.msk.bf16.gmra.mrb[196].mxu1 %vm1865_vm2, %v11939_v37  ;;  %4522 = vmatprep.mubr.bf16.mxu0 %v13744_v0 }
 0x44f   : > { %v4340_v24 = vpack.c.bf16 %v4244_v40, %v4228_v39  ;;  %v3806_v36 = vpop.f32.mrb[128].mxu0  ;;  %v4339_v13 = vpack.c.bf16 %v4243_v43, %v4227_v47  ;;  %4595 = vmatprep.mubr.bf16.mxu1 %v13744_v0 }
 0x450   : > { %v3807_v41 = vadd.f32 %v3806_v36, %v11890_v38  ;;  %v3879_v4 = vpop.f32.mrb[128].mxu1  ;;  %v3808_v22 = vpop.f32.mrb[129].mxu0  ;;  %v4341_v28 = vpack.c.bf16 %v4245_v21, %v4229_v18 }
 0x451   : > { %v3880_v60 = vadd.f32 %v3879_v4, %v11890_v38  ;;  %v3809_v42 = vadd.f32 %v3808_v22, %v11890_v38  ;;  %v3881_v45 = vpop.f32.mrb[129].mxu1  ;;  %v3810_v57 = vpop.f32.mrb[130].mxu0  ;;  %4618 = vmatprep.subr.bf16.mxu0 %v4339_v13 }
 0x452   : > { %v3882_v55 = vadd.f32 %v3881_v45, %v11890_v38  ;;  %v3811_v49 = vadd.f32 %v3810_v57, %v11892_v52  ;;  %v3883_v50 = vpop.f32.mrb[130].mxu1  ;;  %4691 = vmatprep.subr.bf16.mxu1 %v4341_v28  ;;  %v3812_v51 = vpop.f32.mrb[131].mxu0  ;;  %4619 = vmatpush1.bf16.msra.mxu0 %v4338_v48  ;;  %v4258_v23 = vmax.f32 %v3807_v41, 0.0 }
 0x453   : > { %v3884_v53 = vadd.f32 %v3883_v50, %v11892_v52  ;;  %v3813_v54 = vadd.f32 %v3812_v51, %v11892_v52  ;;  %v3885_v14 = vpop.f32.mrb[131].mxu1  ;;  %4692 = vmatpush1.bf16.msra.mxu1 %v4340_v24  ;;  %v4260_v63 = vmax.f32 %v3880_v60, 0.0  ;;  %v4259_v3 = vmax.f32 %v3809_v42, 0.0 }
 0x454   : > { %v4274_v58 = vmax.f32 %v3811_v49, 0.0  ;;  %v3886_v59 = vadd.f32 %v3885_v14, %v11892_v52  ;;  %v4261_v44 = vmax.f32 %v3882_v55, 0.0 }
 0x455   : > { %v4276_v32 = vmax.f32 %v3884_v53, 0.0  ;;  %v4275_v6 = vmax.f32 %v3813_v54, 0.0  ;;  %9997 = vmatmul.mubr.msk.bf16.gmra.mrb[200].mxu0 %vm1865_vm2, %v11958_v29 }
 0x456   : > { %v4354_v10 = vpack.c.bf16 %v4274_v58, %v4258_v23  ;;  %v4277_v25 = vmax.f32 %v3886_v59, 0.0  ;;  %10001 = vmatmul.mubr.msk.bf16.gmra.mrb[200].mxu1 %vm1865_vm2, %v11958_v29  ;;  %4532 = vmatprep.mubr.bf16.mxu0 %v13744_v0 }
 0x457   : > { %v4356_v11 = vpack.c.bf16 %v4276_v32, %v4260_v63  ;;  %v3816_v15 = vpop.f32.mrb[132].mxu0  ;;  %v4355_v17 = vpack.c.bf16 %v4275_v6, %v4259_v3  ;;  %4605 = vmatprep.mubr.bf16.mxu1 %v13744_v0 }
 0x458   : > { %v3817_v62 = vadd.f32 %v3816_v15, %v11902_v5  ;;  %v3889_v20 = vpop.f32.mrb[132].mxu1  ;;  %v3818_v26 = vpop.f32.mrb[133].mxu0  ;;  %v4357_v46 = vpack.c.bf16 %v4277_v25, %v4261_v44 }
 0x459   : > { %v3890_v7 = vadd.f32 %v3889_v20, %v11902_v5  ;;  %v3819_v9 = vadd.f32 %v3818_v26, %v11902_v5  ;;  %v3891_v27 = vpop.f32.mrb[133].mxu1  ;;  %v3820_v30 = vpop.f32.mrb[134].mxu0  ;;  %4620 = vmatprep.subr.bf16.mxu0 %v4355_v17 }
 0x45a   : > { %v3892_v33 = vadd.f32 %v3891_v27, %v11902_v5  ;;  %v3821_v12 = vadd.f32 %v3820_v30, %v11904_v1  ;;  %v3893_v34 = vpop.f32.mrb[134].mxu1  ;;  %4693 = vmatprep.subr.bf16.mxu1 %v4357_v46  ;;  %v3822_v35 = vpop.f32.mrb[135].mxu0  ;;  %4621 = vmatpush1.bf16.msra.mxu0 %v4354_v10  ;;  %v4290_v40 = vmax.f32 %v3817_v62, 0.0 }
 0x45b   : > { %v3894_v16 = vadd.f32 %v3893_v34, %v11904_v1  ;;  %v3823_v39 = vadd.f32 %v3822_v35, %v11904_v1  ;;  %v3895_v47 = vpop.f32.mrb[135].mxu1  ;;  %4694 = vmatpush1.bf16.msra.mxu1 %v4356_v11  ;;  %v4292_v48 = vmax.f32 %v3890_v7, 0.0  ;;  %v4291_v21 = vmax.f32 %v3819_v9, 0.0 }
 0x45c   : > { %v4306_v43 = vmax.f32 %v3821_v12, 0.0  ;;  %v3896_v18 = vadd.f32 %v3895_v47, %v11904_v1  ;;  %v4293_v13 = vmax.f32 %v3892_v33, 0.0 }
 0x45d   : > { %v4308_v24 = vmax.f32 %v3894_v16, 0.0  ;;  %v4307_v36 = vmax.f32 %v3823_v39, 0.0  ;;  %9998 = vmatmul.mubr.msk.bf16.gmra.mrb[204].mxu0 %vm1865_vm2, %v11977_v31 }
 0x45e   : > { %v4370_v41 = vpack.c.bf16 %v4306_v43, %v4290_v40  ;;  %v4309_v4 = vmax.f32 %v3896_v18, 0.0  ;;  %10002 = vmatmul.mubr.msk.bf16.gmra.mrb[204].mxu1 %vm1865_vm2, %v11977_v31  ;;  %4648 = vmatprep.mubr.bf16.mxu0 %v13744_v0 }
 0x45f   : > { %v4372_v22 = vpack.c.bf16 %v4308_v24, %v4292_v48  ;;  %v4371_v28 = vpack.c.bf16 %v4307_v36, %v4291_v21  ;;  %4721 = vmatprep.mubr.bf16.mxu1 %v13744_v0 }
 0x460   : > { %v4373_v60 = vpack.c.bf16 %v4309_v4, %v4293_v13 }
 0x461   : > { %4622 = vmatprep.subr.bf16.mxu0 %v4371_v28 }
 0x462   : > { %4695 = vmatprep.subr.bf16.mxu1 %v4373_v60  ;;  %4623 = vmatpush1.bf16.msra.mxu0 %v4370_v41 }
 0x463   : > { %4696 = vmatpush1.bf16.msra.mxu1 %v4372_v22 }
 0x465   : > { %10003 = vmatmul.mubr.msk.bf16.vlgmr.msra.gmra.mrb[208].mxu0 %vm1865_vm2, %v11920_v61 }
 0x466   : > { %10007 = vmatmul.mubr.msk.bf16.vlgmr.msra.gmra.mrb[208].mxu1 %vm1865_vm2, %v11920_v61  ;;  %4658 = vmatprep.mubr.bf16.mxu0 %v13744_v0 }
 0x467   : > { %4731 = vmatprep.mubr.bf16.mxu1 %v13744_v0 }
 0x46d   : > { %10004 = vmatmul.mubr.msk.bf16.gmra.mrb[212].mxu0 %vm1865_vm2, %v11939_v37 }
 0x46e   : > { %10008 = vmatmul.mubr.msk.bf16.gmra.mrb[212].mxu1 %vm1865_vm2, %v11939_v37  ;;  %4668 = vmatprep.mubr.bf16.mxu0 %v13744_v0 }
 0x46f   : > { %4741 = vmatprep.mubr.bf16.mxu1 %v13744_v0 }
 0x475   : > { %10005 = vmatmul.mubr.msk.bf16.gmra.mrb[216].mxu0 %vm1865_vm2, %v11958_v29 }
 0x476   : > { %10009 = vmatmul.mubr.msk.bf16.gmra.mrb[216].mxu1 %vm1865_vm2, %v11958_v29  ;;  %4678 = vmatprep.mubr.bf16.mxu0 %v13744_v0 }
 0x477   : > { %4751 = vmatprep.mubr.bf16.mxu1 %v13744_v0 }
 0x478   : > { %v3932_v42 = vpop.f32.mrb[160].mxu0 }
 0x479   : > { %v3933_v45 = vadd.f32 %v3932_v42, %v11866_v2  ;;  %v4005_v57 = vpop.f32.mrb[160].mxu1  ;;  %v3934_v55 = vpop.f32.mrb[161].mxu0 }
 0x47a   : > { %v4006_v49 = vadd.f32 %v4005_v57, %v11866_v2  ;;  %v3935_v50 = vadd.f32 %v3934_v55, %v11866_v2  ;;  %v4007_v51 = vpop.f32.mrb[161].mxu1  ;;  %v3936_v53 = vpop.f32.mrb[162].mxu0 }
 0x47b   : > { %v4008_v54 = vadd.f32 %v4007_v51, %v11866_v2  ;;  %v3937_v14 = vadd.f32 %v3936_v53, %v11868_v19  ;;  %v4009_v23 = vpop.f32.mrb[162].mxu1  ;;  %v3938_v58 = vpop.f32.mrb[163].mxu0  ;;  %v4198_v32 = vmax.f32 %v3933_v45, 0.0 }
 0x47c   : > { %v4010_v59 = vadd.f32 %v4009_v23, %v11868_v19  ;;  %v3939_v63 = vadd.f32 %v3938_v58, %v11868_v19  ;;  %v4011_v3 = vpop.f32.mrb[163].mxu1  ;;  %v4200_v10 = vmax.f32 %v4006_v49, 0.0  ;;  %v4199_v25 = vmax.f32 %v3935_v50, 0.0 }
 0x47d   : > { %v4214_v6 = vmax.f32 %v3937_v14, 0.0  ;;  %v4012_v44 = vadd.f32 %v4011_v3, %v11868_v19  ;;  %10006 = vmatmul.mubr.msk.bf16.gmra.mrb[220].mxu0 %vm1865_vm2, %v11977_v31  ;;  %v4201_v17 = vmax.f32 %v4008_v54, 0.0 }
 0x47e   : > { %v4216_v11 = vmax.f32 %v4010_v59, 0.0  ;;  %v4215_v15 = vmax.f32 %v3939_v63, 0.0  ;;  %10010 = vmatmul.mubr.msk.bf16.gmra.mrb[220].mxu1 %vm1865_vm2, %v11977_v31  ;;  %4794 = vmatprep.mubr.bf16.mxu0 %v13744_v0 }
 0x47f   : > { %v4326_v62 = vpack.c.bf16 %v4214_v6, %v4198_v32  ;;  %v4217_v20 = vmax.f32 %v4012_v44, 0.0  ;;  %4867 = vmatprep.mubr.bf16.mxu1 %v13744_v0 }
 0x480   : > { %v4328_v26 = vpack.c.bf16 %v4216_v11, %v4200_v10  ;;  %v3942_v46 = vpop.f32.mrb[164].mxu0  ;;  %v4327_v7 = vpack.c.bf16 %v4215_v15, %v4199_v25 }
 0x481   : > { %v3943_v9 = vadd.f32 %v3942_v46, %v11878_v56  ;;  %v4015_v27 = vpop.f32.mrb[164].mxu1  ;;  %v3944_v30 = vpop.f32.mrb[165].mxu0  ;;  %v4329_v33 = vpack.c.bf16 %v4217_v20, %v4201_v17 }
 0x482   : > { %v4016_v12 = vadd.f32 %v4015_v27, %v11878_v56  ;;  %v3945_v34 = vadd.f32 %v3944_v30, %v11878_v56  ;;  %v4017_v35 = vpop.f32.mrb[165].mxu1  ;;  %v3946_v16 = vpop.f32.mrb[166].mxu0  ;;  %4762 = vmatprep.subr.bf16.mxu0 %v4327_v7 }
 0x483   : > { %v4018_v39 = vadd.f32 %v4017_v35, %v11878_v56  ;;  %v3947_v47 = vadd.f32 %v3946_v16, %v11880_v8  ;;  %v4019_v40 = vpop.f32.mrb[166].mxu1  ;;  %4835 = vmatprep.subr.bf16.mxu1 %v4329_v33  ;;  %v3948_v43 = vpop.f32.mrb[167].mxu0  ;;  %4763 = vmatpush1.bf16.msra.mxu0 %v4326_v62  ;;  %v4230_v24 = vmax.f32 %v3943_v9, 0.0 }
 0x484   : > { %v4020_v18 = vadd.f32 %v4019_v40, %v11880_v8  ;;  %v3949_v48 = vadd.f32 %v3948_v43, %v11880_v8  ;;  %v4021_v21 = vpop.f32.mrb[167].mxu1  ;;  %4836 = vmatpush1.bf16.msra.mxu1 %v4328_v26  ;;  %v4232_v41 = vmax.f32 %v4016_v12, 0.0  ;;  %v4231_v4 = vmax.f32 %v3945_v34, 0.0 }
 0x485   : > { %v4246_v36 = vmax.f32 %v3947_v47, 0.0  ;;  %v4022_v13 = vadd.f32 %v4021_v21, %v11880_v8  ;;  %v4233_v60 = vmax.f32 %v4018_v39, 0.0 }
 0x486   : > { %v4248_v22 = vmax.f32 %v4020_v18, 0.0  ;;  %v4247_v28 = vmax.f32 %v3949_v48, 0.0 }
 0x487   : > { %v4342_v42 = vpack.c.bf16 %v4246_v36, %v4230_v24  ;;  %v4249_v45 = vmax.f32 %v4022_v13, 0.0 }
 0x488   : > { %v4344_v57 = vpack.c.bf16 %v4248_v22, %v4232_v41  ;;  %v3952_v55 = vpop.f32.mrb[168].mxu0  ;;  %v4343_v49 = vpack.c.bf16 %v4247_v28, %v4231_v4 }
 0x489   : > { %v3953_v50 = vadd.f32 %v3952_v55, %v11890_v38  ;;  %v4025_v51 = vpop.f32.mrb[168].mxu1  ;;  %v3954_v53 = vpop.f32.mrb[169].mxu0  ;;  %v4345_v54 = vpack.c.bf16 %v4249_v45, %v4233_v60 }
 0x48a   : > { %v4026_v14 = vadd.f32 %v4025_v51, %v11890_v38  ;;  %v3955_v23 = vadd.f32 %v3954_v53, %v11890_v38  ;;  %v4027_v58 = vpop.f32.mrb[169].mxu1  ;;  %v3956_v59 = vpop.f32.mrb[170].mxu0  ;;  %4764 = vmatprep.subr.bf16.mxu0 %v4343_v49 }
 0x48b   : > { %v4028_v63 = vadd.f32 %v4027_v58, %v11890_v38  ;;  %v3957_v3 = vadd.f32 %v3956_v59, %v11892_v52  ;;  %v4029_v32 = vpop.f32.mrb[170].mxu1  ;;  %4837 = vmatprep.subr.bf16.mxu1 %v4345_v54  ;;  %v3958_v6 = vpop.f32.mrb[171].mxu0  ;;  %4765 = vmatpush1.bf16.msra.mxu0 %v4342_v42  ;;  %v4262_v11 = vmax.f32 %v3953_v50, 0.0 }
 0x48c   : > { %v4030_v44 = vadd.f32 %v4029_v32, %v11892_v52  ;;  %v3959_v10 = vadd.f32 %v3958_v6, %v11892_v52  ;;  %v4031_v25 = vpop.f32.mrb[171].mxu1  ;;  %4838 = vmatpush1.bf16.msra.mxu1 %v4344_v57  ;;  %v4264_v62 = vmax.f32 %v4026_v14, 0.0  ;;  %v4263_v20 = vmax.f32 %v3955_v23, 0.0 }
 0x48d   : > { %v4278_v15 = vmax.f32 %v3957_v3, 0.0  ;;  %v4032_v17 = vadd.f32 %v4031_v25, %v11892_v52  ;;  %v4265_v7 = vmax.f32 %v4028_v63, 0.0 }
 0x48e   : > { %v4280_v26 = vmax.f32 %v4030_v44, 0.0  ;;  %v4279_v46 = vmax.f32 %v3959_v10, 0.0 }
 0x48f   : > { %v4358_v9 = vpack.c.bf16 %v4278_v15, %v4262_v11  ;;  %v4281_v27 = vmax.f32 %v4032_v17, 0.0 }
 0x490   : > { %v4360_v30 = vpack.c.bf16 %v4280_v26, %v4264_v62  ;;  %v3962_v33 = vpop.f32.mrb[172].mxu0  ;;  %v4359_v12 = vpack.c.bf16 %v4279_v46, %v4263_v20 }
 0x491   : > { %v3963_v34 = vadd.f32 %v3962_v33, %v11902_v5  ;;  %v4035_v35 = vpop.f32.mrb[172].mxu1  ;;  %v3964_v16 = vpop.f32.mrb[173].mxu0  ;;  %v4361_v39 = vpack.c.bf16 %v4281_v27, %v4265_v7 }
 0x492   : > { %v4036_v47 = vadd.f32 %v4035_v35, %v11902_v5  ;;  %v3965_v40 = vadd.f32 %v3964_v16, %v11902_v5  ;;  %v4037_v43 = vpop.f32.mrb[173].mxu1  ;;  %v3966_v18 = vpop.f32.mrb[174].mxu0  ;;  %4766 = vmatprep.subr.bf16.mxu0 %v4359_v12 }
 0x493   : > { %v4038_v48 = vadd.f32 %v4037_v43, %v11902_v5  ;;  %v3967_v21 = vadd.f32 %v3966_v18, %v11904_v1  ;;  %v4039_v24 = vpop.f32.mrb[174].mxu1  ;;  %4839 = vmatprep.subr.bf16.mxu1 %v4361_v39  ;;  %v3968_v36 = vpop.f32.mrb[175].mxu0  ;;  %4767 = vmatpush1.bf16.msra.mxu0 %v4358_v9  ;;  %v4294_v22 = vmax.f32 %v3963_v34, 0.0 }
 0x494   : > { %v4040_v13 = vadd.f32 %v4039_v24, %v11904_v1  ;;  %v3969_v41 = vadd.f32 %v3968_v36, %v11904_v1  ;;  %v4041_v4 = vpop.f32.mrb[175].mxu1  ;;  %4840 = vmatpush1.bf16.msra.mxu1 %v4360_v30  ;;  %v4296_v42 = vmax.f32 %v4036_v47, 0.0  ;;  %v4295_v45 = vmax.f32 %v3965_v40, 0.0 }
 0x495   : > { %v4310_v28 = vmax.f32 %v3967_v21, 0.0  ;;  %v4042_v60 = vadd.f32 %v4041_v4, %v11904_v1  ;;  %v4297_v49 = vmax.f32 %v4038_v48, 0.0 }
 0x496   : > { %v4312_v57 = vmax.f32 %v4040_v13, 0.0  ;;  %v4311_v55 = vmax.f32 %v3969_v41, 0.0 }
 0x497   : > { %v4374_v50 = vpack.c.bf16 %v4310_v28, %v4294_v22  ;;  %v4313_v51 = vmax.f32 %v4042_v60, 0.0 }
 0x498   : > { %v4376_v53 = vpack.c.bf16 %v4312_v57, %v4296_v42  ;;  %v4375_v54 = vpack.c.bf16 %v4311_v55, %v4295_v45 }
 0x499   : > { %v4377_v14 = vpack.c.bf16 %v4313_v51, %v4297_v49 }
 0x49a   : > { %4768 = vmatprep.subr.bf16.mxu0 %v4375_v54 }
 0x49b   : > { %4841 = vmatprep.subr.bf16.mxu1 %v4377_v14  ;;  %4769 = vmatpush1.bf16.msra.mxu0 %v4374_v50 }
 0x49c   : > { %4842 = vmatpush1.bf16.msra.mxu1 %v4376_v53 }
 0x49e   : > { %10011 = vmatmul.mubr.msk.bf16.vlgmr.msra.gmra.mrb[224].mxu0 %vm1865_vm2, %v11920_v61 }
 0x49f   : > { %10015 = vmatmul.mubr.msk.bf16.vlgmr.msra.gmra.mrb[224].mxu1 %vm1865_vm2, %v11920_v61  ;;  %4804 = vmatprep.mubr.bf16.mxu0 %v13744_v0 }
 0x4a0   : > { %4877 = vmatprep.mubr.bf16.mxu1 %v13744_v0 }
 0x4a6   : > { %10012 = vmatmul.mubr.msk.bf16.gmra.mrb[228].mxu0 %vm1865_vm2, %v11939_v37 }
 0x4a7   : > { %10016 = vmatmul.mubr.msk.bf16.gmra.mrb[228].mxu1 %vm1865_vm2, %v11939_v37  ;;  %4814 = vmatprep.mubr.bf16.mxu0 %v13744_v0 }
 0x4a8   : > { %4887 = vmatprep.mubr.bf16.mxu1 %v13744_v0 }
 0x4ae   : > { %10013 = vmatmul.mubr.msk.bf16.gmra.mrb[232].mxu0 %vm1865_vm2, %v11958_v29 }
 0x4af   : > { %10017 = vmatmul.mubr.msk.bf16.gmra.mrb[232].mxu1 %vm1865_vm2, %v11958_v29  ;;  %4824 = vmatprep.mubr.bf16.mxu0 %v13744_v0 }
 0x4b0   : > { %4897 = vmatprep.mubr.bf16.mxu1 %v13744_v0 }
 0x4b6   : > { %10014 = vmatmul.mubr.msk.bf16.gmra.mrb[236].mxu0 %vm1865_vm2, %v11977_v31 }
 0x4b7   : > { %10018 = vmatmul.mubr.msk.bf16.gmra.mrb[236].mxu1 %vm1865_vm2, %v11977_v31  ;;  %4940 = vmatprep.mubr.bf16.mxu0 %v13744_v0 }
 0x4b8   : > { %5013 = vmatprep.mubr.bf16.mxu1 %v13744_v0 }
 0x4c8   : > { %v4078_v23 = vpop.f32.mrb[176].mxu0 }
 0x4c9   : > { %v4079_v58 = vadd.f32 %v4078_v23, %v11866_v2  ;;  %v4151_v59 = vpop.f32.mrb[176].mxu1  ;;  %v4080_v63 = vpop.f32.mrb[177].mxu0 }
 0x4ca   : > { %v4152_v3 = vadd.f32 %v4151_v59, %v11866_v2  ;;  %v4081_v32 = vadd.f32 %v4080_v63, %v11866_v2  ;;  %v4153_v6 = vpop.f32.mrb[177].mxu1  ;;  %v4082_v44 = vpop.f32.mrb[178].mxu0 }
 0x4cb   : > { %v4154_v10 = vadd.f32 %v4153_v6, %v11866_v2  ;;  %v4083_v25 = vadd.f32 %v4082_v44, %v11868_v19  ;;  %v4155_v11 = vpop.f32.mrb[178].mxu1  ;;  %v4084_v15 = vpop.f32.mrb[179].mxu0  ;;  %v4202_v26 = vmax.f32 %v4079_v58, 0.0 }
 0x4cc   : > { %v4156_v17 = vadd.f32 %v4155_v11, %v11868_v19  ;;  %v4085_v62 = vadd.f32 %v4084_v15, %v11868_v19  ;;  %v4157_v20 = vpop.f32.mrb[179].mxu1  ;;  %v4204_v9 = vmax.f32 %v4152_v3, 0.0  ;;  %v4203_v27 = vmax.f32 %v4081_v32, 0.0 }
 0x4cd   : > { %v4218_v46 = vmax.f32 %v4083_v25, 0.0  ;;  %v4158_v7 = vadd.f32 %v4157_v20, %v11868_v19  ;;  %v4205_v12 = vmax.f32 %v4154_v10, 0.0 }
 0x4ce   : > { %v4220_v30 = vmax.f32 %v4156_v17, 0.0  ;;  %v4219_v33 = vmax.f32 %v4085_v62, 0.0 }
 0x4cf   : > { %v4330_v34 = vpack.c.bf16 %v4218_v46, %v4202_v26  ;;  %v4221_v2 = vmax.f32 %v4158_v7, 0.0 }
 0x4d0   : > { %v4332_v35 = vpack.c.bf16 %v4220_v30, %v4204_v9  ;;  %v4088_v16 = vpop.f32.mrb[180].mxu0  ;;  %v4331_v39 = vpack.c.bf16 %v4219_v33, %v4203_v27 }
 0x4d1   : > { %v4089_v47 = vadd.f32 %v4088_v16, %v11878_v56  ;;  %v4161_v40 = vpop.f32.mrb[180].mxu1  ;;  %v4090_v43 = vpop.f32.mrb[181].mxu0  ;;  %v4333_v18 = vpack.c.bf16 %v4221_v2, %v4205_v12 }
 0x4d2   : > { %v4162_v48 = vadd.f32 %v4161_v40, %v11878_v56  ;;  %v4091_v21 = vadd.f32 %v4090_v43, %v11878_v56  ;;  %v4163_v19 = vpop.f32.mrb[181].mxu1  ;;  %v4092_v24 = vpop.f32.mrb[182].mxu0  ;;  %4908 = vmatprep.subr.bf16.mxu0 %v4331_v39 }
 0x4d3   : > { %v4164_v36 = vadd.f32 %v4163_v19, %v11878_v56  ;;  %v4093_v13 = vadd.f32 %v4092_v24, %v11880_v8  ;;  %v4165_v41 = vpop.f32.mrb[182].mxu1  ;;  %4981 = vmatprep.subr.bf16.mxu1 %v4333_v18  ;;  %v4094_v4 = vpop.f32.mrb[183].mxu0  ;;  %4909 = vmatpush1.bf16.msra.mxu0 %v4330_v34  ;;  %v4234_v42 = vmax.f32 %v4089_v47, 0.0 }
 0x4d4   : > { %v4166_v22 = vadd.f32 %v4165_v41, %v11880_v8  ;;  %v4095_v28 = vadd.f32 %v4094_v4, %v11880_v8  ;;  %v4167_v60 = vpop.f32.mrb[183].mxu1  ;;  %4982 = vmatpush1.bf16.msra.mxu1 %v4332_v35  ;;  %v4236_v55 = vmax.f32 %v4162_v48, 0.0  ;;  %v4235_v49 = vmax.f32 %v4091_v21, 0.0 }
 0x4d5   : > { %v4250_v45 = vmax.f32 %v4093_v13, 0.0  ;;  %v4168_v57 = vadd.f32 %v4167_v60, %v11880_v8  ;;  %v4237_v51 = vmax.f32 %v4164_v36, 0.0 }
 0x4d6   : > { %v4252_v50 = vmax.f32 %v4166_v22, 0.0  ;;  %v4251_v56 = vmax.f32 %v4095_v28, 0.0 }
 0x4d7   : > { %v4346_v53 = vpack.c.bf16 %v4250_v45, %v4234_v42  ;;  %v4253_v54 = vmax.f32 %v4168_v57, 0.0 }
 0x4d8   : > { %v4348_v14 = vpack.c.bf16 %v4252_v50, %v4236_v55  ;;  %v4098_v23 = vpop.f32.mrb[184].mxu0  ;;  %v4347_v58 = vpack.c.bf16 %v4251_v56, %v4235_v49 }
 0x4d9   : > { %v4099_v59 = vadd.f32 %v4098_v23, %v11890_v38  ;;  %v4171_v63 = vpop.f32.mrb[184].mxu1  ;;  %v4100_v3 = vpop.f32.mrb[185].mxu0  ;;  %v4349_v32 = vpack.c.bf16 %v4253_v54, %v4237_v51 }
 0x4da   : > { %v4172_v6 = vadd.f32 %v4171_v63, %v11890_v38  ;;  %v4101_v44 = vadd.f32 %v4100_v3, %v11890_v38  ;;  %v4173_v8 = vpop.f32.mrb[185].mxu1  ;;  %v4102_v10 = vpop.f32.mrb[186].mxu0  ;;  %4910 = vmatprep.subr.bf16.mxu0 %v4347_v58 }
 0x4db   : > { %v4174_v25 = vadd.f32 %v4173_v8, %v11890_v38  ;;  %v4103_v11 = vadd.f32 %v4102_v10, %v11892_v52  ;;  %v4175_v15 = vpop.f32.mrb[186].mxu1  ;;  %4983 = vmatprep.subr.bf16.mxu1 %v4349_v32  ;;  %v4104_v17 = vpop.f32.mrb[187].mxu0  ;;  %4911 = vmatpush1.bf16.msra.mxu0 %v4346_v53  ;;  %v4266_v46 = vmax.f32 %v4099_v59, 0.0 }
 0x4dc   : > { %v4176_v62 = vadd.f32 %v4175_v15, %v11892_v52  ;;  %v4105_v20 = vadd.f32 %v4104_v17, %v11892_v52  ;;  %v4177_v26 = vpop.f32.mrb[187].mxu1  ;;  %4984 = vmatpush1.bf16.msra.mxu1 %v4348_v14  ;;  %v4268_v27 = vmax.f32 %v4172_v6, 0.0  ;;  %v4267_v30 = vmax.f32 %v4101_v44, 0.0 }
 0x4dd   : > { %v4282_v7 = vmax.f32 %v4103_v11, 0.0  ;;  %v4178_v9 = vadd.f32 %v4177_v26, %v11892_v52  ;;  %v4269_v12 = vmax.f32 %v4174_v25, 0.0 }
 0x4de   : > { %v4284_v33 = vmax.f32 %v4176_v62, 0.0  ;;  %v4283_v38 = vmax.f32 %v4105_v20, 0.0 }
 0x4df   : > { %v4362_v34 = vpack.c.bf16 %v4282_v7, %v4266_v46  ;;  %v4285_v2 = vmax.f32 %v4178_v9, 0.0 }
 0x4e0   : > { %v4364_v35 = vpack.c.bf16 %v4284_v33, %v4268_v27  ;;  %v4108_v16 = vpop.f32.mrb[188].mxu0  ;;  %v4363_v39 = vpack.c.bf16 %v4283_v38, %v4267_v30 }
 0x4e1   : > { %v4109_v47 = vadd.f32 %v4108_v16, %v11902_v5  ;;  %v4181_v40 = vpop.f32.mrb[188].mxu1  ;;  %v4110_v43 = vpop.f32.mrb[189].mxu0  ;;  %v4365_v18 = vpack.c.bf16 %v4285_v2, %v4269_v12 }
 0x4e2   : > { %v4182_v48 = vadd.f32 %v4181_v40, %v11902_v5  ;;  %v4111_v21 = vadd.f32 %v4110_v43, %v11902_v5  ;;  %v4183_v52 = vpop.f32.mrb[189].mxu1  ;;  %v4112_v19 = vpop.f32.mrb[190].mxu0  ;;  %4912 = vmatprep.subr.bf16.mxu0 %v4363_v39 }
 0x4e3   : > { %v4184_v24 = vadd.f32 %v4183_v52, %v11902_v5  ;;  %v4113_v36 = vadd.f32 %v4112_v19, %v11904_v1  ;;  %v4185_v13 = vpop.f32.mrb[190].mxu1  ;;  %4985 = vmatprep.subr.bf16.mxu1 %v4365_v18  ;;  %v4114_v41 = vpop.f32.mrb[191].mxu0  ;;  %4913 = vmatpush1.bf16.msra.mxu0 %v4362_v34  ;;  %v4298_v60 = vmax.f32 %v4109_v47, 0.0 }
 0x4e4   : > { %v4186_v4 = vadd.f32 %v4185_v13, %v11904_v1  ;;  %v4115_v22 = vadd.f32 %v4114_v41, %v11904_v1  ;;  %v4187_v28 = vpop.f32.mrb[191].mxu1  ;;  %4986 = vmatpush1.bf16.msra.mxu1 %v4364_v35  ;;  %v4300_v57 = vmax.f32 %v4182_v48, 0.0  ;;  %v4299_v55 = vmax.f32 %v4111_v21, 0.0 }
 0x4e5   : > { %v4314_v42 = vmax.f32 %v4113_v36, 0.0  ;;  %v4188_v45 = vadd.f32 %v4187_v28, %v11904_v1  ;;  %v4301_v50 = vmax.f32 %v4184_v24, 0.0  ;;  %v12126_v1 = vpop.permute.xlu0 %4400 }
 0x4e6   : > { %v4316_v49 = vmax.f32 %v4186_v4, 0.0  ;;  %v4315_v5 = vmax.f32 %v4115_v22, 0.0 }
 0x4e7   : > { %v4378_v56 = vpack.c.bf16 %v4314_v42, %v4298_v60  ;;  %v4317_v51 = vmax.f32 %v4188_v45, 0.0 }
 0x4e8   : > { %v4380_v53 = vpack.c.bf16 %v4316_v49, %v4300_v57  ;;  %v4379_v54 = vpack.c.bf16 %v4315_v5, %v4299_v55 }
 0x4e9   : > { %v4381_v14 = vpack.c.bf16 %v4317_v51, %v4301_v50  ;;  %v12138_v9 = vpop.permute.xlu0 %4410 }
 0x4ea   : > { %4914 = vmatprep.subr.bf16.mxu0 %v4379_v54 }
 0x4eb   : > { %4987 = vmatprep.subr.bf16.mxu1 %v4381_v14  ;;  %4915 = vmatpush1.bf16.msra.mxu0 %v4378_v56 }
 0x4ec   : > { %4988 = vmatpush1.bf16.msra.mxu1 %v4380_v53 }
 0x4ed   : > { %v12150_v55 = vpop.permute.xlu0 %4420 }
 0x4ee   : > { %10019 = vmatmul.mubr.msk.bf16.vlgmr.msra.gmra.mrb[240].mxu0 %vm1865_vm2, %v11920_v61 }
 0x4ef   : > { %10023 = vmatmul.mubr.msk.bf16.vlgmr.msra.gmra.mrb[240].mxu1 %vm1865_vm2, %v11920_v61  ;;  %4950 = vmatprep.mubr.bf16.mxu0 %v13744_v0  ;;  %v12128_v61 = vpop.permute.xlu1 %4405 }
 0x4f0   : > { %5023 = vmatprep.mubr.bf16.mxu1 %v13744_v0 }
 0x4f3   : > { %v12140_v38 = vpop.permute.xlu1 %4415 }
 0x4f6   : > { %10020 = vmatmul.mubr.msk.bf16.gmra.mrb[244].mxu0 %vm1865_vm2, %v11939_v37 }
 0x4f7   : > { %10024 = vmatmul.mubr.msk.bf16.gmra.mrb[244].mxu1 %vm1865_vm2, %v11939_v37  ;;  %4960 = vmatprep.mubr.bf16.mxu0 %v13744_v0  ;;  %v12152_v56 = vpop.permute.xlu1 %4425 }
 0x4f8   : > { %5033 = vmatprep.mubr.bf16.mxu1 %v13744_v0 }
 0x4fe   : > { %10021 = vmatmul.mubr.msk.bf16.gmra.mrb[248].mxu0 %vm1865_vm2, %v11958_v29 }
 0x4ff   : > { %10025 = vmatmul.mubr.msk.bf16.gmra.mrb[248].mxu1 %vm1865_vm2, %v11958_v29  ;;  %4970 = vmatprep.mubr.bf16.mxu0 %v13744_v0 }
 0x500   : > { %5043 = vmatprep.mubr.bf16.mxu1 %v13744_v0 }
 0x506   : > { %10022 = vmatmul.mubr.msk.bf16.gmra.mrb[252].mxu0 %vm1865_vm2, %v11977_v31 }
 0x507   : > { %10026 = vmatmul.mubr.msk.bf16.gmra.mrb[252].mxu1 %vm1865_vm2, %v11977_v31  ;;  %5326 = vmatprep.mubr.bf16.mxu0 %v13744_v0 }
 0x508   : > { %5399 = vmatprep.mubr.bf16.mxu1 %v13744_v0 }
 0x518   : > { %v4504_v37 = vpop.f32.mrb[192].mxu0 }
 0x519   : > { %v4505_v29 = vadd.f32 %v4504_v37, %v12126_v1  ;;  %v4577_v23 = vpop.f32.mrb[192].mxu1  ;;  %v4506_v58 = vpop.f32.mrb[193].mxu0 }
 0x51a   : > { %v4578_v59 = vadd.f32 %v4577_v23, %v12126_v1  ;;  %v4507_v63 = vadd.f32 %v4506_v58, %v12126_v1  ;;  %v4579_v3 = vpop.f32.mrb[193].mxu1  ;;  %v4508_v32 = vpop.f32.mrb[194].mxu0 }
 0x51b   : > { %v4580_v31 = vadd.f32 %v4579_v3, %v12126_v1  ;;  %v4509_v6 = vadd.f32 %v4508_v32, %v12128_v61  ;;  %v4581_v44 = vpop.f32.mrb[194].mxu1  ;;  %v4510_v8 = vpop.f32.mrb[195].mxu0  ;;  %v5054_v15 = vmax.f32 %v4505_v29, 0.0 }
 0x51c   : > { %v4582_v10 = vadd.f32 %v4581_v44, %v12128_v61  ;;  %v4511_v25 = vadd.f32 %v4510_v8, %v12128_v61  ;;  %v4583_v11 = vpop.f32.mrb[195].mxu1  ;;  %v5056_v20 = vmax.f32 %v4578_v59, 0.0  ;;  %v5055_v26 = vmax.f32 %v4507_v63, 0.0 }
 0x51d   : > { %v5070_v17 = vmax.f32 %v4509_v6, 0.0  ;;  %v4584_v62 = vadd.f32 %v4583_v11, %v12128_v61  ;;  %v5057_v27 = vmax.f32 %v4580_v31, 0.0 }
 0x51e   : > { %v5072_v46 = vmax.f32 %v4582_v10, 0.0  ;;  %v5071_v7 = vmax.f32 %v4511_v25, 0.0 }
 0x51f   : > { %v5182_v30 = vpack.c.bf16 %v5070_v17, %v5054_v15  ;;  %v5073_v33 = vmax.f32 %v4584_v62, 0.0 }
 0x520   : > { %v5184_v12 = vpack.c.bf16 %v5072_v46, %v5056_v20  ;;  %v4514_v34 = vpop.f32.mrb[196].mxu0  ;;  %v5183_v2 = vpack.c.bf16 %v5071_v7, %v5055_v26  ;;  %v12162_v7 = vpop.permute.xlu0 %4430 }
 0x521   : > { %v4515_v35 = vadd.f32 %v4514_v34, %v12138_v9  ;;  %v4587_v16 = vpop.f32.mrb[196].mxu1  ;;  %v4516_v39 = vpop.f32.mrb[197].mxu0  ;;  %v5185_v47 = vpack.c.bf16 %v5073_v33, %v5057_v27 }
 0x522   : > { %v4588_v40 = vadd.f32 %v4587_v16, %v12138_v9  ;;  %v4517_v43 = vadd.f32 %v4516_v39, %v12138_v9  ;;  %v4589_v18 = vpop.f32.mrb[197].mxu1  ;;  %v4518_v48 = vpop.f32.mrb[198].mxu0  ;;  %5294 = vmatprep.subr.bf16.mxu0 %v5183_v2 }
 0x523   : > { %v4590_v21 = vadd.f32 %v4589_v18, %v12138_v9  ;;  %v4519_v52 = vadd.f32 %v4518_v48, %v12140_v38  ;;  %v4591_v19 = vpop.f32.mrb[198].mxu1  ;;  %5367 = vmatprep.subr.bf16.mxu1 %v5185_v47  ;;  %v4520_v24 = vpop.f32.mrb[199].mxu0  ;;  %5295 = vmatpush1.bf16.msra.mxu0 %v5182_v30  ;;  %v5086_v4 = vmax.f32 %v4515_v35, 0.0 }
 0x524   : > { %v4592_v36 = vadd.f32 %v4591_v19, %v12140_v38  ;;  %v4521_v13 = vadd.f32 %v4520_v24, %v12140_v38  ;;  %v4593_v41 = vpop.f32.mrb[199].mxu1  ;;  %5368 = vmatpush1.bf16.msra.mxu1 %v5184_v12  ;;  %v5088_v60 = vmax.f32 %v4588_v40, 0.0  ;;  %v5087_v42 = vmax.f32 %v4517_v43, 0.0  ;;  %v12164_v12 = vpop.permute.xlu1 %4435 }
 0x525   : > { %v5102_v22 = vmax.f32 %v4519_v52, 0.0  ;;  %v4594_v28 = vadd.f32 %v4593_v41, %v12140_v38  ;;  %v5089_v49 = vmax.f32 %v4590_v21, 0.0 }
 0x526   : > { %v5104_v45 = vmax.f32 %v4592_v36, 0.0  ;;  %v5103_v57 = vmax.f32 %v4521_v13, 0.0 }
 0x527   : > { %v5198_v5 = vpack.c.bf16 %v5102_v22, %v5086_v4  ;;  %v5105_v50 = vmax.f32 %v4594_v28, 0.0 }
 0x528   : > { %v5200_v51 = vpack.c.bf16 %v5104_v45, %v5088_v60  ;;  %v4524_v53 = vpop.f32.mrb[200].mxu0  ;;  %v5199_v54 = vpack.c.bf16 %v5103_v57, %v5087_v42 }
 0x529   : > { %v4525_v14 = vadd.f32 %v4524_v53, %v12150_v55  ;;  %v4597_v37 = vpop.f32.mrb[200].mxu1  ;;  %v4526_v29 = vpop.f32.mrb[201].mxu0  ;;  %v5201_v23 = vpack.c.bf16 %v5105_v50, %v5089_v49 }
 0x52a   : > { %v4598_v58 = vadd.f32 %v4597_v37, %v12150_v55  ;;  %v4527_v59 = vadd.f32 %v4526_v29, %v12150_v55  ;;  %v4599_v63 = vpop.f32.mrb[201].mxu1  ;;  %v4528_v3 = vpop.f32.mrb[202].mxu0  ;;  %5296 = vmatprep.subr.bf16.mxu0 %v5199_v54 }
 0x52b   : > { %v4600_v32 = vadd.f32 %v4599_v63, %v12150_v55  ;;  %v4529_v31 = vadd.f32 %v4528_v3, %v12152_v56  ;;  %v4601_v6 = vpop.f32.mrb[202].mxu1  ;;  %5369 = vmatprep.subr.bf16.mxu1 %v5201_v23  ;;  %v4530_v44 = vpop.f32.mrb[203].mxu0  ;;  %5297 = vmatpush1.bf16.msra.mxu0 %v5198_v5  ;;  %v5118_v11 = vmax.f32 %v4525_v14, 0.0 }
 0x52c   : > { %v4602_v8 = vadd.f32 %v4601_v6, %v12152_v56  ;;  %v4531_v10 = vadd.f32 %v4530_v44, %v12152_v56  ;;  %v4603_v25 = vpop.f32.mrb[203].mxu1  ;;  %5370 = vmatpush1.bf16.msra.mxu1 %v5200_v51  ;;  %v5120_v62 = vmax.f32 %v4598_v58, 0.0  ;;  %v5119_v20 = vmax.f32 %v4527_v59, 0.0 }
 0x52d   : > { %v5134_v15 = vmax.f32 %v4529_v31, 0.0  ;;  %v4604_v17 = vadd.f32 %v4603_v25, %v12152_v56  ;;  %v5121_v27 = vmax.f32 %v4600_v32, 0.0  ;;  %v12180_v31 = vld [vmem:[%s13741_s1 + $0xd0] sm:$0xff]  }
 0x52e   : > { %v5136_v26 = vmax.f32 %v4602_v8, 0.0  ;;  %v5135_v46 = vmax.f32 %v4531_v10, 0.0 }
 0x52f   : > { %v5214_v30 = vpack.c.bf16 %v5134_v15, %v5118_v11  ;;  %v5137_v33 = vmax.f32 %v4604_v17, 0.0 }
 0x530   : > { %v5216_v34 = vpack.c.bf16 %v5136_v26, %v5120_v62  ;;  %v4534_v2 = vpop.f32.mrb[204].mxu0  ;;  %v5215_v35 = vpack.c.bf16 %v5135_v46, %v5119_v20 }
 0x531   : > { %v4535_v16 = vadd.f32 %v4534_v2, %v12162_v7  ;;  %v4607_v39 = vpop.f32.mrb[204].mxu1  ;;  %v4536_v47 = vpop.f32.mrb[205].mxu0  ;;  %v5217_v40 = vpack.c.bf16 %v5137_v33, %v5121_v27 }
 0x532   : > { %v4608_v43 = vadd.f32 %v4607_v39, %v12162_v7  ;;  %v4537_v18 = vadd.f32 %v4536_v47, %v12162_v7  ;;  %v4609_v48 = vpop.f32.mrb[205].mxu1  ;;  %v4538_v21 = vpop.f32.mrb[206].mxu0  ;;  %5298 = vmatprep.subr.bf16.mxu0 %v5215_v35 }
 0x533   : > { %v4610_v52 = vadd.f32 %v4609_v48, %v12162_v7  ;;  %v4539_v19 = vadd.f32 %v4538_v21, %v12164_v12  ;;  %v4611_v24 = vpop.f32.mrb[206].mxu1  ;;  %5371 = vmatprep.subr.bf16.mxu1 %v5217_v40  ;;  %v4540_v36 = vpop.f32.mrb[207].mxu0  ;;  %5299 = vmatpush1.bf16.msra.mxu0 %v5214_v30  ;;  %v5150_v22 = vmax.f32 %v4535_v16, 0.0 }
 0x534   : > { %v4612_v13 = vadd.f32 %v4611_v24, %v12164_v12  ;;  %v4541_v41 = vadd.f32 %v4540_v36, %v12164_v12  ;;  %v4613_v4 = vpop.f32.mrb[207].mxu1  ;;  %5372 = vmatpush1.bf16.msra.mxu1 %v5216_v34  ;;  %v5152_v42 = vmax.f32 %v4608_v43, 0.0  ;;  %v5151_v45 = vmax.f32 %v4537_v18, 0.0  ;;  %v12199_v24 = vld [vmem:[%s13741_s1 + $0xd8] sm:$0xff]  }
 0x535   : > { %v5166_v28 = vmax.f32 %v4539_v19, 0.0  ;;  %v4614_v60 = vadd.f32 %v4613_v4, %v12164_v12  ;;  %v5153_v5 = vmax.f32 %v4610_v52, 0.0 }
 0x536   : > { %v5168_v57 = vmax.f32 %v4612_v13, 0.0  ;;  %v5167_v49 = vmax.f32 %v4541_v41, 0.0 }
 0x537   : > { %v5230_v50 = vpack.c.bf16 %v5166_v28, %v5150_v22  ;;  %v5169_v51 = vmax.f32 %v4614_v60, 0.0 }
 0x538   : > { %v5232_v53 = vpack.c.bf16 %v5168_v57, %v5152_v42  ;;  %v4650_v54 = vpop.f32.mrb[208].mxu0  ;;  %v5231_v14 = vpack.c.bf16 %v5167_v49, %v5151_v45 }
 0x539   : > { %v4651_v37 = vadd.f32 %v4650_v54, %v12126_v1  ;;  %v4723_v29 = vpop.f32.mrb[208].mxu1  ;;  %v4652_v23 = vpop.f32.mrb[209].mxu0  ;;  %v5233_v58 = vpack.c.bf16 %v5169_v51, %v5153_v5 }
 0x53a   : > { %v4724_v59 = vadd.f32 %v4723_v29, %v12126_v1  ;;  %v4653_v63 = vadd.f32 %v4652_v23, %v12126_v1  ;;  %v4725_v3 = vpop.f32.mrb[209].mxu1  ;;  %v4654_v32 = vpop.f32.mrb[210].mxu0  ;;  %5300 = vmatprep.subr.bf16.mxu0 %v5231_v14 }
 0x53b   : > { %v4726_v6 = vadd.f32 %v4725_v3, %v12126_v1  ;;  %v4655_v44 = vadd.f32 %v4654_v32, %v12128_v61  ;;  %v4727_v8 = vpop.f32.mrb[210].mxu1  ;;  %5373 = vmatprep.subr.bf16.mxu1 %v5233_v58  ;;  %v4656_v10 = vpop.f32.mrb[211].mxu0  ;;  %5301 = vmatpush1.bf16.msra.mxu0 %v5230_v50  ;;  %v5058_v17 = vmax.f32 %v4651_v37, 0.0 }
 0x53c   : > { %v4728_v25 = vadd.f32 %v4727_v8, %v12128_v61  ;;  %v4657_v11 = vadd.f32 %v4656_v10, %v12128_v61  ;;  %v4729_v15 = vpop.f32.mrb[211].mxu1  ;;  %5374 = vmatpush1.bf16.msra.mxu1 %v5232_v53  ;;  %v5060_v26 = vmax.f32 %v4724_v59, 0.0  ;;  %v5059_v46 = vmax.f32 %v4653_v63, 0.0  ;;  %v12218_v10 = vld [vmem:[%s13741_s1 + $0xe0] sm:$0xff]  }
 0x53d   : > { %v5074_v62 = vmax.f32 %v4655_v44, 0.0  ;;  %v4730_v20 = vadd.f32 %v4729_v15, %v12128_v61  ;;  %v5061_v33 = vmax.f32 %v4726_v6, 0.0 }
 0x53e   : > { %v5076_v27 = vmax.f32 %v4728_v25, 0.0  ;;  %v5075_v30 = vmax.f32 %v4657_v11, 0.0  ;;  %10031 = vmatmul.mubr.msk.bf16.vlgmr.msra.gmra.mrb[16].mxu0 %vm1865_vm2, %v12180_v31 }
 0x53f   : > { %v5186_v34 = vpack.c.bf16 %v5074_v62, %v5058_v17  ;;  %v5077_v2 = vmax.f32 %v4730_v20, 0.0  ;;  %10035 = vmatmul.mubr.msk.bf16.vlgmr.msra.gmra.mrb[16].mxu1 %vm1865_vm2, %v12180_v31  ;;  %5336 = vmatprep.mubr.bf16.mxu0 %v13744_v0 }
 0x540   : > { %v5188_v35 = vpack.c.bf16 %v5076_v27, %v5060_v26  ;;  %v4660_v16 = vpop.f32.mrb[212].mxu0  ;;  %v5187_v39 = vpack.c.bf16 %v5075_v30, %v5059_v46  ;;  %5409 = vmatprep.mubr.bf16.mxu1 %v13744_v0 }
 0x541   : > { %v4661_v47 = vadd.f32 %v4660_v16, %v12138_v9  ;;  %v4733_v40 = vpop.f32.mrb[212].mxu1  ;;  %v4662_v43 = vpop.f32.mrb[213].mxu0  ;;  %v5189_v18 = vpack.c.bf16 %v5077_v2, %v5061_v33 }
 0x542   : > { %v4734_v48 = vadd.f32 %v4733_v40, %v12138_v9  ;;  %v4663_v21 = vadd.f32 %v4662_v43, %v12138_v9  ;;  %v4735_v52 = vpop.f32.mrb[213].mxu1  ;;  %v4664_v19 = vpop.f32.mrb[214].mxu0  ;;  %5440 = vmatprep.subr.bf16.mxu0 %v5187_v39 }
 0x543   : > { %v4736_v36 = vadd.f32 %v4735_v52, %v12138_v9  ;;  %v4665_v13 = vadd.f32 %v4664_v19, %v12140_v38  ;;  %v4737_v41 = vpop.f32.mrb[214].mxu1  ;;  %5513 = vmatprep.subr.bf16.mxu1 %v5189_v18  ;;  %v4666_v4 = vpop.f32.mrb[215].mxu0  ;;  %5441 = vmatpush1.bf16.msra.mxu0 %v5186_v34  ;;  %v5090_v42 = vmax.f32 %v4661_v47, 0.0 }
 0x544   : > { %v4738_v22 = vadd.f32 %v4737_v41, %v12140_v38  ;;  %v4667_v28 = vadd.f32 %v4666_v4, %v12140_v38  ;;  %v4739_v60 = vpop.f32.mrb[215].mxu1  ;;  %5514 = vmatpush1.bf16.msra.mxu1 %v5188_v35  ;;  %v5092_v49 = vmax.f32 %v4734_v48, 0.0  ;;  %v5091_v5 = vmax.f32 %v4663_v21, 0.0 }
 0x545   : > { %v5106_v45 = vmax.f32 %v4665_v13, 0.0  ;;  %v4740_v57 = vadd.f32 %v4739_v60, %v12140_v38  ;;  %v5093_v53 = vmax.f32 %v4736_v36, 0.0 }
 0x546   : > { %v5108_v50 = vmax.f32 %v4738_v22, 0.0  ;;  %v5107_v51 = vmax.f32 %v4667_v28, 0.0  ;;  %10032 = vmatmul.mubr.msk.bf16.gmra.mrb[20].mxu0 %vm1865_vm2, %v12199_v24  ;;  %v12237_v22 = vld [vmem:[%s13741_s1 + $0xe8] sm:$0xff]  }
 0x547   : > { %v5202_v54 = vpack.c.bf16 %v5106_v45, %v5090_v42  ;;  %v5109_v14 = vmax.f32 %v4740_v57, 0.0  ;;  %10036 = vmatmul.mubr.msk.bf16.gmra.mrb[20].mxu1 %vm1865_vm2, %v12199_v24  ;;  %5346 = vmatprep.mubr.bf16.mxu0 %v13744_v0 }
 0x548   : > { %v5204_v37 = vpack.c.bf16 %v5108_v50, %v5092_v49  ;;  %v4670_v29 = vpop.f32.mrb[216].mxu0  ;;  %v5203_v23 = vpack.c.bf16 %v5107_v51, %v5091_v5  ;;  %5419 = vmatprep.mubr.bf16.mxu1 %v13744_v0 }
 0x549   : > { %v4671_v58 = vadd.f32 %v4670_v29, %v12150_v55  ;;  %v4743_v59 = vpop.f32.mrb[216].mxu1  ;;  %v4672_v63 = vpop.f32.mrb[217].mxu0  ;;  %v5205_v3 = vpack.c.bf16 %v5109_v14, %v5093_v53 }
 0x54a   : > { %v4744_v32 = vadd.f32 %v4743_v59, %v12150_v55  ;;  %v4673_v6 = vadd.f32 %v4672_v63, %v12150_v55  ;;  %v4745_v44 = vpop.f32.mrb[217].mxu1  ;;  %v4674_v8 = vpop.f32.mrb[218].mxu0  ;;  %5442 = vmatprep.subr.bf16.mxu0 %v5203_v23 }
 0x54b   : > { %v4746_v25 = vadd.f32 %v4745_v44, %v12150_v55  ;;  %v4675_v11 = vadd.f32 %v4674_v8, %v12152_v56  ;;  %v4747_v15 = vpop.f32.mrb[218].mxu1  ;;  %5515 = vmatprep.subr.bf16.mxu1 %v5205_v3  ;;  %v4676_v17 = vpop.f32.mrb[219].mxu0  ;;  %5443 = vmatpush1.bf16.msra.mxu0 %v5202_v54  ;;  %v5122_v46 = vmax.f32 %v4671_v58, 0.0 }
 0x54c   : > { %v4748_v62 = vadd.f32 %v4747_v15, %v12152_v56  ;;  %v4677_v20 = vadd.f32 %v4676_v17, %v12152_v56  ;;  %v4749_v26 = vpop.f32.mrb[219].mxu1  ;;  %5516 = vmatpush1.bf16.msra.mxu1 %v5204_v37  ;;  %v5124_v33 = vmax.f32 %v4744_v32, 0.0  ;;  %v5123_v34 = vmax.f32 %v4673_v6, 0.0 }
 0x54d   : > { %v5138_v27 = vmax.f32 %v4675_v11, 0.0  ;;  %v4750_v30 = vadd.f32 %v4749_v26, %v12152_v56  ;;  %v5125_v16 = vmax.f32 %v4746_v25, 0.0 }
 0x54e   : > { %v5140_v2 = vmax.f32 %v4748_v62, 0.0  ;;  %v5139_v35 = vmax.f32 %v4677_v20, 0.0  ;;  %10033 = vmatmul.mubr.msk.bf16.gmra.mrb[24].mxu0 %vm1865_vm2, %v12218_v10 }
 0x54f   : > { %v5218_v39 = vpack.c.bf16 %v5138_v27, %v5122_v46  ;;  %v5141_v47 = vmax.f32 %v4750_v30, 0.0  ;;  %10037 = vmatmul.mubr.msk.bf16.gmra.mrb[24].mxu1 %vm1865_vm2, %v12218_v10  ;;  %5356 = vmatprep.mubr.bf16.mxu0 %v13744_v0 }
 0x550   : > { %v5220_v40 = vpack.c.bf16 %v5140_v2, %v5124_v33  ;;  %v4680_v43 = vpop.f32.mrb[220].mxu0  ;;  %v5219_v18 = vpack.c.bf16 %v5139_v35, %v5123_v34  ;;  %5429 = vmatprep.mubr.bf16.mxu1 %v13744_v0 }
 0x551   : > { %v4681_v48 = vadd.f32 %v4680_v43, %v12162_v7  ;;  %v4753_v21 = vpop.f32.mrb[220].mxu1  ;;  %v4682_v52 = vpop.f32.mrb[221].mxu0  ;;  %v5221_v19 = vpack.c.bf16 %v5141_v47, %v5125_v16 }
 0x552   : > { %v4754_v36 = vadd.f32 %v4753_v21, %v12162_v7  ;;  %v4683_v13 = vadd.f32 %v4682_v52, %v12162_v7  ;;  %v4755_v41 = vpop.f32.mrb[221].mxu1  ;;  %v4684_v4 = vpop.f32.mrb[222].mxu0  ;;  %5444 = vmatprep.subr.bf16.mxu0 %v5219_v18 }
 0x553   : > { %v4756_v28 = vadd.f32 %v4755_v41, %v12162_v7  ;;  %v4685_v60 = vadd.f32 %v4684_v4, %v12164_v12  ;;  %v4757_v42 = vpop.f32.mrb[222].mxu1  ;;  %5517 = vmatprep.subr.bf16.mxu1 %v5221_v19  ;;  %v4686_v45 = vpop.f32.mrb[223].mxu0  ;;  %5445 = vmatpush1.bf16.msra.mxu0 %v5218_v39  ;;  %v5154_v50 = vmax.f32 %v4681_v48, 0.0 }
 0x554   : > { %v4758_v57 = vadd.f32 %v4757_v42, %v12164_v12  ;;  %v4687_v49 = vadd.f32 %v4686_v45, %v12164_v12  ;;  %v4759_v5 = vpop.f32.mrb[223].mxu1  ;;  %5518 = vmatpush1.bf16.msra.mxu1 %v5220_v40  ;;  %v5156_v54 = vmax.f32 %v4754_v36, 0.0  ;;  %v5155_v14 = vmax.f32 %v4683_v13, 0.0 }
 0x555   : > { %v5170_v51 = vmax.f32 %v4685_v60, 0.0  ;;  %v4760_v53 = vadd.f32 %v4759_v5, %v12164_v12  ;;  %v5157_v23 = vmax.f32 %v4756_v28, 0.0 }
 0x556   : > { %v5172_v37 = vmax.f32 %v4758_v57, 0.0  ;;  %v5171_v29 = vmax.f32 %v4687_v49, 0.0  ;;  %10034 = vmatmul.mubr.msk.bf16.gmra.mrb[28].mxu0 %vm1865_vm2, %v12237_v22 }
 0x557   : > { %v5234_v58 = vpack.c.bf16 %v5170_v51, %v5154_v50  ;;  %v5173_v59 = vmax.f32 %v4760_v53, 0.0  ;;  %10038 = vmatmul.mubr.msk.bf16.gmra.mrb[28].mxu1 %vm1865_vm2, %v12237_v22  ;;  %5472 = vmatprep.mubr.bf16.mxu0 %v13744_v0 }
 0x558   : > { %v5236_v63 = vpack.c.bf16 %v5172_v37, %v5156_v54  ;;  %v5235_v3 = vpack.c.bf16 %v5171_v29, %v5155_v14  ;;  %5545 = vmatprep.mubr.bf16.mxu1 %v13744_v0 }
 0x559   : > { %v5237_v32 = vpack.c.bf16 %v5173_v59, %v5157_v23 }
 0x55a   : > { %5446 = vmatprep.subr.bf16.mxu0 %v5235_v3 }
 0x55b   : > { %5519 = vmatprep.subr.bf16.mxu1 %v5237_v32  ;;  %5447 = vmatpush1.bf16.msra.mxu0 %v5234_v58 }
 0x55c   : > { %5520 = vmatpush1.bf16.msra.mxu1 %v5236_v63 }
 0x55e   : > { %10039 = vmatmul.mubr.msk.bf16.vlgmr.msra.gmra.mrb[56].mxu0 %vm1865_vm2, %v12180_v31 }
 0x55f   : > { %10043 = vmatmul.mubr.msk.bf16.vlgmr.msra.gmra.mrb[56].mxu1 %vm1865_vm2, %v12180_v31  ;;  %5482 = vmatprep.mubr.bf16.mxu0 %v13744_v0 }
 0x560   : > { %5555 = vmatprep.mubr.bf16.mxu1 %v13744_v0 }
 0x566   : > { %10040 = vmatmul.mubr.msk.bf16.gmra.mrb[60].mxu0 %vm1865_vm2, %v12199_v24 }
 0x567   : > { %10044 = vmatmul.mubr.msk.bf16.gmra.mrb[60].mxu1 %vm1865_vm2, %v12199_v24  ;;  %5492 = vmatprep.mubr.bf16.mxu0 %v13744_v0 }
 0x568   : > { %5565 = vmatprep.mubr.bf16.mxu1 %v13744_v0 }
 0x56e   : > { %10041 = vmatmul.mubr.msk.bf16.gmra.mrb[64].mxu0 %vm1865_vm2, %v12218_v10 }
 0x56f   : > { %10045 = vmatmul.mubr.msk.bf16.gmra.mrb[64].mxu1 %vm1865_vm2, %v12218_v10  ;;  %5502 = vmatprep.mubr.bf16.mxu0 %v13744_v0 }
 0x570   : > { %5575 = vmatprep.mubr.bf16.mxu1 %v13744_v0 }
 0x571   : > { %v4796_v6 = vpop.f32.mrb[224].mxu0 }
 0x572   : > { %v4797_v44 = vadd.f32 %v4796_v6, %v12126_v1  ;;  %v4869_v8 = vpop.f32.mrb[224].mxu1  ;;  %v4798_v25 = vpop.f32.mrb[225].mxu0 }
 0x573   : > { %v4870_v11 = vadd.f32 %v4869_v8, %v12126_v1  ;;  %v4799_v15 = vadd.f32 %v4798_v25, %v12126_v1  ;;  %v4871_v17 = vpop.f32.mrb[225].mxu1  ;;  %v4800_v62 = vpop.f32.mrb[226].mxu0 }
 0x574   : > { %v4872_v20 = vadd.f32 %v4871_v17, %v12126_v1  ;;  %v4801_v26 = vadd.f32 %v4800_v62, %v12128_v61  ;;  %v4873_v46 = vpop.f32.mrb[226].mxu1  ;;  %v4802_v27 = vpop.f32.mrb[227].mxu0  ;;  %v5062_v2 = vmax.f32 %v4797_v44, 0.0 }
 0x575   : > { %v4874_v30 = vadd.f32 %v4873_v46, %v12128_v61  ;;  %v4803_v33 = vadd.f32 %v4802_v27, %v12128_v61  ;;  %v4875_v34 = vpop.f32.mrb[227].mxu1  ;;  %v5064_v39 = vmax.f32 %v4870_v11, 0.0  ;;  %v5063_v47 = vmax.f32 %v4799_v15, 0.0 }
 0x576   : > { %v5078_v35 = vmax.f32 %v4801_v26, 0.0  ;;  %v4876_v16 = vadd.f32 %v4875_v34, %v12128_v61  ;;  %10042 = vmatmul.mubr.msk.bf16.gmra.mrb[68].mxu0 %vm1865_vm2, %v12237_v22  ;;  %v5065_v18 = vmax.f32 %v4872_v20, 0.0 }
 0x577   : > { %v5080_v40 = vmax.f32 %v4874_v30, 0.0  ;;  %v5079_v43 = vmax.f32 %v4803_v33, 0.0  ;;  %10046 = vmatmul.mubr.msk.bf16.gmra.mrb[68].mxu1 %vm1865_vm2, %v12237_v22  ;;  %5618 = vmatprep.mubr.bf16.mxu0 %v13744_v0 }
 0x578   : > { %v5190_v48 = vpack.c.bf16 %v5078_v35, %v5062_v2  ;;  %v5081_v21 = vmax.f32 %v4876_v16, 0.0  ;;  %5691 = vmatprep.mubr.bf16.mxu1 %v13744_v0 }
 0x579   : > { %v5192_v52 = vpack.c.bf16 %v5080_v40, %v5064_v39  ;;  %v4806_v19 = vpop.f32.mrb[228].mxu0  ;;  %v5191_v36 = vpack.c.bf16 %v5079_v43, %v5063_v47 }
 0x57a   : > { %v4807_v13 = vadd.f32 %v4806_v19, %v12138_v9  ;;  %v4879_v41 = vpop.f32.mrb[228].mxu1  ;;  %v4808_v4 = vpop.f32.mrb[229].mxu0  ;;  %v5193_v28 = vpack.c.bf16 %v5081_v21, %v5065_v18 }
 0x57b   : > { %v4880_v60 = vadd.f32 %v4879_v41, %v12138_v9  ;;  %v4809_v42 = vadd.f32 %v4808_v4, %v12138_v9  ;;  %v4881_v45 = vpop.f32.mrb[229].mxu1  ;;  %v4810_v57 = vpop.f32.mrb[230].mxu0  ;;  %5586 = vmatprep.subr.bf16.mxu0 %v5191_v36 }
 0x57c   : > { %v4882_v49 = vadd.f32 %v4881_v45, %v12138_v9  ;;  %v4811_v5 = vadd.f32 %v4810_v57, %v12140_v38  ;;  %v4883_v50 = vpop.f32.mrb[230].mxu1  ;;  %5659 = vmatprep.subr.bf16.mxu1 %v5193_v28  ;;  %v4812_v51 = vpop.f32.mrb[231].mxu0  ;;  %5587 = vmatpush1.bf16.msra.mxu0 %v5190_v48  ;;  %v5094_v37 = vmax.f32 %v4807_v13, 0.0 }
 0x57d   : > { %v4884_v53 = vadd.f32 %v4883_v50, %v12140_v38  ;;  %v4813_v54 = vadd.f32 %v4812_v51, %v12140_v38  ;;  %v4885_v14 = vpop.f32.mrb[231].mxu1  ;;  %5660 = vmatpush1.bf16.msra.mxu1 %v5192_v52  ;;  %v5096_v58 = vmax.f32 %v4880_v60, 0.0  ;;  %v5095_v59 = vmax.f32 %v4809_v42, 0.0 }
 0x57e   : > { %v5110_v29 = vmax.f32 %v4811_v5, 0.0  ;;  %v4886_v23 = vadd.f32 %v4885_v14, %v12140_v38  ;;  %v5097_v32 = vmax.f32 %v4882_v49, 0.0 }
 0x57f   : > { %v5112_v63 = vmax.f32 %v4884_v53, 0.0  ;;  %v5111_v3 = vmax.f32 %v4813_v54, 0.0 }
 0x580   : > { %v5206_v6 = vpack.c.bf16 %v5110_v29, %v5094_v37  ;;  %v5113_v44 = vmax.f32 %v4886_v23, 0.0 }
 0x581   : > { %v5208_v8 = vpack.c.bf16 %v5112_v63, %v5096_v58  ;;  %v4816_v25 = vpop.f32.mrb[232].mxu0  ;;  %v5207_v11 = vpack.c.bf16 %v5111_v3, %v5095_v59 }
 0x582   : > { %v4817_v15 = vadd.f32 %v4816_v25, %v12150_v55  ;;  %v4889_v17 = vpop.f32.mrb[232].mxu1  ;;  %v4818_v62 = vpop.f32.mrb[233].mxu0  ;;  %v5209_v20 = vpack.c.bf16 %v5113_v44, %v5097_v32 }
 0x583   : > { %v4890_v26 = vadd.f32 %v4889_v17, %v12150_v55  ;;  %v4819_v46 = vadd.f32 %v4818_v62, %v12150_v55  ;;  %v4891_v27 = vpop.f32.mrb[233].mxu1  ;;  %v4820_v30 = vpop.f32.mrb[234].mxu0  ;;  %5588 = vmatprep.subr.bf16.mxu0 %v5207_v11 }
 0x584   : > { %v4892_v33 = vadd.f32 %v4891_v27, %v12150_v55  ;;  %v4821_v34 = vadd.f32 %v4820_v30, %v12152_v56  ;;  %v4893_v2 = vpop.f32.mrb[234].mxu1  ;;  %5661 = vmatprep.subr.bf16.mxu1 %v5209_v20  ;;  %v4822_v35 = vpop.f32.mrb[235].mxu0  ;;  %5589 = vmatpush1.bf16.msra.mxu0 %v5206_v6  ;;  %v5126_v40 = vmax.f32 %v4817_v15, 0.0 }
 0x585   : > { %v4894_v16 = vadd.f32 %v4893_v2, %v12152_v56  ;;  %v4823_v39 = vadd.f32 %v4822_v35, %v12152_v56  ;;  %v4895_v47 = vpop.f32.mrb[235].mxu1  ;;  %5662 = vmatpush1.bf16.msra.mxu1 %v5208_v8  ;;  %v5128_v48 = vmax.f32 %v4890_v26, 0.0  ;;  %v5127_v21 = vmax.f32 %v4819_v46, 0.0 }
 0x586   : > { %v5142_v43 = vmax.f32 %v4821_v34, 0.0  ;;  %v4896_v18 = vadd.f32 %v4895_v47, %v12152_v56  ;;  %v5129_v36 = vmax.f32 %v4892_v33, 0.0 }
 0x587   : > { %v5144_v52 = vmax.f32 %v4894_v16, 0.0  ;;  %v5143_v19 = vmax.f32 %v4823_v39, 0.0 }
 0x588   : > { %v5222_v13 = vpack.c.bf16 %v5142_v43, %v5126_v40  ;;  %v5145_v41 = vmax.f32 %v4896_v18, 0.0 }
 0x589   : > { %v5224_v4 = vpack.c.bf16 %v5144_v52, %v5128_v48  ;;  %v4826_v28 = vpop.f32.mrb[236].mxu0  ;;  %v5223_v60 = vpack.c.bf16 %v5143_v19, %v5127_v21 }
 0x58a   : > { %v4827_v42 = vadd.f32 %v4826_v28, %v12162_v7  ;;  %v4899_v45 = vpop.f32.mrb[236].mxu1  ;;  %v4828_v57 = vpop.f32.mrb[237].mxu0  ;;  %v5225_v49 = vpack.c.bf16 %v5145_v41, %v5129_v36 }
 0x58b   : > { %v4900_v5 = vadd.f32 %v4899_v45, %v12162_v7  ;;  %v4829_v50 = vadd.f32 %v4828_v57, %v12162_v7  ;;  %v4901_v51 = vpop.f32.mrb[237].mxu1  ;;  %v4830_v53 = vpop.f32.mrb[238].mxu0  ;;  %5590 = vmatprep.subr.bf16.mxu0 %v5223_v60 }
 0x58c   : > { %v4902_v54 = vadd.f32 %v4901_v51, %v12162_v7  ;;  %v4831_v14 = vadd.f32 %v4830_v53, %v12164_v12  ;;  %v4903_v37 = vpop.f32.mrb[238].mxu1  ;;  %5663 = vmatprep.subr.bf16.mxu1 %v5225_v49  ;;  %v4832_v29 = vpop.f32.mrb[239].mxu0  ;;  %5591 = vmatpush1.bf16.msra.mxu0 %v5222_v13  ;;  %v5158_v63 = vmax.f32 %v4827_v42, 0.0 }
 0x58d   : > { %v4904_v23 = vadd.f32 %v4903_v37, %v12164_v12  ;;  %v4833_v58 = vadd.f32 %v4832_v29, %v12164_v12  ;;  %v4905_v59 = vpop.f32.mrb[239].mxu1  ;;  %5664 = vmatpush1.bf16.msra.mxu1 %v5224_v4  ;;  %v5160_v6 = vmax.f32 %v4900_v5, 0.0  ;;  %v5159_v44 = vmax.f32 %v4829_v50, 0.0 }
 0x58e   : > { %v5174_v3 = vmax.f32 %v4831_v14, 0.0  ;;  %v4906_v32 = vadd.f32 %v4905_v59, %v12164_v12  ;;  %v5161_v11 = vmax.f32 %v4902_v54, 0.0 }
 0x58f   : > { %v5176_v8 = vmax.f32 %v4904_v23, 0.0  ;;  %v5175_v25 = vmax.f32 %v4833_v58, 0.0 }
 0x590   : > { %v5238_v15 = vpack.c.bf16 %v5174_v3, %v5158_v63  ;;  %v5177_v17 = vmax.f32 %v4906_v32, 0.0 }
 0x591   : > { %v5240_v62 = vpack.c.bf16 %v5176_v8, %v5160_v6  ;;  %v5239_v20 = vpack.c.bf16 %v5175_v25, %v5159_v44 }
 0x592   : > { %v5241_v26 = vpack.c.bf16 %v5177_v17, %v5161_v11 }
 0x593   : > { %5592 = vmatprep.subr.bf16.mxu0 %v5239_v20 }
 0x594   : > { %5665 = vmatprep.subr.bf16.mxu1 %v5241_v26  ;;  %5593 = vmatpush1.bf16.msra.mxu0 %v5238_v15 }
 0x595   : > { %5666 = vmatpush1.bf16.msra.mxu1 %v5240_v62 }
 0x597   : > { %10047 = vmatmul.mubr.msk.bf16.vlgmr.msra.gmra.mrb[96].mxu0 %vm1865_vm2, %v12180_v31 }
 0x598   : > { %10051 = vmatmul.mubr.msk.bf16.vlgmr.msra.gmra.mrb[96].mxu1 %vm1865_vm2, %v12180_v31  ;;  %5628 = vmatprep.mubr.bf16.mxu0 %v13744_v0 }
 0x599   : > { %5701 = vmatprep.mubr.bf16.mxu1 %v13744_v0 }
 0x59f   : > { %10048 = vmatmul.mubr.msk.bf16.gmra.mrb[100].mxu0 %vm1865_vm2, %v12199_v24 }
 0x5a0   : > { %10052 = vmatmul.mubr.msk.bf16.gmra.mrb[100].mxu1 %vm1865_vm2, %v12199_v24  ;;  %5638 = vmatprep.mubr.bf16.mxu0 %v13744_v0 }
 0x5a1   : > { %5711 = vmatprep.mubr.bf16.mxu1 %v13744_v0 }
 0x5a7   : > { %10049 = vmatmul.mubr.msk.bf16.gmra.mrb[104].mxu0 %vm1865_vm2, %v12218_v10 }
 0x5a8   : > { %10053 = vmatmul.mubr.msk.bf16.gmra.mrb[104].mxu1 %vm1865_vm2, %v12218_v10  ;;  %5648 = vmatprep.mubr.bf16.mxu0 %v13744_v0 }
 0x5a9   : > { %5721 = vmatprep.mubr.bf16.mxu1 %v13744_v0 }
 0x5af   : > { %10050 = vmatmul.mubr.msk.bf16.gmra.mrb[108].mxu0 %vm1865_vm2, %v12237_v22 }
 0x5b0   : > { %10054 = vmatmul.mubr.msk.bf16.gmra.mrb[108].mxu1 %vm1865_vm2, %v12237_v22  ;;  %5764 = vmatprep.mubr.bf16.mxu0 %v13744_v0 }
 0x5b1   : > { %5837 = vmatprep.mubr.bf16.mxu1 %v13744_v0 }
 0x5c1   : > { %v4942_v46 = vpop.f32.mrb[240].mxu0 }
 0x5c2   : > { %v4943_v27 = vadd.f32 %v4942_v46, %v12126_v1  ;;  %v5015_v30 = vpop.f32.mrb[240].mxu1  ;;  %v4944_v33 = vpop.f32.mrb[241].mxu0 }
 0x5c3   : > { %v5016_v34 = vadd.f32 %v5015_v30, %v12126_v1  ;;  %v4945_v2 = vadd.f32 %v4944_v33, %v12126_v1  ;;  %v5017_v35 = vpop.f32.mrb[241].mxu1  ;;  %v4946_v16 = vpop.f32.mrb[242].mxu0 }
 0x5c4   : > { %v5018_v39 = vadd.f32 %v5017_v35, %v12126_v1  ;;  %v4947_v47 = vadd.f32 %v4946_v16, %v12128_v61  ;;  %v5019_v40 = vpop.f32.mrb[242].mxu1  ;;  %v4948_v43 = vpop.f32.mrb[243].mxu0  ;;  %v5066_v52 = vmax.f32 %v4943_v27, 0.0 }
 0x5c5   : > { %v5020_v18 = vadd.f32 %v5019_v40, %v12128_v61  ;;  %v4949_v48 = vadd.f32 %v4948_v43, %v12128_v61  ;;  %v5021_v21 = vpop.f32.mrb[243].mxu1  ;;  %v5068_v13 = vmax.f32 %v5016_v34, 0.0  ;;  %v5067_v41 = vmax.f32 %v4945_v2, 0.0 }
 0x5c6   : > { %v5082_v19 = vmax.f32 %v4947_v47, 0.0  ;;  %v5022_v36 = vadd.f32 %v5021_v21, %v12128_v61  ;;  %v5069_v60 = vmax.f32 %v5018_v39, 0.0 }
 0x5c7   : > { %v5084_v4 = vmax.f32 %v5020_v18, 0.0  ;;  %v5083_v28 = vmax.f32 %v4949_v48, 0.0 }
 0x5c8   : > { %v5194_v42 = vpack.c.bf16 %v5082_v19, %v5066_v52  ;;  %v5085_v1 = vmax.f32 %v5022_v36, 0.0 }
 0x5c9   : > { %v5196_v45 = vpack.c.bf16 %v5084_v4, %v5068_v13  ;;  %v4952_v57 = vpop.f32.mrb[244].mxu0  ;;  %v5195_v49 = vpack.c.bf16 %v5083_v28, %v5067_v41 }
 0x5ca   : > { %v4953_v5 = vadd.f32 %v4952_v57, %v12138_v9  ;;  %v5025_v50 = vpop.f32.mrb[244].mxu1  ;;  %v4954_v51 = vpop.f32.mrb[245].mxu0  ;;  %v5197_v53 = vpack.c.bf16 %v5085_v1, %v5069_v60 }
 0x5cb   : > { %v5026_v54 = vadd.f32 %v5025_v50, %v12138_v9  ;;  %v4955_v14 = vadd.f32 %v4954_v51, %v12138_v9  ;;  %v5027_v61 = vpop.f32.mrb[245].mxu1  ;;  %v4956_v37 = vpop.f32.mrb[246].mxu0  ;;  %5732 = vmatprep.subr.bf16.mxu0 %v5195_v49 }
 0x5cc   : > { %v5028_v29 = vadd.f32 %v5027_v61, %v12138_v9  ;;  %v4957_v23 = vadd.f32 %v4956_v37, %v12140_v38  ;;  %v5029_v58 = vpop.f32.mrb[246].mxu1  ;;  %5805 = vmatprep.subr.bf16.mxu1 %v5197_v53  ;;  %v4958_v59 = vpop.f32.mrb[247].mxu0  ;;  %5733 = vmatpush1.bf16.msra.mxu0 %v5194_v42  ;;  %v5098_v6 = vmax.f32 %v4953_v5, 0.0 }
 0x5cd   : > { %v5030_v63 = vadd.f32 %v5029_v58, %v12140_v38  ;;  %v4959_v3 = vadd.f32 %v4958_v59, %v12140_v38  ;;  %v5031_v32 = vpop.f32.mrb[247].mxu1  ;;  %5806 = vmatpush1.bf16.msra.mxu1 %v5196_v45  ;;  %v5100_v25 = vmax.f32 %v5026_v54, 0.0  ;;  %v5099_v11 = vmax.f32 %v4955_v14, 0.0 }
 0x5ce   : > { %v5114_v44 = vmax.f32 %v4957_v23, 0.0  ;;  %v5032_v8 = vadd.f32 %v5031_v32, %v12140_v38  ;;  %v5101_v17 = vmax.f32 %v5028_v29, 0.0 }
 0x5cf   : > { %v5116_v15 = vmax.f32 %v5030_v63, 0.0  ;;  %v5115_v9 = vmax.f32 %v4959_v3, 0.0 }
 0x5d0   : > { %v5210_v62 = vpack.c.bf16 %v5114_v44, %v5098_v6  ;;  %v5117_v20 = vmax.f32 %v5032_v8, 0.0 }
 0x5d1   : > { %v5212_v26 = vpack.c.bf16 %v5116_v15, %v5100_v25  ;;  %v4962_v46 = vpop.f32.mrb[248].mxu0  ;;  %v5211_v27 = vpack.c.bf16 %v5115_v9, %v5099_v11 }
 0x5d2   : > { %v4963_v30 = vadd.f32 %v4962_v46, %v12150_v55  ;;  %v5035_v33 = vpop.f32.mrb[248].mxu1  ;;  %v4964_v34 = vpop.f32.mrb[249].mxu0  ;;  %v5213_v2 = vpack.c.bf16 %v5117_v20, %v5101_v17 }
 0x5d3   : > { %v5036_v35 = vadd.f32 %v5035_v33, %v12150_v55  ;;  %v4965_v16 = vadd.f32 %v4964_v34, %v12150_v55  ;;  %v5037_v38 = vpop.f32.mrb[249].mxu1  ;;  %v4966_v39 = vpop.f32.mrb[250].mxu0  ;;  %5734 = vmatprep.subr.bf16.mxu0 %v5211_v27 }
 0x5d4   : > { %v5038_v47 = vadd.f32 %v5037_v38, %v12150_v55  ;;  %v4967_v40 = vadd.f32 %v4966_v39, %v12152_v56  ;;  %v5039_v43 = vpop.f32.mrb[250].mxu1  ;;  %5807 = vmatprep.subr.bf16.mxu1 %v5213_v2  ;;  %v4968_v18 = vpop.f32.mrb[251].mxu0  ;;  %5735 = vmatpush1.bf16.msra.mxu0 %v5210_v62  ;;  %v5130_v19 = vmax.f32 %v4963_v30, 0.0 }
 0x5d5   : > { %v5040_v48 = vadd.f32 %v5039_v43, %v12152_v56  ;;  %v4969_v21 = vadd.f32 %v4968_v18, %v12152_v56  ;;  %v5041_v52 = vpop.f32.mrb[251].mxu1  ;;  %5808 = vmatpush1.bf16.msra.mxu1 %v5212_v26  ;;  %v5132_v41 = vmax.f32 %v5036_v35, 0.0  ;;  %v5131_v4 = vmax.f32 %v4965_v16, 0.0 }
 0x5d6   : > { %v5146_v36 = vmax.f32 %v4967_v40, 0.0  ;;  %v5042_v13 = vadd.f32 %v5041_v52, %v12152_v56  ;;  %v5133_v60 = vmax.f32 %v5038_v47, 0.0 }
 0x5d7   : > { %v5148_v28 = vmax.f32 %v5040_v48, 0.0  ;;  %v5147_v55 = vmax.f32 %v4969_v21, 0.0 }
 0x5d8   : > { %v5226_v42 = vpack.c.bf16 %v5146_v36, %v5130_v19  ;;  %v5149_v1 = vmax.f32 %v5042_v13, 0.0 }
 0x5d9   : > { %v5228_v45 = vpack.c.bf16 %v5148_v28, %v5132_v41  ;;  %v4972_v57 = vpop.f32.mrb[252].mxu0  ;;  %v5227_v49 = vpack.c.bf16 %v5147_v55, %v5131_v4 }
 0x5da   : > { %v4973_v5 = vadd.f32 %v4972_v57, %v12162_v7  ;;  %v5045_v50 = vpop.f32.mrb[252].mxu1  ;;  %v4974_v51 = vpop.f32.mrb[253].mxu0  ;;  %v5229_v53 = vpack.c.bf16 %v5149_v1, %v5133_v60 }
 0x5db   : > { %v5046_v54 = vadd.f32 %v5045_v50, %v12162_v7  ;;  %v4975_v14 = vadd.f32 %v4974_v51, %v12162_v7  ;;  %v5047_v56 = vpop.f32.mrb[253].mxu1  ;;  %v4976_v61 = vpop.f32.mrb[254].mxu0  ;;  %5736 = vmatprep.subr.bf16.mxu0 %v5227_v49 }
 0x5dc   : > { %v5048_v37 = vadd.f32 %v5047_v56, %v12162_v7  ;;  %v4977_v29 = vadd.f32 %v4976_v61, %v12164_v12  ;;  %v5049_v23 = vpop.f32.mrb[254].mxu1  ;;  %5809 = vmatprep.subr.bf16.mxu1 %v5229_v53  ;;  %v4978_v58 = vpop.f32.mrb[255].mxu0  ;;  %5737 = vmatpush1.bf16.msra.mxu0 %v5226_v42  ;;  %v5162_v32 = vmax.f32 %v4973_v5, 0.0 }
 0x5dd   : > { %v5050_v59 = vadd.f32 %v5049_v23, %v12164_v12  ;;  %v4979_v63 = vadd.f32 %v4978_v58, %v12164_v12  ;;  %v5051_v3 = vpop.f32.mrb[255].mxu1  ;;  %5810 = vmatpush1.bf16.msra.mxu1 %v5228_v45  ;;  %v5164_v8 = vmax.f32 %v5046_v54, 0.0  ;;  %v5163_v25 = vmax.f32 %v4975_v14, 0.0 }
 0x5de   : > { %v5178_v6 = vmax.f32 %v4977_v29, 0.0  ;;  %v5052_v44 = vadd.f32 %v5051_v3, %v12164_v12  ;;  %v5165_v15 = vmax.f32 %v5048_v37, 0.0  ;;  %v12386_v12 = vpop.permute.xlu0 %5880 }
 0x5df   : > { %v5180_v11 = vmax.f32 %v5050_v59, 0.0  ;;  %v5179_v7 = vmax.f32 %v4979_v63, 0.0 }
 0x5e0   : > { %v5242_v9 = vpack.c.bf16 %v5178_v6, %v5162_v32  ;;  %v5181_v17 = vmax.f32 %v5052_v44, 0.0 }
 0x5e1   : > { %v5244_v62 = vpack.c.bf16 %v5180_v11, %v5164_v8  ;;  %v5243_v20 = vpack.c.bf16 %v5179_v7, %v5163_v25 }
 0x5e2   : > { %v5245_v26 = vpack.c.bf16 %v5181_v17, %v5165_v15  ;;  %v12398_v13 = vpop.permute.xlu0 %5890 }
 0x5e3   : > { %5738 = vmatprep.subr.bf16.mxu0 %v5243_v20 }
 0x5e4   : > { %5811 = vmatprep.subr.bf16.mxu1 %v5245_v26  ;;  %5739 = vmatpush1.bf16.msra.mxu0 %v5242_v9 }
 0x5e5   : > { %5812 = vmatpush1.bf16.msra.mxu1 %v5244_v62 }
 0x5e6   : > { %v12410_v25 = vpop.permute.xlu0 %5900 }
 0x5e7   : > { %10055 = vmatmul.mubr.msk.bf16.vlgmr.msra.gmra.mrb[136].mxu0 %vm1865_vm2, %v12180_v31 }
 0x5e8   : > { %10059 = vmatmul.mubr.msk.bf16.vlgmr.msra.gmra.mrb[136].mxu1 %vm1865_vm2, %v12180_v31  ;;  %5774 = vmatprep.mubr.bf16.mxu0 %v13744_v0  ;;  %v12388_v31 = vpop.permute.xlu1 %5885 }
 0x5e9   : > { %5847 = vmatprep.mubr.bf16.mxu1 %v13744_v0 }
 0x5ec   : > { %v12400_v55 = vpop.permute.xlu1 %5895 }
 0x5ef   : > { %10056 = vmatmul.mubr.msk.bf16.gmra.mrb[140].mxu0 %vm1865_vm2, %v12199_v24 }
 0x5f0   : > { %10060 = vmatmul.mubr.msk.bf16.gmra.mrb[140].mxu1 %vm1865_vm2, %v12199_v24  ;;  %5784 = vmatprep.mubr.bf16.mxu0 %v13744_v0  ;;  %v12412_v9 = vpop.permute.xlu1 %5905 }
 0x5f1   : > { %5857 = vmatprep.mubr.bf16.mxu1 %v13744_v0 }
 0x5f7   : > { %10057 = vmatmul.mubr.msk.bf16.gmra.mrb[144].mxu0 %vm1865_vm2, %v12218_v10 }
 0x5f8   : > { %10061 = vmatmul.mubr.msk.bf16.gmra.mrb[144].mxu1 %vm1865_vm2, %v12218_v10  ;;  %5794 = vmatprep.mubr.bf16.mxu0 %v13744_v0 }
 0x5f9   : > { %5867 = vmatprep.mubr.bf16.mxu1 %v13744_v0 }
 0x5ff   : > { %10058 = vmatmul.mubr.msk.bf16.gmra.mrb[148].mxu0 %vm1865_vm2, %v12237_v22 }
 0x600   : > { %10062 = vmatmul.mubr.msk.bf16.gmra.mrb[148].mxu1 %vm1865_vm2, %v12237_v22  ;;  %6358 = vmatprep.mubr.bf16.mxu0 %v13744_v0 }
 0x601   : > { %6431 = vmatprep.mubr.bf16.mxu1 %v13744_v0 }
 0x611   : > { %v5328_v24 = vpop.f32.mrb[16].mxu0 }
 0x612   : > { %v5918_v10 = vadd.f32 %v12386_v12, %v5328_v24  ;;  %v5401_v46 = vpop.f32.mrb[16].mxu1  ;;  %v5330_v27 = vpop.f32.mrb[17].mxu0 }
 0x613   : > { %v5920_v30 = vadd.f32 %v12386_v12, %v5401_v46  ;;  %v5919_v33 = vadd.f32 %v12386_v12, %v5330_v27  ;;  %v5403_v34 = vpop.f32.mrb[17].mxu1  ;;  %v5332_v2 = vpop.f32.mrb[18].mxu0 }
 0x614   : > { %v5921_v22 = vadd.f32 %v12386_v12, %v5403_v34  ;;  %v5934_v35 = vadd.f32 %v12388_v31, %v5332_v2  ;;  %v5405_v16 = vpop.f32.mrb[18].mxu1  ;;  %v5334_v38 = vpop.f32.mrb[19].mxu0  ;;  %v6046_v43 = vmax.f32 %v5918_v10, 0.0 }
 0x615   : > { %v5936_v39 = vadd.f32 %v12388_v31, %v5405_v16  ;;  %v5935_v47 = vadd.f32 %v12388_v31, %v5334_v38  ;;  %v5407_v40 = vpop.f32.mrb[19].mxu1  ;;  %v6048_v21 = vmax.f32 %v5920_v30, 0.0  ;;  %v6047_v52 = vmax.f32 %v5919_v33, 0.0 }
 0x616   : > { %v6062_v18 = vmax.f32 %v5934_v35, 0.0  ;;  %v5937_v48 = vadd.f32 %v12388_v31, %v5407_v40  ;;  %v6049_v41 = vmax.f32 %v5921_v22, 0.0 }
 0x617   : > { %v6064_v19 = vmax.f32 %v5936_v39, 0.0  ;;  %v6063_v36 = vmax.f32 %v5935_v47, 0.0 }
 0x618   : > { %v6174_v4 = vpack.c.bf16 %v6062_v18, %v6046_v43  ;;  %v6065_v28 = vmax.f32 %v5937_v48, 0.0 }
 0x619   : > { %v6176_v60 = vpack.c.bf16 %v6064_v19, %v6048_v21  ;;  %v5338_v42 = vpop.f32.mrb[20].mxu0  ;;  %v6175_v1 = vpack.c.bf16 %v6063_v36, %v6047_v52  ;;  %v12422_v36 = vpop.permute.xlu0 %5910 }
 0x61a   : > { %v5950_v45 = vadd.f32 %v12398_v13, %v5338_v42  ;;  %v5411_v57 = vpop.f32.mrb[20].mxu1  ;;  %v5340_v49 = vpop.f32.mrb[21].mxu0  ;;  %v6177_v5 = vpack.c.bf16 %v6065_v28, %v6049_v41 }
 0x61b   : > { %v5952_v50 = vadd.f32 %v12398_v13, %v5411_v57  ;;  %v5951_v51 = vadd.f32 %v12398_v13, %v5340_v49  ;;  %v5413_v53 = vpop.f32.mrb[21].mxu1  ;;  %v5342_v54 = vpop.f32.mrb[22].mxu0  ;;  %6326 = vmatprep.subr.bf16.mxu0 %v6175_v1 }
 0x61c   : > { %v5953_v14 = vadd.f32 %v12398_v13, %v5413_v53  ;;  %v5966_v56 = vadd.f32 %v12400_v55, %v5342_v54  ;;  %v5415_v61 = vpop.f32.mrb[22].mxu1  ;;  %6399 = vmatprep.subr.bf16.mxu1 %v6177_v5  ;;  %v5344_v37 = vpop.f32.mrb[23].mxu0  ;;  %6327 = vmatpush1.bf16.msra.mxu0 %v6174_v4  ;;  %v6078_v59 = vmax.f32 %v5950_v45, 0.0 }
 0x61d   : > { %v5968_v29 = vadd.f32 %v12400_v55, %v5415_v61  ;;  %v5967_v23 = vadd.f32 %v12400_v55, %v5344_v37  ;;  %v5417_v58 = vpop.f32.mrb[23].mxu1  ;;  %6400 = vmatpush1.bf16.msra.mxu1 %v6176_v60  ;;  %v6080_v32 = vmax.f32 %v5952_v50, 0.0  ;;  %v6079_v6 = vmax.f32 %v5951_v51, 0.0  ;;  %v12424_v60 = vpop.permute.xlu1 %5915 }
 0x61e   : > { %v6094_v63 = vmax.f32 %v5966_v56, 0.0  ;;  %v5969_v3 = vadd.f32 %v12400_v55, %v5417_v58  ;;  %v6081_v11 = vmax.f32 %v5953_v14, 0.0 }
 0x61f   : > { %v6096_v44 = vmax.f32 %v5968_v29, 0.0  ;;  %v6095_v8 = vmax.f32 %v5967_v23, 0.0 }
 0x620   : > { %v6190_v7 = vpack.c.bf16 %v6094_v63, %v6078_v59  ;;  %v6097_v15 = vmax.f32 %v5969_v3, 0.0 }
 0x621   : > { %v6192_v17 = vpack.c.bf16 %v6096_v44, %v6080_v32  ;;  %v5348_v62 = vpop.f32.mrb[24].mxu0  ;;  %v6191_v20 = vpack.c.bf16 %v6095_v8, %v6079_v6 }
 0x622   : > { %v5982_v26 = vadd.f32 %v12410_v25, %v5348_v62  ;;  %v5421_v24 = vpop.f32.mrb[24].mxu1  ;;  %v5350_v10 = vpop.f32.mrb[25].mxu0  ;;  %v6193_v46 = vpack.c.bf16 %v6097_v15, %v6081_v11 }
 0x623   : > { %v5984_v27 = vadd.f32 %v12410_v25, %v5421_v24  ;;  %v5983_v30 = vadd.f32 %v12410_v25, %v5350_v10  ;;  %v5423_v33 = vpop.f32.mrb[25].mxu1  ;;  %v5352_v34 = vpop.f32.mrb[26].mxu0  ;;  %6328 = vmatprep.subr.bf16.mxu0 %v6191_v20 }
 0x624   : > { %v5985_v2 = vadd.f32 %v12410_v25, %v5423_v33  ;;  %v5998_v22 = vadd.f32 %v12412_v9, %v5352_v34  ;;  %v5425_v35 = vpop.f32.mrb[26].mxu1  ;;  %6401 = vmatprep.subr.bf16.mxu1 %v6193_v46  ;;  %v5354_v16 = vpop.f32.mrb[27].mxu0  ;;  %6329 = vmatpush1.bf16.msra.mxu0 %v6190_v7  ;;  %v6110_v40 = vmax.f32 %v5982_v26, 0.0 }
 0x625   : > { %v6000_v38 = vadd.f32 %v12412_v9, %v5425_v35  ;;  %v5999_v39 = vadd.f32 %v12412_v9, %v5354_v16  ;;  %v5427_v47 = vpop.f32.mrb[27].mxu1  ;;  %6402 = vmatpush1.bf16.msra.mxu1 %v6192_v17  ;;  %v6112_v48 = vmax.f32 %v5984_v27, 0.0  ;;  %v6111_v21 = vmax.f32 %v5983_v30, 0.0 }
 0x626   : > { %v6126_v43 = vmax.f32 %v5998_v22, 0.0  ;;  %v6001_v18 = vadd.f32 %v12412_v9, %v5427_v47  ;;  %v6113_v41 = vmax.f32 %v5985_v2, 0.0  ;;  %v12440_v22 = vld [vmem:[%s13741_s1 + $0xf0] sm:$0xff]  }
 0x627   : > { %v6128_v52 = vmax.f32 %v6000_v38, 0.0  ;;  %v6127_v19 = vmax.f32 %v5999_v39, 0.0 }
 0x628   : > { %v6206_v4 = vpack.c.bf16 %v6126_v43, %v6110_v40  ;;  %v6129_v28 = vmax.f32 %v6001_v18, 0.0 }
 0x629   : > { %v6208_v42 = vpack.c.bf16 %v6128_v52, %v6112_v48  ;;  %v5358_v1 = vpop.f32.mrb[28].mxu0  ;;  %v6207_v45 = vpack.c.bf16 %v6127_v19, %v6111_v21 }
 0x62a   : > { %v6014_v57 = vadd.f32 %v12422_v36, %v5358_v1  ;;  %v5431_v49 = vpop.f32.mrb[28].mxu1  ;;  %v5360_v5 = vpop.f32.mrb[29].mxu0  ;;  %v6209_v50 = vpack.c.bf16 %v6129_v28, %v6113_v41 }
 0x62b   : > { %v6016_v51 = vadd.f32 %v12422_v36, %v5431_v49  ;;  %v6015_v53 = vadd.f32 %v12422_v36, %v5360_v5  ;;  %v5433_v54 = vpop.f32.mrb[29].mxu1  ;;  %v5362_v14 = vpop.f32.mrb[30].mxu0  ;;  %6330 = vmatprep.subr.bf16.mxu0 %v6207_v45 }
 0x62c   : > { %v6017_v56 = vadd.f32 %v12422_v36, %v5433_v54  ;;  %v6030_v61 = vadd.f32 %v12424_v60, %v5362_v14  ;;  %v5435_v37 = vpop.f32.mrb[30].mxu1  ;;  %6403 = vmatprep.subr.bf16.mxu1 %v6209_v50  ;;  %v5364_v29 = vpop.f32.mrb[31].mxu0  ;;  %6331 = vmatpush1.bf16.msra.mxu0 %v6206_v4  ;;  %v6142_v63 = vmax.f32 %v6014_v57, 0.0 }
 0x62d   : > { %v6032_v23 = vadd.f32 %v12424_v60, %v5435_v37  ;;  %v6031_v58 = vadd.f32 %v12424_v60, %v5364_v29  ;;  %v5437_v59 = vpop.f32.mrb[31].mxu1  ;;  %6404 = vmatpush1.bf16.msra.mxu1 %v6208_v42  ;;  %v6144_v6 = vmax.f32 %v6016_v51, 0.0  ;;  %v6143_v44 = vmax.f32 %v6015_v53, 0.0  ;;  %v12459_v37 = vld [vmem:[%s13741_s1 + $0xf8] sm:$0xff]  }
 0x62e   : > { %v6158_v3 = vmax.f32 %v6030_v61, 0.0  ;;  %v6033_v32 = vadd.f32 %v12424_v60, %v5437_v59  ;;  %v6145_v7 = vmax.f32 %v6017_v56, 0.0 }
 0x62f   : > { %v6160_v8 = vmax.f32 %v6032_v23, 0.0  ;;  %v6159_v11 = vmax.f32 %v6031_v58, 0.0 }
 0x630   : > { %v6222_v15 = vpack.c.bf16 %v6158_v3, %v6142_v63  ;;  %v6161_v17 = vmax.f32 %v6033_v32, 0.0 }
 0x631   : > { %v6224_v62 = vpack.c.bf16 %v6160_v8, %v6144_v6  ;;  %v5474_v20 = vpop.f32.mrb[56].mxu0  ;;  %v6223_v26 = vpack.c.bf16 %v6159_v11, %v6143_v44 }
 0x632   : > { %v5922_v24 = vadd.f32 %v12386_v12, %v5474_v20  ;;  %v5547_v10 = vpop.f32.mrb[56].mxu1  ;;  %v5476_v46 = vpop.f32.mrb[57].mxu0  ;;  %v6225_v27 = vpack.c.bf16 %v6161_v17, %v6145_v7 }
 0x633   : > { %v5924_v30 = vadd.f32 %v12386_v12, %v5547_v10  ;;  %v5923_v33 = vadd.f32 %v12386_v12, %v5476_v46  ;;  %v5549_v34 = vpop.f32.mrb[57].mxu1  ;;  %v5478_v2 = vpop.f32.mrb[58].mxu0  ;;  %6332 = vmatprep.subr.bf16.mxu0 %v6223_v26 }
 0x634   : > { %v5925_v35 = vadd.f32 %v12386_v12, %v5549_v34  ;;  %v5938_v16 = vadd.f32 %v12388_v31, %v5478_v2  ;;  %v5551_v38 = vpop.f32.mrb[58].mxu1  ;;  %6405 = vmatprep.subr.bf16.mxu1 %v6225_v27  ;;  %v5480_v39 = vpop.f32.mrb[59].mxu0  ;;  %6333 = vmatpush1.bf16.msra.mxu0 %v6222_v15  ;;  %v6050_v18 = vmax.f32 %v5922_v24, 0.0 }
 0x635   : > { %v5940_v47 = vadd.f32 %v12388_v31, %v5551_v38  ;;  %v5939_v40 = vadd.f32 %v12388_v31, %v5480_v39  ;;  %v5553_v43 = vpop.f32.mrb[59].mxu1  ;;  %6406 = vmatpush1.bf16.msra.mxu1 %v6224_v62  ;;  %v6052_v52 = vmax.f32 %v5924_v30, 0.0  ;;  %v6051_v19 = vmax.f32 %v5923_v33, 0.0  ;;  %v12478_v39 = vld [vmem:[%s13741_s1 + $0x100] sm:$0xff]  }
 0x636   : > { %v6066_v48 = vmax.f32 %v5938_v16, 0.0  ;;  %v5941_v21 = vadd.f32 %v12388_v31, %v5553_v43  ;;  %v6053_v28 = vmax.f32 %v5925_v35, 0.0 }
 0x637   : > { %v6068_v41 = vmax.f32 %v5940_v47, 0.0  ;;  %v6067_v4 = vmax.f32 %v5939_v40, 0.0  ;;  %10067 = vmatmul.mubr.msk.bf16.vlgmr.msra.gmra.mrb[0].mxu0 %vm1865_vm2, %v12440_v22 }
 0x638   : > { %v6178_v42 = vpack.c.bf16 %v6066_v48, %v6050_v18  ;;  %v6069_v1 = vmax.f32 %v5941_v21, 0.0  ;;  %10071 = vmatmul.mubr.msk.bf16.vlgmr.msra.gmra.mrb[0].mxu1 %vm1865_vm2, %v12440_v22  ;;  %6368 = vmatprep.mubr.bf16.mxu0 %v13744_v0 }
 0x639   : > { %v6180_v45 = vpack.c.bf16 %v6068_v41, %v6052_v52  ;;  %v5484_v57 = vpop.f32.mrb[60].mxu0  ;;  %v6179_v49 = vpack.c.bf16 %v6067_v4, %v6051_v19  ;;  %6441 = vmatprep.mubr.bf16.mxu1 %v13744_v0 }
 0x63a   : > { %v5954_v5 = vadd.f32 %v12398_v13, %v5484_v57  ;;  %v5557_v50 = vpop.f32.mrb[60].mxu1  ;;  %v5486_v51 = vpop.f32.mrb[61].mxu0  ;;  %v6181_v53 = vpack.c.bf16 %v6069_v1, %v6053_v28 }
 0x63b   : > { %v5956_v54 = vadd.f32 %v12398_v13, %v5557_v50  ;;  %v5955_v14 = vadd.f32 %v12398_v13, %v5486_v51  ;;  %v5559_v56 = vpop.f32.mrb[61].mxu1  ;;  %v5488_v61 = vpop.f32.mrb[62].mxu0  ;;  %6472 = vmatprep.subr.bf16.mxu0 %v6179_v49 }
 0x63c   : > { %v5957_v29 = vadd.f32 %v12398_v13, %v5559_v56  ;;  %v5970_v23 = vadd.f32 %v12400_v55, %v5488_v61  ;;  %v5561_v58 = vpop.f32.mrb[62].mxu1  ;;  %6545 = vmatprep.subr.bf16.mxu1 %v6181_v53  ;;  %v5490_v59 = vpop.f32.mrb[63].mxu0  ;;  %6473 = vmatpush1.bf16.msra.mxu0 %v6178_v42  ;;  %v6082_v6 = vmax.f32 %v5954_v5, 0.0 }
 0x63d   : > { %v5972_v63 = vadd.f32 %v12400_v55, %v5561_v58  ;;  %v5971_v3 = vadd.f32 %v12400_v55, %v5490_v59  ;;  %v5563_v32 = vpop.f32.mrb[63].mxu1  ;;  %6546 = vmatpush1.bf16.msra.mxu1 %v6180_v45  ;;  %v6084_v11 = vmax.f32 %v5956_v54, 0.0  ;;  %v6083_v7 = vmax.f32 %v5955_v14, 0.0 }
 0x63e   : > { %v6098_v44 = vmax.f32 %v5970_v23, 0.0  ;;  %v5973_v8 = vadd.f32 %v12400_v55, %v5563_v32  ;;  %v6085_v62 = vmax.f32 %v5957_v29, 0.0 }
 0x63f   : > { %v6100_v15 = vmax.f32 %v5972_v63, 0.0  ;;  %v6099_v17 = vmax.f32 %v5971_v3, 0.0  ;;  %10068 = vmatmul.mubr.msk.bf16.gmra.mrb[4].mxu0 %vm1865_vm2, %v12459_v37  ;;  %v12497_v63 = vld [vmem:[%s13741_s1 + $0x108] sm:$0xff]  }
 0x640   : > { %v6194_v20 = vpack.c.bf16 %v6098_v44, %v6082_v6  ;;  %v6101_v26 = vmax.f32 %v5973_v8, 0.0  ;;  %10072 = vmatmul.mubr.msk.bf16.gmra.mrb[4].mxu1 %vm1865_vm2, %v12459_v37  ;;  %6378 = vmatprep.mubr.bf16.mxu0 %v13744_v0 }
 0x641   : > { %v6196_v24 = vpack.c.bf16 %v6100_v15, %v6084_v11  ;;  %v5494_v10 = vpop.f32.mrb[64].mxu0  ;;  %v6195_v46 = vpack.c.bf16 %v6099_v17, %v6083_v7  ;;  %6451 = vmatprep.mubr.bf16.mxu1 %v13744_v0 }
 0x642   : > { %v5986_v27 = vadd.f32 %v12410_v25, %v5494_v10  ;;  %v5567_v30 = vpop.f32.mrb[64].mxu1  ;;  %v5496_v33 = vpop.f32.mrb[65].mxu0  ;;  %v6197_v34 = vpack.c.bf16 %v6101_v26, %v6085_v62 }
 0x643   : > { %v5988_v2 = vadd.f32 %v12410_v25, %v5567_v30  ;;  %v5987_v35 = vadd.f32 %v12410_v25, %v5496_v33  ;;  %v5569_v16 = vpop.f32.mrb[65].mxu1  ;;  %v5498_v38 = vpop.f32.mrb[66].mxu0  ;;  %6474 = vmatprep.subr.bf16.mxu0 %v6195_v46 }
 0x644   : > { %v5989_v47 = vadd.f32 %v12410_v25, %v5569_v16  ;;  %v6002_v40 = vadd.f32 %v12412_v9, %v5498_v38  ;;  %v5571_v43 = vpop.f32.mrb[66].mxu1  ;;  %6547 = vmatprep.subr.bf16.mxu1 %v6197_v34  ;;  %v5500_v18 = vpop.f32.mrb[67].mxu0  ;;  %6475 = vmatpush1.bf16.msra.mxu0 %v6194_v20  ;;  %v6114_v19 = vmax.f32 %v5986_v27, 0.0 }
 0x645   : > { %v6004_v48 = vadd.f32 %v12412_v9, %v5571_v43  ;;  %v6003_v21 = vadd.f32 %v12412_v9, %v5500_v18  ;;  %v5573_v52 = vpop.f32.mrb[67].mxu1  ;;  %6548 = vmatpush1.bf16.msra.mxu1 %v6196_v24  ;;  %v6116_v28 = vmax.f32 %v5988_v2, 0.0  ;;  %v6115_v42 = vmax.f32 %v5987_v35, 0.0 }
 0x646   : > { %v6130_v41 = vmax.f32 %v6002_v40, 0.0  ;;  %v6005_v4 = vadd.f32 %v12412_v9, %v5573_v52  ;;  %v6117_v57 = vmax.f32 %v5989_v47, 0.0 }
 0x647   : > { %v6132_v1 = vmax.f32 %v6004_v48, 0.0  ;;  %v6131_v45 = vmax.f32 %v6003_v21, 0.0  ;;  %10069 = vmatmul.mubr.msk.bf16.gmra.mrb[8].mxu0 %vm1865_vm2, %v12478_v39 }
 0x648   : > { %v6210_v49 = vpack.c.bf16 %v6130_v41, %v6114_v19  ;;  %v6133_v5 = vmax.f32 %v6005_v4, 0.0  ;;  %10073 = vmatmul.mubr.msk.bf16.gmra.mrb[8].mxu1 %vm1865_vm2, %v12478_v39  ;;  %6388 = vmatprep.mubr.bf16.mxu0 %v13744_v0 }
 0x649   : > { %v6212_v50 = vpack.c.bf16 %v6132_v1, %v6116_v28  ;;  %v5504_v51 = vpop.f32.mrb[68].mxu0  ;;  %v6211_v53 = vpack.c.bf16 %v6131_v45, %v6115_v42  ;;  %6461 = vmatprep.mubr.bf16.mxu1 %v13744_v0 }
 0x64a   : > { %v6018_v54 = vadd.f32 %v12422_v36, %v5504_v51  ;;  %v5577_v14 = vpop.f32.mrb[68].mxu1  ;;  %v5506_v56 = vpop.f32.mrb[69].mxu0  ;;  %v6213_v61 = vpack.c.bf16 %v6133_v5, %v6117_v57 }
 0x64b   : > { %v6020_v29 = vadd.f32 %v12422_v36, %v5577_v14  ;;  %v6019_v23 = vadd.f32 %v12422_v36, %v5506_v56  ;;  %v5579_v58 = vpop.f32.mrb[69].mxu1  ;;  %v5508_v59 = vpop.f32.mrb[70].mxu0  ;;  %6476 = vmatprep.subr.bf16.mxu0 %v6211_v53 }
 0x64c   : > { %v6021_v3 = vadd.f32 %v12422_v36, %v5579_v58  ;;  %v6034_v32 = vadd.f32 %v12424_v60, %v5508_v59  ;;  %v5581_v6 = vpop.f32.mrb[70].mxu1  ;;  %6549 = vmatprep.subr.bf16.mxu1 %v6213_v61  ;;  %v5510_v44 = vpop.f32.mrb[71].mxu0  ;;  %6477 = vmatpush1.bf16.msra.mxu0 %v6210_v49  ;;  %v6146_v15 = vmax.f32 %v6018_v54, 0.0 }
 0x64d   : > { %v6036_v8 = vadd.f32 %v12424_v60, %v5581_v6  ;;  %v6035_v11 = vadd.f32 %v12424_v60, %v5510_v44  ;;  %v5583_v7 = vpop.f32.mrb[71].mxu1  ;;  %6550 = vmatpush1.bf16.msra.mxu1 %v6212_v50  ;;  %v6148_v20 = vmax.f32 %v6020_v29, 0.0  ;;  %v6147_v26 = vmax.f32 %v6019_v23, 0.0 }
 0x64e   : > { %v6162_v17 = vmax.f32 %v6034_v32, 0.0  ;;  %v6037_v62 = vadd.f32 %v12424_v60, %v5583_v7  ;;  %v6149_v46 = vmax.f32 %v6021_v3, 0.0 }
 0x64f   : > { %v6164_v24 = vmax.f32 %v6036_v8, 0.0  ;;  %v6163_v10 = vmax.f32 %v6035_v11, 0.0  ;;  %10070 = vmatmul.mubr.msk.bf16.gmra.mrb[12].mxu0 %vm1865_vm2, %v12497_v63 }
 0x650   : > { %v6226_v27 = vpack.c.bf16 %v6162_v17, %v6146_v15  ;;  %v6165_v30 = vmax.f32 %v6037_v62, 0.0  ;;  %10074 = vmatmul.mubr.msk.bf16.gmra.mrb[12].mxu1 %vm1865_vm2, %v12497_v63  ;;  %6504 = vmatprep.mubr.bf16.mxu0 %v13744_v0 }
 0x651   : > { %v6228_v33 = vpack.c.bf16 %v6164_v24, %v6148_v20  ;;  %v6227_v34 = vpack.c.bf16 %v6163_v10, %v6147_v26  ;;  %6577 = vmatprep.mubr.bf16.mxu1 %v13744_v0 }
 0x652   : > { %v6229_v2 = vpack.c.bf16 %v6165_v30, %v6149_v46 }
 0x653   : > { %6478 = vmatprep.subr.bf16.mxu0 %v6227_v34 }
 0x654   : > { %6551 = vmatprep.subr.bf16.mxu1 %v6229_v2  ;;  %6479 = vmatpush1.bf16.msra.mxu0 %v6226_v27 }
 0x655   : > { %6552 = vmatpush1.bf16.msra.mxu1 %v6228_v33 }
 0x657   : > { %10075 = vmatmul.mubr.msk.bf16.vlgmr.msra.gmra.mrb[40].mxu0 %vm1865_vm2, %v12440_v22 }
 0x658   : > { %10079 = vmatmul.mubr.msk.bf16.vlgmr.msra.gmra.mrb[40].mxu1 %vm1865_vm2, %v12440_v22  ;;  %6514 = vmatprep.mubr.bf16.mxu0 %v13744_v0 }
 0x659   : > { %6587 = vmatprep.mubr.bf16.mxu1 %v13744_v0 }
 0x65f   : > { %10076 = vmatmul.mubr.msk.bf16.gmra.mrb[44].mxu0 %vm1865_vm2, %v12459_v37 }
 0x660   : > { %10080 = vmatmul.mubr.msk.bf16.gmra.mrb[44].mxu1 %vm1865_vm2, %v12459_v37  ;;  %6524 = vmatprep.mubr.bf16.mxu0 %v13744_v0 }
 0x661   : > { %6597 = vmatprep.mubr.bf16.mxu1 %v13744_v0 }
 0x667   : > { %10077 = vmatmul.mubr.msk.bf16.gmra.mrb[48].mxu0 %vm1865_vm2, %v12478_v39 }
 0x668   : > { %10081 = vmatmul.mubr.msk.bf16.gmra.mrb[48].mxu1 %vm1865_vm2, %v12478_v39  ;;  %6534 = vmatprep.mubr.bf16.mxu0 %v13744_v0 }
 0x669   : > { %6607 = vmatprep.mubr.bf16.mxu1 %v13744_v0 }
 0x66a   : > { %v5620_v35 = vpop.f32.mrb[96].mxu0 }
 0x66b   : > { %v5926_v16 = vadd.f32 %v12386_v12, %v5620_v35  ;;  %v5693_v38 = vpop.f32.mrb[96].mxu1  ;;  %v5622_v47 = vpop.f32.mrb[97].mxu0 }
 0x66c   : > { %v5928_v40 = vadd.f32 %v12386_v12, %v5693_v38  ;;  %v5927_v43 = vadd.f32 %v12386_v12, %v5622_v47  ;;  %v5695_v18 = vpop.f32.mrb[97].mxu1  ;;  %v5624_v48 = vpop.f32.mrb[98].mxu0 }
 0x66d   : > { %v5929_v21 = vadd.f32 %v12386_v12, %v5695_v18  ;;  %v5942_v52 = vadd.f32 %v12388_v31, %v5624_v48  ;;  %v5697_v19 = vpop.f32.mrb[98].mxu1  ;;  %v5626_v41 = vpop.f32.mrb[99].mxu0  ;;  %v6054_v1 = vmax.f32 %v5926_v16, 0.0 }
 0x66e   : > { %v5944_v4 = vadd.f32 %v12388_v31, %v5697_v19  ;;  %v5943_v28 = vadd.f32 %v12388_v31, %v5626_v41  ;;  %v5699_v42 = vpop.f32.mrb[99].mxu1  ;;  %v6056_v49 = vmax.f32 %v5928_v40, 0.0  ;;  %v6055_v5 = vmax.f32 %v5927_v43, 0.0 }
 0x66f   : > { %v6070_v45 = vmax.f32 %v5942_v52, 0.0  ;;  %v5945_v57 = vadd.f32 %v12388_v31, %v5699_v42  ;;  %10078 = vmatmul.mubr.msk.bf16.gmra.mrb[52].mxu0 %vm1865_vm2, %v12497_v63  ;;  %v6057_v53 = vmax.f32 %v5929_v21, 0.0 }
 0x670   : > { %v6072_v50 = vmax.f32 %v5944_v4, 0.0  ;;  %v6071_v51 = vmax.f32 %v5943_v28, 0.0  ;;  %10082 = vmatmul.mubr.msk.bf16.gmra.mrb[52].mxu1 %vm1865_vm2, %v12497_v63  ;;  %6650 = vmatprep.mubr.bf16.mxu0 %v13744_v0 }
 0x671   : > { %v6182_v54 = vpack.c.bf16 %v6070_v45, %v6054_v1  ;;  %v6073_v14 = vmax.f32 %v5945_v57, 0.0  ;;  %6723 = vmatprep.mubr.bf16.mxu1 %v13744_v0 }
 0x672   : > { %v6184_v56 = vpack.c.bf16 %v6072_v50, %v6056_v49  ;;  %v5630_v61 = vpop.f32.mrb[100].mxu0  ;;  %v6183_v29 = vpack.c.bf16 %v6071_v51, %v6055_v5 }
 0x673   : > { %v5958_v23 = vadd.f32 %v12398_v13, %v5630_v61  ;;  %v5703_v58 = vpop.f32.mrb[100].mxu1  ;;  %v5632_v59 = vpop.f32.mrb[101].mxu0  ;;  %v6185_v3 = vpack.c.bf16 %v6073_v14, %v6057_v53 }
 0x674   : > { %v5960_v32 = vadd.f32 %v12398_v13, %v5703_v58  ;;  %v5959_v6 = vadd.f32 %v12398_v13, %v5632_v59  ;;  %v5705_v44 = vpop.f32.mrb[101].mxu1  ;;  %v5634_v8 = vpop.f32.mrb[102].mxu0  ;;  %6618 = vmatprep.subr.bf16.mxu0 %v6183_v29 }
 0x675   : > { %v5961_v11 = vadd.f32 %v12398_v13, %v5705_v44  ;;  %v5974_v7 = vadd.f32 %v12400_v55, %v5634_v8  ;;  %v5707_v15 = vpop.f32.mrb[102].mxu1  ;;  %6691 = vmatprep.subr.bf16.mxu1 %v6185_v3  ;;  %v5636_v17 = vpop.f32.mrb[103].mxu0  ;;  %6619 = vmatpush1.bf16.msra.mxu0 %v6182_v54  ;;  %v6086_v24 = vmax.f32 %v5958_v23, 0.0 }
 0x676   : > { %v5976_v62 = vadd.f32 %v12400_v55, %v5707_v15  ;;  %v5975_v20 = vadd.f32 %v12400_v55, %v5636_v17  ;;  %v5709_v26 = vpop.f32.mrb[103].mxu1  ;;  %6692 = vmatpush1.bf16.msra.mxu1 %v6184_v56  ;;  %v6088_v27 = vmax.f32 %v5960_v32, 0.0  ;;  %v6087_v30 = vmax.f32 %v5959_v6, 0.0 }
 0x677   : > { %v6102_v10 = vmax.f32 %v5974_v7, 0.0  ;;  %v5977_v46 = vadd.f32 %v12400_v55, %v5709_v26  ;;  %v6089_v2 = vmax.f32 %v5961_v11, 0.0 }
 0x678   : > { %v6104_v33 = vmax.f32 %v5976_v62, 0.0  ;;  %v6103_v34 = vmax.f32 %v5975_v20, 0.0 }
 0x679   : > { %v6198_v35 = vpack.c.bf16 %v6102_v10, %v6086_v24  ;;  %v6105_v16 = vmax.f32 %v5977_v46, 0.0 }
 0x67a   : > { %v6200_v38 = vpack.c.bf16 %v6104_v33, %v6088_v27  ;;  %v5640_v47 = vpop.f32.mrb[104].mxu0  ;;  %v6199_v40 = vpack.c.bf16 %v6103_v34, %v6087_v30 }
 0x67b   : > { %v5990_v43 = vadd.f32 %v12410_v25, %v5640_v47  ;;  %v5713_v18 = vpop.f32.mrb[104].mxu1  ;;  %v5642_v48 = vpop.f32.mrb[105].mxu0  ;;  %v6201_v21 = vpack.c.bf16 %v6105_v16, %v6089_v2 }
 0x67c   : > { %v5992_v52 = vadd.f32 %v12410_v25, %v5713_v18  ;;  %v5991_v19 = vadd.f32 %v12410_v25, %v5642_v48  ;;  %v5715_v41 = vpop.f32.mrb[105].mxu1  ;;  %v5644_v4 = vpop.f32.mrb[106].mxu0  ;;  %6620 = vmatprep.subr.bf16.mxu0 %v6199_v40 }
 0x67d   : > { %v5993_v28 = vadd.f32 %v12410_v25, %v5715_v41  ;;  %v6006_v42 = vadd.f32 %v12412_v9, %v5644_v4  ;;  %v5717_v1 = vpop.f32.mrb[106].mxu1  ;;  %6693 = vmatprep.subr.bf16.mxu1 %v6201_v21  ;;  %v5646_v45 = vpop.f32.mrb[107].mxu0  ;;  %6621 = vmatpush1.bf16.msra.mxu0 %v6198_v35  ;;  %v6118_v50 = vmax.f32 %v5990_v43, 0.0 }
 0x67e   : > { %v6008_v57 = vadd.f32 %v12412_v9, %v5717_v1  ;;  %v6007_v49 = vadd.f32 %v12412_v9, %v5646_v45  ;;  %v5719_v5 = vpop.f32.mrb[107].mxu1  ;;  %6694 = vmatpush1.bf16.msra.mxu1 %v6200_v38  ;;  %v6120_v54 = vmax.f32 %v5992_v52, 0.0  ;;  %v6119_v14 = vmax.f32 %v5991_v19, 0.0 }
 0x67f   : > { %v6134_v51 = vmax.f32 %v6006_v42, 0.0  ;;  %v6009_v53 = vadd.f32 %v12412_v9, %v5719_v5  ;;  %v6121_v29 = vmax.f32 %v5993_v28, 0.0 }
 0x680   : > { %v6136_v56 = vmax.f32 %v6008_v57, 0.0  ;;  %v6135_v61 = vmax.f32 %v6007_v49, 0.0 }
 0x681   : > { %v6214_v23 = vpack.c.bf16 %v6134_v51, %v6118_v50  ;;  %v6137_v58 = vmax.f32 %v6009_v53, 0.0 }
 0x682   : > { %v6216_v59 = vpack.c.bf16 %v6136_v56, %v6120_v54  ;;  %v5650_v3 = vpop.f32.mrb[108].mxu0  ;;  %v6215_v32 = vpack.c.bf16 %v6135_v61, %v6119_v14 }
 0x683   : > { %v6022_v6 = vadd.f32 %v12422_v36, %v5650_v3  ;;  %v5723_v44 = vpop.f32.mrb[108].mxu1  ;;  %v5652_v8 = vpop.f32.mrb[109].mxu0  ;;  %v6217_v11 = vpack.c.bf16 %v6137_v58, %v6121_v29 }
 0x684   : > { %v6024_v7 = vadd.f32 %v12422_v36, %v5723_v44  ;;  %v6023_v15 = vadd.f32 %v12422_v36, %v5652_v8  ;;  %v5725_v17 = vpop.f32.mrb[109].mxu1  ;;  %v5654_v62 = vpop.f32.mrb[110].mxu0  ;;  %6622 = vmatprep.subr.bf16.mxu0 %v6215_v32 }
 0x685   : > { %v6025_v20 = vadd.f32 %v12422_v36, %v5725_v17  ;;  %v6038_v26 = vadd.f32 %v12424_v60, %v5654_v62  ;;  %v5727_v24 = vpop.f32.mrb[110].mxu1  ;;  %6695 = vmatprep.subr.bf16.mxu1 %v6217_v11  ;;  %v5656_v10 = vpop.f32.mrb[111].mxu0  ;;  %6623 = vmatpush1.bf16.msra.mxu0 %v6214_v23  ;;  %v6150_v33 = vmax.f32 %v6022_v6, 0.0 }
 0x686   : > { %v6040_v46 = vadd.f32 %v12424_v60, %v5727_v24  ;;  %v6039_v27 = vadd.f32 %v12424_v60, %v5656_v10  ;;  %v5729_v30 = vpop.f32.mrb[111].mxu1  ;;  %6696 = vmatpush1.bf16.msra.mxu1 %v6216_v59  ;;  %v6152_v35 = vmax.f32 %v6024_v7, 0.0  ;;  %v6151_v16 = vmax.f32 %v6023_v15, 0.0 }
 0x687   : > { %v6166_v34 = vmax.f32 %v6038_v26, 0.0  ;;  %v6041_v2 = vadd.f32 %v12424_v60, %v5729_v30  ;;  %v6153_v40 = vmax.f32 %v6025_v20, 0.0 }
 0x688   : > { %v6168_v38 = vmax.f32 %v6040_v46, 0.0  ;;  %v6167_v47 = vmax.f32 %v6039_v27, 0.0 }
 0x689   : > { %v6230_v43 = vpack.c.bf16 %v6166_v34, %v6150_v33  ;;  %v6169_v18 = vmax.f32 %v6041_v2, 0.0 }
 0x68a   : > { %v6232_v48 = vpack.c.bf16 %v6168_v38, %v6152_v35  ;;  %v6231_v21 = vpack.c.bf16 %v6167_v47, %v6151_v16 }
 0x68b   : > { %v6233_v52 = vpack.c.bf16 %v6169_v18, %v6153_v40 }
 0x68c   : > { %6624 = vmatprep.subr.bf16.mxu0 %v6231_v21 }
 0x68d   : > { %6697 = vmatprep.subr.bf16.mxu1 %v6233_v52  ;;  %6625 = vmatpush1.bf16.msra.mxu0 %v6230_v43 }
 0x68e   : > { %6698 = vmatpush1.bf16.msra.mxu1 %v6232_v48 }
 0x690   : > { %10083 = vmatmul.mubr.msk.bf16.vlgmr.msra.gmra.mrb[80].mxu0 %vm1865_vm2, %v12440_v22 }
 0x691   : > { %10087 = vmatmul.mubr.msk.bf16.vlgmr.msra.gmra.mrb[80].mxu1 %vm1865_vm2, %v12440_v22  ;;  %6660 = vmatprep.mubr.bf16.mxu0 %v13744_v0 }
 0x692   : > { %6733 = vmatprep.mubr.bf16.mxu1 %v13744_v0 }
 0x698   : > { %10084 = vmatmul.mubr.msk.bf16.gmra.mrb[84].mxu0 %vm1865_vm2, %v12459_v37 }
 0x699   : > { %10088 = vmatmul.mubr.msk.bf16.gmra.mrb[84].mxu1 %vm1865_vm2, %v12459_v37  ;;  %6670 = vmatprep.mubr.bf16.mxu0 %v13744_v0 }
 0x69a   : > { %6743 = vmatprep.mubr.bf16.mxu1 %v13744_v0 }
 0x6a0   : > { %10085 = vmatmul.mubr.msk.bf16.gmra.mrb[88].mxu0 %vm1865_vm2, %v12478_v39 }
 0x6a1   : > { %10089 = vmatmul.mubr.msk.bf16.gmra.mrb[88].mxu1 %vm1865_vm2, %v12478_v39  ;;  %6680 = vmatprep.mubr.bf16.mxu0 %v13744_v0 }
 0x6a2   : > { %6753 = vmatprep.mubr.bf16.mxu1 %v13744_v0 }
 0x6a8   : > { %10086 = vmatmul.mubr.msk.bf16.gmra.mrb[92].mxu0 %vm1865_vm2, %v12497_v63 }
 0x6a9   : > { %10090 = vmatmul.mubr.msk.bf16.gmra.mrb[92].mxu1 %vm1865_vm2, %v12497_v63  ;;  %6796 = vmatprep.mubr.bf16.mxu0 %v13744_v0 }
 0x6aa   : > { %6869 = vmatprep.mubr.bf16.mxu1 %v13744_v0 }
 0x6ba   : > { %v5766_v19 = vpop.f32.mrb[136].mxu0 }
 0x6bb   : > { %v5930_v41 = vadd.f32 %v12386_v12, %v5766_v19  ;;  %v5839_v4 = vpop.f32.mrb[136].mxu1  ;;  %v5768_v28 = vpop.f32.mrb[137].mxu0 }
 0x6bc   : > { %v5932_v42 = vadd.f32 %v12386_v12, %v5839_v4  ;;  %v5931_v1 = vadd.f32 %v12386_v12, %v5768_v28  ;;  %v5841_v45 = vpop.f32.mrb[137].mxu1  ;;  %v5770_v57 = vpop.f32.mrb[138].mxu0 }
 0x6bd   : > { %v5933_v49 = vadd.f32 %v12386_v12, %v5841_v45  ;;  %v5946_v5 = vadd.f32 %v12388_v31, %v5770_v57  ;;  %v5843_v50 = vpop.f32.mrb[138].mxu1  ;;  %v5772_v51 = vpop.f32.mrb[139].mxu0  ;;  %v6058_v56 = vmax.f32 %v5930_v41, 0.0 }
 0x6be   : > { %v5948_v53 = vadd.f32 %v12388_v31, %v5843_v50  ;;  %v5947_v54 = vadd.f32 %v12388_v31, %v5772_v51  ;;  %v5845_v14 = vpop.f32.mrb[139].mxu1  ;;  %v6060_v23 = vmax.f32 %v5932_v42, 0.0  ;;  %v6059_v58 = vmax.f32 %v5931_v1, 0.0 }
 0x6bf   : > { %v6074_v61 = vmax.f32 %v5946_v5, 0.0  ;;  %v5949_v29 = vadd.f32 %v12388_v31, %v5845_v14  ;;  %v6061_v32 = vmax.f32 %v5933_v49, 0.0 }
 0x6c0   : > { %v6076_v59 = vmax.f32 %v5948_v53, 0.0  ;;  %v6075_v3 = vmax.f32 %v5947_v54, 0.0 }
 0x6c1   : > { %v6186_v6 = vpack.c.bf16 %v6074_v61, %v6058_v56  ;;  %v6077_v12 = vmax.f32 %v5949_v29, 0.0 }
 0x6c2   : > { %v6188_v44 = vpack.c.bf16 %v6076_v59, %v6060_v23  ;;  %v6187_v8 = vpack.c.bf16 %v6075_v3, %v6059_v58  ;;  %v5776_v11 = vpop.f32.mrb[140].mxu0 }
 0x6c3   : > { %v6189_v7 = vpack.c.bf16 %v6077_v12, %v6061_v32  ;;  %v5962_v15 = vadd.f32 %v12398_v13, %v5776_v11  ;;  %v5849_v17 = vpop.f32.mrb[140].mxu1  ;;  %v5778_v62 = vpop.f32.mrb[141].mxu0 }
 0x6c4   : > { %v5964_v20 = vadd.f32 %v12398_v13, %v5849_v17  ;;  %v5963_v26 = vadd.f32 %v12398_v13, %v5778_v62  ;;  %v5851_v31 = vpop.f32.mrb[141].mxu1  ;;  %v5780_v24 = vpop.f32.mrb[142].mxu0  ;;  %6764 = vmatprep.subr.bf16.mxu0 %v6187_v8 }
 0x6c5   : > { %v5965_v10 = vadd.f32 %v12398_v13, %v5851_v31  ;;  %v5978_v46 = vadd.f32 %v12400_v55, %v5780_v24  ;;  %v5853_v27 = vpop.f32.mrb[142].mxu1  ;;  %6837 = vmatprep.subr.bf16.mxu1 %v6189_v7  ;;  %v5782_v30 = vpop.f32.mrb[143].mxu0  ;;  %6765 = vmatpush1.bf16.msra.mxu0 %v6186_v6  ;;  %v6090_v35 = vmax.f32 %v5962_v15, 0.0 }
 0x6c6   : > { %v5980_v33 = vadd.f32 %v12400_v55, %v5853_v27  ;;  %v5979_v34 = vadd.f32 %v12400_v55, %v5782_v30  ;;  %v5855_v2 = vpop.f32.mrb[143].mxu1  ;;  %6838 = vmatpush1.bf16.msra.mxu1 %v6188_v44  ;;  %v6092_v47 = vmax.f32 %v5964_v20, 0.0  ;;  %v6091_v40 = vmax.f32 %v5963_v26, 0.0 }
 0x6c7   : > { %v6106_v16 = vmax.f32 %v5978_v46, 0.0  ;;  %v5981_v38 = vadd.f32 %v12400_v55, %v5855_v2  ;;  %v6093_v18 = vmax.f32 %v5965_v10, 0.0 }
 0x6c8   : > { %v6108_v43 = vmax.f32 %v5980_v33, 0.0  ;;  %v6107_v13 = vmax.f32 %v5979_v34, 0.0 }
 0x6c9   : > { %v6202_v48 = vpack.c.bf16 %v6106_v16, %v6090_v35  ;;  %v6109_v21 = vmax.f32 %v5981_v38, 0.0 }
 0x6ca   : > { %v6204_v52 = vpack.c.bf16 %v6108_v43, %v6092_v47  ;;  %v6203_v19 = vpack.c.bf16 %v6107_v13, %v6091_v40  ;;  %v5786_v41 = vpop.f32.mrb[144].mxu0 }
 0x6cb   : > { %v6205_v4 = vpack.c.bf16 %v6109_v21, %v6093_v18  ;;  %v5994_v28 = vadd.f32 %v12410_v25, %v5786_v41  ;;  %v5859_v42 = vpop.f32.mrb[144].mxu1  ;;  %v5788_v1 = vpop.f32.mrb[145].mxu0 }
 0x6cc   : > { %v5996_v45 = vadd.f32 %v12410_v25, %v5859_v42  ;;  %v5995_v57 = vadd.f32 %v12410_v25, %v5788_v1  ;;  %v5861_v55 = vpop.f32.mrb[145].mxu1  ;;  %v5790_v49 = vpop.f32.mrb[146].mxu0  ;;  %6766 = vmatprep.subr.bf16.mxu0 %v6203_v19 }
 0x6cd   : > { %v5997_v5 = vadd.f32 %v12410_v25, %v5861_v55  ;;  %v6010_v50 = vadd.f32 %v12412_v9, %v5790_v49  ;;  %v5863_v51 = vpop.f32.mrb[146].mxu1  ;;  %6839 = vmatprep.subr.bf16.mxu1 %v6205_v4  ;;  %v5792_v53 = vpop.f32.mrb[147].mxu0  ;;  %6767 = vmatpush1.bf16.msra.mxu0 %v6202_v48  ;;  %v6122_v61 = vmax.f32 %v5994_v28, 0.0 }
 0x6ce   : > { %v6012_v54 = vadd.f32 %v12412_v9, %v5863_v51  ;;  %v6011_v14 = vadd.f32 %v12412_v9, %v5792_v53  ;;  %v5865_v56 = vpop.f32.mrb[147].mxu1  ;;  %6840 = vmatpush1.bf16.msra.mxu1 %v6204_v52  ;;  %v6124_v58 = vmax.f32 %v5996_v45, 0.0  ;;  %v6123_v59 = vmax.f32 %v5995_v57, 0.0 }
 0x6cf   : > { %v6138_v29 = vmax.f32 %v6010_v50, 0.0  ;;  %v6013_v23 = vadd.f32 %v12412_v9, %v5865_v56  ;;  %v6125_v32 = vmax.f32 %v5997_v5, 0.0 }
 0x6d0   : > { %v6140_v3 = vmax.f32 %v6012_v54, 0.0  ;;  %v6139_v25 = vmax.f32 %v6011_v14, 0.0 }
 0x6d1   : > { %v6218_v6 = vpack.c.bf16 %v6138_v29, %v6122_v61  ;;  %v6141_v12 = vmax.f32 %v6013_v23, 0.0 }
 0x6d2   : > { %v6220_v44 = vpack.c.bf16 %v6140_v3, %v6124_v58  ;;  %v6219_v8 = vpack.c.bf16 %v6139_v25, %v6123_v59  ;;  %v5796_v11 = vpop.f32.mrb[148].mxu0 }
 0x6d3   : > { %v6221_v7 = vpack.c.bf16 %v6141_v12, %v6125_v32  ;;  %v6026_v15 = vadd.f32 %v12422_v36, %v5796_v11  ;;  %v5869_v17 = vpop.f32.mrb[148].mxu1  ;;  %v5798_v62 = vpop.f32.mrb[149].mxu0 }
 0x6d4   : > { %v6028_v20 = vadd.f32 %v12422_v36, %v5869_v17  ;;  %v6027_v26 = vadd.f32 %v12422_v36, %v5798_v62  ;;  %v5871_v9 = vpop.f32.mrb[149].mxu1  ;;  %v5800_v31 = vpop.f32.mrb[150].mxu0  ;;  %6768 = vmatprep.subr.bf16.mxu0 %v6219_v8 }
 0x6d5   : > { %v6029_v24 = vadd.f32 %v12422_v36, %v5871_v9  ;;  %v6042_v10 = vadd.f32 %v12424_v60, %v5800_v31  ;;  %v5873_v46 = vpop.f32.mrb[150].mxu1  ;;  %6841 = vmatprep.subr.bf16.mxu1 %v6221_v7  ;;  %v5802_v27 = vpop.f32.mrb[151].mxu0  ;;  %6769 = vmatpush1.bf16.msra.mxu0 %v6218_v6  ;;  %v6154_v2 = vmax.f32 %v6026_v15, 0.0 }
 0x6d6   : > { %v6044_v30 = vadd.f32 %v12424_v60, %v5873_v46  ;;  %v6043_v33 = vadd.f32 %v12424_v60, %v5802_v27  ;;  %v5875_v34 = vpop.f32.mrb[151].mxu1  ;;  %6842 = vmatpush1.bf16.msra.mxu1 %v6220_v44  ;;  %v6156_v38 = vmax.f32 %v6028_v20, 0.0  ;;  %v6155_v47 = vmax.f32 %v6027_v26, 0.0 }
 0x6d7   : > { %v6170_v35 = vmax.f32 %v6042_v10, 0.0  ;;  %v6045_v16 = vadd.f32 %v12424_v60, %v5875_v34  ;;  %v6157_v43 = vmax.f32 %v6029_v24, 0.0  ;;  %v12646_v60 = vpop.permute.xlu0 %6256 }
 0x6d8   : > { %v6172_v40 = vmax.f32 %v6044_v30, 0.0  ;;  %v6171_v36 = vmax.f32 %v6043_v33, 0.0 }
 0x6d9   : > { %v6234_v13 = vpack.c.bf16 %v6170_v35, %v6154_v2  ;;  %v6173_v18 = vmax.f32 %v6045_v16, 0.0 }
 0x6da   : > { %v6236_v48 = vpack.c.bf16 %v6172_v40, %v6156_v38  ;;  %v6235_v21 = vpack.c.bf16 %v6171_v36, %v6155_v47 }
 0x6db   : > { %v6237_v52 = vpack.c.bf16 %v6173_v18, %v6157_v43  ;;  %v12658_v23 = vpop.permute.xlu0 %6266 }
 0x6dc   : > { %6770 = vmatprep.subr.bf16.mxu0 %v6235_v21 }
 0x6dd   : > { %6843 = vmatprep.subr.bf16.mxu1 %v6237_v52  ;;  %6771 = vmatpush1.bf16.msra.mxu0 %v6234_v13 }
 0x6de   : > { %6844 = vmatpush1.bf16.msra.mxu1 %v6236_v48 }
 0x6df   : > { %v12670_v47 = vpop.permute.xlu0 %6276 }
 0x6e0   : > { %10091 = vmatmul.mubr.msk.bf16.vlgmr.msra.gmra.mrb[120].mxu0 %vm1865_vm2, %v12440_v22 }
 0x6e1   : > { %10095 = vmatmul.mubr.msk.bf16.vlgmr.msra.gmra.mrb[120].mxu1 %vm1865_vm2, %v12440_v22  ;;  %6806 = vmatprep.mubr.bf16.mxu0 %v13744_v0  ;;  %v12648_v22 = vpop.permute.xlu1 %6261 }
 0x6e2   : > { %6879 = vmatprep.mubr.bf16.mxu1 %v13744_v0 }
 0x6e5   : > { %v12660_v25 = vpop.permute.xlu1 %6271 }
 0x6e8   : > { %10092 = vmatmul.mubr.msk.bf16.gmra.mrb[124].mxu0 %vm1865_vm2, %v12459_v37 }
 0x6e9   : > { %10096 = vmatmul.mubr.msk.bf16.gmra.mrb[124].mxu1 %vm1865_vm2, %v12459_v37  ;;  %6816 = vmatprep.mubr.bf16.mxu0 %v13744_v0  ;;  %v12672_v13 = vpop.permute.xlu1 %6281 }
 0x6ea   : > { %6889 = vmatprep.mubr.bf16.mxu1 %v13744_v0 }
 0x6f0   : > { %10093 = vmatmul.mubr.msk.bf16.gmra.mrb[128].mxu0 %vm1865_vm2, %v12478_v39 }
 0x6f1   : > { %10097 = vmatmul.mubr.msk.bf16.gmra.mrb[128].mxu1 %vm1865_vm2, %v12478_v39  ;;  %6826 = vmatprep.mubr.bf16.mxu0 %v13744_v0 }
 0x6f2   : > { %6899 = vmatprep.mubr.bf16.mxu1 %v13744_v0 }
 0x6f8   : > { %10094 = vmatmul.mubr.msk.bf16.gmra.mrb[132].mxu0 %vm1865_vm2, %v12497_v63 }
 0x6f9   : > { %10098 = vmatmul.mubr.msk.bf16.gmra.mrb[132].mxu1 %vm1865_vm2, %v12497_v63  ;;  %7222 = vmatprep.mubr.bf16.mxu0 %v13744_v0 }
 0x6fa   : > { %7295 = vmatprep.mubr.bf16.mxu1 %v13744_v0 }
 0x70a   : > { %v6360_v37 = vpop.f32.mrb[0].mxu0 }
 0x70b   : > { %v6361_v39 = vadd.f32 %v6360_v37, %v12646_v60  ;;  %v6433_v19 = vpop.f32.mrb[0].mxu1  ;;  %v6362_v41 = vpop.f32.mrb[1].mxu0 }
 0x70c   : > { %v6434_v4 = vadd.f32 %v6433_v19, %v12646_v60  ;;  %v6363_v28 = vadd.f32 %v6362_v41, %v12646_v60  ;;  %v6435_v42 = vpop.f32.mrb[1].mxu1  ;;  %v6364_v1 = vpop.f32.mrb[2].mxu0 }
 0x70d   : > { %v6436_v63 = vadd.f32 %v6435_v42, %v12646_v60  ;;  %v6365_v45 = vadd.f32 %v6364_v1, %v12648_v22  ;;  %v6437_v57 = vpop.f32.mrb[2].mxu1  ;;  %v6366_v55 = vpop.f32.mrb[3].mxu0  ;;  %v6910_v51 = vmax.f32 %v6361_v39, 0.0 }
 0x70e   : > { %v6438_v49 = vadd.f32 %v6437_v57, %v12648_v22  ;;  %v6367_v5 = vadd.f32 %v6366_v55, %v12648_v22  ;;  %v6439_v50 = vpop.f32.mrb[3].mxu1  ;;  %v6912_v14 = vmax.f32 %v6434_v4, 0.0  ;;  %v6911_v56 = vmax.f32 %v6363_v28, 0.0 }
 0x70f   : > { %v6926_v53 = vmax.f32 %v6365_v45, 0.0  ;;  %v6440_v54 = vadd.f32 %v6439_v50, %v12648_v22  ;;  %v6913_v58 = vmax.f32 %v6436_v63, 0.0 }
 0x710   : > { %v6928_v61 = vmax.f32 %v6438_v49, 0.0  ;;  %v6927_v29 = vmax.f32 %v6367_v5, 0.0 }
 0x711   : > { %v7038_v59 = vpack.c.bf16 %v6926_v53, %v6910_v51  ;;  %v6929_v3 = vmax.f32 %v6440_v54, 0.0 }
 0x712   : > { %v7040_v32 = vpack.c.bf16 %v6928_v61, %v6912_v14  ;;  %v7039_v6 = vpack.c.bf16 %v6927_v29, %v6911_v56  ;;  %v6370_v12 = vpop.f32.mrb[4].mxu0  ;;  %v12682_v29 = vpop.permute.xlu0 %6286 }
 0x713   : > { %v7041_v44 = vpack.c.bf16 %v6929_v3, %v6913_v58  ;;  %v6371_v8 = vadd.f32 %v6370_v12, %v12658_v23  ;;  %v6443_v11 = vpop.f32.mrb[4].mxu1  ;;  %v6372_v7 = vpop.f32.mrb[5].mxu0 }
 0x714   : > { %v6444_v15 = vadd.f32 %v6443_v11, %v12658_v23  ;;  %v6373_v17 = vadd.f32 %v6372_v7, %v12658_v23  ;;  %v6445_v62 = vpop.f32.mrb[5].mxu1  ;;  %v6374_v20 = vpop.f32.mrb[6].mxu0  ;;  %7190 = vmatprep.subr.bf16.mxu0 %v7039_v6 }
 0x715   : > { %v6446_v26 = vadd.f32 %v6445_v62, %v12658_v23  ;;  %v6375_v9 = vadd.f32 %v6374_v20, %v12660_v25  ;;  %v6447_v31 = vpop.f32.mrb[6].mxu1  ;;  %7263 = vmatprep.subr.bf16.mxu1 %v7041_v44  ;;  %v6376_v24 = vpop.f32.mrb[7].mxu0  ;;  %7191 = vmatpush1.bf16.msra.mxu0 %v7038_v59  ;;  %v6942_v30 = vmax.f32 %v6371_v8, 0.0 }
 0x716   : > { %v6448_v10 = vadd.f32 %v6447_v31, %v12660_v25  ;;  %v6377_v46 = vadd.f32 %v6376_v24, %v12660_v25  ;;  %v6449_v27 = vpop.f32.mrb[7].mxu1  ;;  %7264 = vmatpush1.bf16.msra.mxu1 %v7040_v32  ;;  %v6944_v2 = vmax.f32 %v6444_v15, 0.0  ;;  %v6943_v35 = vmax.f32 %v6373_v17, 0.0  ;;  %v12684_v32 = vpop.permute.xlu1 %6291 }
 0x717   : > { %v6958_v33 = vmax.f32 %v6375_v9, 0.0  ;;  %v6450_v34 = vadd.f32 %v6449_v27, %v12660_v25  ;;  %v6945_v40 = vmax.f32 %v6446_v26, 0.0 }
 0x718   : > { %v6960_v16 = vmax.f32 %v6448_v10, 0.0  ;;  %v6959_v38 = vmax.f32 %v6377_v46, 0.0 }
 0x719   : > { %v7054_v36 = vpack.c.bf16 %v6958_v33, %v6942_v30  ;;  %v6961_v43 = vmax.f32 %v6450_v34, 0.0 }
 0x71a   : > { %v7056_v18 = vpack.c.bf16 %v6960_v16, %v6944_v2  ;;  %v7055_v48 = vpack.c.bf16 %v6959_v38, %v6943_v35  ;;  %v6380_v21 = vpop.f32.mrb[8].mxu0 }
 0x71b   : > { %v7057_v52 = vpack.c.bf16 %v6961_v43, %v6945_v40  ;;  %v6381_v37 = vadd.f32 %v6380_v21, %v12670_v47  ;;  %v6453_v39 = vpop.f32.mrb[8].mxu1  ;;  %v6382_v19 = vpop.f32.mrb[9].mxu0 }
 0x71c   : > { %v6454_v41 = vadd.f32 %v6453_v39, %v12670_v47  ;;  %v6383_v4 = vadd.f32 %v6382_v19, %v12670_v47  ;;  %v6455_v28 = vpop.f32.mrb[9].mxu1  ;;  %v6384_v42 = vpop.f32.mrb[10].mxu0  ;;  %7192 = vmatprep.subr.bf16.mxu0 %v7055_v48 }
 0x71d   : > { %v6456_v1 = vadd.f32 %v6455_v28, %v12670_v47  ;;  %v6385_v63 = vadd.f32 %v6384_v42, %v12672_v13  ;;  %v6457_v45 = vpop.f32.mrb[10].mxu1  ;;  %7265 = vmatprep.subr.bf16.mxu1 %v7057_v52  ;;  %v6386_v57 = vpop.f32.mrb[11].mxu0  ;;  %7193 = vmatpush1.bf16.msra.mxu0 %v7054_v36  ;;  %v6974_v50 = vmax.f32 %v6381_v37, 0.0 }
 0x71e   : > { %v6458_v55 = vadd.f32 %v6457_v45, %v12672_v13  ;;  %v6387_v49 = vadd.f32 %v6386_v57, %v12672_v13  ;;  %v6459_v5 = vpop.f32.mrb[11].mxu1  ;;  %7266 = vmatpush1.bf16.msra.mxu1 %v7056_v18  ;;  %v6976_v54 = vmax.f32 %v6454_v41, 0.0  ;;  %v6975_v14 = vmax.f32 %v6383_v4, 0.0 }
 0x71f   : > { %v6990_v51 = vmax.f32 %v6385_v63, 0.0  ;;  %v6460_v53 = vadd.f32 %v6459_v5, %v12672_v13  ;;  %v6977_v58 = vmax.f32 %v6456_v1, 0.0  ;;  %v12700_v63 = vld [vmem:[%s13741_s1 + $0x110] sm:$0xff]  }
 0x720   : > { %v6992_v56 = vmax.f32 %v6458_v55, 0.0  ;;  %v6991_v61 = vmax.f32 %v6387_v49, 0.0 }
 0x721   : > { %v7070_v59 = vpack.c.bf16 %v6990_v51, %v6974_v50  ;;  %v6993_v3 = vmax.f32 %v6460_v53, 0.0 }
 0x722   : > { %v7072_v6 = vpack.c.bf16 %v6992_v56, %v6976_v54  ;;  %v7071_v12 = vpack.c.bf16 %v6991_v61, %v6975_v14  ;;  %v6390_v44 = vpop.f32.mrb[12].mxu0 }
 0x723   : > { %v7073_v8 = vpack.c.bf16 %v6993_v3, %v6977_v58  ;;  %v6391_v11 = vadd.f32 %v6390_v44, %v12682_v29  ;;  %v6463_v7 = vpop.f32.mrb[12].mxu1  ;;  %v6392_v15 = vpop.f32.mrb[13].mxu0 }
 0x724   : > { %v6464_v17 = vadd.f32 %v6463_v7, %v12682_v29  ;;  %v6393_v62 = vadd.f32 %v6392_v15, %v12682_v29  ;;  %v6465_v20 = vpop.f32.mrb[13].mxu1  ;;  %v6394_v26 = vpop.f32.mrb[14].mxu0  ;;  %7194 = vmatprep.subr.bf16.mxu0 %v7071_v12 }
 0x725   : > { %v6466_v9 = vadd.f32 %v6465_v20, %v12682_v29  ;;  %v6395_v31 = vadd.f32 %v6394_v26, %v12684_v32  ;;  %v6467_v24 = vpop.f32.mrb[14].mxu1  ;;  %7267 = vmatprep.subr.bf16.mxu1 %v7073_v8  ;;  %v6396_v10 = vpop.f32.mrb[15].mxu0  ;;  %7195 = vmatpush1.bf16.msra.mxu0 %v7070_v59  ;;  %v7006_v33 = vmax.f32 %v6391_v11, 0.0 }
 0x726   : > { %v6468_v46 = vadd.f32 %v6467_v24, %v12684_v32  ;;  %v6397_v27 = vadd.f32 %v6396_v10, %v12684_v32  ;;  %v6469_v30 = vpop.f32.mrb[15].mxu1  ;;  %7268 = vmatpush1.bf16.msra.mxu1 %v7072_v6  ;;  %v7008_v35 = vmax.f32 %v6464_v17, 0.0  ;;  %v7007_v16 = vmax.f32 %v6393_v62, 0.0  ;;  %v12719_v24 = vld [vmem:[%s13741_s1 + $0x118] sm:$0xff]  }
 0x727   : > { %v7022_v34 = vmax.f32 %v6395_v31, 0.0  ;;  %v6470_v2 = vadd.f32 %v6469_v30, %v12684_v32  ;;  %v7009_v36 = vmax.f32 %v6466_v9, 0.0 }
 0x728   : > { %v7024_v38 = vmax.f32 %v6468_v46, 0.0  ;;  %v7023_v40 = vmax.f32 %v6397_v27, 0.0 }
 0x729   : > { %v7086_v43 = vpack.c.bf16 %v7022_v34, %v7006_v33  ;;  %v7025_v18 = vmax.f32 %v6470_v2, 0.0 }
 0x72a   : > { %v7088_v48 = vpack.c.bf16 %v7024_v38, %v7008_v35  ;;  %v7087_v21 = vpack.c.bf16 %v7023_v40, %v7007_v16  ;;  %v6506_v52 = vpop.f32.mrb[40].mxu0 }
 0x72b   : > { %v7089_v37 = vpack.c.bf16 %v7025_v18, %v7009_v36  ;;  %v6507_v39 = vadd.f32 %v6506_v52, %v12646_v60  ;;  %v6579_v19 = vpop.f32.mrb[40].mxu1  ;;  %v6508_v41 = vpop.f32.mrb[41].mxu0 }
 0x72c   : > { %v6580_v4 = vadd.f32 %v6579_v19, %v12646_v60  ;;  %v6509_v28 = vadd.f32 %v6508_v41, %v12646_v60  ;;  %v6581_v42 = vpop.f32.mrb[41].mxu1  ;;  %v6510_v1 = vpop.f32.mrb[42].mxu0  ;;  %7196 = vmatprep.subr.bf16.mxu0 %v7087_v21 }
 0x72d   : > { %v6582_v45 = vadd.f32 %v6581_v42, %v12646_v60  ;;  %v6511_v57 = vadd.f32 %v6510_v1, %v12648_v22  ;;  %v6583_v55 = vpop.f32.mrb[42].mxu1  ;;  %7269 = vmatprep.subr.bf16.mxu1 %v7089_v37  ;;  %v6512_v49 = vpop.f32.mrb[43].mxu0  ;;  %7197 = vmatpush1.bf16.msra.mxu0 %v7086_v43  ;;  %v6914_v53 = vmax.f32 %v6507_v39, 0.0 }
 0x72e   : > { %v6584_v5 = vadd.f32 %v6583_v55, %v12648_v22  ;;  %v6513_v50 = vadd.f32 %v6512_v49, %v12648_v22  ;;  %v6585_v51 = vpop.f32.mrb[43].mxu1  ;;  %7270 = vmatpush1.bf16.msra.mxu1 %v7088_v48  ;;  %v6916_v56 = vmax.f32 %v6580_v4, 0.0  ;;  %v6915_v61 = vmax.f32 %v6509_v28, 0.0  ;;  %v12738_v49 = vld [vmem:[%s13741_s1 + $0x120] sm:$0xff]  }
 0x72f   : > { %v6930_v54 = vmax.f32 %v6511_v57, 0.0  ;;  %v6586_v14 = vadd.f32 %v6585_v51, %v12648_v22  ;;  %v6917_v3 = vmax.f32 %v6582_v45, 0.0 }
 0x730   : > { %v6932_v58 = vmax.f32 %v6584_v5, 0.0  ;;  %v6931_v59 = vmax.f32 %v6513_v50, 0.0  ;;  %10103 = vmatmul.mubr.msk.bf16.vlgmr.msra.gmra.mrb[160].mxu0 %vm1865_vm2, %v12700_v63 }
 0x731   : > { %v7042_v6 = vpack.c.bf16 %v6930_v54, %v6914_v53  ;;  %v6933_v12 = vmax.f32 %v6586_v14, 0.0  ;;  %10107 = vmatmul.mubr.msk.bf16.vlgmr.msra.gmra.mrb[160].mxu1 %vm1865_vm2, %v12700_v63  ;;  %7232 = vmatprep.mubr.bf16.mxu0 %v13744_v0 }
 0x732   : > { %v7044_v44 = vpack.c.bf16 %v6932_v58, %v6916_v56  ;;  %v7043_v8 = vpack.c.bf16 %v6931_v59, %v6915_v61  ;;  %v6516_v11 = vpop.f32.mrb[44].mxu0  ;;  %7305 = vmatprep.mubr.bf16.mxu1 %v13744_v0 }
 0x733   : > { %v7045_v7 = vpack.c.bf16 %v6933_v12, %v6917_v3  ;;  %v6517_v15 = vadd.f32 %v6516_v11, %v12658_v23  ;;  %v6589_v17 = vpop.f32.mrb[44].mxu1  ;;  %v6518_v62 = vpop.f32.mrb[45].mxu0 }
 0x734   : > { %v6590_v20 = vadd.f32 %v6589_v17, %v12658_v23  ;;  %v6519_v26 = vadd.f32 %v6518_v62, %v12658_v23  ;;  %v6591_v9 = vpop.f32.mrb[45].mxu1  ;;  %v6520_v31 = vpop.f32.mrb[46].mxu0  ;;  %7336 = vmatprep.subr.bf16.mxu0 %v7043_v8 }
 0x735   : > { %v6592_v10 = vadd.f32 %v6591_v9, %v12658_v23  ;;  %v6521_v46 = vadd.f32 %v6520_v31, %v12660_v25  ;;  %v6593_v27 = vpop.f32.mrb[46].mxu1  ;;  %7409 = vmatprep.subr.bf16.mxu1 %v7045_v7  ;;  %v6522_v30 = vpop.f32.mrb[47].mxu0  ;;  %7337 = vmatpush1.bf16.msra.mxu0 %v7042_v6  ;;  %v6946_v35 = vmax.f32 %v6517_v15, 0.0 }
 0x736   : > { %v6594_v33 = vadd.f32 %v6593_v27, %v12660_v25  ;;  %v6523_v34 = vadd.f32 %v6522_v30, %v12660_v25  ;;  %v6595_v2 = vpop.f32.mrb[47].mxu1  ;;  %7410 = vmatpush1.bf16.msra.mxu1 %v7044_v44  ;;  %v6948_v40 = vmax.f32 %v6590_v20, 0.0  ;;  %v6947_v36 = vmax.f32 %v6519_v26, 0.0 }
 0x737   : > { %v6962_v16 = vmax.f32 %v6521_v46, 0.0  ;;  %v6596_v38 = vadd.f32 %v6595_v2, %v12660_v25  ;;  %v6949_v48 = vmax.f32 %v6592_v10, 0.0 }
 0x738   : > { %v6964_v43 = vmax.f32 %v6594_v33, 0.0  ;;  %v6963_v18 = vmax.f32 %v6523_v34, 0.0  ;;  %10104 = vmatmul.mubr.msk.bf16.gmra.mrb[164].mxu0 %vm1865_vm2, %v12719_v24  ;;  %v12757_v33 = vld [vmem:[%s13741_s1 + $0x128] sm:$0xff]  }
 0x739   : > { %v7058_v21 = vpack.c.bf16 %v6962_v16, %v6946_v35  ;;  %v6965_v52 = vmax.f32 %v6596_v38, 0.0  ;;  %10108 = vmatmul.mubr.msk.bf16.gmra.mrb[164].mxu1 %vm1865_vm2, %v12719_v24  ;;  %7242 = vmatprep.mubr.bf16.mxu0 %v13744_v0 }
 0x73a   : > { %v7060_v37 = vpack.c.bf16 %v6964_v43, %v6948_v40  ;;  %v7059_v39 = vpack.c.bf16 %v6963_v18, %v6947_v36  ;;  %v6526_v19 = vpop.f32.mrb[48].mxu0  ;;  %7315 = vmatprep.mubr.bf16.mxu1 %v13744_v0 }
 0x73b   : > { %v7061_v41 = vpack.c.bf16 %v6965_v52, %v6949_v48  ;;  %v6527_v4 = vadd.f32 %v6526_v19, %v12670_v47  ;;  %v6599_v28 = vpop.f32.mrb[48].mxu1  ;;  %v6528_v42 = vpop.f32.mrb[49].mxu0 }
 0x73c   : > { %v6600_v1 = vadd.f32 %v6599_v28, %v12670_v47  ;;  %v6529_v45 = vadd.f32 %v6528_v42, %v12670_v47  ;;  %v6601_v57 = vpop.f32.mrb[49].mxu1  ;;  %v6530_v55 = vpop.f32.mrb[50].mxu0  ;;  %7338 = vmatprep.subr.bf16.mxu0 %v7059_v39 }
 0x73d   : > { %v6602_v5 = vadd.f32 %v6601_v57, %v12670_v47  ;;  %v6531_v50 = vadd.f32 %v6530_v55, %v12672_v13  ;;  %v6603_v51 = vpop.f32.mrb[50].mxu1  ;;  %7411 = vmatprep.subr.bf16.mxu1 %v7061_v41  ;;  %v6532_v53 = vpop.f32.mrb[51].mxu0  ;;  %7339 = vmatpush1.bf16.msra.mxu0 %v7058_v21  ;;  %v6978_v61 = vmax.f32 %v6527_v4, 0.0 }
 0x73e   : > { %v6604_v54 = vadd.f32 %v6603_v51, %v12672_v13  ;;  %v6533_v14 = vadd.f32 %v6532_v53, %v12672_v13  ;;  %v6605_v56 = vpop.f32.mrb[51].mxu1  ;;  %7412 = vmatpush1.bf16.msra.mxu1 %v7060_v37  ;;  %v6980_v3 = vmax.f32 %v6600_v1, 0.0  ;;  %v6979_v6 = vmax.f32 %v6529_v45, 0.0 }
 0x73f   : > { %v6994_v58 = vmax.f32 %v6531_v50, 0.0  ;;  %v6606_v59 = vadd.f32 %v6605_v56, %v12672_v13  ;;  %v6981_v8 = vmax.f32 %v6602_v5, 0.0 }
 0x740   : > { %v6996_v12 = vmax.f32 %v6604_v54, 0.0  ;;  %v6995_v44 = vmax.f32 %v6533_v14, 0.0  ;;  %10105 = vmatmul.mubr.msk.bf16.gmra.mrb[168].mxu0 %vm1865_vm2, %v12738_v49 }
 0x741   : > { %v7074_v11 = vpack.c.bf16 %v6994_v58, %v6978_v61  ;;  %v6997_v7 = vmax.f32 %v6606_v59, 0.0  ;;  %10109 = vmatmul.mubr.msk.bf16.gmra.mrb[168].mxu1 %vm1865_vm2, %v12738_v49  ;;  %7252 = vmatprep.mubr.bf16.mxu0 %v13744_v0 }
 0x742   : > { %v7076_v15 = vpack.c.bf16 %v6996_v12, %v6980_v3  ;;  %v7075_v17 = vpack.c.bf16 %v6995_v44, %v6979_v6  ;;  %v6536_v62 = vpop.f32.mrb[52].mxu0  ;;  %7325 = vmatprep.mubr.bf16.mxu1 %v13744_v0 }
 0x743   : > { %v7077_v20 = vpack.c.bf16 %v6997_v7, %v6981_v8  ;;  %v6537_v26 = vadd.f32 %v6536_v62, %v12682_v29  ;;  %v6609_v9 = vpop.f32.mrb[52].mxu1  ;;  %v6538_v31 = vpop.f32.mrb[53].mxu0 }
 0x744   : > { %v6610_v10 = vadd.f32 %v6609_v9, %v12682_v29  ;;  %v6539_v46 = vadd.f32 %v6538_v31, %v12682_v29  ;;  %v6611_v27 = vpop.f32.mrb[53].mxu1  ;;  %v6540_v30 = vpop.f32.mrb[54].mxu0  ;;  %7340 = vmatprep.subr.bf16.mxu0 %v7075_v17 }
 0x745   : > { %v6612_v34 = vadd.f32 %v6611_v27, %v12682_v29  ;;  %v6541_v2 = vadd.f32 %v6540_v30, %v12684_v32  ;;  %v6613_v35 = vpop.f32.mrb[54].mxu1  ;;  %7413 = vmatprep.subr.bf16.mxu1 %v7077_v20  ;;  %v6542_v16 = vpop.f32.mrb[55].mxu0  ;;  %7341 = vmatpush1.bf16.msra.mxu0 %v7074_v11  ;;  %v7010_v43 = vmax.f32 %v6537_v26, 0.0 }
 0x746   : > { %v6614_v38 = vadd.f32 %v6613_v35, %v12684_v32  ;;  %v6543_v40 = vadd.f32 %v6542_v16, %v12684_v32  ;;  %v6615_v36 = vpop.f32.mrb[55].mxu1  ;;  %7414 = vmatpush1.bf16.msra.mxu1 %v7076_v15  ;;  %v7012_v21 = vmax.f32 %v6610_v10, 0.0  ;;  %v7011_v52 = vmax.f32 %v6539_v46, 0.0 }
 0x747   : > { %v7026_v18 = vmax.f32 %v6541_v2, 0.0  ;;  %v6616_v48 = vadd.f32 %v6615_v36, %v12684_v32  ;;  %v7013_v19 = vmax.f32 %v6612_v34, 0.0 }
 0x748   : > { %v7028_v37 = vmax.f32 %v6614_v38, 0.0  ;;  %v7027_v39 = vmax.f32 %v6543_v40, 0.0  ;;  %10106 = vmatmul.mubr.msk.bf16.gmra.mrb[172].mxu0 %vm1865_vm2, %v12757_v33 }
 0x749   : > { %v7090_v41 = vpack.c.bf16 %v7026_v18, %v7010_v43  ;;  %v7029_v4 = vmax.f32 %v6616_v48, 0.0  ;;  %10110 = vmatmul.mubr.msk.bf16.gmra.mrb[172].mxu1 %vm1865_vm2, %v12757_v33  ;;  %7368 = vmatprep.mubr.bf16.mxu0 %v13744_v0 }
 0x74a   : > { %v7092_v28 = vpack.c.bf16 %v7028_v37, %v7012_v21  ;;  %v7091_v42 = vpack.c.bf16 %v7027_v39, %v7011_v52  ;;  %7441 = vmatprep.mubr.bf16.mxu1 %v13744_v0 }
 0x74b   : > { %v7093_v1 = vpack.c.bf16 %v7029_v4, %v7013_v19 }
 0x74c   : > { %7342 = vmatprep.subr.bf16.mxu0 %v7091_v42 }
 0x74d   : > { %7415 = vmatprep.subr.bf16.mxu1 %v7093_v1  ;;  %7343 = vmatpush1.bf16.msra.mxu0 %v7090_v41 }
 0x74e   : > { %7416 = vmatpush1.bf16.msra.mxu1 %v7092_v28 }
 0x750   : > { %10111 = vmatmul.mubr.msk.bf16.vlgmr.msra.gmra.mrb[176].mxu0 %vm1865_vm2, %v12700_v63 }
 0x751   : > { %10115 = vmatmul.mubr.msk.bf16.vlgmr.msra.gmra.mrb[176].mxu1 %vm1865_vm2, %v12700_v63  ;;  %7378 = vmatprep.mubr.bf16.mxu0 %v13744_v0 }
 0x752   : > { %7451 = vmatprep.mubr.bf16.mxu1 %v13744_v0 }
 0x758   : > { %10112 = vmatmul.mubr.msk.bf16.gmra.mrb[180].mxu0 %vm1865_vm2, %v12719_v24 }
 0x759   : > { %10116 = vmatmul.mubr.msk.bf16.gmra.mrb[180].mxu1 %vm1865_vm2, %v12719_v24  ;;  %7388 = vmatprep.mubr.bf16.mxu0 %v13744_v0 }
 0x75a   : > { %7461 = vmatprep.mubr.bf16.mxu1 %v13744_v0 }
 0x760   : > { %10113 = vmatmul.mubr.msk.bf16.gmra.mrb[184].mxu0 %vm1865_vm2, %v12738_v49 }
 0x761   : > { %10117 = vmatmul.mubr.msk.bf16.gmra.mrb[184].mxu1 %vm1865_vm2, %v12738_v49  ;;  %7398 = vmatprep.mubr.bf16.mxu0 %v13744_v0 }
 0x762   : > { %7471 = vmatprep.mubr.bf16.mxu1 %v13744_v0 }
 0x763   : > { %v6652_v45 = vpop.f32.mrb[80].mxu0 }
 0x764   : > { %v6653_v57 = vadd.f32 %v6652_v45, %v12646_v60  ;;  %v6725_v55 = vpop.f32.mrb[80].mxu1  ;;  %v6654_v5 = vpop.f32.mrb[81].mxu0 }
 0x765   : > { %v6726_v50 = vadd.f32 %v6725_v55, %v12646_v60  ;;  %v6655_v51 = vadd.f32 %v6654_v5, %v12646_v60  ;;  %v6727_v53 = vpop.f32.mrb[81].mxu1  ;;  %v6656_v54 = vpop.f32.mrb[82].mxu0 }
 0x766   : > { %v6728_v14 = vadd.f32 %v6727_v53, %v12646_v60  ;;  %v6657_v56 = vadd.f32 %v6656_v54, %v12648_v22  ;;  %v6729_v61 = vpop.f32.mrb[82].mxu1  ;;  %v6658_v58 = vpop.f32.mrb[83].mxu0  ;;  %v6918_v12 = vmax.f32 %v6653_v57, 0.0 }
 0x767   : > { %v6730_v59 = vadd.f32 %v6729_v61, %v12648_v22  ;;  %v6659_v3 = vadd.f32 %v6658_v58, %v12648_v22  ;;  %v6731_v6 = vpop.f32.mrb[83].mxu1  ;;  %v6920_v11 = vmax.f32 %v6726_v50, 0.0  ;;  %v6919_v7 = vmax.f32 %v6655_v51, 0.0 }
 0x768   : > { %v6934_v44 = vmax.f32 %v6657_v56, 0.0  ;;  %v6732_v8 = vadd.f32 %v6731_v6, %v12648_v22  ;;  %10114 = vmatmul.mubr.msk.bf16.gmra.mrb[188].mxu0 %vm1865_vm2, %v12757_v33  ;;  %v6921_v62 = vmax.f32 %v6728_v14, 0.0 }
 0x769   : > { %v6936_v15 = vmax.f32 %v6730_v59, 0.0  ;;  %v6935_v17 = vmax.f32 %v6659_v3, 0.0  ;;  %10118 = vmatmul.mubr.msk.bf16.gmra.mrb[188].mxu1 %vm1865_vm2, %v12757_v33  ;;  %7514 = vmatprep.mubr.bf16.mxu0 %v13744_v0 }
 0x76a   : > { %v7046_v20 = vpack.c.bf16 %v6934_v44, %v6918_v12  ;;  %v6937_v26 = vmax.f32 %v6732_v8, 0.0  ;;  %7587 = vmatprep.mubr.bf16.mxu1 %v13744_v0 }
 0x76b   : > { %v7048_v9 = vpack.c.bf16 %v6936_v15, %v6920_v11  ;;  %v7047_v31 = vpack.c.bf16 %v6935_v17, %v6919_v7  ;;  %v6662_v10 = vpop.f32.mrb[84].mxu0 }
 0x76c   : > { %v7049_v46 = vpack.c.bf16 %v6937_v26, %v6921_v62  ;;  %v6663_v27 = vadd.f32 %v6662_v10, %v12658_v23  ;;  %v6735_v30 = vpop.f32.mrb[84].mxu1  ;;  %v6664_v34 = vpop.f32.mrb[85].mxu0 }
 0x76d   : > { %v6736_v2 = vadd.f32 %v6735_v30, %v12658_v23  ;;  %v6665_v35 = vadd.f32 %v6664_v34, %v12658_v23  ;;  %v6737_v16 = vpop.f32.mrb[85].mxu1  ;;  %v6666_v38 = vpop.f32.mrb[86].mxu0  ;;  %7482 = vmatprep.subr.bf16.mxu0 %v7047_v31 }
 0x76e   : > { %v6738_v40 = vadd.f32 %v6737_v16, %v12658_v23  ;;  %v6667_v36 = vadd.f32 %v6666_v38, %v12660_v25  ;;  %v6739_v43 = vpop.f32.mrb[86].mxu1  ;;  %7555 = vmatprep.subr.bf16.mxu1 %v7049_v46  ;;  %v6668_v18 = vpop.f32.mrb[87].mxu0  ;;  %7483 = vmatpush1.bf16.msra.mxu0 %v7046_v20  ;;  %v6950_v37 = vmax.f32 %v6663_v27, 0.0 }
 0x76f   : > { %v6740_v48 = vadd.f32 %v6739_v43, %v12660_v25  ;;  %v6669_v21 = vadd.f32 %v6668_v18, %v12660_v25  ;;  %v6741_v52 = vpop.f32.mrb[87].mxu1  ;;  %7556 = vmatpush1.bf16.msra.mxu1 %v7048_v9  ;;  %v6952_v41 = vmax.f32 %v6736_v2, 0.0  ;;  %v6951_v4 = vmax.f32 %v6665_v35, 0.0 }
 0x770   : > { %v6966_v39 = vmax.f32 %v6667_v36, 0.0  ;;  %v6742_v19 = vadd.f32 %v6741_v52, %v12660_v25  ;;  %v6953_v1 = vmax.f32 %v6738_v40, 0.0 }
 0x771   : > { %v6968_v28 = vmax.f32 %v6740_v48, 0.0  ;;  %v6967_v42 = vmax.f32 %v6669_v21, 0.0 }
 0x772   : > { %v7062_v45 = vpack.c.bf16 %v6966_v39, %v6950_v37  ;;  %v6969_v57 = vmax.f32 %v6742_v19, 0.0 }
 0x773   : > { %v7064_v55 = vpack.c.bf16 %v6968_v28, %v6952_v41  ;;  %v7063_v5 = vpack.c.bf16 %v6967_v42, %v6951_v4  ;;  %v6672_v50 = vpop.f32.mrb[88].mxu0 }
 0x774   : > { %v7065_v51 = vpack.c.bf16 %v6969_v57, %v6953_v1  ;;  %v6673_v53 = vadd.f32 %v6672_v50, %v12670_v47  ;;  %v6745_v54 = vpop.f32.mrb[88].mxu1  ;;  %v6674_v14 = vpop.f32.mrb[89].mxu0 }
 0x775   : > { %v6746_v56 = vadd.f32 %v6745_v54, %v12670_v47  ;;  %v6675_v61 = vadd.f32 %v6674_v14, %v12670_v47  ;;  %v6747_v58 = vpop.f32.mrb[89].mxu1  ;;  %v6676_v59 = vpop.f32.mrb[90].mxu0  ;;  %7484 = vmatprep.subr.bf16.mxu0 %v7063_v5 }
 0x776   : > { %v6748_v3 = vadd.f32 %v6747_v58, %v12670_v47  ;;  %v6677_v6 = vadd.f32 %v6676_v59, %v12672_v13  ;;  %v6749_v12 = vpop.f32.mrb[90].mxu1  ;;  %7557 = vmatprep.subr.bf16.mxu1 %v7065_v51  ;;  %v6678_v44 = vpop.f32.mrb[91].mxu0  ;;  %7485 = vmatpush1.bf16.msra.mxu0 %v7062_v45  ;;  %v6982_v15 = vmax.f32 %v6673_v53, 0.0 }
 0x777   : > { %v6750_v8 = vadd.f32 %v6749_v12, %v12672_v13  ;;  %v6679_v11 = vadd.f32 %v6678_v44, %v12672_v13  ;;  %v6751_v7 = vpop.f32.mrb[91].mxu1  ;;  %7558 = vmatpush1.bf16.msra.mxu1 %v7064_v55  ;;  %v6984_v20 = vmax.f32 %v6746_v56, 0.0  ;;  %v6983_v26 = vmax.f32 %v6675_v61, 0.0 }
 0x778   : > { %v6998_v17 = vmax.f32 %v6677_v6, 0.0  ;;  %v6752_v62 = vadd.f32 %v6751_v7, %v12672_v13  ;;  %v6985_v10 = vmax.f32 %v6748_v3, 0.0 }
 0x779   : > { %v7000_v9 = vmax.f32 %v6750_v8, 0.0  ;;  %v6999_v31 = vmax.f32 %v6679_v11, 0.0 }
 0x77a   : > { %v7078_v46 = vpack.c.bf16 %v6998_v17, %v6982_v15  ;;  %v7001_v27 = vmax.f32 %v6752_v62, 0.0 }
 0x77b   : > { %v7080_v30 = vpack.c.bf16 %v7000_v9, %v6984_v20  ;;  %v7079_v34 = vpack.c.bf16 %v6999_v31, %v6983_v26  ;;  %v6682_v2 = vpop.f32.mrb[92].mxu0 }
 0x77c   : > { %v7081_v35 = vpack.c.bf16 %v7001_v27, %v6985_v10  ;;  %v6683_v16 = vadd.f32 %v6682_v2, %v12682_v29  ;;  %v6755_v38 = vpop.f32.mrb[92].mxu1  ;;  %v6684_v40 = vpop.f32.mrb[93].mxu0 }
 0x77d   : > { %v6756_v36 = vadd.f32 %v6755_v38, %v12682_v29  ;;  %v6685_v43 = vadd.f32 %v6684_v40, %v12682_v29  ;;  %v6757_v18 = vpop.f32.mrb[93].mxu1  ;;  %v6686_v48 = vpop.f32.mrb[94].mxu0  ;;  %7486 = vmatprep.subr.bf16.mxu0 %v7079_v34 }
 0x77e   : > { %v6758_v21 = vadd.f32 %v6757_v18, %v12682_v29  ;;  %v6687_v52 = vadd.f32 %v6686_v48, %v12684_v32  ;;  %v6759_v37 = vpop.f32.mrb[94].mxu1  ;;  %7559 = vmatprep.subr.bf16.mxu1 %v7081_v35  ;;  %v6688_v39 = vpop.f32.mrb[95].mxu0  ;;  %7487 = vmatpush1.bf16.msra.mxu0 %v7078_v46  ;;  %v7014_v28 = vmax.f32 %v6683_v16, 0.0 }
 0x77f   : > { %v6760_v19 = vadd.f32 %v6759_v37, %v12684_v32  ;;  %v6689_v41 = vadd.f32 %v6688_v39, %v12684_v32  ;;  %v6761_v4 = vpop.f32.mrb[95].mxu1  ;;  %7560 = vmatpush1.bf16.msra.mxu1 %v7080_v30  ;;  %v7016_v45 = vmax.f32 %v6756_v36, 0.0  ;;  %v7015_v57 = vmax.f32 %v6685_v43, 0.0 }
 0x780   : > { %v7030_v42 = vmax.f32 %v6687_v52, 0.0  ;;  %v6762_v1 = vadd.f32 %v6761_v4, %v12684_v32  ;;  %v7017_v50 = vmax.f32 %v6758_v21, 0.0 }
 0x781   : > { %v7032_v55 = vmax.f32 %v6760_v19, 0.0  ;;  %v7031_v5 = vmax.f32 %v6689_v41, 0.0 }
 0x782   : > { %v7094_v51 = vpack.c.bf16 %v7030_v42, %v7014_v28  ;;  %v7033_v53 = vmax.f32 %v6762_v1, 0.0 }
 0x783   : > { %v7096_v54 = vpack.c.bf16 %v7032_v55, %v7016_v45  ;;  %v7095_v14 = vpack.c.bf16 %v7031_v5, %v7015_v57 }
 0x784   : > { %v7097_v56 = vpack.c.bf16 %v7033_v53, %v7017_v50 }
 0x785   : > { %7488 = vmatprep.subr.bf16.mxu0 %v7095_v14 }
 0x786   : > { %7561 = vmatprep.subr.bf16.mxu1 %v7097_v56  ;;  %7489 = vmatpush1.bf16.msra.mxu0 %v7094_v51 }
 0x787   : > { %7562 = vmatpush1.bf16.msra.mxu1 %v7096_v54 }
 0x789   : > { %10119 = vmatmul.mubr.msk.bf16.vlgmr.msra.gmra.mrb[192].mxu0 %vm1865_vm2, %v12700_v63 }
 0x78a   : > { %10123 = vmatmul.mubr.msk.bf16.vlgmr.msra.gmra.mrb[192].mxu1 %vm1865_vm2, %v12700_v63  ;;  %7524 = vmatprep.mubr.bf16.mxu0 %v13744_v0 }
 0x78b   : > { %7597 = vmatprep.mubr.bf16.mxu1 %v13744_v0 }
 0x791   : > { %10120 = vmatmul.mubr.msk.bf16.gmra.mrb[196].mxu0 %vm1865_vm2, %v12719_v24 }
 0x792   : > { %10124 = vmatmul.mubr.msk.bf16.gmra.mrb[196].mxu1 %vm1865_vm2, %v12719_v24  ;;  %7534 = vmatprep.mubr.bf16.mxu0 %v13744_v0 }
 0x793   : > { %7607 = vmatprep.mubr.bf16.mxu1 %v13744_v0 }
 0x799   : > { %10121 = vmatmul.mubr.msk.bf16.gmra.mrb[200].mxu0 %vm1865_vm2, %v12738_v49 }
 0x79a   : > { %10125 = vmatmul.mubr.msk.bf16.gmra.mrb[200].mxu1 %vm1865_vm2, %v12738_v49  ;;  %7544 = vmatprep.mubr.bf16.mxu0 %v13744_v0 }
 0x79b   : > { %7617 = vmatprep.mubr.bf16.mxu1 %v13744_v0 }
 0x7a1   : > { %10122 = vmatmul.mubr.msk.bf16.gmra.mrb[204].mxu0 %vm1865_vm2, %v12757_v33 }
 0x7a2   : > { %10126 = vmatmul.mubr.msk.bf16.gmra.mrb[204].mxu1 %vm1865_vm2, %v12757_v33  ;;  %7660 = vmatprep.mubr.bf16.mxu0 %v13744_v0 }
 0x7a3   : > { %7733 = vmatprep.mubr.bf16.mxu1 %v13744_v0 }
 0x7b3   : > { %v6798_v61 = vpop.f32.mrb[120].mxu0 }
 0x7b4   : > { %v6799_v58 = vadd.f32 %v6798_v61, %v12646_v60  ;;  %v6871_v59 = vpop.f32.mrb[120].mxu1  ;;  %v6800_v3 = vpop.f32.mrb[121].mxu0 }
 0x7b5   : > { %v6872_v6 = vadd.f32 %v6871_v59, %v12646_v60  ;;  %v6801_v12 = vadd.f32 %v6800_v3, %v12646_v60  ;;  %v6873_v44 = vpop.f32.mrb[121].mxu1  ;;  %v6802_v8 = vpop.f32.mrb[122].mxu0 }
 0x7b6   : > { %v6874_v11 = vadd.f32 %v6873_v44, %v12646_v60  ;;  %v6803_v7 = vadd.f32 %v6802_v8, %v12648_v22  ;;  %v6875_v15 = vpop.f32.mrb[122].mxu1  ;;  %v6804_v17 = vpop.f32.mrb[123].mxu0  ;;  %v6922_v9 = vmax.f32 %v6799_v58, 0.0 }
 0x7b7   : > { %v6876_v62 = vadd.f32 %v6875_v15, %v12648_v22  ;;  %v6805_v20 = vadd.f32 %v6804_v17, %v12648_v22  ;;  %v6877_v26 = vpop.f32.mrb[123].mxu1  ;;  %v6924_v46 = vmax.f32 %v6872_v6, 0.0  ;;  %v6923_v27 = vmax.f32 %v6801_v12, 0.0 }
 0x7b8   : > { %v6938_v31 = vmax.f32 %v6803_v7, 0.0  ;;  %v6878_v10 = vadd.f32 %v6877_v26, %v12648_v22  ;;  %v6925_v2 = vmax.f32 %v6874_v11, 0.0 }
 0x7b9   : > { %v6940_v30 = vmax.f32 %v6876_v62, 0.0  ;;  %v6939_v34 = vmax.f32 %v6805_v20, 0.0 }
 0x7ba   : > { %v7050_v35 = vpack.c.bf16 %v6938_v31, %v6922_v9  ;;  %v6941_v60 = vmax.f32 %v6878_v10, 0.0 }
 0x7bb   : > { %v7052_v16 = vpack.c.bf16 %v6940_v30, %v6924_v46  ;;  %v7051_v38 = vpack.c.bf16 %v6939_v34, %v6923_v27  ;;  %v6808_v40 = vpop.f32.mrb[124].mxu0 }
 0x7bc   : > { %v7053_v36 = vpack.c.bf16 %v6941_v60, %v6925_v2  ;;  %v6809_v43 = vadd.f32 %v6808_v40, %v12658_v23  ;;  %v6881_v18 = vpop.f32.mrb[124].mxu1  ;;  %v6810_v48 = vpop.f32.mrb[125].mxu0 }
 0x7bd   : > { %v6882_v21 = vadd.f32 %v6881_v18, %v12658_v23  ;;  %v6811_v52 = vadd.f32 %v6810_v48, %v12658_v23  ;;  %v6883_v22 = vpop.f32.mrb[125].mxu1  ;;  %v6812_v37 = vpop.f32.mrb[126].mxu0  ;;  %7628 = vmatprep.subr.bf16.mxu0 %v7051_v38 }
 0x7be   : > { %v6884_v39 = vadd.f32 %v6883_v22, %v12658_v23  ;;  %v6813_v19 = vadd.f32 %v6812_v37, %v12660_v25  ;;  %v6885_v41 = vpop.f32.mrb[126].mxu1  ;;  %7701 = vmatprep.subr.bf16.mxu1 %v7053_v36  ;;  %v6814_v4 = vpop.f32.mrb[127].mxu0  ;;  %7629 = vmatpush1.bf16.msra.mxu0 %v7050_v35  ;;  %v6954_v45 = vmax.f32 %v6809_v43, 0.0 }
 0x7bf   : > { %v6886_v28 = vadd.f32 %v6885_v41, %v12660_v25  ;;  %v6815_v42 = vadd.f32 %v6814_v4, %v12660_v25  ;;  %v6887_v1 = vpop.f32.mrb[127].mxu1  ;;  %7702 = vmatpush1.bf16.msra.mxu1 %v7052_v16  ;;  %v6956_v5 = vmax.f32 %v6882_v21, 0.0  ;;  %v6955_v50 = vmax.f32 %v6811_v52, 0.0 }
 0x7c0   : > { %v6970_v57 = vmax.f32 %v6813_v19, 0.0  ;;  %v6888_v55 = vadd.f32 %v6887_v1, %v12660_v25  ;;  %v6957_v53 = vmax.f32 %v6884_v39, 0.0 }
 0x7c1   : > { %v6972_v51 = vmax.f32 %v6886_v28, 0.0  ;;  %v6971_v23 = vmax.f32 %v6815_v42, 0.0 }
 0x7c2   : > { %v7066_v54 = vpack.c.bf16 %v6970_v57, %v6954_v45  ;;  %v6973_v14 = vmax.f32 %v6888_v55, 0.0 }
 0x7c3   : > { %v7068_v56 = vpack.c.bf16 %v6972_v51, %v6956_v5  ;;  %v7067_v61 = vpack.c.bf16 %v6971_v23, %v6955_v50  ;;  %v6818_v58 = vpop.f32.mrb[128].mxu0 }
 0x7c4   : > { %v7069_v59 = vpack.c.bf16 %v6973_v14, %v6957_v53  ;;  %v6819_v3 = vadd.f32 %v6818_v58, %v12670_v47  ;;  %v6891_v6 = vpop.f32.mrb[128].mxu1  ;;  %v6820_v12 = vpop.f32.mrb[129].mxu0 }
 0x7c5   : > { %v6892_v44 = vadd.f32 %v6891_v6, %v12670_v47  ;;  %v6821_v8 = vadd.f32 %v6820_v12, %v12670_v47  ;;  %v6893_v25 = vpop.f32.mrb[129].mxu1  ;;  %v6822_v11 = vpop.f32.mrb[130].mxu0  ;;  %7630 = vmatprep.subr.bf16.mxu0 %v7067_v61 }
 0x7c6   : > { %v6894_v7 = vadd.f32 %v6893_v25, %v12670_v47  ;;  %v6823_v15 = vadd.f32 %v6822_v11, %v12672_v13  ;;  %v6895_v17 = vpop.f32.mrb[130].mxu1  ;;  %7703 = vmatprep.subr.bf16.mxu1 %v7069_v59  ;;  %v6824_v62 = vpop.f32.mrb[131].mxu0  ;;  %7631 = vmatpush1.bf16.msra.mxu0 %v7066_v54  ;;  %v6986_v31 = vmax.f32 %v6819_v3, 0.0 }
 0x7c7   : > { %v6896_v20 = vadd.f32 %v6895_v17, %v12672_v13  ;;  %v6825_v26 = vadd.f32 %v6824_v62, %v12672_v13  ;;  %v6897_v9 = vpop.f32.mrb[131].mxu1  ;;  %7704 = vmatpush1.bf16.msra.mxu1 %v7068_v56  ;;  %v6988_v27 = vmax.f32 %v6892_v44, 0.0  ;;  %v6987_v30 = vmax.f32 %v6821_v8, 0.0 }
 0x7c8   : > { %v7002_v10 = vmax.f32 %v6823_v15, 0.0  ;;  %v6898_v46 = vadd.f32 %v6897_v9, %v12672_v13  ;;  %v6989_v2 = vmax.f32 %v6894_v7, 0.0 }
 0x7c9   : > { %v7004_v34 = vmax.f32 %v6896_v20, 0.0  ;;  %v7003_v47 = vmax.f32 %v6825_v26, 0.0 }
 0x7ca   : > { %v7082_v35 = vpack.c.bf16 %v7002_v10, %v6986_v31  ;;  %v7005_v60 = vmax.f32 %v6898_v46, 0.0 }
 0x7cb   : > { %v7084_v16 = vpack.c.bf16 %v7004_v34, %v6988_v27  ;;  %v7083_v38 = vpack.c.bf16 %v7003_v47, %v6987_v30  ;;  %v6828_v40 = vpop.f32.mrb[132].mxu0 }
 0x7cc   : > { %v7085_v36 = vpack.c.bf16 %v7005_v60, %v6989_v2  ;;  %v6829_v43 = vadd.f32 %v6828_v40, %v12682_v29  ;;  %v6901_v18 = vpop.f32.mrb[132].mxu1  ;;  %v6830_v48 = vpop.f32.mrb[133].mxu0 }
 0x7cd   : > { %v6902_v21 = vadd.f32 %v6901_v18, %v12682_v29  ;;  %v6831_v52 = vadd.f32 %v6830_v48, %v12682_v29  ;;  %v6903_v13 = vpop.f32.mrb[133].mxu1  ;;  %v6832_v22 = vpop.f32.mrb[134].mxu0  ;;  %7632 = vmatprep.subr.bf16.mxu0 %v7083_v38 }
 0x7ce   : > { %v6904_v37 = vadd.f32 %v6903_v13, %v12682_v29  ;;  %v6833_v39 = vadd.f32 %v6832_v22, %v12684_v32  ;;  %v6905_v19 = vpop.f32.mrb[134].mxu1  ;;  %7705 = vmatprep.subr.bf16.mxu1 %v7085_v36  ;;  %v6834_v41 = vpop.f32.mrb[135].mxu0  ;;  %7633 = vmatpush1.bf16.msra.mxu0 %v7082_v35  ;;  %v7018_v1 = vmax.f32 %v6829_v43, 0.0 }
 0x7cf   : > { %v6906_v4 = vadd.f32 %v6905_v19, %v12684_v32  ;;  %v6835_v28 = vadd.f32 %v6834_v41, %v12684_v32  ;;  %v6907_v42 = vpop.f32.mrb[135].mxu1  ;;  %7706 = vmatpush1.bf16.msra.mxu1 %v7084_v16  ;;  %v7020_v55 = vmax.f32 %v6902_v21, 0.0  ;;  %v7019_v5 = vmax.f32 %v6831_v52, 0.0 }
 0x7d0   : > { %v7034_v45 = vmax.f32 %v6833_v39, 0.0  ;;  %v6908_v57 = vadd.f32 %v6907_v42, %v12684_v32  ;;  %v7021_v51 = vmax.f32 %v6904_v37, 0.0  ;;  %v12906_v32 = vpop.permute.xlu0 %7120 }
 0x7d1   : > { %v7036_v50 = vmax.f32 %v6906_v4, 0.0  ;;  %v7035_v29 = vmax.f32 %v6835_v28, 0.0 }
 0x7d2   : > { %v7098_v23 = vpack.c.bf16 %v7034_v45, %v7018_v1  ;;  %v7037_v53 = vmax.f32 %v6908_v57, 0.0 }
 0x7d3   : > { %v7100_v54 = vpack.c.bf16 %v7036_v50, %v7020_v55  ;;  %v7099_v14 = vpack.c.bf16 %v7035_v29, %v7019_v5 }
 0x7d4   : > { %v7101_v56 = vpack.c.bf16 %v7037_v53, %v7021_v51  ;;  %v12918_v46 = vpop.permute.xlu0 %7130 }
 0x7d5   : > { %7634 = vmatprep.subr.bf16.mxu0 %v7099_v14 }
 0x7d6   : > { %7707 = vmatprep.subr.bf16.mxu1 %v7101_v56  ;;  %7635 = vmatpush1.bf16.msra.mxu0 %v7098_v23 }
 0x7d7   : > { %7708 = vmatpush1.bf16.msra.mxu1 %v7100_v54 }
 0x7d8   : > { %v12942_v5 = vpop.permute.xlu0 %7140 }
 0x7d9   : > { %10127 = vmatmul.mubr.msk.bf16.vlgmr.msra.gmra.mrb[208].mxu0 %vm1865_vm2, %v12700_v63 }
 0x7da   : > { %10131 = vmatmul.mubr.msk.bf16.vlgmr.msra.gmra.mrb[208].mxu1 %vm1865_vm2, %v12700_v63  ;;  %7670 = vmatprep.mubr.bf16.mxu0 %v13744_v0  ;;  %v12908_v63 = vpop.permute.xlu1 %7125 }
 0x7db   : > { %7743 = vmatprep.mubr.bf16.mxu1 %v13744_v0 }
 0x7de   : > { %v12922_v47 = vpop.permute.xlu1 %7135 }
 0x7e1   : > { %10128 = vmatmul.mubr.msk.bf16.gmra.mrb[212].mxu0 %vm1865_vm2, %v12719_v24 }
 0x7e2   : > { %10132 = vmatmul.mubr.msk.bf16.gmra.mrb[212].mxu1 %vm1865_vm2, %v12719_v24  ;;  %7680 = vmatprep.mubr.bf16.mxu0 %v13744_v0  ;;  %v12946_v23 = vpop.permute.xlu1 %7145 }
 0x7e3   : > { %7753 = vmatprep.mubr.bf16.mxu1 %v13744_v0 }
 0x7e9   : > { %10129 = vmatmul.mubr.msk.bf16.gmra.mrb[216].mxu0 %vm1865_vm2, %v12738_v49 }
 0x7ea   : > { %10133 = vmatmul.mubr.msk.bf16.gmra.mrb[216].mxu1 %vm1865_vm2, %v12738_v49  ;;  %7690 = vmatprep.mubr.bf16.mxu0 %v13744_v0 }
 0x7eb   : > { %7763 = vmatprep.mubr.bf16.mxu1 %v13744_v0 }
 0x7f1   : > { %10130 = vmatmul.mubr.msk.bf16.gmra.mrb[220].mxu0 %vm1865_vm2, %v12757_v33 }
 0x7f2   : > { %10134 = vmatmul.mubr.msk.bf16.gmra.mrb[220].mxu1 %vm1865_vm2, %v12757_v33  ;;  %8086 = vmatprep.mubr.bf16.mxu0 %v13744_v0 }
 0x7f3   : > { %8159 = vmatprep.mubr.bf16.mxu1 %v13744_v0 }
 0x803   : > { %v7224_v24 = vpop.f32.mrb[160].mxu0 }
 0x804   : > { %v7225_v49 = vadd.f32 %v7224_v24, %v12906_v32  ;;  %v7297_v61 = vpop.f32.mrb[160].mxu1  ;;  %v7226_v58 = vpop.f32.mrb[161].mxu0 }
 0x805   : > { %v7298_v59 = vadd.f32 %v7297_v61, %v12906_v32  ;;  %v7227_v3 = vadd.f32 %v7226_v58, %v12906_v32  ;;  %v7299_v6 = vpop.f32.mrb[161].mxu1  ;;  %v7228_v12 = vpop.f32.mrb[162].mxu0 }
 0x806   : > { %v7300_v33 = vadd.f32 %v7299_v6, %v12906_v32  ;;  %v7229_v44 = vadd.f32 %v7228_v12, %v12908_v63  ;;  %v7301_v8 = vpop.f32.mrb[162].mxu1  ;;  %v7230_v25 = vpop.f32.mrb[163].mxu0  ;;  %v7774_v17 = vmax.f32 %v7225_v49, 0.0 }
 0x807   : > { %v7302_v11 = vadd.f32 %v7301_v8, %v12908_v63  ;;  %v7231_v7 = vadd.f32 %v7230_v25, %v12908_v63  ;;  %v7303_v15 = vpop.f32.mrb[163].mxu1  ;;  %v7776_v26 = vmax.f32 %v7298_v59, 0.0  ;;  %v7775_v9 = vmax.f32 %v7227_v3, 0.0 }
 0x808   : > { %v7790_v62 = vmax.f32 %v7229_v44, 0.0  ;;  %v7304_v20 = vadd.f32 %v7303_v15, %v12908_v63  ;;  %v7777_v27 = vmax.f32 %v7300_v33, 0.0 }
 0x809   : > { %v7792_v31 = vmax.f32 %v7302_v11, 0.0  ;;  %v7791_v10 = vmax.f32 %v7231_v7, 0.0 }
 0x80a   : > { %v12920_v30 = vpack.c.bf16 %v7790_v62, %v7774_v17  ;;  %v7793_v34 = vmax.f32 %v7304_v20, 0.0 }
 0x80b   : > { %v12924_v2 = vpack.c.bf16 %v7792_v31, %v7776_v26  ;;  %v12926_v35 = vpack.c.bf16 %v7791_v10, %v7775_v9  ;;  %v7234_v60 = vpop.f32.mrb[164].mxu0  ;;  %v12966_v10 = vpop.permute.xlu0 %7150 }
 0x80c   : > { %v12928_v16 = vpack.c.bf16 %v7793_v34, %v7777_v27  ;;  %v7235_v38 = vadd.f32 %v7234_v60, %v12918_v46  ;;  %v7307_v40 = vpop.f32.mrb[164].mxu1  ;;  %v7236_v36 = vpop.f32.mrb[165].mxu0 }
 0x80d   : > { %v7308_v43 = vadd.f32 %v7307_v40, %v12918_v46  ;;  %v7237_v18 = vadd.f32 %v7236_v36, %v12918_v46  ;;  %v7309_v48 = vpop.f32.mrb[165].mxu1  ;;  %v7238_v21 = vpop.f32.mrb[166].mxu0  ;;  %8054 = vmatprep.subr.bf16.mxu0 %v12926_v35 }
 0x80e   : > { %v7310_v52 = vadd.f32 %v7309_v48, %v12918_v46  ;;  %v7239_v13 = vadd.f32 %v7238_v21, %v12922_v47  ;;  %v7311_v22 = vpop.f32.mrb[166].mxu1  ;;  %8127 = vmatprep.subr.bf16.mxu1 %v12928_v16  ;;  %v7240_v37 = vpop.f32.mrb[167].mxu0  ;;  %8055 = vmatpush1.bf16.msra.mxu0 %v12920_v30  ;;  %v7806_v4 = vmax.f32 %v7235_v38, 0.0 }
 0x80f   : > { %v7312_v39 = vadd.f32 %v7311_v22, %v12922_v47  ;;  %v7241_v19 = vadd.f32 %v7240_v37, %v12922_v47  ;;  %v7313_v41 = vpop.f32.mrb[167].mxu1  ;;  %8128 = vmatpush1.bf16.msra.mxu1 %v12924_v2  ;;  %v7808_v1 = vmax.f32 %v7308_v43, 0.0  ;;  %v7807_v45 = vmax.f32 %v7237_v18, 0.0  ;;  %v12970_v38 = vpop.permute.xlu1 %7155 }
 0x810   : > { %v7822_v28 = vmax.f32 %v7239_v13, 0.0  ;;  %v7314_v42 = vadd.f32 %v7313_v41, %v12922_v47  ;;  %v7809_v50 = vmax.f32 %v7310_v52, 0.0 }
 0x811   : > { %v7824_v57 = vmax.f32 %v7312_v39, 0.0  ;;  %v7823_v55 = vmax.f32 %v7241_v19, 0.0 }
 0x812   : > { %v12944_v29 = vpack.c.bf16 %v7822_v28, %v7806_v4  ;;  %v7825_v51 = vmax.f32 %v7314_v42, 0.0 }
 0x813   : > { %v12948_v53 = vpack.c.bf16 %v7824_v57, %v7808_v1  ;;  %v12950_v54 = vpack.c.bf16 %v7823_v55, %v7807_v45  ;;  %v7244_v14 = vpop.f32.mrb[168].mxu0 }
 0x814   : > { %v12952_v56 = vpack.c.bf16 %v7825_v51, %v7809_v50  ;;  %v7245_v24 = vadd.f32 %v7244_v14, %v12942_v5  ;;  %v7317_v49 = vpop.f32.mrb[168].mxu1  ;;  %v7246_v61 = vpop.f32.mrb[169].mxu0 }
 0x815   : > { %v7318_v58 = vadd.f32 %v7317_v49, %v12942_v5  ;;  %v7247_v59 = vadd.f32 %v7246_v61, %v12942_v5  ;;  %v7319_v3 = vpop.f32.mrb[169].mxu1  ;;  %v7248_v6 = vpop.f32.mrb[170].mxu0  ;;  %8056 = vmatprep.subr.bf16.mxu0 %v12950_v54 }
 0x816   : > { %v7320_v12 = vadd.f32 %v7319_v3, %v12942_v5  ;;  %v7249_v33 = vadd.f32 %v7248_v6, %v12946_v23  ;;  %v7321_v44 = vpop.f32.mrb[170].mxu1  ;;  %8129 = vmatprep.subr.bf16.mxu1 %v12952_v56  ;;  %v7250_v8 = vpop.f32.mrb[171].mxu0  ;;  %8057 = vmatpush1.bf16.msra.mxu0 %v12944_v29  ;;  %v7838_v15 = vmax.f32 %v7245_v24, 0.0 }
 0x817   : > { %v7322_v25 = vadd.f32 %v7321_v44, %v12946_v23  ;;  %v7251_v11 = vadd.f32 %v7250_v8, %v12946_v23  ;;  %v7323_v7 = vpop.f32.mrb[171].mxu1  ;;  %8130 = vmatpush1.bf16.msra.mxu1 %v12948_v53  ;;  %v7840_v20 = vmax.f32 %v7318_v58, 0.0  ;;  %v7839_v26 = vmax.f32 %v7247_v59, 0.0 }
 0x818   : > { %v7854_v17 = vmax.f32 %v7249_v33, 0.0  ;;  %v7324_v62 = vadd.f32 %v7323_v7, %v12946_v23  ;;  %v7841_v27 = vmax.f32 %v7320_v12, 0.0 }
 0x819   : > { %v7856_v9 = vmax.f32 %v7322_v25, 0.0  ;;  %v7855_v31 = vmax.f32 %v7251_v11, 0.0 }
 0x81a   : > { %v12968_v34 = vpack.c.bf16 %v7854_v17, %v7838_v15  ;;  %v7857_v60 = vmax.f32 %v7324_v62, 0.0  ;;  %v13005_v62 = vld [vmem:[%s13741_s1 + $0x130] sm:$0xff]  }
 0x81b   : > { %v12972_v40 = vpack.c.bf16 %v7856_v9, %v7840_v20  ;;  %v12974_v36 = vpack.c.bf16 %v7855_v31, %v7839_v26  ;;  %v7254_v43 = vpop.f32.mrb[172].mxu0 }
 0x81c   : > { %v12976_v18 = vpack.c.bf16 %v7857_v60, %v7841_v27  ;;  %v7255_v48 = vadd.f32 %v7254_v43, %v12966_v10  ;;  %v7327_v21 = vpop.f32.mrb[172].mxu1  ;;  %v7256_v52 = vpop.f32.mrb[173].mxu0 }
 0x81d   : > { %v7328_v13 = vadd.f32 %v7327_v21, %v12966_v10  ;;  %v7257_v22 = vadd.f32 %v7256_v52, %v12966_v10  ;;  %v7329_v37 = vpop.f32.mrb[173].mxu1  ;;  %v7258_v39 = vpop.f32.mrb[174].mxu0  ;;  %8058 = vmatprep.subr.bf16.mxu0 %v12974_v36 }
 0x81e   : > { %v7330_v19 = vadd.f32 %v7329_v37, %v12966_v10  ;;  %v7259_v41 = vadd.f32 %v7258_v39, %v12970_v38  ;;  %v7331_v4 = vpop.f32.mrb[174].mxu1  ;;  %8131 = vmatprep.subr.bf16.mxu1 %v12976_v18  ;;  %v7260_v28 = vpop.f32.mrb[175].mxu0  ;;  %8059 = vmatpush1.bf16.msra.mxu0 %v12968_v34  ;;  %v7870_v57 = vmax.f32 %v7255_v48, 0.0 }
 0x81f   : > { %v7332_v42 = vadd.f32 %v7331_v4, %v12970_v38  ;;  %v7261_v1 = vadd.f32 %v7260_v28, %v12970_v38  ;;  %v7333_v45 = vpop.f32.mrb[175].mxu1  ;;  %8132 = vmatpush1.bf16.msra.mxu1 %v12972_v40  ;;  %v7872_v51 = vmax.f32 %v7328_v13, 0.0  ;;  %v7871_v14 = vmax.f32 %v7257_v22, 0.0 }
 0x820   : > { %v7886_v55 = vmax.f32 %v7259_v41, 0.0  ;;  %v7334_v50 = vadd.f32 %v7333_v45, %v12970_v38  ;;  %v7873_v61 = vmax.f32 %v7330_v19, 0.0 }
 0x821   : > { %v7888_v24 = vmax.f32 %v7332_v42, 0.0  ;;  %v7887_v49 = vmax.f32 %v7261_v1, 0.0 }
 0x822   : > { %v12990_v58 = vpack.c.bf16 %v7886_v55, %v7870_v57  ;;  %v7889_v59 = vmax.f32 %v7334_v50, 0.0 }
 0x823   : > { %v12992_v3 = vpack.c.bf16 %v7888_v24, %v7872_v51  ;;  %v12994_v6 = vpack.c.bf16 %v7887_v49, %v7871_v14  ;;  %v7370_v12 = vpop.f32.mrb[176].mxu0 }
 0x824   : > { %v12996_v33 = vpack.c.bf16 %v7889_v59, %v7873_v61  ;;  %v7371_v44 = vadd.f32 %v7370_v12, %v12906_v32  ;;  %v7443_v8 = vpop.f32.mrb[176].mxu1  ;;  %v7372_v25 = vpop.f32.mrb[177].mxu0  ;;  %v13036_v61 = vld [vmem:[%s13741_s1 + $0x138] sm:$0xff]  }
 0x825   : > { %v7444_v11 = vadd.f32 %v7443_v8, %v12906_v32  ;;  %v7373_v7 = vadd.f32 %v7372_v25, %v12906_v32  ;;  %v7445_v15 = vpop.f32.mrb[177].mxu1  ;;  %v7374_v17 = vpop.f32.mrb[178].mxu0  ;;  %8060 = vmatprep.subr.bf16.mxu0 %v12994_v6 }
 0x826   : > { %v7446_v20 = vadd.f32 %v7445_v15, %v12906_v32  ;;  %v7375_v26 = vadd.f32 %v7374_v17, %v12908_v63  ;;  %v7447_v9 = vpop.f32.mrb[178].mxu1  ;;  %8133 = vmatprep.subr.bf16.mxu1 %v12996_v33  ;;  %v7376_v31 = vpop.f32.mrb[179].mxu0  ;;  %8061 = vmatpush1.bf16.msra.mxu0 %v12990_v58  ;;  %v7778_v48 = vmax.f32 %v7371_v44, 0.0 }
 0x827   : > { %v7448_v27 = vadd.f32 %v7447_v9, %v12908_v63  ;;  %v7377_v60 = vadd.f32 %v7376_v31, %v12908_v63  ;;  %v7449_v43 = vpop.f32.mrb[179].mxu1  ;;  %8134 = vmatpush1.bf16.msra.mxu1 %v12992_v3  ;;  %v7780_v13 = vmax.f32 %v7444_v11, 0.0  ;;  %v7779_v22 = vmax.f32 %v7373_v7, 0.0 }
 0x828   : > { %v7794_v21 = vmax.f32 %v7375_v26, 0.0  ;;  %v7450_v52 = vadd.f32 %v7449_v43, %v12908_v63  ;;  %v7781_v19 = vmax.f32 %v7446_v20, 0.0 }
 0x829   : > { %v7796_v37 = vmax.f32 %v7448_v27, 0.0  ;;  %v7795_v39 = vmax.f32 %v7377_v60, 0.0  ;;  %10139 = vmatmul.mubr.msk.bf16.vlgmr.msra.gmra.mrb[224].mxu0 %vm1865_vm2, %v13005_v62 }
 0x82a   : > { %v13017_v41 = vpack.c.bf16 %v7794_v21, %v7778_v48  ;;  %v7797_v4 = vmax.f32 %v7450_v52, 0.0  ;;  %10143 = vmatmul.mubr.msk.bf16.vlgmr.msra.gmra.mrb[224].mxu1 %vm1865_vm2, %v13005_v62  ;;  %8096 = vmatprep.mubr.bf16.mxu0 %v13744_v0 }
 0x82b   : > { %v13022_v28 = vpack.c.bf16 %v7796_v37, %v7780_v13  ;;  %v13024_v42 = vpack.c.bf16 %v7795_v39, %v7779_v22  ;;  %v7380_v1 = vpop.f32.mrb[180].mxu0  ;;  %8169 = vmatprep.mubr.bf16.mxu1 %v13744_v0 }
 0x82c   : > { %v13027_v45 = vpack.c.bf16 %v7797_v4, %v7781_v19  ;;  %v7381_v57 = vadd.f32 %v7380_v1, %v12918_v46  ;;  %v7453_v55 = vpop.f32.mrb[180].mxu1  ;;  %v7382_v50 = vpop.f32.mrb[181].mxu0 }
 0x82d   : > { %v7454_v51 = vadd.f32 %v7453_v55, %v12918_v46  ;;  %v7383_v14 = vadd.f32 %v7382_v50, %v12918_v46  ;;  %v7455_v24 = vpop.f32.mrb[181].mxu1  ;;  %v7384_v49 = vpop.f32.mrb[182].mxu0  ;;  %8200 = vmatprep.subr.bf16.mxu0 %v13024_v42  ;;  %v13067_v50 = vld [vmem:[%s13741_s1 + $0x140] sm:$0xff]  }
 0x82e   : > { %v7456_v59 = vadd.f32 %v7455_v24, %v12918_v46  ;;  %v7385_v12 = vadd.f32 %v7384_v49, %v12922_v47  ;;  %v7457_v44 = vpop.f32.mrb[182].mxu1  ;;  %8273 = vmatprep.subr.bf16.mxu1 %v13027_v45  ;;  %v7386_v8 = vpop.f32.mrb[183].mxu0  ;;  %8201 = vmatpush1.bf16.msra.mxu0 %v13017_v41  ;;  %v7810_v15 = vmax.f32 %v7381_v57, 0.0 }
 0x82f   : > { %v7458_v25 = vadd.f32 %v7457_v44, %v12922_v47  ;;  %v7387_v11 = vadd.f32 %v7386_v8, %v12922_v47  ;;  %v7459_v7 = vpop.f32.mrb[183].mxu1  ;;  %8274 = vmatpush1.bf16.msra.mxu1 %v13022_v28  ;;  %v7812_v26 = vmax.f32 %v7454_v51, 0.0  ;;  %v7811_v9 = vmax.f32 %v7383_v14, 0.0 }
 0x830   : > { %v7826_v17 = vmax.f32 %v7385_v12, 0.0  ;;  %v7460_v20 = vadd.f32 %v7459_v7, %v12922_v47  ;;  %v7813_v60 = vmax.f32 %v7456_v59, 0.0 }
 0x831   : > { %v7828_v31 = vmax.f32 %v7458_v25, 0.0  ;;  %v7827_v27 = vmax.f32 %v7387_v11, 0.0  ;;  %10140 = vmatmul.mubr.msk.bf16.gmra.mrb[228].mxu0 %vm1865_vm2, %v13036_v61 }
 0x832   : > { %v13048_v43 = vpack.c.bf16 %v7826_v17, %v7810_v15  ;;  %v7829_v48 = vmax.f32 %v7460_v20, 0.0  ;;  %10144 = vmatmul.mubr.msk.bf16.gmra.mrb[228].mxu1 %vm1865_vm2, %v13036_v61  ;;  %8106 = vmatprep.mubr.bf16.mxu0 %v13744_v0 }
 0x833   : > { %v13053_v21 = vpack.c.bf16 %v7828_v31, %v7812_v26  ;;  %v13055_v52 = vpack.c.bf16 %v7827_v27, %v7811_v9  ;;  %v7390_v13 = vpop.f32.mrb[184].mxu0  ;;  %8179 = vmatprep.mubr.bf16.mxu1 %v13744_v0 }
 0x834   : > { %v13058_v22 = vpack.c.bf16 %v7829_v48, %v7813_v60  ;;  %v7391_v37 = vadd.f32 %v7390_v13, %v12942_v5  ;;  %v7463_v39 = vpop.f32.mrb[184].mxu1  ;;  %v7392_v19 = vpop.f32.mrb[185].mxu0 }
 0x835   : > { %v7464_v4 = vadd.f32 %v7463_v39, %v12942_v5  ;;  %v7393_v1 = vadd.f32 %v7392_v19, %v12942_v5  ;;  %v7465_v57 = vpop.f32.mrb[185].mxu1  ;;  %v7394_v55 = vpop.f32.mrb[186].mxu0  ;;  %8202 = vmatprep.subr.bf16.mxu0 %v13055_v52 }
 0x836   : > { %v7466_v51 = vadd.f32 %v7465_v57, %v12942_v5  ;;  %v7395_v14 = vadd.f32 %v7394_v55, %v12946_v23  ;;  %v7467_v24 = vpop.f32.mrb[186].mxu1  ;;  %8275 = vmatprep.subr.bf16.mxu1 %v13058_v22  ;;  %v7396_v49 = vpop.f32.mrb[187].mxu0  ;;  %8203 = vmatpush1.bf16.msra.mxu0 %v13048_v43  ;;  %v7842_v8 = vmax.f32 %v7391_v37, 0.0 }
 0x837   : > { %v7468_v59 = vadd.f32 %v7467_v24, %v12946_v23  ;;  %v7397_v12 = vadd.f32 %v7396_v49, %v12946_v23  ;;  %v7469_v44 = vpop.f32.mrb[187].mxu1  ;;  %8276 = vmatpush1.bf16.msra.mxu1 %v13053_v21  ;;  %v7844_v7 = vmax.f32 %v7464_v4, 0.0  ;;  %v7843_v15 = vmax.f32 %v7393_v1, 0.0 }
 0x838   : > { %v7858_v25 = vmax.f32 %v7395_v14, 0.0  ;;  %v7470_v11 = vadd.f32 %v7469_v44, %v12946_v23  ;;  %v7845_v26 = vmax.f32 %v7466_v51, 0.0  ;;  %v13098_v51 = vld [vmem:[%s13741_s1 + $0x148] sm:$0xff]  }
 0x839   : > { %v7860_v17 = vmax.f32 %v7468_v59, 0.0  ;;  %v7859_v20 = vmax.f32 %v7397_v12, 0.0  ;;  %10141 = vmatmul.mubr.msk.bf16.gmra.mrb[232].mxu0 %vm1865_vm2, %v13067_v50 }
 0x83a   : > { %v13079_v9 = vpack.c.bf16 %v7858_v25, %v7842_v8  ;;  %v7861_v31 = vmax.f32 %v7470_v11, 0.0  ;;  %10145 = vmatmul.mubr.msk.bf16.gmra.mrb[232].mxu1 %vm1865_vm2, %v13067_v50  ;;  %8116 = vmatprep.mubr.bf16.mxu0 %v13744_v0 }
 0x83b   : > { %v13084_v27 = vpack.c.bf16 %v7860_v17, %v7844_v7  ;;  %v13086_v60 = vpack.c.bf16 %v7859_v20, %v7843_v15  ;;  %v7400_v48 = vpop.f32.mrb[188].mxu0  ;;  %8189 = vmatprep.mubr.bf16.mxu1 %v13744_v0 }
 0x83c   : > { %v13089_v13 = vpack.c.bf16 %v7861_v31, %v7845_v26  ;;  %v7401_v37 = vadd.f32 %v7400_v48, %v12966_v10  ;;  %v7473_v39 = vpop.f32.mrb[188].mxu1  ;;  %v7402_v19 = vpop.f32.mrb[189].mxu0 }
 0x83d   : > { %v7474_v4 = vadd.f32 %v7473_v39, %v12966_v10  ;;  %v7403_v1 = vadd.f32 %v7402_v19, %v12966_v10  ;;  %v7475_v57 = vpop.f32.mrb[189].mxu1  ;;  %v7404_v55 = vpop.f32.mrb[190].mxu0  ;;  %8204 = vmatprep.subr.bf16.mxu0 %v13086_v60 }
 0x83e   : > { %v7476_v14 = vadd.f32 %v7475_v57, %v12966_v10  ;;  %v7405_v24 = vadd.f32 %v7404_v55, %v12970_v38  ;;  %v7477_v49 = vpop.f32.mrb[190].mxu1  ;;  %8277 = vmatprep.subr.bf16.mxu1 %v13089_v13  ;;  %v7406_v59 = vpop.f32.mrb[191].mxu0  ;;  %8205 = vmatpush1.bf16.msra.mxu0 %v13079_v9  ;;  %v7874_v25 = vmax.f32 %v7401_v37, 0.0 }
 0x83f   : > { %v7478_v12 = vadd.f32 %v7477_v49, %v12970_v38  ;;  %v7407_v44 = vadd.f32 %v7406_v59, %v12970_v38  ;;  %v7479_v8 = vpop.f32.mrb[191].mxu1  ;;  %8278 = vmatpush1.bf16.msra.mxu1 %v13084_v27  ;;  %v7876_v15 = vmax.f32 %v7474_v4, 0.0  ;;  %v7875_v17 = vmax.f32 %v7403_v1, 0.0 }
 0x840   : > { %v7890_v11 = vmax.f32 %v7405_v24, 0.0  ;;  %v7480_v7 = vadd.f32 %v7479_v8, %v12970_v38  ;;  %v7877_v31 = vmax.f32 %v7476_v14, 0.0 }
 0x841   : > { %v7892_v20 = vmax.f32 %v7478_v12, 0.0  ;;  %v7891_v26 = vmax.f32 %v7407_v44, 0.0  ;;  %10142 = vmatmul.mubr.msk.bf16.gmra.mrb[236].mxu0 %vm1865_vm2, %v13098_v51 }
 0x842   : > { %v13110_v48 = vpack.c.bf16 %v7890_v11, %v7874_v25  ;;  %v7893_v39 = vmax.f32 %v7480_v7, 0.0  ;;  %10146 = vmatmul.mubr.msk.bf16.gmra.mrb[236].mxu1 %vm1865_vm2, %v13098_v51  ;;  %8232 = vmatprep.mubr.bf16.mxu0 %v13744_v0 }
 0x843   : > { %v13115_v37 = vpack.c.bf16 %v7892_v20, %v7876_v15  ;;  %v13117_v19 = vpack.c.bf16 %v7891_v26, %v7875_v17  ;;  %8305 = vmatprep.mubr.bf16.mxu1 %v13744_v0 }
 0x844   : > { %13778 = vst [vmem:[#allocation2_spill] sm:$0xff] %v13110_v48  ;;  %v13120_v4 = vpack.c.bf16 %v7893_v39, %v7877_v31 }
 0x845   : > { %13779 = vst [vmem:[#allocation3_spill] sm:$0xff] %v13115_v37  ;;  %8206 = vmatprep.subr.bf16.mxu0 %v13117_v19 }
 0x846   : > { %13780 = vst [vmem:[#allocation4_spill] sm:$0xff] %v13120_v4  ;;  %8279 = vmatprep.subr.bf16.mxu1 %v13120_v4  ;;  %8207 = vmatpush1.bf16.msra.mxu0 %v13110_v48 }
 0x847   : > { %8280 = vmatpush1.bf16.msra.mxu1 %v13115_v37 }
 0x849   : > { %10147 = vmatmul.mubr.msk.bf16.vlgmr.msra.gmra.mrb[240].mxu0 %vm1865_vm2, %v13005_v62 }
 0x84a   : > { %10151 = vmatmul.mubr.msk.bf16.vlgmr.msra.gmra.mrb[240].mxu1 %vm1865_vm2, %v13005_v62  ;;  %8242 = vmatprep.mubr.bf16.mxu0 %v13744_v0 }
 0x84b   : > { %8315 = vmatprep.mubr.bf16.mxu1 %v13744_v0 }
 0x851   : > { %10148 = vmatmul.mubr.msk.bf16.gmra.mrb[244].mxu0 %vm1865_vm2, %v13036_v61 }
 0x852   : > { %10152 = vmatmul.mubr.msk.bf16.gmra.mrb[244].mxu1 %vm1865_vm2, %v13036_v61  ;;  %8252 = vmatprep.mubr.bf16.mxu0 %v13744_v0 }
 0x853   : > { %8325 = vmatprep.mubr.bf16.mxu1 %v13744_v0 }
 0x859   : > { %10149 = vmatmul.mubr.msk.bf16.gmra.mrb[248].mxu0 %vm1865_vm2, %v13067_v50 }
 0x85a   : > { %10153 = vmatmul.mubr.msk.bf16.gmra.mrb[248].mxu1 %vm1865_vm2, %v13067_v50  ;;  %8262 = vmatprep.mubr.bf16.mxu0 %v13744_v0 }
 0x85b   : > { %8335 = vmatprep.mubr.bf16.mxu1 %v13744_v0 }
 0x85c   : > { %v7516_v1 = vpop.f32.mrb[192].mxu0 }
 0x85d   : > { %v7517_v57 = vadd.f32 %v7516_v1, %v12906_v32  ;;  %v7589_v55 = vpop.f32.mrb[192].mxu1  ;;  %v7518_v14 = vpop.f32.mrb[193].mxu0 }
 0x85e   : > { %v7590_v24 = vadd.f32 %v7589_v55, %v12906_v32  ;;  %v7519_v49 = vadd.f32 %v7518_v14, %v12906_v32  ;;  %v7591_v59 = vpop.f32.mrb[193].mxu1  ;;  %v7520_v12 = vpop.f32.mrb[194].mxu0 }
 0x85f   : > { %v7592_v44 = vadd.f32 %v7591_v59, %v12906_v32  ;;  %v7521_v8 = vadd.f32 %v7520_v12, %v12908_v63  ;;  %v7593_v25 = vpop.f32.mrb[194].mxu1  ;;  %v7522_v11 = vpop.f32.mrb[195].mxu0  ;;  %v7782_v20 = vmax.f32 %v7517_v57, 0.0 }
 0x860   : > { %v7594_v7 = vadd.f32 %v7593_v25, %v12908_v63  ;;  %v7523_v15 = vadd.f32 %v7522_v11, %v12908_v63  ;;  %v7595_v17 = vpop.f32.mrb[195].mxu1  ;;  %v7784_v39 = vmax.f32 %v7590_v24, 0.0  ;;  %v7783_v1 = vmax.f32 %v7519_v49, 0.0 }
 0x861   : > { %v7798_v26 = vmax.f32 %v7521_v8, 0.0  ;;  %v7596_v31 = vadd.f32 %v7595_v17, %v12908_v63  ;;  %10150 = vmatmul.mubr.msk.bf16.gmra.mrb[252].mxu0 %vm1865_vm2, %v13098_v51  ;;  %v7785_v59 = vmax.f32 %v7592_v44, 0.0 }
 0x862   : > { %v7800_v55 = vmax.f32 %v7594_v7, 0.0  ;;  %v7799_v14 = vmax.f32 %v7523_v15, 0.0  ;;  %10154 = vmatmul.mubr.msk.bf16.gmra.mrb[252].mxu1 %vm1865_vm2, %v13098_v51  ;;  %8378 = vmatprep.mubr.bf16.mxu0 %v13744_v0 }
 0x863   : > { %v13157_v12 = vpack.c.bf16 %v7798_v26, %v7782_v20  ;;  %v7801_v25 = vmax.f32 %v7596_v31, 0.0  ;;  %8451 = vmatprep.mubr.bf16.mxu1 %v13744_v0 }
 0x864   : > { %v13160_v57 = vpack.c.bf16 %v7800_v55, %v7784_v39  ;;  %v13162_v8 = vpack.c.bf16 %v7799_v14, %v7783_v1  ;;  %v7526_v11 = vpop.f32.mrb[196].mxu0 }
 0x865   : > { %13781 = vst [vmem:[#allocation5_spill] sm:$0xff] %v13157_v12  ;;  %v13164_v24 = vpack.c.bf16 %v7801_v25, %v7785_v59  ;;  %v7527_v49 = vadd.f32 %v7526_v11, %v12918_v46  ;;  %v7599_v7 = vpop.f32.mrb[196].mxu1  ;;  %v7528_v15 = vpop.f32.mrb[197].mxu0 }
 0x866   : > { %13782 = vst [vmem:[#allocation6_spill] sm:$0xff] %v13160_v57  ;;  %13783 = vst [vmem:[#allocation7_spill] sm:$0xff] %v13162_v8  ;;  %v7600_v17 = vadd.f32 %v7599_v7, %v12918_v46  ;;  %v7529_v44 = vadd.f32 %v7528_v15, %v12918_v46  ;;  %v7601_v20 = vpop.f32.mrb[197].mxu1  ;;  %v7530_v26 = vpop.f32.mrb[198].mxu0  ;;  %8346 = vmatprep.subr.bf16.mxu0 %v13162_v8 }
 0x867   : > { %13784 = vst [vmem:[#allocation8_spill] sm:$0xff] %v13164_v24  ;;  %v7602_v31 = vadd.f32 %v7601_v20, %v12918_v46  ;;  %v7531_v39 = vadd.f32 %v7530_v26, %v12922_v47  ;;  %v7603_v1 = vpop.f32.mrb[198].mxu1  ;;  %8419 = vmatprep.subr.bf16.mxu1 %v13164_v24  ;;  %v7532_v55 = vpop.f32.mrb[199].mxu0  ;;  %8347 = vmatpush1.bf16.msra.mxu0 %v13157_v12  ;;  %v7814_v11 = vmax.f32 %v7527_v49, 0.0 }
 0x868   : > { %v7604_v14 = vadd.f32 %v7603_v1, %v12922_v47  ;;  %v7533_v59 = vadd.f32 %v7532_v55, %v12922_v47  ;;  %v7605_v25 = vpop.f32.mrb[199].mxu1  ;;  %8420 = vmatpush1.bf16.msra.mxu1 %v13160_v57  ;;  %v7816_v20 = vmax.f32 %v7600_v17, 0.0  ;;  %v7815_v0 = vmax.f32 %v7529_v44, 0.0 }
 0x869   : > { %v7830_v7 = vmax.f32 %v7531_v39, 0.0  ;;  %v7606_v15 = vadd.f32 %v7605_v25, %v12922_v47  ;;  %v7817_v37 = vmax.f32 %v7602_v31, 0.0 }
 0x86a   : > { %v7832_v26 = vmax.f32 %v7604_v14, 0.0  ;;  %v7831_v8 = vmax.f32 %v7533_v59, 0.0 }
 0x86b   : > { %v13178_v24 = vpack.c.bf16 %v7830_v7, %v7814_v11  ;;  %v7833_v48 = vmax.f32 %v7606_v15, 0.0 }
 0x86c   : > { %v13180_v12 = vpack.c.bf16 %v7832_v26, %v7816_v20  ;;  %v13182_v1 = vpack.c.bf16 %v7831_v8, %v7815_v0  ;;  %v7536_v55 = vpop.f32.mrb[200].mxu0 }
 0x86d   : > { %13785 = vst [vmem:[#allocation9_spill] sm:$0xff] %v13178_v24  ;;  %v13184_v4 = vpack.c.bf16 %v7833_v48, %v7817_v37  ;;  %v7537_v49 = vadd.f32 %v7536_v55, %v12942_v5  ;;  %v7609_v39 = vpop.f32.mrb[200].mxu1  ;;  %v7538_v57 = vpop.f32.mrb[201].mxu0 }
 0x86e   : > { %13786 = vst [vmem:[#allocation10_spill] sm:$0xff] %v13180_v12  ;;  %13787 = vst [vmem:[#allocation11_spill] sm:$0xff] %v13182_v1  ;;  %v7610_v17 = vadd.f32 %v7609_v39, %v12942_v5  ;;  %v7539_v44 = vadd.f32 %v7538_v57, %v12942_v5  ;;  %v7611_v14 = vpop.f32.mrb[201].mxu1  ;;  %v7540_v31 = vpop.f32.mrb[202].mxu0  ;;  %8348 = vmatprep.subr.bf16.mxu0 %v13182_v1 }
 0x86f   : > { %13788 = vst [vmem:[#allocation12_spill] sm:$0xff] %v13184_v4  ;;  %v7612_v59 = vadd.f32 %v7611_v14, %v12942_v5  ;;  %v7541_v0 = vadd.f32 %v7540_v31, %v12946_v23  ;;  %v7613_v8 = vpop.f32.mrb[202].mxu1  ;;  %8421 = vmatprep.subr.bf16.mxu1 %v13184_v4  ;;  %v7542_v48 = vpop.f32.mrb[203].mxu0  ;;  %8349 = vmatpush1.bf16.msra.mxu0 %v13178_v24  ;;  %v7846_v57 = vmax.f32 %v7537_v49, 0.0 }
 0x870   : > { %v7614_v37 = vadd.f32 %v7613_v8, %v12946_v23  ;;  %v7543_v25 = vadd.f32 %v7542_v48, %v12946_v23  ;;  %v7615_v11 = vpop.f32.mrb[203].mxu1  ;;  %8422 = vmatpush1.bf16.msra.mxu1 %v13180_v12  ;;  %v7848_v20 = vmax.f32 %v7610_v17, 0.0  ;;  %v7847_v26 = vmax.f32 %v7539_v44, 0.0 }
 0x871   : > { %v7862_v7 = vmax.f32 %v7541_v0, 0.0  ;;  %v7616_v15 = vadd.f32 %v7615_v11, %v12946_v23  ;;  %v7849_v14 = vmax.f32 %v7612_v59, 0.0 }
 0x872   : > { %v7864_v55 = vmax.f32 %v7614_v37, 0.0  ;;  %v7863_v39 = vmax.f32 %v7543_v25, 0.0 }
 0x873   : > { %v13198_v31 = vpack.c.bf16 %v7862_v7, %v7846_v57  ;;  %v7865_v4 = vmax.f32 %v7616_v15, 0.0 }
 0x874   : > { %v13200_v24 = vpack.c.bf16 %v7864_v55, %v7848_v20  ;;  %v13202_v8 = vpack.c.bf16 %v7863_v39, %v7847_v26  ;;  %v7546_v48 = vpop.f32.mrb[204].mxu0 }
 0x875   : > { %13789 = vst [vmem:[#allocation13_spill] sm:$0xff] %v13198_v31  ;;  %v13204_v1 = vpack.c.bf16 %v7865_v4, %v7849_v14  ;;  %v7547_v49 = vadd.f32 %v7546_v48, %v12966_v10  ;;  %v7619_v0 = vpop.f32.mrb[204].mxu1  ;;  %v7548_v12 = vpop.f32.mrb[205].mxu0 }
 0x876   : > { %13790 = vst [vmem:[#allocation14_spill] sm:$0xff] %v13200_v24  ;;  %13791 = vst [vmem:[#allocation15_spill] sm:$0xff] %v13202_v8  ;;  %v7620_v17 = vadd.f32 %v7619_v0, %v12966_v10  ;;  %v7549_v44 = vadd.f32 %v7548_v12, %v12966_v10  ;;  %v7621_v37 = vpop.f32.mrb[205].mxu1  ;;  %v7550_v59 = vpop.f32.mrb[206].mxu0  ;;  %8350 = vmatprep.subr.bf16.mxu0 %v13202_v8 }
 0x877   : > { %13792 = vst [vmem:[#allocation16_spill] sm:$0xff] %v13204_v1  ;;  %v7622_v25 = vadd.f32 %v7621_v37, %v12966_v10  ;;  %v7551_v11 = vadd.f32 %v7550_v59, %v12970_v38  ;;  %v7623_v57 = vpop.f32.mrb[206].mxu1  ;;  %8423 = vmatprep.subr.bf16.mxu1 %v13204_v1  ;;  %v7552_v4 = vpop.f32.mrb[207].mxu0  ;;  %8351 = vmatpush1.bf16.msra.mxu0 %v13198_v31  ;;  %v7878_v12 = vmax.f32 %v7547_v49, 0.0  ;;  %v13797_v49 = vmov 0  }
 0x878   : > { %v7624_v7 = vadd.f32 %v7623_v57, %v12970_v38  ;;  %v7553_v15 = vadd.f32 %v7552_v4, %v12970_v38  ;;  %v7625_v20 = vpop.f32.mrb[207].mxu1  ;;  %8424 = vmatpush1.bf16.msra.mxu1 %v13200_v24  ;;  %v7880_v39 = vmax.f32 %v7620_v17, 0.0  ;;  %v7879_v14 = vmax.f32 %v7549_v44, 0.0 }
 0x879   : > { %v7894_v26 = vmax.f32 %v7551_v11, 0.0  ;;  %v7626_v55 = vadd.f32 %v7625_v20, %v12970_v38  ;;  %v7881_v37 = vmax.f32 %v7622_v25, 0.0 }
 0x87a   : > { %v7896_v48 = vmax.f32 %v7624_v7, 0.0  ;;  %v7895_v0 = vmax.f32 %v7553_v15, 0.0 }
 0x87b   : > { %v13218_v59 = vpack.c.bf16 %v7894_v26, %v7878_v12  ;;  %v7897_v1 = vmax.f32 %v7626_v55, 0.0 }
 0x87c   : > { %v13220_v31 = vpack.c.bf16 %v7896_v48, %v7880_v39  ;;  %v13222_v57 = vpack.c.bf16 %v7895_v0, %v7879_v14 }
 0x87d   : > { %13793 = vst [vmem:[#allocation17_spill] sm:$0xff] %v13218_v59  ;;  %v13224_v4 = vpack.c.bf16 %v7897_v1, %v7881_v37 }
 0x87e   : > { %13794 = vst [vmem:[#allocation18_spill] sm:$0xff] %v13220_v31  ;;  %13795 = vst [vmem:[#allocation19_spill] sm:$0xff] %v13222_v57  ;;  %8352 = vmatprep.subr.bf16.mxu0 %v13222_v57 }
 0x87f   : > { %13796 = vst [vmem:[#allocation20_spill] sm:$0xff] %v13224_v4  ;;  %8425 = vmatprep.subr.bf16.mxu1 %v13224_v4  ;;  %8353 = vmatpush1.bf16.msra.mxu0 %v13218_v59 }
 0x880   : > { %8426 = vmatpush1.bf16.msra.mxu1 %v13220_v31 }
 0x882   : > { %10155 = vmatmul.mubr.msk.bf16.vlgmr.msra.gmra.mrb[16].mxu0 %vm1865_vm2, %v13005_v62 }
 0x883   : > { %10159 = vmatmul.mubr.msk.bf16.vlgmr.msra.gmra.mrb[16].mxu1 %vm1865_vm2, %v13005_v62  ;;  %8388 = vmatprep.mubr.bf16.mxu0 %v13797_v49 }
 0x884   : > { %8461 = vmatprep.mubr.bf16.mxu1 %v13797_v49 }
 0x88a   : > { %10156 = vmatmul.mubr.msk.bf16.gmra.mrb[20].mxu0 %vm1865_vm2, %v13036_v61 }
 0x88b   : > { %10160 = vmatmul.mubr.msk.bf16.gmra.mrb[20].mxu1 %vm1865_vm2, %v13036_v61  ;;  %8398 = vmatprep.mubr.bf16.mxu0 %v13797_v49 }
 0x88c   : > { %8471 = vmatprep.mubr.bf16.mxu1 %v13797_v49 }
 0x892   : > { %10157 = vmatmul.mubr.msk.bf16.gmra.mrb[24].mxu0 %vm1865_vm2, %v13067_v50 }
 0x893   : > { %10161 = vmatmul.mubr.msk.bf16.gmra.mrb[24].mxu1 %vm1865_vm2, %v13067_v50  ;;  %8408 = vmatprep.mubr.bf16.mxu0 %v13797_v49 }
 0x894   : > { %8481 = vmatprep.mubr.bf16.mxu1 %v13797_v49 }
 0x89a   : > { %10158 = vmatmul.mubr.msk.bf16.gmra.mrb[28].mxu0 %vm1865_vm2, %v13098_v51 }
 0x89b   : > { %10162 = vmatmul.mubr.msk.bf16.gmra.mrb[28].mxu1 %vm1865_vm2, %v13098_v51  ;;  %8524 = vmatprep.mubr.bf16.mxu0 %v13797_v49 }
 0x89c   : > { %8597 = vmatprep.mubr.bf16.mxu1 %v13797_v49 }
 0x8ac   : > { %v7662_v1 = vpop.f32.mrb[208].mxu0 }
 0x8ad   : > { %v7663_v17 = vadd.f32 %v7662_v1, %v12906_v32  ;;  %v7735_v44 = vpop.f32.mrb[208].mxu1  ;;  %v7664_v25 = vpop.f32.mrb[209].mxu0 }
 0x8ae   : > { %v7736_v11 = vadd.f32 %v7735_v44, %v12906_v32  ;;  %v7665_v7 = vadd.f32 %v7664_v25, %v12906_v32  ;;  %v7737_v15 = vpop.f32.mrb[209].mxu1  ;;  %v7666_v20 = vpop.f32.mrb[210].mxu0 }
 0x8af   : > { %v7738_v12 = vadd.f32 %v7737_v15, %v12906_v32  ;;  %v7667_v26 = vadd.f32 %v7666_v20, %v12908_v63  ;;  %v7739_v55 = vpop.f32.mrb[210].mxu1  ;;  %v7668_v39 = vpop.f32.mrb[211].mxu0  ;;  %v7786_v37 = vmax.f32 %v7663_v17, 0.0 }
 0x8b0   : > { %v7740_v14 = vadd.f32 %v7739_v55, %v12908_v63  ;;  %v7669_v48 = vadd.f32 %v7668_v39, %v12908_v63  ;;  %v7741_v0 = vpop.f32.mrb[211].mxu1  ;;  %v7788_v44 = vmax.f32 %v7736_v11, 0.0  ;;  %v7787_v59 = vmax.f32 %v7665_v7, 0.0 }
 0x8b1   : > { %v7802_v1 = vmax.f32 %v7667_v26, 0.0  ;;  %v7742_v31 = vadd.f32 %v7741_v0, %v12908_v63  ;;  %v7789_v57 = vmax.f32 %v7738_v12, 0.0 }
 0x8b2   : > { %v7804_v25 = vmax.f32 %v7740_v14, 0.0  ;;  %v7803_v4 = vmax.f32 %v7669_v48, 0.0 }
 0x8b3   : > { %v13262_v24 = vpack.c.bf16 %v7802_v1, %v7786_v37  ;;  %v7805_v32 = vmax.f32 %v7742_v31, 0.0 }
 0x8b4   : > { %v13264_v15 = vpack.c.bf16 %v7804_v25, %v7788_v44  ;;  %v13266_v20 = vpack.c.bf16 %v7803_v4, %v7787_v59  ;;  %v7672_v55 = vpop.f32.mrb[212].mxu0 }
 0x8b5   : > { %13798 = vst [vmem:[#allocation21_spill] sm:$0xff] %v13262_v24  ;;  %v13268_v8 = vpack.c.bf16 %v7805_v32, %v7789_v57  ;;  %v7673_v17 = vadd.f32 %v7672_v55, %v12918_v46  ;;  %v7745_v26 = vpop.f32.mrb[212].mxu1  ;;  %v7674_v39 = vpop.f32.mrb[213].mxu0 }
 0x8b6   : > { %13799 = vst [vmem:[#allocation22_spill] sm:$0xff] %v13264_v15  ;;  %v7746_v63 = vadd.f32 %v7745_v26, %v12918_v46  ;;  %v7675_v11 = vadd.f32 %v7674_v39, %v12918_v46  ;;  %v7747_v7 = vpop.f32.mrb[213].mxu1  ;;  %v7676_v12 = vpop.f32.mrb[214].mxu0  ;;  %8492 = vmatprep.subr.bf16.mxu0 %v13266_v20 }
 0x8b7   : > { %v7748_v31 = vadd.f32 %v7747_v7, %v12918_v46  ;;  %v7677_v59 = vadd.f32 %v7676_v12, %v12922_v47  ;;  %v7749_v4 = vpop.f32.mrb[214].mxu1  ;;  %8565 = vmatprep.subr.bf16.mxu1 %v13268_v8  ;;  %v7678_v57 = vpop.f32.mrb[215].mxu0  ;;  %8493 = vmatpush1.bf16.msra.mxu0 %v13262_v24  ;;  %v7818_v37 = vmax.f32 %v7673_v17, 0.0 }
 0x8b8   : > { %v7750_v14 = vadd.f32 %v7749_v4, %v12922_v47  ;;  %v7679_v48 = vadd.f32 %v7678_v57, %v12922_v47  ;;  %v7751_v0 = vpop.f32.mrb[215].mxu1  ;;  %8566 = vmatpush1.bf16.msra.mxu1 %v13264_v15  ;;  %v7820_v46 = vmax.f32 %v7746_v63, 0.0  ;;  %v7819_v25 = vmax.f32 %v7675_v11, 0.0 }
 0x8b9   : > { %v7834_v1 = vmax.f32 %v7677_v59, 0.0  ;;  %v7752_v44 = vadd.f32 %v7751_v0, %v12922_v47  ;;  %v7821_v26 = vmax.f32 %v7748_v31, 0.0 }
 0x8ba   : > { %v7836_v32 = vmax.f32 %v7750_v14, 0.0  ;;  %v7835_v55 = vmax.f32 %v7679_v48, 0.0 }
 0x8bb   : > { %v13282_v39 = vpack.c.bf16 %v7834_v1, %v7818_v37  ;;  %v7837_v7 = vmax.f32 %v7752_v44, 0.0 }
 0x8bc   : > { %v13284_v12 = vpack.c.bf16 %v7836_v32, %v7820_v46  ;;  %v13286_v4 = vpack.c.bf16 %v7835_v55, %v7819_v25  ;;  %v7682_v57 = vpop.f32.mrb[216].mxu0 }
 0x8bd   : > { %13800 = vst [vmem:[#allocation23_spill] sm:$0xff] %v13282_v39  ;;  %v13288_v24 = vpack.c.bf16 %v7837_v7, %v7821_v26  ;;  %v7683_v17 = vadd.f32 %v7682_v57, %v12942_v5  ;;  %v7755_v59 = vpop.f32.mrb[216].mxu1  ;;  %v7684_v15 = vpop.f32.mrb[217].mxu0 }
 0x8be   : > { %13801 = vst [vmem:[#allocation24_spill] sm:$0xff] %v13284_v12  ;;  %v7756_v47 = vadd.f32 %v7755_v59, %v12942_v5  ;;  %v7685_v63 = vadd.f32 %v7684_v15, %v12942_v5  ;;  %v7757_v11 = vpop.f32.mrb[217].mxu1  ;;  %v7686_v31 = vpop.f32.mrb[218].mxu0  ;;  %8494 = vmatprep.subr.bf16.mxu0 %v13286_v4 }
 0x8bf   : > { %13802 = vst [vmem:[#allocation25_spill] sm:$0xff] %v13288_v24  ;;  %v7758_v14 = vadd.f32 %v7757_v11, %v12942_v5  ;;  %v7687_v48 = vadd.f32 %v7686_v31, %v12946_v23  ;;  %v7759_v0 = vpop.f32.mrb[218].mxu1  ;;  %8567 = vmatprep.subr.bf16.mxu1 %v13288_v24  ;;  %v7688_v37 = vpop.f32.mrb[219].mxu0  ;;  %8495 = vmatpush1.bf16.msra.mxu0 %v13282_v39  ;;  %v7850_v15 = vmax.f32 %v7683_v17, 0.0 }
 0x8c0   : > { %v7760_v1 = vadd.f32 %v7759_v0, %v12946_v23  ;;  %v7689_v44 = vadd.f32 %v7688_v37, %v12946_v23  ;;  %v7761_v46 = vpop.f32.mrb[219].mxu1  ;;  %8568 = vmatpush1.bf16.msra.mxu1 %v13284_v12  ;;  %v7852_v5 = vmax.f32 %v7756_v47, 0.0  ;;  %v7851_v55 = vmax.f32 %v7685_v63, 0.0 }
 0x8c1   : > { %v7866_v25 = vmax.f32 %v7687_v48, 0.0  ;;  %v7762_v32 = vadd.f32 %v7761_v46, %v12946_v23  ;;  %v7853_v57 = vmax.f32 %v7758_v14, 0.0 }
 0x8c2   : > { %v7868_v26 = vmax.f32 %v7760_v1, 0.0  ;;  %v7867_v7 = vmax.f32 %v7689_v44, 0.0 }
 0x8c3   : > { %v13302_v59 = vpack.c.bf16 %v7866_v25, %v7850_v15  ;;  %v7869_v11 = vmax.f32 %v7762_v32, 0.0 }
 0x8c4   : > { %v13304_v31 = vpack.c.bf16 %v7868_v26, %v7852_v5  ;;  %v13306_v0 = vpack.c.bf16 %v7867_v7, %v7851_v55  ;;  %v7692_v37 = vpop.f32.mrb[220].mxu0 }
 0x8c5   : > { %13803 = vst [vmem:[#allocation26_spill] sm:$0xff] %v13302_v59  ;;  %v13308_v39 = vpack.c.bf16 %v7869_v11, %v7853_v57  ;;  %v7693_v17 = vadd.f32 %v7692_v37, %v12966_v10  ;;  %v7765_v48 = vpop.f32.mrb[220].mxu1  ;;  %v7694_v12 = vpop.f32.mrb[221].mxu0 }
 0x8c6   : > { %13804 = vst [vmem:[#allocation27_spill] sm:$0xff] %v13304_v31  ;;  %13805 = vst [vmem:[#allocation28_spill] sm:$0xff] %v13306_v0  ;;  %v7766_v23 = vadd.f32 %v7765_v48, %v12966_v10  ;;  %v7695_v47 = vadd.f32 %v7694_v12, %v12966_v10  ;;  %v7767_v63 = vpop.f32.mrb[221].mxu1  ;;  %v7696_v14 = vpop.f32.mrb[222].mxu0  ;;  %8496 = vmatprep.subr.bf16.mxu0 %v13306_v0 }
 0x8c7   : > { %13806 = vst [vmem:[#allocation29_spill] sm:$0xff] %v13308_v39  ;;  %v7768_v1 = vadd.f32 %v7767_v63, %v12966_v10  ;;  %v7697_v44 = vadd.f32 %v7696_v14, %v12970_v38  ;;  %v7769_v46 = vpop.f32.mrb[222].mxu1  ;;  %8569 = vmatprep.subr.bf16.mxu1 %v13308_v39  ;;  %v7698_v15 = vpop.f32.mrb[223].mxu0  ;;  %8497 = vmatpush1.bf16.msra.mxu0 %v13302_v59  ;;  %v7882_v12 = vmax.f32 %v7693_v17, 0.0 }
 0x8c8   : > { %v7770_v25 = vadd.f32 %v7769_v46, %v12970_v38  ;;  %v7699_v32 = vadd.f32 %v7698_v15, %v12970_v38  ;;  %v7771_v5 = vpop.f32.mrb[223].mxu1  ;;  %8570 = vmatpush1.bf16.msra.mxu1 %v13304_v31  ;;  %v7884_v10 = vmax.f32 %v7766_v23, 0.0  ;;  %v7883_v7 = vmax.f32 %v7695_v47, 0.0 }
 0x8c9   : > { %v7898_v55 = vmax.f32 %v7697_v44, 0.0  ;;  %v7772_v26 = vadd.f32 %v7771_v5, %v12970_v38  ;;  %v7885_v37 = vmax.f32 %v7768_v1, 0.0  ;;  %v13358_v38 = vpop.permute.xlu0 %7984 }
 0x8ca   : > { %v7900_v57 = vmax.f32 %v7770_v25, 0.0  ;;  %v7899_v11 = vmax.f32 %v7699_v32, 0.0 }
 0x8cb   : > { %v13322_v48 = vpack.c.bf16 %v7898_v55, %v7882_v12  ;;  %v7901_v63 = vmax.f32 %v7772_v26, 0.0 }
 0x8cc   : > { %v13324_v14 = vpack.c.bf16 %v7900_v57, %v7884_v10  ;;  %v13326_v46 = vpack.c.bf16 %v7899_v11, %v7883_v7 }
 0x8cd   : > { %13807 = vst [vmem:[#allocation30_spill] sm:$0xff] %v13322_v48  ;;  %v13328_v15 = vpack.c.bf16 %v7901_v63, %v7885_v37  ;;  %v13370_v63 = vpop.permute.xlu0 %7994 }
 0x8ce   : > { %13808 = vst [vmem:[#allocation31_spill] sm:$0xff] %v13324_v14  ;;  %13809 = vst [vmem:[#allocation32_spill] sm:$0xff] %v13326_v46  ;;  %8498 = vmatprep.subr.bf16.mxu0 %v13326_v46 }
 0x8cf   : > { %13810 = vst [vmem:[#allocation33_spill] sm:$0xff] %v13328_v15  ;;  %8571 = vmatprep.subr.bf16.mxu1 %v13328_v15  ;;  %8499 = vmatpush1.bf16.msra.mxu0 %v13322_v48 }
 0x8d0   : > { %8572 = vmatpush1.bf16.msra.mxu1 %v13324_v14 }
 0x8d2   : > { %10163 = vmatmul.mubr.msk.bf16.vlgmr.msra.gmra.mrb[56].mxu0 %vm1865_vm2, %v13005_v62 }
 0x8d3   : > { %10167 = vmatmul.mubr.msk.bf16.vlgmr.msra.gmra.mrb[56].mxu1 %vm1865_vm2, %v13005_v62  ;;  %8534 = vmatprep.mubr.bf16.mxu0 %v13797_v49  ;;  %v13360_v62 = vpop.permute.xlu1 %7989 }
 0x8d4   : > { %8607 = vmatprep.mubr.bf16.mxu1 %v13797_v49 }
 0x8da   : > { %10164 = vmatmul.mubr.msk.bf16.gmra.mrb[60].mxu0 %vm1865_vm2, %v13036_v61 }
 0x8db   : > { %10168 = vmatmul.mubr.msk.bf16.gmra.mrb[60].mxu1 %vm1865_vm2, %v13036_v61  ;;  %8544 = vmatprep.mubr.bf16.mxu0 %v13797_v49 }
 0x8dc   : > { %8617 = vmatprep.mubr.bf16.mxu1 %v13797_v49 }
 0x8e2   : > { %10165 = vmatmul.mubr.msk.bf16.gmra.mrb[64].mxu0 %vm1865_vm2, %v13067_v50 }
 0x8e3   : > { %10169 = vmatmul.mubr.msk.bf16.gmra.mrb[64].mxu1 %vm1865_vm2, %v13067_v50  ;;  %8554 = vmatprep.mubr.bf16.mxu0 %v13797_v49 }
 0x8e4   : > { %8627 = vmatprep.mubr.bf16.mxu1 %v13797_v49 }
 0x8ea   : > { %10166 = vmatmul.mubr.msk.bf16.gmra.mrb[68].mxu0 %vm1865_vm2, %v13098_v51 }
 0x8eb   : > { %10170 = vmatmul.mubr.msk.bf16.gmra.mrb[68].mxu1 %vm1865_vm2, %v13098_v51  ;;  %8754 = vmatprep.mubr.bf16.mxu0 %v13797_v49 }
 0x8ec   : > { %8807 = vmatprep.mubr.bf16.mxu1 %v13797_v49 }
 0x8fc   : > { %v8088_v61 = vpop.f32.mrb[224].mxu0 }
 0x8fd   : > { %v8161_v50 = vpop.f32.mrb[224].mxu1  ;;  %v8090_v17 = vpop.f32.mrb[225].mxu0  ;;  %v8089_v1 = vadd.f32 %v8088_v61, %v13358_v38 }
 0x8fe   : > { %v8163_v23 = vpop.f32.mrb[225].mxu1  ;;  %v8092_v47 = vpop.f32.mrb[226].mxu0  ;;  %v8162_v51 = vadd.f32 %v8161_v50, %v13358_v38  ;;  %v8091_v5 = vadd.f32 %v8090_v17, %v13358_v38 }
 0x8ff   : > { %v8093_v44 = vadd.f32 %v8092_v47, %v13360_v62  ;;  %v8165_v25 = vpop.f32.mrb[226].mxu1  ;;  %v8094_v32 = vpop.f32.mrb[227].mxu0  ;;  %v8164_v10 = vadd.f32 %v8163_v23, %v13358_v38 }
 0x900   : > { %v8166_v12 = vadd.f32 %v8165_v25, %v13360_v62  ;;  %v8095_v55 = vadd.f32 %v8094_v32, %v13360_v62  ;;  %v8167_v26 = vpop.f32.mrb[227].mxu1  ;;  %v13372_v47 = vpop.permute.xlu1 %7999 }
 0x901   : > { %v8638_v7 = vpack.c.bf16 %v8093_v44, %v8089_v1  ;;  %v8168_v57 = vadd.f32 %v8167_v26, %v13360_v62 }
 0x902   : > { %v8640_v11 = vpack.c.bf16 %v8166_v12, %v8162_v51  ;;  %v8639_v37 = vpack.c.bf16 %v8095_v55, %v8091_v5 }
 0x903   : > { %v8641_v61 = vpack.c.bf16 %v8168_v57, %v8164_v10 }
 0x904   : > { %v8098_v50 = vpop.f32.mrb[228].mxu0  ;;  %8722 = vmatprep.subr.bf16.mxu0 %v8639_v37  ;;  %v13384_v48 = vpop.permute.xlu1 %8009 }
 0x905   : > { %v8171_v17 = vpop.f32.mrb[228].mxu1  ;;  %8775 = vmatprep.subr.bf16.mxu1 %v8641_v61  ;;  %v8100_v25 = vpop.f32.mrb[229].mxu0  ;;  %8723 = vmatpush1.bf16.msra.mxu0 %v8638_v7  ;;  %v8099_v23 = vadd.f32 %v8098_v50, %v13370_v63 }
 0x906   : > { %v8173_v32 = vpop.f32.mrb[229].mxu1  ;;  %8776 = vmatpush1.bf16.msra.mxu1 %v8640_v11  ;;  %v8102_v14 = vpop.f32.mrb[230].mxu0  ;;  %v8172_v5 = vadd.f32 %v8171_v17, %v13370_v63  ;;  %v8101_v12 = vadd.f32 %v8100_v25, %v13370_v63 }
 0x907   : > { %v8103_v1 = vadd.f32 %v8102_v14, %v13372_v47  ;;  %v8175_v44 = vpop.f32.mrb[230].mxu1  ;;  %v8104_v51 = vpop.f32.mrb[231].mxu0  ;;  %v8174_v7 = vadd.f32 %v8173_v32, %v13370_v63 }
 0x908   : > { %v8176_v55 = vadd.f32 %v8175_v44, %v13372_v47  ;;  %v8105_v26 = vadd.f32 %v8104_v51, %v13372_v47  ;;  %v8177_v10 = vpop.f32.mrb[231].mxu1  ;;  %v13382_v50 = vpop.permute.xlu0 %8004 }
 0x909   : > { %v8654_v57 = vpack.c.bf16 %v8103_v1, %v8099_v23  ;;  %v8178_v11 = vadd.f32 %v8177_v10, %v13372_v47  ;;  %v13396_v46 = vpop.permute.xlu1 %8019 }
 0x90a   : > { %v8656_v37 = vpack.c.bf16 %v8176_v55, %v8172_v5  ;;  %v8655_v61 = vpack.c.bf16 %v8105_v26, %v8101_v12 }
 0x90b   : > { %v8657_v14 = vpack.c.bf16 %v8178_v11, %v8174_v7 }
 0x90c   : > { %v8108_v17 = vpop.f32.mrb[232].mxu0  ;;  %8724 = vmatprep.subr.bf16.mxu0 %v8655_v61 }
 0x90d   : > { %v8181_v25 = vpop.f32.mrb[232].mxu1  ;;  %8777 = vmatprep.subr.bf16.mxu1 %v8657_v14  ;;  %v8110_v44 = vpop.f32.mrb[233].mxu0  ;;  %8725 = vmatpush1.bf16.msra.mxu0 %v8654_v57  ;;  %v8109_v32 = vadd.f32 %v8108_v17, %v13382_v50 }
 0x90e   : > { %v8183_v51 = vpop.f32.mrb[233].mxu1  ;;  %8778 = vmatpush1.bf16.msra.mxu1 %v8656_v37  ;;  %v8112_v15 = vpop.f32.mrb[234].mxu0  ;;  %v8182_v12 = vadd.f32 %v8181_v25, %v13382_v50  ;;  %v8111_v55 = vadd.f32 %v8110_v44, %v13382_v50 }
 0x90f   : > { %v8113_v23 = vadd.f32 %v8112_v15, %v13384_v48  ;;  %v8185_v1 = vpop.f32.mrb[234].mxu1  ;;  %v8114_v5 = vpop.f32.mrb[235].mxu0  ;;  %v8184_v57 = vadd.f32 %v8183_v51, %v13382_v50 }
 0x910   : > { %v8186_v26 = vadd.f32 %v8185_v1, %v13384_v48  ;;  %v8115_v10 = vadd.f32 %v8114_v5, %v13384_v48  ;;  %v8187_v7 = vpop.f32.mrb[235].mxu1  ;;  %v13394_v17 = vpop.permute.xlu0 %8014 }
 0x911   : > { %v8670_v11 = vpack.c.bf16 %v8113_v23, %v8109_v32  ;;  %v8188_v37 = vadd.f32 %v8187_v7, %v13384_v48 }
 0x912   : > { %v8672_v61 = vpack.c.bf16 %v8186_v26, %v8182_v12  ;;  %v8671_v14 = vpack.c.bf16 %v8115_v10, %v8111_v55 }
 0x913   : > { %v8673_v15 = vpack.c.bf16 %v8188_v37, %v8184_v57 }
 0x914   : > { %v8118_v25 = vpop.f32.mrb[236].mxu0  ;;  %8726 = vmatprep.subr.bf16.mxu0 %v8671_v14 }
 0x915   : > { %v8191_v44 = vpop.f32.mrb[236].mxu1  ;;  %8779 = vmatprep.subr.bf16.mxu1 %v8673_v15  ;;  %v8120_v1 = vpop.f32.mrb[237].mxu0  ;;  %8727 = vmatpush1.bf16.msra.mxu0 %v8670_v11  ;;  %v8119_v51 = vadd.f32 %v8118_v25, %v13394_v17 }
 0x916   : > { %v8193_v5 = vpop.f32.mrb[237].mxu1  ;;  %8780 = vmatpush1.bf16.msra.mxu1 %v8672_v61  ;;  %v8122_v31 = vpop.f32.mrb[238].mxu0  ;;  %v8192_v55 = vadd.f32 %v8191_v44, %v13394_v17  ;;  %v8121_v26 = vadd.f32 %v8120_v1, %v13394_v17  ;;  %v13409_v44 = vld [vmem:[%s13741_s1 + $0x150] sm:$0xff]  }
 0x917   : > { %v8123_v32 = vadd.f32 %v8122_v31, %v13396_v46  ;;  %v8195_v23 = vpop.f32.mrb[238].mxu1  ;;  %v8124_v12 = vpop.f32.mrb[239].mxu0  ;;  %v8194_v11 = vadd.f32 %v8193_v5, %v13394_v17 }
 0x918   : > { %v8196_v10 = vadd.f32 %v8195_v23, %v13396_v46  ;;  %v8125_v7 = vadd.f32 %v8124_v12, %v13396_v46  ;;  %v8197_v57 = vpop.f32.mrb[239].mxu1 }
 0x919   : > { %v8686_v37 = vpack.c.bf16 %v8123_v32, %v8119_v51  ;;  %v8198_v61 = vadd.f32 %v8197_v57, %v13396_v46 }
 0x91a   : > { %v8688_v14 = vpack.c.bf16 %v8196_v10, %v8192_v55  ;;  %v8687_v15 = vpack.c.bf16 %v8125_v7, %v8121_v26 }
 0x91b   : > { %v8689_v25 = vpack.c.bf16 %v8198_v61, %v8194_v11 }
 0x91c   : > { %v8234_v31 = vpop.f32.mrb[240].mxu0  ;;  %8728 = vmatprep.subr.bf16.mxu0 %v8687_v15 }
 0x91d   : > { %v8307_v1 = vpop.f32.mrb[240].mxu1  ;;  %8781 = vmatprep.subr.bf16.mxu1 %v8689_v25  ;;  %v8236_v23 = vpop.f32.mrb[241].mxu0  ;;  %8729 = vmatpush1.bf16.msra.mxu0 %v8686_v37  ;;  %v8235_v51 = vadd.f32 %v8234_v31, %v13358_v38 }
 0x91e   : > { %v8309_v12 = vpop.f32.mrb[241].mxu1  ;;  %8782 = vmatpush1.bf16.msra.mxu1 %v8688_v14  ;;  %v8238_v5 = vpop.f32.mrb[242].mxu0  ;;  %v8308_v10 = vadd.f32 %v8307_v1, %v13358_v38  ;;  %v8237_v7 = vadd.f32 %v8236_v23, %v13358_v38 }
 0x91f   : > { %v8239_v32 = vadd.f32 %v8238_v5, %v13360_v62  ;;  %v8311_v55 = vpop.f32.mrb[242].mxu1  ;;  %v8240_v26 = vpop.f32.mrb[243].mxu0  ;;  %v8310_v37 = vadd.f32 %v8309_v12, %v13358_v38  ;;  %v13428_v5 = vld [vmem:[%s13741_s1 + $0x158] sm:$0xff]  }
 0x920   : > { %v8312_v57 = vadd.f32 %v8311_v55, %v13360_v62  ;;  %v8241_v11 = vadd.f32 %v8240_v26, %v13360_v62  ;;  %v8313_v61 = vpop.f32.mrb[243].mxu1  ;;  %10173 = vmatmul.mubr.msk.bf16.vlgmr.msra.gmra.mrb[32].mxu0 %vm1865_vm2, %v13409_v44 }
 0x921   : > { %v8642_v14 = vpack.c.bf16 %v8239_v32, %v8235_v51  ;;  %v8314_v15 = vadd.f32 %v8313_v61, %v13360_v62  ;;  %10175 = vmatmul.mubr.msk.bf16.vlgmr.msra.gmra.mrb[32].mxu1 %vm1865_vm2, %v13409_v44  ;;  %8764 = vmatprep.mubr.bf16.mxu0 %v13797_v49 }
 0x922   : > { %v8644_v25 = vpack.c.bf16 %v8312_v57, %v8308_v10  ;;  %v8643_v31 = vpack.c.bf16 %v8241_v11, %v8237_v7  ;;  %8817 = vmatprep.mubr.bf16.mxu1 %v13797_v49 }
 0x923   : > { %v8645_v1 = vpack.c.bf16 %v8314_v15, %v8310_v37 }
 0x924   : > { %v8244_v23 = vpop.f32.mrb[244].mxu0  ;;  %8828 = vmatprep.subr.bf16.mxu0 %v8643_v31 }
 0x925   : > { %v8317_v12 = vpop.f32.mrb[244].mxu1  ;;  %8881 = vmatprep.subr.bf16.mxu1 %v8645_v1  ;;  %v8246_v51 = vpop.f32.mrb[245].mxu0  ;;  %8829 = vmatpush1.bf16.msra.mxu0 %v8642_v14  ;;  %v8245_v26 = vadd.f32 %v8244_v23, %v13370_v63 }
 0x926   : > { %v8319_v32 = vpop.f32.mrb[245].mxu1  ;;  %8882 = vmatpush1.bf16.msra.mxu1 %v8644_v25  ;;  %v8248_v55 = vpop.f32.mrb[246].mxu0  ;;  %v8318_v11 = vadd.f32 %v8317_v12, %v13370_v63  ;;  %v8247_v61 = vadd.f32 %v8246_v51, %v13370_v63 }
 0x927   : > { %v8249_v10 = vadd.f32 %v8248_v55, %v13372_v47  ;;  %v8321_v7 = vpop.f32.mrb[246].mxu1  ;;  %v8250_v57 = vpop.f32.mrb[247].mxu0  ;;  %v8320_v14 = vadd.f32 %v8319_v32, %v13370_v63 }
 0x928   : > { %v8322_v37 = vadd.f32 %v8321_v7, %v13372_v47  ;;  %v8251_v15 = vadd.f32 %v8250_v57, %v13372_v47  ;;  %v8323_v31 = vpop.f32.mrb[247].mxu1  ;;  %10174 = vmatmul.mubr.msk.bf16.gmra.mrb[36].mxu0 %vm1865_vm2, %v13428_v5 }
 0x929   : > { %v8658_v25 = vpack.c.bf16 %v8249_v10, %v8245_v26  ;;  %v8324_v1 = vadd.f32 %v8323_v31, %v13372_v47  ;;  %10176 = vmatmul.mubr.msk.bf16.gmra.mrb[36].mxu1 %vm1865_vm2, %v13428_v5  ;;  %8860 = vmatprep.mubr.bf16.mxu0 %v13797_v49 }
 0x92a   : > { %v8660_v23 = vpack.c.bf16 %v8322_v37, %v8318_v11  ;;  %v8659_v12 = vpack.c.bf16 %v8251_v15, %v8247_v61  ;;  %8913 = vmatprep.mubr.bf16.mxu1 %v13797_v49 }
 0x92b   : > { %v8661_v51 = vpack.c.bf16 %v8324_v1, %v8320_v14 }
 0x92c   : > { %v8254_v55 = vpop.f32.mrb[248].mxu0  ;;  %8830 = vmatprep.subr.bf16.mxu0 %v8659_v12 }
 0x92d   : > { %v8327_v7 = vpop.f32.mrb[248].mxu1  ;;  %8883 = vmatprep.subr.bf16.mxu1 %v8661_v51  ;;  %v8256_v57 = vpop.f32.mrb[249].mxu0  ;;  %8831 = vmatpush1.bf16.msra.mxu0 %v8658_v25  ;;  %v8255_v10 = vadd.f32 %v8254_v55, %v13382_v50 }
 0x92e   : > { %v8329_v32 = vpop.f32.mrb[249].mxu1  ;;  %8884 = vmatpush1.bf16.msra.mxu1 %v8660_v23  ;;  %v8258_v26 = vpop.f32.mrb[250].mxu0  ;;  %v8328_v11 = vadd.f32 %v8327_v7, %v13382_v50  ;;  %v8257_v61 = vadd.f32 %v8256_v57, %v13382_v50 }
 0x92f   : > { %v8259_v31 = vadd.f32 %v8258_v26, %v13384_v48  ;;  %v8331_v59 = vpop.f32.mrb[250].mxu1  ;;  %v8260_v39 = vpop.f32.mrb[251].mxu0  ;;  %v8330_v25 = vadd.f32 %v8329_v32, %v13382_v50 }
 0x930   : > { %v8332_v37 = vadd.f32 %v8331_v59, %v13384_v48  ;;  %v8261_v15 = vadd.f32 %v8260_v39, %v13384_v48  ;;  %v8333_v14 = vpop.f32.mrb[251].mxu1 }
 0x931   : > { %v8674_v1 = vpack.c.bf16 %v8259_v31, %v8255_v10  ;;  %v8334_v23 = vadd.f32 %v8333_v14, %v13384_v48 }
 0x932   : > { %v8676_v12 = vpack.c.bf16 %v8332_v37, %v8328_v11  ;;  %v8675_v51 = vpack.c.bf16 %v8261_v15, %v8257_v61 }
 0x933   : > { %v8677_v55 = vpack.c.bf16 %v8334_v23, %v8330_v25 }
 0x934   : > { %v8264_v26 = vpop.f32.mrb[252].mxu0  ;;  %8832 = vmatprep.subr.bf16.mxu0 %v8675_v51 }
 0x935   : > { %v8337_v0 = vpop.f32.mrb[252].mxu1  ;;  %8885 = vmatprep.subr.bf16.mxu1 %v8677_v55  ;;  %v8266_v7 = vpop.f32.mrb[253].mxu0  ;;  %8833 = vmatpush1.bf16.msra.mxu0 %v8674_v1  ;;  %v8265_v39 = vadd.f32 %v8264_v26, %v13394_v17 }
 0x936   : > { %v8339_v57 = vpop.f32.mrb[253].mxu1  ;;  %8886 = vmatpush1.bf16.msra.mxu1 %v8676_v12  ;;  %v8268_v59 = vpop.f32.mrb[254].mxu0  ;;  %v8338_v31 = vadd.f32 %v8337_v0, %v13394_v17  ;;  %v8267_v11 = vadd.f32 %v8266_v7, %v13394_v17 }
 0x937   : > { %v8269_v24 = vadd.f32 %v8268_v59, %v13396_v46  ;;  %v8341_v32 = vpop.f32.mrb[254].mxu1  ;;  %v8270_v10 = vpop.f32.mrb[255].mxu0  ;;  %v8340_v14 = vadd.f32 %v8339_v57, %v13394_v17 }
 0x938   : > { %v8342_v61 = vadd.f32 %v8341_v32, %v13396_v46  ;;  %v8271_v37 = vadd.f32 %v8270_v10, %v13396_v46  ;;  %v8343_v15 = vpop.f32.mrb[255].mxu1 }
 0x939   : > { %v8690_v25 = vpack.c.bf16 %v8269_v24, %v8265_v39  ;;  %v8344_v1 = vadd.f32 %v8343_v15, %v13396_v46 }
 0x93a   : > { %v8692_v23 = vpack.c.bf16 %v8342_v61, %v8338_v31  ;;  %v8691_v12 = vpack.c.bf16 %v8271_v37, %v8267_v11 }
 0x93b   : > { %v8693_v51 = vpack.c.bf16 %v8344_v1, %v8340_v14 }
 0x93c   : > { %8834 = vmatprep.subr.bf16.mxu0 %v8691_v12 }
 0x93d   : > { %8887 = vmatprep.subr.bf16.mxu1 %v8693_v51  ;;  %8835 = vmatpush1.bf16.msra.mxu0 %v8690_v25 }
 0x93e   : > { %8888 = vmatpush1.bf16.msra.mxu1 %v8692_v23 }
 0x940   : > { %10177 = vmatmul.mubr.msk.bf16.vlgmr.msra.gmra.mrb[72].mxu0 %vm1865_vm2, %v13409_v44 }
 0x941   : > { %10179 = vmatmul.mubr.msk.bf16.vlgmr.msra.gmra.mrb[72].mxu1 %vm1865_vm2, %v13409_v44  ;;  %8870 = vmatprep.mubr.bf16.mxu0 %v13797_v49 }
 0x942   : > { %8923 = vmatprep.mubr.bf16.mxu1 %v13797_v49 }
 0x948   : > { %10178 = vmatmul.mubr.msk.bf16.gmra.mrb[76].mxu0 %vm1865_vm2, %v13428_v5 }
 0x949   : > { %10180 = vmatmul.mubr.msk.bf16.gmra.mrb[76].mxu1 %vm1865_vm2, %v13428_v5  ;;  %8966 = vmatprep.mubr.bf16.mxu0 %v13797_v49 }
 0x94a   : > { %9019 = vmatprep.mubr.bf16.mxu1 %v13797_v49 }
 0x955   : > { %v8380_v24 = vpop.f32.mrb[16].mxu0 }
 0x956   : > { %v8453_v0 = vpop.f32.mrb[16].mxu1  ;;  %v8382_v55 = vpop.f32.mrb[17].mxu0  ;;  %v8381_v57 = vadd.f32 %v8380_v24, %v13358_v38 }
 0x957   : > { %v8455_v26 = vpop.f32.mrb[17].mxu1  ;;  %v8384_v7 = vpop.f32.mrb[18].mxu0  ;;  %v8454_v10 = vadd.f32 %v8453_v0, %v13358_v38  ;;  %v8383_v31 = vadd.f32 %v8382_v55, %v13358_v38 }
 0x958   : > { %v8385_v59 = vadd.f32 %v8384_v7, %v13360_v62  ;;  %v8457_v39 = vpop.f32.mrb[18].mxu1  ;;  %v8386_v32 = vpop.f32.mrb[19].mxu0  ;;  %v8456_v15 = vadd.f32 %v8455_v26, %v13358_v38 }
 0x959   : > { %v8458_v11 = vadd.f32 %v8457_v39, %v13360_v62  ;;  %v8387_v61 = vadd.f32 %v8386_v32, %v13360_v62  ;;  %v8459_v37 = vpop.f32.mrb[19].mxu1 }
 0x95a   : > { %v8646_v14 = vpack.c.bf16 %v8385_v59, %v8381_v57  ;;  %v8460_v25 = vadd.f32 %v8459_v37, %v13360_v62 }
 0x95b   : > { %v8648_v1 = vpack.c.bf16 %v8458_v11, %v8454_v10  ;;  %v8647_v23 = vpack.c.bf16 %v8387_v61, %v8383_v31 }
 0x95c   : > { %v8649_v12 = vpack.c.bf16 %v8460_v25, %v8456_v15 }
 0x95d   : > { %v8390_v51 = vpop.f32.mrb[20].mxu0  ;;  %8934 = vmatprep.subr.bf16.mxu0 %v8647_v23 }
 0x95e   : > { %v8463_v24 = vpop.f32.mrb[20].mxu1  ;;  %8987 = vmatprep.subr.bf16.mxu1 %v8649_v12  ;;  %v8392_v0 = vpop.f32.mrb[21].mxu0  ;;  %8935 = vmatpush1.bf16.msra.mxu0 %v8646_v14  ;;  %v8391_v39 = vadd.f32 %v8390_v51, %v13370_v63 }
 0x95f   : > { %v8465_v55 = vpop.f32.mrb[21].mxu1  ;;  %8988 = vmatpush1.bf16.msra.mxu1 %v8648_v1  ;;  %v8394_v7 = vpop.f32.mrb[22].mxu0  ;;  %v8464_v59 = vadd.f32 %v8463_v24, %v13370_v63  ;;  %v8393_v10 = vadd.f32 %v8392_v0, %v13370_v63 }
 0x960   : > { %v8395_v32 = vadd.f32 %v8394_v7, %v13372_v47  ;;  %v8467_v26 = vpop.f32.mrb[22].mxu1  ;;  %v8396_v57 = vpop.f32.mrb[23].mxu0  ;;  %v8466_v37 = vadd.f32 %v8465_v55, %v13370_v63 }
 0x961   : > { %v8468_v31 = vadd.f32 %v8467_v26, %v13372_v47  ;;  %v8397_v11 = vadd.f32 %v8396_v57, %v13372_v47  ;;  %v8469_v61 = vpop.f32.mrb[23].mxu1 }
 0x962   : > { %v8662_v15 = vpack.c.bf16 %v8395_v32, %v8391_v39  ;;  %v8470_v14 = vadd.f32 %v8469_v61, %v13372_v47 }
 0x963   : > { %v8664_v25 = vpack.c.bf16 %v8468_v31, %v8464_v59  ;;  %v8663_v1 = vpack.c.bf16 %v8397_v11, %v8393_v10 }
 0x964   : > { %v8665_v23 = vpack.c.bf16 %v8470_v14, %v8466_v37 }
 0x965   : > { %v8400_v12 = vpop.f32.mrb[24].mxu0  ;;  %8936 = vmatprep.subr.bf16.mxu0 %v8663_v1 }
 0x966   : > { %v8473_v51 = vpop.f32.mrb[24].mxu1  ;;  %8989 = vmatprep.subr.bf16.mxu1 %v8665_v23  ;;  %v8402_v24 = vpop.f32.mrb[25].mxu0  ;;  %8937 = vmatpush1.bf16.msra.mxu0 %v8662_v15  ;;  %v8401_v26 = vadd.f32 %v8400_v12, %v13382_v50 }
 0x967   : > { %v8475_v0 = vpop.f32.mrb[25].mxu1  ;;  %8990 = vmatpush1.bf16.msra.mxu1 %v8664_v25  ;;  %v8404_v7 = vpop.f32.mrb[26].mxu0  ;;  %v8474_v32 = vadd.f32 %v8473_v51, %v13382_v50  ;;  %v8403_v59 = vadd.f32 %v8402_v24, %v13382_v50 }
 0x968   : > { %v8405_v57 = vadd.f32 %v8404_v7, %v13384_v48  ;;  %v8477_v55 = vpop.f32.mrb[26].mxu1  ;;  %v8406_v39 = vpop.f32.mrb[27].mxu0  ;;  %v8476_v61 = vadd.f32 %v8475_v0, %v13382_v50 }
 0x969   : > { %v8478_v10 = vadd.f32 %v8477_v55, %v13384_v48  ;;  %v8407_v31 = vadd.f32 %v8406_v39, %v13384_v48  ;;  %v8479_v11 = vpop.f32.mrb[27].mxu1 }
 0x96a   : > { %v8678_v37 = vpack.c.bf16 %v8405_v57, %v8401_v26  ;;  %v8480_v15 = vadd.f32 %v8479_v11, %v13384_v48 }
 0x96b   : > { %v8680_v14 = vpack.c.bf16 %v8478_v10, %v8474_v32  ;;  %v8679_v25 = vpack.c.bf16 %v8407_v31, %v8403_v59 }
 0x96c   : > { %v8681_v1 = vpack.c.bf16 %v8480_v15, %v8476_v61 }
 0x96d   : > { %v8410_v23 = vpop.f32.mrb[28].mxu0  ;;  %8938 = vmatprep.subr.bf16.mxu0 %v8679_v25 }
 0x96e   : > { %v8483_v12 = vpop.f32.mrb[28].mxu1  ;;  %8991 = vmatprep.subr.bf16.mxu1 %v8681_v1  ;;  %v8412_v51 = vpop.f32.mrb[29].mxu0  ;;  %8939 = vmatpush1.bf16.msra.mxu0 %v8678_v37  ;;  %v8411_v55 = vadd.f32 %v8410_v23, %v13394_v17 }
 0x96f   : > { %v8485_v24 = vpop.f32.mrb[29].mxu1  ;;  %8992 = vmatpush1.bf16.msra.mxu1 %v8680_v14  ;;  %v8414_v7 = vpop.f32.mrb[30].mxu0  ;;  %v8484_v57 = vadd.f32 %v8483_v12, %v13394_v17  ;;  %v8413_v32 = vadd.f32 %v8412_v51, %v13394_v17 }
 0x970   : > { %v8415_v39 = vadd.f32 %v8414_v7, %v13396_v46  ;;  %v8487_v0 = vpop.f32.mrb[30].mxu1  ;;  %v8416_v26 = vpop.f32.mrb[31].mxu0  ;;  %v8486_v11 = vadd.f32 %v8485_v24, %v13394_v17 }
 0x971   : > { %v8488_v59 = vadd.f32 %v8487_v0, %v13396_v46  ;;  %v8417_v10 = vadd.f32 %v8416_v26, %v13396_v46  ;;  %v8489_v31 = vpop.f32.mrb[31].mxu1 }
 0x972   : > { %v8694_v61 = vpack.c.bf16 %v8415_v39, %v8411_v55  ;;  %v8490_v37 = vadd.f32 %v8489_v31, %v13396_v46 }
 0x973   : > { %v8696_v15 = vpack.c.bf16 %v8488_v59, %v8484_v57  ;;  %v8695_v14 = vpack.c.bf16 %v8417_v10, %v8413_v32 }
 0x974   : > { %v8697_v25 = vpack.c.bf16 %v8490_v37, %v8486_v11 }
 0x975   : > { %8940 = vmatprep.subr.bf16.mxu0 %v8695_v14 }
 0x976   : > { %8993 = vmatprep.subr.bf16.mxu1 %v8697_v25  ;;  %8941 = vmatpush1.bf16.msra.mxu0 %v8694_v61 }
 0x977   : > { %8994 = vmatpush1.bf16.msra.mxu1 %v8696_v15 }
 0x979   : > { %10181 = vmatmul.mubr.msk.bf16.vlgmr.msra.gmra.mrb[112].mxu0 %vm1865_vm2, %v13409_v44 }
 0x97a   : > { %10183 = vmatmul.mubr.msk.bf16.vlgmr.msra.gmra.mrb[112].mxu1 %vm1865_vm2, %v13409_v44  ;;  %8976 = vmatprep.mubr.bf16.mxu0 %v13797_v49 }
 0x97b   : > { %9029 = vmatprep.mubr.bf16.mxu1 %v13797_v49 }
 0x981   : > { %10182 = vmatmul.mubr.msk.bf16.gmra.mrb[116].mxu0 %vm1865_vm2, %v13428_v5 }
 0x982   : > { %10184 = vmatmul.mubr.msk.bf16.gmra.mrb[116].mxu1 %vm1865_vm2, %v13428_v5  ;;  %9072 = vmatprep.mubr.bf16.mxu0 %v13797_v49 }
 0x983   : > { %9125 = vmatprep.mubr.bf16.mxu1 %v13797_v49 }
 0x9a5   : > { %v8526_v1 = vpop.f32.mrb[56].mxu0 }
 0x9a6   : > { %v8599_v23 = vpop.f32.mrb[56].mxu1  ;;  %v8528_v12 = vpop.f32.mrb[57].mxu0  ;;  %v8527_v7 = vadd.f32 %v8526_v1, %v13358_v38 }
 0x9a7   : > { %v8601_v51 = vpop.f32.mrb[57].mxu1  ;;  %v8530_v24 = vpop.f32.mrb[58].mxu0  ;;  %v8600_v26 = vadd.f32 %v8599_v23, %v13358_v38  ;;  %v8529_v57 = vadd.f32 %v8528_v12, %v13358_v38 }
 0x9a8   : > { %v8531_v55 = vadd.f32 %v8530_v24, %v13360_v62  ;;  %v8603_v39 = vpop.f32.mrb[58].mxu1  ;;  %v8532_v0 = vpop.f32.mrb[59].mxu0  ;;  %v8602_v31 = vadd.f32 %v8601_v51, %v13358_v38 }
 0x9a9   : > { %v8604_v32 = vadd.f32 %v8603_v39, %v13360_v62  ;;  %v8533_v59 = vadd.f32 %v8532_v0, %v13360_v62  ;;  %v8605_v10 = vpop.f32.mrb[59].mxu1 }
 0x9aa   : > { %v8650_v11 = vpack.c.bf16 %v8531_v55, %v8527_v7  ;;  %v8606_v61 = vadd.f32 %v8605_v10, %v13360_v62 }
 0x9ab   : > { %v8652_v37 = vpack.c.bf16 %v8604_v32, %v8600_v26  ;;  %v8651_v15 = vpack.c.bf16 %v8533_v59, %v8529_v57 }
 0x9ac   : > { %v8653_v14 = vpack.c.bf16 %v8606_v61, %v8602_v31 }
 0x9ad   : > { %v8536_v25 = vpop.f32.mrb[60].mxu0  ;;  %9040 = vmatprep.subr.bf16.mxu0 %v8651_v15 }
 0x9ae   : > { %v8609_v1 = vpop.f32.mrb[60].mxu1  ;;  %9093 = vmatprep.subr.bf16.mxu1 %v8653_v14  ;;  %v8538_v23 = vpop.f32.mrb[61].mxu0  ;;  %9041 = vmatpush1.bf16.msra.mxu0 %v8650_v11  ;;  %v8537_v39 = vadd.f32 %v8536_v25, %v13370_v63 }
 0x9af   : > { %v8611_v12 = vpop.f32.mrb[61].mxu1  ;;  %9094 = vmatpush1.bf16.msra.mxu1 %v8652_v37  ;;  %v8540_v24 = vpop.f32.mrb[62].mxu0  ;;  %v8610_v62 = vadd.f32 %v8609_v1, %v13370_v63  ;;  %v8539_v7 = vadd.f32 %v8538_v23, %v13370_v63 }
 0x9b0   : > { %v8541_v0 = vadd.f32 %v8540_v24, %v13372_v47  ;;  %v8613_v38 = vpop.f32.mrb[62].mxu1  ;;  %v8542_v51 = vpop.f32.mrb[63].mxu0  ;;  %v8612_v32 = vadd.f32 %v8611_v12, %v13370_v63 }
 0x9b1   : > { %v8614_v55 = vadd.f32 %v8613_v38, %v13372_v47  ;;  %v8543_v26 = vadd.f32 %v8542_v51, %v13372_v47  ;;  %v8615_v57 = vpop.f32.mrb[63].mxu1 }
 0x9b2   : > { %v8666_v59 = vpack.c.bf16 %v8541_v0, %v8537_v39  ;;  %v8616_v10 = vadd.f32 %v8615_v57, %v13372_v47 }
 0x9b3   : > { %v8668_v31 = vpack.c.bf16 %v8614_v55, %v8610_v62  ;;  %v8667_v11 = vpack.c.bf16 %v8543_v26, %v8539_v7 }
 0x9b4   : > { %v8669_v61 = vpack.c.bf16 %v8616_v10, %v8612_v32 }
 0x9b5   : > { %v8546_v37 = vpop.f32.mrb[64].mxu0  ;;  %9042 = vmatprep.subr.bf16.mxu0 %v8667_v11 }
 0x9b6   : > { %v8619_v15 = vpop.f32.mrb[64].mxu1  ;;  %9095 = vmatprep.subr.bf16.mxu1 %v8669_v61  ;;  %v8548_v14 = vpop.f32.mrb[65].mxu0  ;;  %9043 = vmatpush1.bf16.msra.mxu0 %v8666_v59  ;;  %v8547_v23 = vadd.f32 %v8546_v37, %v13382_v50 }
 0x9b7   : > { %v8621_v25 = vpop.f32.mrb[65].mxu1  ;;  %9096 = vmatpush1.bf16.msra.mxu1 %v8668_v31  ;;  %v8550_v1 = vpop.f32.mrb[66].mxu0  ;;  %v8620_v47 = vadd.f32 %v8619_v15, %v13382_v50  ;;  %v8549_v39 = vadd.f32 %v8548_v14, %v13382_v50 }
 0x9b8   : > { %v8551_v24 = vadd.f32 %v8550_v1, %v13384_v48  ;;  %v8623_v63 = vpop.f32.mrb[66].mxu1  ;;  %v8552_v12 = vpop.f32.mrb[67].mxu0  ;;  %v8622_v62 = vadd.f32 %v8621_v25, %v13382_v50 }
 0x9b9   : > { %v8624_v0 = vadd.f32 %v8623_v63, %v13384_v48  ;;  %v8553_v38 = vadd.f32 %v8552_v12, %v13384_v48  ;;  %v8625_v51 = vpop.f32.mrb[67].mxu1 }
 0x9ba   : > { %v8682_v7 = vpack.c.bf16 %v8551_v24, %v8547_v23  ;;  %v8626_v55 = vadd.f32 %v8625_v51, %v13384_v48 }
 0x9bb   : > { %v8684_v26 = vpack.c.bf16 %v8624_v0, %v8620_v47  ;;  %v8683_v57 = vpack.c.bf16 %v8553_v38, %v8549_v39 }
 0x9bc   : > { %v8685_v32 = vpack.c.bf16 %v8626_v55, %v8622_v62 }
 0x9bd   : > { %v8556_v59 = vpop.f32.mrb[68].mxu0  ;;  %9044 = vmatprep.subr.bf16.mxu0 %v8683_v57 }
 0x9be   : > { %v8629_v10 = vpop.f32.mrb[68].mxu1  ;;  %9097 = vmatprep.subr.bf16.mxu1 %v8685_v32  ;;  %v8558_v31 = vpop.f32.mrb[69].mxu0  ;;  %9045 = vmatpush1.bf16.msra.mxu0 %v8682_v7  ;;  %v8557_v37 = vadd.f32 %v8556_v59, %v13394_v17 }
 0x9bf   : > { %v8631_v11 = vpop.f32.mrb[69].mxu1  ;;  %9098 = vmatpush1.bf16.msra.mxu1 %v8684_v26  ;;  %v8560_v61 = vpop.f32.mrb[70].mxu0  ;;  %v8630_v48 = vadd.f32 %v8629_v10, %v13394_v17  ;;  %v8559_v25 = vadd.f32 %v8558_v31, %v13394_v17 }
 0x9c0   : > { %v8561_v15 = vadd.f32 %v8560_v61, %v13396_v46  ;;  %v8633_v50 = vpop.f32.mrb[70].mxu1  ;;  %v8562_v14 = vpop.f32.mrb[71].mxu0  ;;  %v8632_v63 = vadd.f32 %v8631_v11, %v13394_v17 }
 0x9c1   : > { %v8634_v1 = vadd.f32 %v8633_v50, %v13396_v46  ;;  %v8563_v23 = vadd.f32 %v8562_v14, %v13396_v46  ;;  %v8635_v24 = vpop.f32.mrb[71].mxu1  ;;  %v13562_v17 = vpop.permute.xlu1 %9157 }
 0x9c2   : > { %v8698_v12 = vpack.c.bf16 %v8561_v15, %v8557_v37  ;;  %v8636_v47 = vadd.f32 %v8635_v24, %v13396_v46  ;;  %v13560_v46 = vpop.permute.xlu0 %9152 }
 0x9c3   : > { %v8700_v39 = vpack.c.bf16 %v8634_v1, %v8630_v48  ;;  %v8699_v0 = vpack.c.bf16 %v8563_v23, %v8559_v25 }
 0x9c4   : > { %v8701_v38 = vpack.c.bf16 %v8636_v47, %v8632_v63 }
 0x9c5   : > { %9046 = vmatprep.subr.bf16.mxu0 %v8699_v0 }
 0x9c6   : > { %9099 = vmatprep.subr.bf16.mxu1 %v8701_v38  ;;  %9047 = vmatpush1.bf16.msra.mxu0 %v8698_v12  ;;  %v13572_v24 = vpop.permute.xlu0 %9162 }
 0x9c7   : > { %9100 = vmatpush1.bf16.msra.mxu1 %v8700_v39  ;;  %v13574_v39 = vpop.permute.xlu1 %9167 }
 0x9c9   : > { %10185 = vmatmul.mubr.msk.bf16.vlgmr.msra.gmra.mrb[152].mxu0 %vm1865_vm2, %v13409_v44 }
 0x9ca   : > { %10187 = vmatmul.mubr.msk.bf16.vlgmr.msra.gmra.mrb[152].mxu1 %vm1865_vm2, %v13409_v44  ;;  %9082 = vmatprep.mubr.bf16.mxu0 %v13797_v49 }
 0x9cb   : > { %9135 = vmatprep.mubr.bf16.mxu1 %v13797_v49 }
 0x9d1   : > { %10186 = vmatmul.mubr.msk.bf16.gmra.mrb[156].mxu0 %vm1865_vm2, %v13428_v5 }
 0x9d2   : > { %10188 = vmatmul.mubr.msk.bf16.gmra.mrb[156].mxu1 %vm1865_vm2, %v13428_v5  ;;  %9384 = vmatprep.mubr.bf16.mxu0 %v13797_v49 }
 0x9d3   : > { %9425 = vmatprep.mubr.bf16.mxu1 %v13797_v49 }
 0x9f3   : > { %v8756_v51 = vpop.f32.mrb[32].mxu0 }
 0x9f4   : > { %v9170_v44 = vadd.f32 %v13560_v46, %v8756_v51  ;;  %v8809_v62 = vpop.f32.mrb[32].mxu1  ;;  %v8758_v7 = vpop.f32.mrb[33].mxu0 }
 0x9f5   : > { %v9172_v55 = vadd.f32 %v13560_v46, %v8809_v62  ;;  %v9171_v26 = vadd.f32 %v13560_v46, %v8758_v7  ;;  %v8811_v57 = vpop.f32.mrb[33].mxu1  ;;  %v8760_v32 = vpop.f32.mrb[34].mxu0 }
 0x9f6   : > { %v9173_v5 = vadd.f32 %v13560_v46, %v8811_v57  ;;  %v9186_v59 = vadd.f32 %v13562_v17, %v8760_v32  ;;  %v8813_v10 = vpop.f32.mrb[34].mxu1  ;;  %v8762_v31 = vpop.f32.mrb[35].mxu0  ;;  %v9234_v15 = vmax.f32 %v9170_v44, 0.0 }
 0x9f7   : > { %v9188_v11 = vadd.f32 %v13562_v17, %v8813_v10  ;;  %v9187_v61 = vadd.f32 %v13562_v17, %v8762_v31  ;;  %v8815_v37 = vpop.f32.mrb[35].mxu1  ;;  %v9236_v48 = vmax.f32 %v9172_v55, 0.0  ;;  %v9235_v25 = vmax.f32 %v9171_v26, 0.0 }
 0x9f8   : > { %v9250_v50 = vmax.f32 %v9186_v59, 0.0  ;;  %v9189_v14 = vadd.f32 %v13562_v17, %v8815_v37  ;;  %v9237_v63 = vmax.f32 %v9173_v5, 0.0 }
 0x9f9   : > { %v9252_v1 = vmax.f32 %v9188_v11, 0.0  ;;  %v9251_v23 = vmax.f32 %v9187_v61, 0.0 }
 0x9fa   : > { %v9298_v12 = vpack.c.bf16 %v9250_v50, %v9234_v15  ;;  %v9253_v47 = vmax.f32 %v9189_v14, 0.0 }
 0x9fb   : > { %v9300_v0 = vpack.c.bf16 %v9252_v1, %v9236_v48  ;;  %v9299_v38 = vpack.c.bf16 %v9251_v23, %v9235_v25  ;;  %v8766_v51 = vpop.f32.mrb[36].mxu0 }
 0x9fc   : > { %v9301_v62 = vpack.c.bf16 %v9253_v47, %v9237_v63  ;;  %v9202_v44 = vadd.f32 %v13572_v24, %v8766_v51  ;;  %v8819_v7 = vpop.f32.mrb[36].mxu1  ;;  %v8768_v57 = vpop.f32.mrb[37].mxu0 }
 0x9fd   : > { %v9204_v55 = vadd.f32 %v13572_v24, %v8819_v7  ;;  %v9203_v26 = vadd.f32 %v13572_v24, %v8768_v57  ;;  %v8821_v32 = vpop.f32.mrb[37].mxu1  ;;  %v8770_v59 = vpop.f32.mrb[38].mxu0  ;;  %9352 = vmatprep.subr.bf16.mxu0 %v9299_v38 }
 0x9fe   : > { %v9205_v5 = vadd.f32 %v13572_v24, %v8821_v32  ;;  %v9218_v10 = vadd.f32 %v13574_v39, %v8770_v59  ;;  %v8823_v31 = vpop.f32.mrb[38].mxu1  ;;  %9393 = vmatprep.subr.bf16.mxu1 %v9301_v62  ;;  %v8772_v11 = vpop.f32.mrb[39].mxu0  ;;  %9353 = vmatpush1.bf16.msra.mxu0 %v9298_v12  ;;  %v9266_v50 = vmax.f32 %v9202_v44, 0.0 }
 0x9ff   : > { %v9220_v61 = vadd.f32 %v13574_v39, %v8823_v31  ;;  %v9219_v37 = vadd.f32 %v13574_v39, %v8772_v11  ;;  %v8825_v15 = vpop.f32.mrb[39].mxu1  ;;  %9394 = vmatpush1.bf16.msra.mxu1 %v9300_v0  ;;  %v9268_v25 = vmax.f32 %v9204_v55, 0.0  ;;  %v9267_v1 = vmax.f32 %v9203_v26, 0.0 }
 0xa00   : > { %v9282_v14 = vmax.f32 %v9218_v10, 0.0  ;;  %v9221_v48 = vadd.f32 %v13574_v39, %v8825_v15  ;;  %v9269_v47 = vmax.f32 %v9205_v5, 0.0 }
 0xa01   : > { %v9284_v23 = vmax.f32 %v9220_v61, 0.0  ;;  %v9283_v63 = vmax.f32 %v9219_v37, 0.0 }
 0xa02   : > { %v9314_v38 = vpack.c.bf16 %v9282_v14, %v9266_v50  ;;  %v9285_v51 = vmax.f32 %v9221_v48, 0.0 }
 0xa03   : > { %v9316_v62 = vpack.c.bf16 %v9284_v23, %v9268_v25  ;;  %v9315_v7 = vpack.c.bf16 %v9283_v63, %v9267_v1 }
 0xa04   : > { %v9317_v12 = vpack.c.bf16 %v9285_v51, %v9269_v47 }
 0xa05   : > { %9354 = vmatprep.subr.bf16.mxu0 %v9315_v7 }
 0xa06   : > { %9395 = vmatprep.subr.bf16.mxu1 %v9317_v12  ;;  %9355 = vmatpush1.bf16.msra.mxu0 %v9314_v38 }
 0xa07   : > { %9396 = vmatpush1.bf16.msra.mxu1 %v9316_v62  ;;  %9356 = vmatprep.subr.bf16.mxu0 %v12926_v35 }
 0xa08   : > { %9397 = vmatprep.subr.bf16.mxu1 %v12928_v16 }
 0xa0a   : > { %9357 = vmatpush1.bf16.msra.mxu0 %v12920_v30 }
 0xa0b   : > { %9398 = vmatpush1.bf16.msra.mxu1 %v12924_v2  ;;  %9358 = vmatprep.subr.bf16.mxu0 %v12950_v54 }
 0xa0c   : > { %9399 = vmatprep.subr.bf16.mxu1 %v12952_v56 }
 0xa0e   : > { %9359 = vmatpush1.bf16.msra.mxu0 %v12944_v29 }
 0xa0f   : > { %9400 = vmatpush1.bf16.msra.mxu1 %v12948_v53  ;;  %9360 = vmatprep.subr.bf16.mxu0 %v12974_v36 }
 0xa10   : > { %9401 = vmatprep.subr.bf16.mxu1 %v12976_v18 }
 0xa12   : > { %9361 = vmatpush1.bf16.msra.mxu0 %v12968_v34  ;;  %v13604_v34 = vld [vmem:[%s13741_s1 + $0x160] sm:$0xff]  }
 0xa13   : > { %9402 = vmatpush1.bf16.msra.mxu1 %v12972_v40  ;;  %v8862_v35 = vpop.f32.mrb[72].mxu0  ;;  %9362 = vmatprep.subr.bf16.mxu0 %v12994_v6 }
 0xa14   : > { %v9174_v30 = vadd.f32 %v13560_v46, %v8862_v35  ;;  %v8915_v2 = vpop.f32.mrb[72].mxu1  ;;  %9403 = vmatprep.subr.bf16.mxu1 %v12996_v33  ;;  %v8864_v16 = vpop.f32.mrb[73].mxu0 }
 0xa15   : > { %v9176_v29 = vadd.f32 %v13560_v46, %v8915_v2  ;;  %v9175_v53 = vadd.f32 %v13560_v46, %v8864_v16  ;;  %v8917_v54 = vpop.f32.mrb[73].mxu1  ;;  %v8866_v56 = vpop.f32.mrb[74].mxu0 }
 0xa16   : > { %v9177_v40 = vadd.f32 %v13560_v46, %v8917_v54  ;;  %v9190_v36 = vadd.f32 %v13562_v17, %v8866_v56  ;;  %v8919_v18 = vpop.f32.mrb[74].mxu1  ;;  %v8868_v6 = vpop.f32.mrb[75].mxu0  ;;  %9363 = vmatpush1.bf16.msra.mxu0 %v12990_v58  ;;  %v9238_v57 = vmax.f32 %v9174_v30, 0.0 }
 0xa17   : > { %v9192_v33 = vadd.f32 %v13562_v17, %v8919_v18  ;;  %v9191_v0 = vadd.f32 %v13562_v17, %v8868_v6  ;;  %v8921_v44 = vpop.f32.mrb[75].mxu1  ;;  %9404 = vmatpush1.bf16.msra.mxu1 %v12992_v3  ;;  %v9240_v32 = vmax.f32 %v9176_v29, 0.0  ;;  %v9239_v59 = vmax.f32 %v9175_v53, 0.0 }
 0xa18   : > { %v9254_v55 = vmax.f32 %v9190_v36, 0.0  ;;  %v9193_v26 = vadd.f32 %v13562_v17, %v8921_v44  ;;  %v9241_v58 = vmax.f32 %v9177_v40, 0.0 }
 0xa19   : > { %v9256_v5 = vmax.f32 %v9192_v33, 0.0  ;;  %v9255_v10 = vmax.f32 %v9191_v0, 0.0  ;;  %10190 = vmatmul.mubr.msk.bf16.vlgmr.msra.gmra.mrb[96].mxu0 %vm9348_vm3, %v13604_v34 }
 0xa1a   : > { %v9302_v31 = vpack.c.bf16 %v9254_v55, %v9238_v57  ;;  %v9257_v11 = vmax.f32 %v9193_v26, 0.0  ;;  %10191 = vmatmul.mubr.msk.bf16.vlgmr.msra.gmra.mrb[96].mxu1 %vm9348_vm3, %v13604_v34  ;;  %9466 = vmatprep.mubr.bf16.mxu0 %v13797_v49 }
 0xa1b   : > { %v9304_v3 = vpack.c.bf16 %v9256_v5, %v9240_v32  ;;  %v9303_v61 = vpack.c.bf16 %v9255_v10, %v9239_v59  ;;  %v8872_v37 = vpop.f32.mrb[76].mxu0  ;;  %9507 = vmatprep.mubr.bf16.mxu1 %v13797_v49 }
 0xa1c   : > { %v9305_v15 = vpack.c.bf16 %v9257_v11, %v9241_v58  ;;  %v9206_v50 = vadd.f32 %v13572_v24, %v8872_v37  ;;  %v8925_v14 = vpop.f32.mrb[76].mxu1  ;;  %v8874_v48 = vpop.f32.mrb[77].mxu0 }
 0xa1d   : > { %v9208_v25 = vadd.f32 %v13572_v24, %v8925_v14  ;;  %v9207_v1 = vadd.f32 %v13572_v24, %v8874_v48  ;;  %v8927_v23 = vpop.f32.mrb[77].mxu1  ;;  %v8876_v63 = vpop.f32.mrb[78].mxu0  ;;  %9434 = vmatprep.subr.bf16.mxu0 %v9303_v61 }
 0xa1e   : > { %v9209_v47 = vadd.f32 %v13572_v24, %v8927_v23  ;;  %v9222_v38 = vadd.f32 %v13574_v39, %v8876_v63  ;;  %v8929_v51 = vpop.f32.mrb[78].mxu1  ;;  %9475 = vmatprep.subr.bf16.mxu1 %v9305_v15  ;;  %v8878_v62 = vpop.f32.mrb[79].mxu0  ;;  %9435 = vmatpush1.bf16.msra.mxu0 %v9302_v31  ;;  %v9270_v30 = vmax.f32 %v9206_v50, 0.0 }
 0xa1f   : > { %v9224_v7 = vadd.f32 %v13574_v39, %v8929_v51  ;;  %v9223_v12 = vadd.f32 %v13574_v39, %v8878_v62  ;;  %v8931_v35 = vpop.f32.mrb[79].mxu1  ;;  %9476 = vmatpush1.bf16.msra.mxu1 %v9304_v3  ;;  %v9272_v29 = vmax.f32 %v9208_v25, 0.0  ;;  %v9271_v53 = vmax.f32 %v9207_v1, 0.0 }
 0xa20   : > { %v9286_v2 = vmax.f32 %v9222_v38, 0.0  ;;  %v9225_v16 = vadd.f32 %v13574_v39, %v8931_v35  ;;  %v9273_v40 = vmax.f32 %v9209_v47, 0.0 }
 0xa21   : > { %v9288_v54 = vmax.f32 %v9224_v7, 0.0  ;;  %v9287_v56 = vmax.f32 %v9223_v12, 0.0 }
 0xa22   : > { %v9318_v36 = vpack.c.bf16 %v9286_v2, %v9270_v30  ;;  %v9289_v18 = vmax.f32 %v9225_v16, 0.0 }
 0xa23   : > { %v9320_v6 = vpack.c.bf16 %v9288_v54, %v9272_v29  ;;  %v9319_v33 = vpack.c.bf16 %v9287_v56, %v9271_v53 }
 0xa24   : > { %v9321_v0 = vpack.c.bf16 %v9289_v18, %v9273_v40 }
 0xa25   : > { %9436 = vmatprep.subr.bf16.mxu0 %v9319_v33 }
 0xa26   : > { %9477 = vmatprep.subr.bf16.mxu1 %v9321_v0  ;;  %9437 = vmatpush1.bf16.msra.mxu0 %v9318_v36 }
 0xa27   : > { %9478 = vmatpush1.bf16.msra.mxu1 %v9320_v6  ;;  %9438 = vmatprep.subr.bf16.mxu0 %v13024_v42  ;;  %v13813_v42 = vld [vmem:[#allocation3_spill] sm:$0xff] }
 0xa28   : > { %9479 = vmatprep.subr.bf16.mxu1 %v13027_v45 }
 0xa2a   : > { %9439 = vmatpush1.bf16.msra.mxu0 %v13017_v41  ;;  %v13811_v41 = vld [vmem:[#allocation4_spill] sm:$0xff] }
 0xa2b   : > { %9480 = vmatpush1.bf16.msra.mxu1 %v13022_v28  ;;  %9440 = vmatprep.subr.bf16.mxu0 %v13055_v52  ;;  %v13812_v28 = vld [vmem:[#allocation2_spill] sm:$0xff] }
 0xa2c   : > { %9481 = vmatprep.subr.bf16.mxu1 %v13058_v22 }
 0xa2e   : > { %9441 = vmatpush1.bf16.msra.mxu0 %v13048_v43 }
 0xa2f   : > { %9482 = vmatpush1.bf16.msra.mxu1 %v13053_v21  ;;  %9442 = vmatprep.subr.bf16.mxu0 %v13086_v60 }
 0xa30   : > { %9483 = vmatprep.subr.bf16.mxu1 %v13089_v13 }
 0xa32   : > { %9443 = vmatpush1.bf16.msra.mxu0 %v13079_v9 }
 0xa33   : > { %9484 = vmatpush1.bf16.msra.mxu1 %v13084_v27  ;;  %9444 = vmatprep.subr.bf16.mxu0 %v13117_v19 }
 0xa34   : > { %9485 = vmatprep.subr.bf16.mxu1 %v13811_v41 }
 0xa36   : > { %9445 = vmatpush1.bf16.msra.mxu0 %v13812_v28 }
 0xa37   : > { %9486 = vmatpush1.bf16.msra.mxu1 %v13813_v42 }
 0xa39   : > { %10192 = vmatmul.mubr.msk.bf16.vlgmr.msra.gmra.mrb[100].mxu0 %vm9348_vm3, %v13604_v34 }
 0xa3a   : > { %10193 = vmatmul.mubr.msk.bf16.vlgmr.msra.gmra.mrb[100].mxu1 %vm9348_vm3, %v13604_v34  ;;  %9548 = vmatprep.mubr.bf16.mxu0 %v13797_v49 }
 0xa3b   : > { %9589 = vmatprep.mubr.bf16.mxu1 %v13797_v49 }
 0xa4c   : > { %v8968_v45 = vpop.f32.mrb[112].mxu0 }
 0xa4d   : > { %v9178_v43 = vadd.f32 %v13560_v46, %v8968_v45  ;;  %v9021_v21 = vpop.f32.mrb[112].mxu1  ;;  %v8970_v52 = vpop.f32.mrb[113].mxu0 }
 0xa4e   : > { %v9180_v22 = vadd.f32 %v13560_v46, %v9021_v21  ;;  %v9179_v9 = vadd.f32 %v13560_v46, %v8970_v52  ;;  %v9023_v27 = vpop.f32.mrb[113].mxu1  ;;  %v8972_v60 = vpop.f32.mrb[114].mxu0  ;;  %v13815_v21 = vld [vmem:[#allocation8_spill] sm:$0xff]  ;;  %v13816_v52 = vld [vmem:[#allocation5_spill] sm:$0xff] }
 0xa4f   : > { %v9181_v13 = vadd.f32 %v13560_v46, %v9023_v27  ;;  %v9194_v19 = vadd.f32 %v13562_v17, %v8972_v60  ;;  %v9025_v44 = vpop.f32.mrb[114].mxu1  ;;  %v8974_v57 = vpop.f32.mrb[115].mxu0  ;;  %v9242_v59 = vmax.f32 %v9178_v43, 0.0  ;;  %v13814_v43 = vld [vmem:[#allocation7_spill] sm:$0xff]  ;;  %v13819_v27 = vld [vmem:[#allocation12_spill] sm:$0xff]  ;;  %v13820_v60 = vld [vmem:[#allocation9_spill] sm:$0xff] }
 0xa50   : > { %v9196_v55 = vadd.f32 %v13562_v17, %v9025_v44  ;;  %v9195_v26 = vadd.f32 %v13562_v17, %v8974_v57  ;;  %v9027_v32 = vpop.f32.mrb[115].mxu1  ;;  %v9244_v58 = vmax.f32 %v9180_v22, 0.0  ;;  %v9243_v31 = vmax.f32 %v9179_v9, 0.0  ;;  %v13817_v22 = vld [vmem:[#allocation6_spill] sm:$0xff]  ;;  %v13818_v9 = vld [vmem:[#allocation11_spill] sm:$0xff]  ;;  %v13823_v44 = vld [vmem:[#allocation16_spill] sm:$0xff] }
 0xa51   : > { %v9258_v5 = vmax.f32 %v9194_v19, 0.0  ;;  %v9197_v10 = vadd.f32 %v13562_v17, %v9027_v32  ;;  %v9245_v61 = vmax.f32 %v9181_v13, 0.0  ;;  %v13821_v13 = vld [vmem:[#allocation10_spill] sm:$0xff]  ;;  %v13822_v19 = vld [vmem:[#allocation15_spill] sm:$0xff]  ;;  %v13824_v57 = vld [vmem:[#allocation13_spill] sm:$0xff] }
 0xa52   : > { %v9260_v11 = vmax.f32 %v9196_v55, 0.0  ;;  %v9259_v3 = vmax.f32 %v9195_v26, 0.0  ;;  %v13825_v55 = vld [vmem:[#allocation14_spill] sm:$0xff]  ;;  %v13826_v26 = vld [vmem:[#allocation19_spill] sm:$0xff]  ;;  %v13827_v32 = vld [vmem:[#allocation20_spill] sm:$0xff] }
 0xa53   : > { %v9306_v37 = vpack.c.bf16 %v9258_v5, %v9242_v59  ;;  %v9261_v15 = vmax.f32 %v9197_v10, 0.0  ;;  %v13828_v59 = vld [vmem:[#allocation17_spill] sm:$0xff]  ;;  %v13829_v5 = vld [vmem:[#allocation18_spill] sm:$0xff] }
 0xa54   : > { %v9308_v50 = vpack.c.bf16 %v9260_v11, %v9244_v58  ;;  %v9307_v14 = vpack.c.bf16 %v9259_v3, %v9243_v31  ;;  %v8978_v48 = vpop.f32.mrb[116].mxu0 }
 0xa55   : > { %v9309_v25 = vpack.c.bf16 %v9261_v15, %v9245_v61  ;;  %v9210_v1 = vadd.f32 %v13572_v24, %v8978_v48  ;;  %v9031_v23 = vpop.f32.mrb[116].mxu1  ;;  %v8980_v63 = vpop.f32.mrb[117].mxu0 }
 0xa56   : > { %v9212_v47 = vadd.f32 %v13572_v24, %v9031_v23  ;;  %v9211_v38 = vadd.f32 %v13572_v24, %v8980_v63  ;;  %v9033_v51 = vpop.f32.mrb[117].mxu1  ;;  %v8982_v62 = vpop.f32.mrb[118].mxu0  ;;  %9516 = vmatprep.subr.bf16.mxu0 %v9307_v14 }
 0xa57   : > { %v9213_v7 = vadd.f32 %v13572_v24, %v9033_v51  ;;  %v9226_v12 = vadd.f32 %v13574_v39, %v8982_v62  ;;  %v9035_v35 = vpop.f32.mrb[118].mxu1  ;;  %9557 = vmatprep.subr.bf16.mxu1 %v9309_v25  ;;  %v8984_v30 = vpop.f32.mrb[119].mxu0  ;;  %9517 = vmatpush1.bf16.msra.mxu0 %v9306_v37  ;;  %v9274_v53 = vmax.f32 %v9210_v1, 0.0 }
 0xa58   : > { %v9228_v2 = vadd.f32 %v13574_v39, %v9035_v35  ;;  %v9227_v16 = vadd.f32 %v13574_v39, %v8984_v30  ;;  %v9037_v29 = vpop.f32.mrb[119].mxu1  ;;  %9558 = vmatpush1.bf16.msra.mxu1 %v9308_v50  ;;  %v9276_v40 = vmax.f32 %v9212_v47, 0.0  ;;  %v9275_v36 = vmax.f32 %v9211_v38, 0.0 }
 0xa59   : > { %v9290_v54 = vmax.f32 %v9226_v12, 0.0  ;;  %v9229_v56 = vadd.f32 %v13574_v39, %v9037_v29  ;;  %v9277_v33 = vmax.f32 %v9213_v7, 0.0 }
 0xa5a   : > { %v9292_v18 = vmax.f32 %v9228_v2, 0.0  ;;  %v9291_v6 = vmax.f32 %v9227_v16, 0.0 }
 0xa5b   : > { %v9322_v0 = vpack.c.bf16 %v9290_v54, %v9274_v53  ;;  %v9293_v41 = vmax.f32 %v9229_v56, 0.0 }
 0xa5c   : > { %v9324_v28 = vpack.c.bf16 %v9292_v18, %v9276_v40  ;;  %v9323_v42 = vpack.c.bf16 %v9291_v6, %v9275_v36 }
 0xa5d   : > { %v9325_v45 = vpack.c.bf16 %v9293_v41, %v9277_v33 }
 0xa5e   : > { %9518 = vmatprep.subr.bf16.mxu0 %v9323_v42 }
 0xa5f   : > { %9559 = vmatprep.subr.bf16.mxu1 %v9325_v45  ;;  %9519 = vmatpush1.bf16.msra.mxu0 %v9322_v0 }
 0xa60   : > { %9560 = vmatpush1.bf16.msra.mxu1 %v9324_v28  ;;  %9520 = vmatprep.subr.bf16.mxu0 %v13814_v43 }
 0xa61   : > { %9561 = vmatprep.subr.bf16.mxu1 %v13815_v21 }
 0xa63   : > { %9521 = vmatpush1.bf16.msra.mxu0 %v13816_v52 }
 0xa64   : > { %9562 = vmatpush1.bf16.msra.mxu1 %v13817_v22  ;;  %9522 = vmatprep.subr.bf16.mxu0 %v13818_v9 }
 0xa65   : > { %9563 = vmatprep.subr.bf16.mxu1 %v13819_v27 }
 0xa67   : > { %9523 = vmatpush1.bf16.msra.mxu0 %v13820_v60 }
 0xa68   : > { %9564 = vmatpush1.bf16.msra.mxu1 %v13821_v13  ;;  %9524 = vmatprep.subr.bf16.mxu0 %v13822_v19 }
 0xa69   : > { %9565 = vmatprep.subr.bf16.mxu1 %v13823_v44 }
 0xa6b   : > { %9525 = vmatpush1.bf16.msra.mxu0 %v13824_v57 }
 0xa6c   : > { %9566 = vmatpush1.bf16.msra.mxu1 %v13825_v55  ;;  %9526 = vmatprep.subr.bf16.mxu0 %v13826_v26 }
 0xa6d   : > { %9567 = vmatprep.subr.bf16.mxu1 %v13827_v32  ;;  %v13830_v32 = vld [vmem:[#allocation21_spill] sm:$0xff] }
 0xa6f   : > { %9527 = vmatpush1.bf16.msra.mxu0 %v13828_v59  ;;  %v13832_v59 = vld [vmem:[#allocation25_spill] sm:$0xff] }
 0xa70   : > { %9568 = vmatpush1.bf16.msra.mxu1 %v13829_v5  ;;  %v13833_v5 = vld [vmem:[#allocation23_spill] sm:$0xff] }
 0xa72   : > { %10194 = vmatmul.mubr.msk.bf16.vlgmr.msra.gmra.mrb[104].mxu0 %vm9348_vm3, %v13604_v34 }
 0xa73   : > { %10195 = vmatmul.mubr.msk.bf16.vlgmr.msra.gmra.mrb[104].mxu1 %vm9348_vm3, %v13604_v34  ;;  %9630 = vmatprep.mubr.bf16.mxu0 %v13797_v49 }
 0xa74   : > { %9671 = vmatprep.mubr.bf16.mxu1 %v13797_v49 }
 0xa9c   : > { %v9074_v10 = vpop.f32.mrb[152].mxu0 }
 0xa9d   : > { %v9182_v58 = vadd.f32 %v13560_v46, %v9074_v10  ;;  %v9127_v31 = vpop.f32.mrb[152].mxu1  ;;  %v9076_v11 = vpop.f32.mrb[153].mxu0  ;;  %v13834_v10 = vld [vmem:[#allocation24_spill] sm:$0xff] }
 0xa9e   : > { %v9184_v3 = vadd.f32 %v13560_v46, %v9127_v31  ;;  %v9183_v61 = vadd.f32 %v13560_v46, %v9076_v11  ;;  %v9129_v37 = vpop.f32.mrb[153].mxu1  ;;  %v9078_v15 = vpop.f32.mrb[154].mxu0  ;;  %v13836_v31 = vld [vmem:[#allocation29_spill] sm:$0xff]  ;;  %v13839_v11 = vld [vmem:[#allocation32_spill] sm:$0xff] }
 0xa9f   : > { %v9185_v50 = vadd.f32 %v13560_v46, %v9129_v37  ;;  %v9198_v14 = vadd.f32 %v13562_v17, %v9078_v15  ;;  %v9131_v48 = vpop.f32.mrb[154].mxu1  ;;  %v9080_v25 = vpop.f32.mrb[155].mxu0  ;;  %v9246_v63 = vmax.f32 %v9182_v58, 0.0  ;;  %v13835_v58 = vld [vmem:[#allocation28_spill] sm:$0xff] }
 0xaa0   : > { %v9200_v1 = vadd.f32 %v13562_v17, %v9131_v48  ;;  %v9199_v49 = vadd.f32 %v13562_v17, %v9080_v25  ;;  %v9133_v23 = vpop.f32.mrb[155].mxu1  ;;  %v9248_v51 = vmax.f32 %v9184_v3, 0.0  ;;  %v9247_v62 = vmax.f32 %v9183_v61, 0.0  ;;  %v13840_v3 = vld [vmem:[#allocation33_spill] sm:$0xff]  ;;  %v13842_v61 = vld [vmem:[#allocation31_spill] sm:$0xff]  ;;  %v9337_v37 = vpop.permute.xlu0 %9336 }
 0xaa1   : > { %v9262_v47 = vmax.f32 %v9198_v14, 0.0  ;;  %v9201_v38 = vadd.f32 %v13562_v17, %v9133_v23  ;;  %v9249_v35 = vmax.f32 %v9185_v50, 0.0 }
 0xaa2   : > { %v9264_v7 = vmax.f32 %v9200_v1, 0.0  ;;  %v9263_v12 = vmax.f32 %v9199_v49, 0.0 }
 0xaa3   : > { %v9310_v30 = vpack.c.bf16 %v9262_v47, %v9246_v63  ;;  %v9265_v46 = vmax.f32 %v9201_v38, 0.0 }
 0xaa4   : > { %v9312_v2 = vpack.c.bf16 %v9264_v7, %v9248_v51  ;;  %v9311_v16 = vpack.c.bf16 %v9263_v12, %v9247_v62  ;;  %v9084_v29 = vpop.f32.mrb[156].mxu0 }
 0xaa5   : > { %v9313_v53 = vpack.c.bf16 %v9265_v46, %v9249_v35  ;;  %v9214_v54 = vadd.f32 %v13572_v24, %v9084_v29  ;;  %v9137_v56 = vpop.f32.mrb[156].mxu1  ;;  %v9086_v40 = vpop.f32.mrb[157].mxu0 }
 0xaa6   : > { %v9216_v36 = vadd.f32 %v13572_v24, %v9137_v56  ;;  %v9215_v18 = vadd.f32 %v13572_v24, %v9086_v40  ;;  %v9139_v17 = vpop.f32.mrb[157].mxu1  ;;  %v9088_v6 = vpop.f32.mrb[158].mxu0  ;;  %9598 = vmatprep.subr.bf16.mxu0 %v9311_v16 }
 0xaa7   : > { %v9217_v33 = vadd.f32 %v13572_v24, %v9139_v17  ;;  %v9230_v0 = vadd.f32 %v13574_v39, %v9088_v6  ;;  %v9141_v41 = vpop.f32.mrb[158].mxu1  ;;  %9639 = vmatprep.subr.bf16.mxu1 %v9313_v53  ;;  %v9090_v28 = vpop.f32.mrb[159].mxu0  ;;  %9599 = vmatpush1.bf16.msra.mxu0 %v9310_v30  ;;  %v9278_v21 = vmax.f32 %v9214_v54, 0.0 }
 0xaa8   : > { %v9232_v42 = vadd.f32 %v13574_v39, %v9141_v41  ;;  %v9231_v45 = vadd.f32 %v13574_v39, %v9090_v28  ;;  %v9143_v43 = vpop.f32.mrb[159].mxu1  ;;  %9640 = vmatpush1.bf16.msra.mxu1 %v9312_v2  ;;  %v9280_v9 = vmax.f32 %v9216_v36, 0.0  ;;  %v9279_v27 = vmax.f32 %v9215_v18, 0.0 }
 0xaa9   : > { %v9294_v52 = vmax.f32 %v9230_v0, 0.0  ;;  %v9233_v22 = vadd.f32 %v13574_v39, %v9143_v43  ;;  %v9281_v13 = vmax.f32 %v9217_v33, 0.0  ;;  %v13831_v39 = vld [vmem:[#allocation22_spill] sm:$0xff] }
 0xaaa   : > { %v9296_v60 = vmax.f32 %v9232_v42, 0.0  ;;  %v9295_v24 = vmax.f32 %v9231_v45, 0.0 }
 0xaab   : > { %v9326_v19 = vpack.c.bf16 %v9294_v52, %v9278_v21  ;;  %v9297_v44 = vmax.f32 %v9233_v22, 0.0 }
 0xaac   : > { %v9328_v57 = vpack.c.bf16 %v9296_v60, %v9280_v9  ;;  %v9327_v55 = vpack.c.bf16 %v9295_v24, %v9279_v27 }
 0xaad   : > { %v9329_v26 = vpack.c.bf16 %v9297_v44, %v9281_v13 }
 0xaae   : > { %9600 = vmatprep.subr.bf16.mxu0 %v9327_v55 }
 0xaaf   : > { %9641 = vmatprep.subr.bf16.mxu1 %v9329_v26  ;;  %9601 = vmatpush1.bf16.msra.mxu0 %v9326_v19 }
 0xab0   : > { %9642 = vmatpush1.bf16.msra.mxu1 %v9328_v57  ;;  %9602 = vmatprep.subr.bf16.mxu0 %v13266_v20  ;;  %v13837_v20 = vld [vmem:[#allocation26_spill] sm:$0xff] }
 0xab1   : > { %9643 = vmatprep.subr.bf16.mxu1 %v13268_v8  ;;  %v13838_v8 = vld [vmem:[#allocation27_spill] sm:$0xff] }
 0xab3   : > { %9603 = vmatpush1.bf16.msra.mxu0 %v13830_v32 }
 0xab4   : > { %9644 = vmatpush1.bf16.msra.mxu1 %v13831_v39  ;;  %9604 = vmatprep.subr.bf16.mxu0 %v13286_v4  ;;  %v13841_v4 = vld [vmem:[#allocation30_spill] sm:$0xff] }
 0xab5   : > { %9645 = vmatprep.subr.bf16.mxu1 %v13832_v59 }
 0xab7   : > { %9605 = vmatpush1.bf16.msra.mxu0 %v13833_v5 }
 0xab8   : > { %9646 = vmatpush1.bf16.msra.mxu1 %v13834_v10  ;;  %9606 = vmatprep.subr.bf16.mxu0 %v13835_v58 }
 0xab9   : > { %9647 = vmatprep.subr.bf16.mxu1 %v13836_v31 }
 0xabb   : > { %9607 = vmatpush1.bf16.msra.mxu0 %v13837_v20 }
 0xabc   : > { %9648 = vmatpush1.bf16.msra.mxu1 %v13838_v8  ;;  %9608 = vmatprep.subr.bf16.mxu0 %v13839_v11 }
 0xabd   : > { %9649 = vmatprep.subr.bf16.mxu1 %v13840_v3 }
 0xabf   : > { %9609 = vmatpush1.bf16.msra.mxu0 %v13841_v4 }
 0xac0   : > { %9650 = vmatpush1.bf16.msra.mxu1 %v13842_v61 }
 0xac2   : > { %10196 = vmatmul.mubr.msk.bf16.vlgmr.msra.gmra.mrb[108].mxu0 %vm9348_vm3, %v13604_v34 }
 0xac3   : > { %10197 = vmatmul.mubr.msk.bf16.vlgmr.msra.gmra.mrb[108].mxu1 %vm9348_vm3, %v13604_v34 }
 0xaec   : > { %v9386_v15 = vpop.f32.mrb[96].mxu0 }
 0xaed   : > { %v9387_v50 = vadd.f32 %v9386_v15, %v9337_v37  ;;  %v9427_v14 = vpop.f32.mrb[96].mxu1  ;;  %v9388_v48 = vpop.f32.mrb[97].mxu0 }
 0xaee   : > { %v9428_v25 = vadd.f32 %v9427_v14, %v9337_v37  ;;  %v9389_v1 = vadd.f32 %v9388_v48, %v9337_v37  ;;  %v9429_v49 = vpop.f32.mrb[97].mxu1  ;;  %v9390_v23 = vpop.f32.mrb[98].mxu0 }
 0xaef   : > { %v9430_v63 = vadd.f32 %v9429_v49, %v9337_v37  ;;  %v9431_v47 = vpop.f32.mrb[98].mxu1  ;;  %v9391_v34 = vpop.f32.mrb[99].mxu0 }
 0xaf0   : > { %v9696_v38 = vcombine.low %v9387_v50, %v9389_v1  ;;  %v9432_v51 = vpop.f32.mrb[99].mxu1 }
 0xaf1   : > { %v9697_v62 = vcombine.low %v9428_v25, %v9430_v63 }
 0xaf2   : > { %9712 = vst [vmem:[%s13727_s20] sm:$0xff] %v9696_v38 }
 0xaf3   : > { %9713 = vst [vmem:[%s13727_s20 + $0x8] sm:$0xff] %v9697_v62 }
 0xb0c   : > { %v9468_v7 = vpop.f32.mrb[100].mxu0 }
 0xb0d   : > { %v9469_v12 = vadd.f32 %v9468_v7, %v9337_v37  ;;  %v9509_v35 = vpop.f32.mrb[100].mxu1  ;;  %v9470_v30 = vpop.f32.mrb[101].mxu0 }
 0xb0e   : > { %v9510_v46 = vadd.f32 %v9509_v35, %v9337_v37  ;;  %v9471_v2 = vadd.f32 %v9470_v30, %v9337_v37  ;;  %v9511_v16 = vpop.f32.mrb[101].mxu1  ;;  %v9472_v29 = vpop.f32.mrb[102].mxu0 }
 0xb0f   : > { %v9512_v53 = vadd.f32 %v9511_v16, %v9337_v37  ;;  %v9513_v54 = vpop.f32.mrb[102].mxu1  ;;  %v9473_v56 = vpop.f32.mrb[103].mxu0 }
 0xb10   : > { %v9698_v40 = vcombine.low %v9469_v12, %v9471_v2  ;;  %v9514_v36 = vpop.f32.mrb[103].mxu1 }
 0xb11   : > { %v9699_v18 = vcombine.low %v9510_v46, %v9512_v53 }
 0xb12   : > { %9714 = vst [vmem:[%s13727_s20 + $0x10] sm:$0xff] %v9698_v40 }
 0xb13   : > { %9715 = vst [vmem:[%s13727_s20 + $0x18] sm:$0xff] %v9699_v18 }
 0xb45   : > { %v9550_v17 = vpop.f32.mrb[104].mxu0 }
 0xb46   : > { %v9551_v6 = vadd.f32 %v9550_v17, %v9337_v37  ;;  %v9591_v33 = vpop.f32.mrb[104].mxu1  ;;  %v9552_v0 = vpop.f32.mrb[105].mxu0 }
 0xb47   : > { %v9592_v41 = vadd.f32 %v9591_v33, %v9337_v37  ;;  %v9553_v28 = vadd.f32 %v9552_v0, %v9337_v37  ;;  %v9593_v42 = vpop.f32.mrb[105].mxu1  ;;  %v9554_v45 = vpop.f32.mrb[106].mxu0 }
 0xb48   : > { %v9594_v43 = vadd.f32 %v9593_v42, %v9337_v37  ;;  %v9595_v21 = vpop.f32.mrb[106].mxu1  ;;  %v9555_v52 = vpop.f32.mrb[107].mxu0 }
 0xb49   : > { %v9700_v22 = vcombine.low %v9551_v6, %v9553_v28  ;;  %v9596_v9 = vpop.f32.mrb[107].mxu1 }
 0xb4a   : > { %v9701_v27 = vcombine.low %v9592_v41, %v9594_v43 }
 0xb4b   : > { %9716 = vst [vmem:[%s13727_s20 + $0x20] sm:$0xff] %v9700_v22 }
 0xb4c   : > { %9717 = vst [vmem:[%s13727_s20 + $0x28] sm:$0xff] %v9701_v27 }
 0xb95   : > { %v9632_v60 = vpop.f32.mrb[108].mxu0 }
 0xb96   : > { %v9633_v24 = vadd.f32 %v9632_v60, %v9337_v37  ;;  %v9673_v13 = vpop.f32.mrb[108].mxu1  ;;  %v9634_v19 = vpop.f32.mrb[109].mxu0 }
 0xb97   : > { %v9674_v44 = vadd.f32 %v9673_v13, %v9337_v37  ;;  %v9635_v57 = vadd.f32 %v9634_v19, %v9337_v37  ;;  %v9675_v55 = vpop.f32.mrb[109].mxu1  ;;  %v9636_v26 = vpop.f32.mrb[110].mxu0 }
 0xb98   : > { %v9676_v32 = vadd.f32 %v9675_v55, %v9337_v37  ;;  %v9677_v39 = vpop.f32.mrb[110].mxu1  ;;  %v9637_v59 = vpop.f32.mrb[111].mxu0 }
 0xb99   : > { %v9702_v5 = vcombine.low %v9633_v24, %v9635_v57  ;;  %v9678_v10 = vpop.f32.mrb[111].mxu1 }
 0xb9a   : > { %v9703_v58 = vcombine.low %v9674_v44, %v9676_v32 }
 0xb9b   : > { %9718 = vst [vmem:[%s13727_s20 + $0x30] sm:$0xff] %v9702_v5 }
 0xb9c   : > { %9719 = vst [vmem:[%s13727_s20 + $0x38] sm:$0xff] %v9703_v58 }
 0xb9d PF: > { %s13_s12 = sadd.s32 1, %s10455_s12  }
 0xb9e   : > { %p10_p4 = scmp.ge.s32.totalorder %s13_s12, 4  }
 0xba0   :  { %12 = sbr.rel (!%p10_p4) target bundleno = 1 (0x1), region = 62 }

</bundles_post_ra>
